<compile_context>
chip_gen: v6e
topology: v6e:2x2x1
jax: 0.10.0
libtpu: 0.0.40
codegen_flags: <defaults>
</compile_context>

<pallas_src>
import functools
import math

import jax
import jax.numpy as jnp
from jax.experimental import pallas as pl
from jax.experimental.pallas import tpu as pltpu

CLIP_EPS = 1e-6     # `eps` from the PyTorch module (get_grasp_infos)
LN_EPS = 1e-5       # nn.LayerNorm default eps

# --- module hyper-parameters (defaults of PatchMultiGraspNet) ---
PATCH_DIM = 6
FEAT_DIM = 256
NECK = 256
THETA_K = 6                      # theta_k_cls
K_CLS = 8
INFO_DIM = 32
RES_NECK = int(0.25 * FEAT_DIM)  # ResMLP neck = 64
ANCHOR_STEP = math.pi / THETA_K

# --- packed, lane-dense output slab layout (width 128) ---
SLAB = 128
C_TC = 0                          # theta_cls    [0:6)
C_TO = THETA_K                    # theta_offset [6:12)
C_WR = 2 * THETA_K                # width_reg    [12:18)
C_PRED = 3 * THETA_K              # anchor_cls   [18:26)
C_OFF = 3 * THETA_K + K_CLS       # offset_reg   [26:50)
assert C_OFF + 3 * K_CLS <= SLAB


# ----------------------------- in-kernel helpers -----------------------------

def _layernorm(y, gamma, beta):
    mean = jnp.mean(y, axis=-1, keepdims=True)
    var = jnp.mean((y - mean) ** 2, axis=-1, keepdims=True)
    return (y - mean) * jax.lax.rsqrt(var + LN_EPS) * gamma + beta


def _chunked_ln_relu(h, gamma, beta, n_chunks):
    """Per-256-chunk LayerNorm + ReLU; chunks sit on vreg-aligned 256-lane
    boundaries, so slicing / reassembly is layout-free and the result feeds a
    single packed second-layer matmul."""
    parts = []
    for c in range(n_chunks):
        sl = slice(c * NECK, (c + 1) * NECK)
        parts.append(jnp.maximum(_layernorm(h[:, sl], gamma[:, sl], beta[:, sl]), 0.0))
    return jnp.concatenate(parts, axis=1)


# --------------------------------- kernel ------------------------------------

def fused_forward_kernel(
    x_ref,                       # (Bt, HW, C)  f32
    bb_w_ref,                    # (C, F)            bf16
    h3_w1_ref, h3_w2_ref,        # (F, 3N), (3N,128) bf16 (w2 zero-packed)
    rw1_ref, rw2_ref,            # (F+32, RN), (RN, F) bf16
    h2_w1_ref, h2_w2_ref,        # (F, 2N), (2N,128) bf16 (w2 zero-packed)
    v768_ref,                    # (3, 768) f32: [h3_b1; h3_g1; h3_be1]
    v512_ref,                    # (3, 512) f32: [h2_b1; h2_g1; h2_be1]
    v256_ref,                    # (4, 256) f32: [bb_b; r_b2; r_g2; r_be2]
    v128_ref,                    # (2, 128) f32: [h3_b2 packed; h2_b2 packed]
    vs_ref,                      # (8, 128) f32: rows 0-4 info_layer (32 wide),
                                 #               rows 5-7 ResMLP neck (64 wide)
    feat_ref,                    # out (Bt, HW, F) bf16
    slab_ref,                    # out (Bt, 128)   f32
):
    Bt, HW, C = x_ref.shape
    F = bb_w_ref.shape[1]

    v768 = v768_ref[...]
    v512 = v512_ref[...]
    v256 = v256_ref[...]
    v128 = v128_ref[...]
    vs = vs_ref[...]

    # ---- backbone stand-in: 1x1 conv -> ReLU -> AdaptiveAvgPool2d(1) ----
    # TODO(synk): CoordResNet/BasicBlock backbone definition not provided in spec.
    x = x_ref[...].reshape(Bt * HW, C).astype(jnp.bfloat16)
    feat = jnp.dot(x, bb_w_ref[...], preferred_element_type=jnp.float32) + v256[0:1]
    feat = jnp.maximum(feat, 0.0).reshape(Bt, HW, F)                        # f32
    feat_ref[...] = feat.astype(jnp.bfloat16)                               # bf16 writeback
    f = jnp.mean(feat, axis=1)                                              # (Bt, F)
    f16 = f.astype(jnp.bfloat16)

    # ---- fused theta_cls / theta_offset / width_reg heads (Dropout = identity) ----
    h3 = jnp.dot(f16, h3_w1_ref[...], preferred_element_type=jnp.float32) + v768[0:1]  # (Bt, 3N)
    h3 = _chunked_ln_relu(h3, v768[1:2], v768[2:3], 3).astype(jnp.bfloat16)
    head3 = jnp.dot(h3, h3_w2_ref[...], preferred_element_type=jnp.float32) + v128[0:1]
    # head3 lanes: [0:TK]=theta_cls, [TK:2TK]=theta_offset, [2TK:3TK]=width_reg, rest 0

    # ---- get_grasp_infos: argmax + gathers via full-vreg lane masks ----
    lane = jax.lax.broadcasted_iota(jnp.int32, head3.shape, 1)              # (Bt, 128)
    s = jnp.clip(jax.nn.sigmoid(head3), CLIP_EPS, 1.0 - CLIP_EPS)
    s = jnp.where(lane < THETA_K, s, -1.0)
    m = jnp.max(s, axis=1, keepdims=True)
    # first index among maxima (matches torch .max(1)[1] tie-break in practice)
    anchor = jnp.min(jnp.where(s == m, lane, THETA_K), axis=1, keepdims=True)   # (Bt, 1) i32
    da = jnp.sum(jnp.where(lane == anchor + THETA_K, jnp.clip(head3, -0.5, 0.5), 0.0),
                 axis=1, keepdims=True)
    wv = jnp.sum(jnp.where(lane == anchor + 2 * THETA_K, head3, 0.0),
                 axis=1, keepdims=True)
    theta = ANCHOR_STEP * (anchor.astype(jnp.float32) + da + 0.5) - math.pi / 2.0

    # ---- info_layer: Linear(2, 32) as two rank-1 updates + LN + ReLU (VPU f32) ----
    info = theta * vs[0:1, :INFO_DIM] + wv * vs[1:2, :INFO_DIM] + vs[2:3, :INFO_DIM]
    info = jnp.maximum(_layernorm(info, vs[3:4, :INFO_DIM], vs[4:5, :INFO_DIM]), 0.0)

    # ---- feat_layer (ResMLP); concat([f, info]) expressed as a split matmul ----
    rw1 = rw1_ref[...]
    r = (jnp.dot(f16, rw1[:FEAT_DIM], preferred_element_type=jnp.float32)
         + jnp.dot(info.astype(jnp.bfloat16), rw1[FEAT_DIM:], preferred_element_type=jnp.float32)
         + vs[5:6, :RES_NECK])                                              # (Bt, RN)
    r = jnp.maximum(_layernorm(r, vs[6:7, :RES_NECK], vs[7:8, :RES_NECK]), 0.0)
    r = jnp.dot(r.astype(jnp.bfloat16), rw2_ref[...], preferred_element_type=jnp.float32) + v256[1:2]
    r = _layernorm(r, v256[2:3], v256[3:4])
    f2 = jnp.maximum(f + r, 0.0).astype(jnp.bfloat16)                       # (Bt, F)

    # ---- fused anchor_cls / offset_reg heads ----
    h2 = jnp.dot(f2, h2_w1_ref[...], preferred_element_type=jnp.float32) + v512[0:1]   # (Bt, 2N)
    h2 = _chunked_ln_relu(h2, v512[1:2], v512[2:3], 2).astype(jnp.bfloat16)
    head2 = jnp.dot(h2, h2_w2_ref[...], preferred_element_type=jnp.float32) + v128[1:2]
    # head2 lanes: [18:26]=anchor_cls, [26:50]=offset_reg, rest 0

    # single sublane- and lane-dense (Bt, 128) store; head3/head2 lanes are disjoint
    slab_ref[...] = head3 + head2


# ------------------------------ pallas wrapper --------------------------------

_WEIGHT_ORDER = (
    "bb_w",
    "h3_w1", "h3_w2",
    "rw1", "rw2",
    "h2_w1", "h2_w2",
    "v768", "v512", "v256", "v128", "vsmall",
)


def _const_spec(shape):
    nd = len(shape)
    return pl.BlockSpec(shape, lambda i, _nd=nd: (0,) * _nd)


def patch_multi_grasp_net_forward(params, patches, *, batch_tile=8):
    B, H, W, C = patches.shape
    HW = H * W
    assert C == PATCH_DIM
    assert HW % 8 == 0
    bt = int(batch_tile)
    assert bt % 8 == 0, "batch_tile must be a multiple of 8 (sublane-dense slab stores)"

    # pad the batch up to a multiple of the batch tile (sliced off at the end)
    b_pad = ((B + bt - 1) // bt) * bt
    x = patches.reshape(B, HW, C)
    if b_pad != B:
        x = jnp.concatenate([x, jnp.zeros((b_pad - B, HW, C), x.dtype)], axis=0)
    nb = b_pad // bt

    # Raise the scoped-VMEM limit only for large batch tiles (stay < 64 MiB
    # physical on v7x; defaults are 16 MiB on v5e, 32 MiB on v6e/v7x).
    vmem_limit = (48 << 20) if bt > 16 else None

    weights = [params[k] for k in _WEIGHT_ORDER]

    feat_map, slab = pl.pallas_call(
        fused_forward_kernel,
        out_shape=(jax.ShapeDtypeStruct((b_pad, HW, FEAT_DIM), jnp.bfloat16),
                   jax.ShapeDtypeStruct((b_pad, SLAB), jnp.float32)),
        grid=(nb,),
        in_specs=[pl.BlockSpec((bt, HW, C), lambda i: (i, 0, 0))]
                 + [_const_spec(w.shape) for w in weights],
        out_specs=(pl.BlockSpec((bt, HW, FEAT_DIM), lambda i: (i, 0, 0)),
                   pl.BlockSpec((bt, SLAB), lambda i: (i, 0))),
        compiler_params=pltpu.CompilerParams(
            dimension_semantics=("parallel",),
            vmem_limit_bytes=vmem_limit,
        ),
    )(x, *weights)

    feat_map = feat_map[:B]
    slab = slab[:B]

    theta_cls = slab[:, C_TC:C_TC + THETA_K]
    theta_offset = slab[:, C_TO:C_TO + THETA_K]
    width_reg = slab[:, C_WR:C_WR + THETA_K]
    pred = slab[:, C_PRED:C_PRED + K_CLS]
    offset = slab[:, C_OFF:C_OFF + 3 * K_CLS].reshape(B, K_CLS, 3)

    features = [feat_map]   # stand-in for the CoordResNet feature pyramid (bf16)
    return features, pred, offset, theta_cls, theta_offset, width_reg


# ------------------------------- parameter init --------------------------------

def _kaiming(key, fan_in, shape):
    return jax.random.normal(key, shape, jnp.float32) * jnp.sqrt(2.0 / fan_in)


def _init_head(key, in_dim, neck, out_dim):
    k1, k2 = jax.random.split(key)
    return dict(
        w1=_kaiming(k1, in_dim, (in_dim, neck)),
        b1=jnp.zeros((neck,), jnp.float32),
        g1=jnp.ones((neck,), jnp.float32),
        be1=jnp.zeros((neck,), jnp.float32),
        w2=_kaiming(k2, neck, (neck, out_dim)),
        b2=jnp.zeros((out_dim,), jnp.float32),
    )


def init_params(key):
    """Per-module weights, laid out like the PyTorch model (Linear stored (in,out))."""
    ks = jax.random.split(key, 9)
    raw = {}
    raw["bb_w"] = jax.random.normal(ks[0], (PATCH_DIM, FEAT_DIM), jnp.float32) * jnp.sqrt(2.0 / FEAT_DIM)
    raw["bb_b"] = jnp.zeros((FEAT_DIM,), jnp.float32)
    raw["theta_cls"] = _init_head(ks[1], FEAT_DIM, NECK, THETA_K)
    raw["theta_offset"] = _init_head(ks[2], FEAT_DIM, NECK, THETA_K)
    raw["width_reg"] = _init_head(ks[3], FEAT_DIM, NECK, THETA_K)
    raw["anchor_cls"] = _init_head(ks[4], FEAT_DIM, NECK, K_CLS)
    raw["offset_reg"] = _init_head(ks[5], FEAT_DIM, NECK, K_CLS * 3)
    raw["info"] = dict(
        w=_kaiming(ks[6], 2, (2, INFO_DIM)),
        b=jnp.zeros((INFO_DIM,), jnp.float32),
        g=jnp.ones((INFO_DIM,), jnp.float32),
        be=jnp.zeros((INFO_DIM,), jnp.float32),
    )
    raw["feat_layer"] = dict(
        w1=_kaiming(ks[7], FEAT_DIM + INFO_DIM, (FEAT_DIM + INFO_DIM, RES_NECK)),
        b1=jnp.zeros((RES_NECK,), jnp.float32),
        g1=jnp.ones((RES_NECK,), jnp.float32),
        be1=jnp.zeros((RES_NECK,), jnp.float32),
        w2=_kaiming(ks[8], RES_NECK, (RES_NECK, FEAT_DIM)),
        b2=jnp.zeros((FEAT_DIM,), jnp.float32),
        g2=jnp.ones((FEAT_DIM,), jnp.float32),
        be2=jnp.zeros((FEAT_DIM,), jnp.float32),
    )
    return raw


def pack_params(raw):
    """Fuse / zero-pack weights for the fused kernel (done once, offline)."""
    bf = jnp.bfloat16
    tc, to, wr = raw["theta_cls"], raw["theta_offset"], raw["width_reg"]
    ac, og = raw["anchor_cls"], raw["offset_reg"]
    fl, info = raw["feat_layer"], raw["info"]

    # theta/offset/width second layers zero-packed block-wise into (3N, 128)
    h3_w2 = jnp.zeros((3 * NECK, SLAB), jnp.float32)
    h3_w2 = h3_w2.at[0 * NECK:1 * NECK, C_TC:C_TC + THETA_K].set(tc["w2"])
    h3_w2 = h3_w2.at[1 * NECK:2 * NECK, C_TO:C_TO + THETA_K].set(to["w2"])
    h3_w2 = h3_w2.at[2 * NECK:3 * NECK, C_WR:C_WR + THETA_K].set(wr["w2"])
    h3_b2 = jnp.zeros((SLAB,), jnp.float32)
    h3_b2 = h3_b2.at[C_TC:C_TC + THETA_K].set(tc["b2"])
    h3_b2 = h3_b2.at[C_TO:C_TO + THETA_K].set(to["b2"])
    h3_b2 = h3_b2.at[C_WR:C_WR + THETA_K].set(wr["b2"])

    # anchor_cls / offset_reg second layers zero-packed into (2N, 128)
    h2_w2 = jnp.zeros((2 * NECK, SLAB), jnp.float32)
    h2_w2 = h2_w2.at[0 * NECK:1 * NECK, C_PRED:C_PRED + K_CLS].set(ac["w2"])
    h2_w2 = h2_w2.at[1 * NECK:2 * NECK, C_OFF:C_OFF + 3 * K_CLS].set(og["w2"])
    h2_b2 = jnp.zeros((SLAB,), jnp.float32)
    h2_b2 = h2_b2.at[C_PRED:C_PRED + K_CLS].set(ac["b2"])
    h2_b2 = h2_b2.at[C_OFF:C_OFF + 3 * K_CLS].set(og["b2"])

    # consolidated bias / gamma / beta slabs (f32)
    v768 = jnp.stack([jnp.concatenate([tc["b1"], to["b1"], wr["b1"]]),
                      jnp.concatenate([tc["g1"], to["g1"], wr["g1"]]),
                      jnp.concatenate([tc["be1"], to["be1"], wr["be1"]])])
    v512 = jnp.stack([jnp.concatenate([ac["b1"], og["b1"]]),
                      jnp.concatenate([ac["g1"], og["g1"]]),
                      jnp.concatenate([ac["be1"], og["be1"]])])
    v256 = jnp.stack([raw["bb_b"], fl["b2"], fl["g2"], fl["be2"]])
    v128 = jnp.stack([h3_b2, h2_b2])

    def pad128(v):
        return jnp.pad(v, (0, 128 - v.shape[0]))

    vsmall = jnp.stack([pad128(info["w"][0]), pad128(info["w"][1]),
                        pad128(info["b"]), pad128(info["g"]), pad128(info["be"]),
                        pad128(fl["b1"]), pad128(fl["g1"]), pad128(fl["be1"])])

    return dict(
        bb_w=raw["bb_w"].astype(bf),
        h3_w1=jnp.concatenate([tc["w1"], to["w1"], wr["w1"]], axis=1).astype(bf),
        h3_w2=h3_w2.astype(bf),
        rw1=fl["w1"].astype(bf),                 # (288, 64): rows [:256]=f, [256:]=info
        rw2=fl["w2"].astype(bf),
        h2_w1=jnp.concatenate([ac["w1"], og["w1"]], axis=1).astype(bf),
        h2_w2=h2_w2.astype(bf),
        v768=v768, v512=v512, v256=v256, v128=v128, vsmall=vsmall,
    )


# ----------------------------------- main --------------------------------------

if __name__ == "__main__":
    key = jax.random.PRNGKey(0)
    k_in, k_params = jax.random.split(key)

    B, H, W, C = 16, 16, 16, PATCH_DIM           # patch_dim == 6 in the module
    patches = jax.random.normal(k_in, (B, H, W, C), jnp.float32)

    params = pack_params(init_params(k_params))

    # Bt=8 samples per grid step -> grid=(2,): fits the 16 MiB v5e scoped default
    # and keeps both v7x TensorCores busy.  Use Bt=16-32 on v6e/v7x for big batches.
    fwd = jax.jit(functools.partial(patch_multi_grasp_net_forward, batch_tile=8))
    outs = fwd(params, patches)
    outs = jax.tree_util.tree_map(jax.block_until_ready, outs)

    features, pred, offset, theta_cls, theta_offset, width_reg = outs
    assert features[0].shape == (B, H * W, FEAT_DIM)
    assert features[0].dtype == jnp.bfloat16
    assert pred.shape == (B, K_CLS)
    assert offset.shape == (B, K_CLS, 3)
    assert theta_cls.shape == (B, THETA_K)
    assert theta_offset.shape == (B, THETA_K)
    assert width_reg.shape == (B, THETA_K)
    assert all(bool(jnp.all(jnp.isfinite(o)))
               for o in (pred, offset, theta_cls, theta_offset, width_reg))
    print("KERNEL_OK")
</pallas_src>

<mosaic_0001>
module attributes {stable_mosaic.version = 11 : i64} {
  func.func @fused_forward_kernel(%arg0: i32, %arg1: memref<8x256x6xf32, #tpu.memory_space<vmem>>, %arg2: memref<6x256xbf16, #tpu.memory_space<vmem>>, %arg3: memref<256x768xbf16, #tpu.memory_space<vmem>>, %arg4: memref<768x128xbf16, #tpu.memory_space<vmem>>, %arg5: memref<288x64xbf16, #tpu.memory_space<vmem>>, %arg6: memref<64x256xbf16, #tpu.memory_space<vmem>>, %arg7: memref<256x512xbf16, #tpu.memory_space<vmem>>, %arg8: memref<512x128xbf16, #tpu.memory_space<vmem>>, %arg9: memref<3x768xf32, #tpu.memory_space<vmem>>, %arg10: memref<3x512xf32, #tpu.memory_space<vmem>>, %arg11: memref<4x256xf32, #tpu.memory_space<vmem>>, %arg12: memref<2x128xf32, #tpu.memory_space<vmem>>, %arg13: memref<8x128xf32, #tpu.memory_space<vmem>>, %arg14: memref<8x256x256xbf16, #tpu.memory_space<vmem>>, %arg15: memref<8x128xf32, #tpu.memory_space<vmem>>) attributes {dimension_semantics = [#tpu.dimension_semantics<parallel>], iteration_bounds = array<i64: 2>, scalar_prefetch = 0 : i64, scratch_operands = 0 : i64, tpu.core_type = #tpu.core_type<tc>, window_params = [{transform_indices = @transform_0, window_bounds = array<i64: 8, 256, 6>}, {pipeline_mode = #tpu.pipeline_mode<synchronous>, transform_indices = @transform_1, window_bounds = array<i64: 6, 256>}, {pipeline_mode = #tpu.pipeline_mode<synchronous>, transform_indices = @transform_2, window_bounds = array<i64: 256, 768>}, {pipeline_mode = #tpu.pipeline_mode<synchronous>, transform_indices = @transform_3, window_bounds = array<i64: 768, 128>}, {pipeline_mode = #tpu.pipeline_mode<synchronous>, transform_indices = @transform_4, window_bounds = array<i64: 288, 64>}, {pipeline_mode = #tpu.pipeline_mode<synchronous>, transform_indices = @transform_5, window_bounds = array<i64: 64, 256>}, {pipeline_mode = #tpu.pipeline_mode<synchronous>, transform_indices = @transform_6, window_bounds = array<i64: 256, 512>}, {pipeline_mode = #tpu.pipeline_mode<synchronous>, transform_indices = @transform_7, window_bounds = array<i64: 512, 128>}, {pipeline_mode = #tpu.pipeline_mode<synchronous>, transform_indices = @transform_8, window_bounds = array<i64: 3, 768>}, {pipeline_mode = #tpu.pipeline_mode<synchronous>, transform_indices = @transform_9, window_bounds = array<i64: 3, 512>}, {pipeline_mode = #tpu.pipeline_mode<synchronous>, transform_indices = @transform_10, window_bounds = array<i64: 4, 256>}, {pipeline_mode = #tpu.pipeline_mode<synchronous>, transform_indices = @transform_11, window_bounds = array<i64: 2, 128>}, {pipeline_mode = #tpu.pipeline_mode<synchronous>, transform_indices = @transform_12, window_bounds = array<i64: 8, 128>}, {transform_indices = @transform_13, window_bounds = array<i64: 8, 256, 256>}, {transform_indices = @transform_14, window_bounds = array<i64: 8, 128>}]} {
    %c0 = arith.constant 0 : index
    %c0_0 = arith.constant 0 : index
    %0 = vector.load %arg9[%c0, %c0_0] : memref<3x768xf32, #tpu.memory_space<vmem>>, vector<3x768xf32>
    %c0_1 = arith.constant 0 : index
    %c0_2 = arith.constant 0 : index
    %1 = vector.load %arg10[%c0_1, %c0_2] : memref<3x512xf32, #tpu.memory_space<vmem>>, vector<3x512xf32>
    %c0_3 = arith.constant 0 : index
    %c0_4 = arith.constant 0 : index
    %2 = vector.load %arg11[%c0_3, %c0_4] : memref<4x256xf32, #tpu.memory_space<vmem>>, vector<4x256xf32>
    %c0_5 = arith.constant 0 : index
    %c0_6 = arith.constant 0 : index
    %3 = vector.load %arg12[%c0_5, %c0_6] : memref<2x128xf32, #tpu.memory_space<vmem>>, vector<2x128xf32>
    %c0_7 = arith.constant 0 : index
    %c0_8 = arith.constant 0 : index
    %4 = vector.load %arg13[%c0_7, %c0_8] : memref<8x128xf32, #tpu.memory_space<vmem>>, vector<8x128xf32>
    %c0_9 = arith.constant 0 : index
    %c0_10 = arith.constant 0 : index
    %c0_11 = arith.constant 0 : index
    %5 = vector.load %arg1[%c0_9, %c0_10, %c0_11] : memref<8x256x6xf32, #tpu.memory_space<vmem>>, vector<8x256x6xf32>
    %6 = vector.shape_cast %5 : vector<8x256x6xf32> to vector<2048x6xf32>
    %7 = arith.truncf %6 : vector<2048x6xf32> to vector<2048x6xbf16>
    %c0_12 = arith.constant 0 : index
    %c0_13 = arith.constant 0 : index
    %8 = vector.load %arg2[%c0_12, %c0_13] : memref<6x256xbf16, #tpu.memory_space<vmem>>, vector<6x256xbf16>
    %cst = arith.constant dense<0.000000e+00> : vector<2048x256xf32>
    %9 = tpu.matmul %7, %8, %cst {dimension_numbers = #tpu.dot_dimension_numbers<[1], [0], [0], [1], [0, 0, 1, 1], [], []>} : vector<2048x6xbf16>, vector<6x256xbf16>, vector<2048x256xf32> -> vector<2048x256xf32>
    %10 = vector.extract_strided_slice %2 {offsets = [0, 0], sizes = [1, 256], strides = [1, 1]} : vector<4x256xf32> to vector<1x256xf32>
    %11 = vector.broadcast %10 : vector<1x256xf32> to vector<2048x256xf32>
    %12 = arith.addf %9, %11 : vector<2048x256xf32>
    %cst_14 = arith.constant 0.000000e+00 : f32
    %13 = vector.broadcast %cst_14 : f32 to vector<2048x256xf32>
    %14 = arith.maximumf %12, %13 : vector<2048x256xf32>
    %15 = vector.shape_cast %14 : vector<2048x256xf32> to vector<8x256x256xf32>
    %16 = arith.truncf %15 : vector<8x256x256xf32> to vector<8x256x256xbf16>
    %c0_15 = arith.constant 0 : index
    %c0_16 = arith.constant 0 : index
    %c0_17 = arith.constant 0 : index
    %17 = vector.load %arg14[%c0_15, %c0_16, %c0_17] : memref<8x256x256xbf16, #tpu.memory_space<vmem>>, vector<8x256x256xbf16>
    tpu.vector_store %arg14[%c0_15, %c0_16, %c0_17], %16 {strides = array<i32>} : memref<8x256x256xbf16, #tpu.memory_space<vmem>>, vector<8x256x256xbf16>,
    %cst_18 = arith.constant dense<0.000000e+00> : vector<8x256xf32>
    %18 = vector.multi_reduction <add>, %15, %cst_18 [1] : vector<8x256x256xf32> to vector<8x256xf32>
    %cst_19 = arith.constant 2.560000e+02 : f32
    %19 = vector.broadcast %cst_19 : f32 to vector<8x256xf32>
    %20 = arith.divf %18, %19 : vector<8x256xf32>
    %21 = arith.truncf %20 : vector<8x256xf32> to vector<8x256xbf16>
    %c0_20 = arith.constant 0 : index
    %c0_21 = arith.constant 0 : index
    %22 = vector.load %arg3[%c0_20, %c0_21] : memref<256x768xbf16, #tpu.memory_space<vmem>>, vector<256x768xbf16>
    %cst_22 = arith.constant dense<0.000000e+00> : vector<8x768xf32>
    %23 = tpu.matmul %21, %22, %cst_22 {dimension_numbers = #tpu.dot_dimension_numbers<[1], [0], [0], [1], [0, 0, 1, 1], [], []>} : vector<8x256xbf16>, vector<256x768xbf16>, vector<8x768xf32> -> vector<8x768xf32>
    %24 = vector.extract_strided_slice %0 {offsets = [0, 0], sizes = [1, 768], strides = [1, 1]} : vector<3x768xf32> to vector<1x768xf32>
    %25 = vector.broadcast %24 : vector<1x768xf32> to vector<8x768xf32>
    %26 = arith.addf %23, %25 : vector<8x768xf32>
    %27 = vector.extract_strided_slice %0 {offsets = [1, 0], sizes = [1, 768], strides = [1, 1]} : vector<3x768xf32> to vector<1x768xf32>
    %28 = vector.extract_strided_slice %0 {offsets = [2, 0], sizes = [1, 768], strides = [1, 1]} : vector<3x768xf32> to vector<1x768xf32>
    %29 = vector.extract_strided_slice %26 {offsets = [0, 0], sizes = [8, 256], strides = [1, 1]} : vector<8x768xf32> to vector<8x256xf32>
    %30 = vector.extract_strided_slice %27 {offsets = [0, 0], sizes = [1, 256], strides = [1, 1]} : vector<1x768xf32> to vector<1x256xf32>
    %31 = vector.extract_strided_slice %28 {offsets = [0, 0], sizes = [1, 256], strides = [1, 1]} : vector<1x768xf32> to vector<1x256xf32>
    %cst_23 = arith.constant dense<0.000000e+00> : vector<8xf32>
    %32 = vector.multi_reduction <add>, %29, %cst_23 [1] : vector<8x256xf32> to vector<8xf32>
    %33 = vector.shape_cast %32 : vector<8xf32> to vector<8x1xf32>
    %cst_24 = arith.constant 2.560000e+02 : f32
    %34 = vector.broadcast %cst_24 : f32 to vector<8x1xf32>
    %35 = arith.divf %33, %34 : vector<8x1xf32>
    %36 = vector.broadcast %35 : vector<8x1xf32> to vector<8x256xf32>
    %37 = arith.subf %29, %36 : vector<8x256xf32>
    %38 = arith.mulf %37, %37 : vector<8x256xf32>
    %cst_25 = arith.constant dense<0.000000e+00> : vector<8xf32>
    %39 = vector.multi_reduction <add>, %38, %cst_25 [1] : vector<8x256xf32> to vector<8xf32>
    %40 = vector.shape_cast %39 : vector<8xf32> to vector<8x1xf32>
    %cst_26 = arith.constant 2.560000e+02 : f32
    %41 = vector.broadcast %cst_26 : f32 to vector<8x1xf32>
    %42 = arith.divf %40, %41 : vector<8x1xf32>
    %43 = vector.broadcast %35 : vector<8x1xf32> to vector<8x256xf32>
    %44 = arith.subf %29, %43 : vector<8x256xf32>
    %cst_27 = arith.constant 9.99999974E-6 : f32
    %45 = vector.broadcast %cst_27 : f32 to vector<8x1xf32>
    %46 = arith.addf %42, %45 : vector<8x1xf32>
    %47 = math.rsqrt %46 : vector<8x1xf32>
    %48 = vector.broadcast %47 : vector<8x1xf32> to vector<8x256xf32>
    %49 = arith.mulf %44, %48 : vector<8x256xf32>
    %50 = vector.broadcast %30 : vector<1x256xf32> to vector<8x256xf32>
    %51 = arith.mulf %49, %50 : vector<8x256xf32>
    %52 = vector.broadcast %31 : vector<1x256xf32> to vector<8x256xf32>
    %53 = arith.addf %51, %52 : vector<8x256xf32>
    %cst_28 = arith.constant 0.000000e+00 : f32
    %54 = vector.broadcast %cst_28 : f32 to vector<8x256xf32>
    %55 = arith.maximumf %53, %54 : vector<8x256xf32>
    %56 = vector.extract_strided_slice %26 {offsets = [0, 256], sizes = [8, 256], strides = [1, 1]} : vector<8x768xf32> to vector<8x256xf32>
    %57 = vector.extract_strided_slice %27 {offsets = [0, 256], sizes = [1, 256], strides = [1, 1]} : vector<1x768xf32> to vector<1x256xf32>
    %58 = vector.extract_strided_slice %28 {offsets = [0, 256], sizes = [1, 256], strides = [1, 1]} : vector<1x768xf32> to vector<1x256xf32>
    %cst_29 = arith.constant dense<0.000000e+00> : vector<8xf32>
    %59 = vector.multi_reduction <add>, %56, %cst_29 [1] : vector<8x256xf32> to vector<8xf32>
    %60 = vector.shape_cast %59 : vector<8xf32> to vector<8x1xf32>
    %cst_30 = arith.constant 2.560000e+02 : f32
    %61 = vector.broadcast %cst_30 : f32 to vector<8x1xf32>
    %62 = arith.divf %60, %61 : vector<8x1xf32>
    %63 = vector.broadcast %62 : vector<8x1xf32> to vector<8x256xf32>
    %64 = arith.subf %56, %63 : vector<8x256xf32>
    %65 = arith.mulf %64, %64 : vector<8x256xf32>
    %cst_31 = arith.constant dense<0.000000e+00> : vector<8xf32>
    %66 = vector.multi_reduction <add>, %65, %cst_31 [1] : vector<8x256xf32> to vector<8xf32>
    %67 = vector.shape_cast %66 : vector<8xf32> to vector<8x1xf32>
    %cst_32 = arith.constant 2.560000e+02 : f32
    %68 = vector.broadcast %cst_32 : f32 to vector<8x1xf32>
    %69 = arith.divf %67, %68 : vector<8x1xf32>
    %70 = vector.broadcast %62 : vector<8x1xf32> to vector<8x256xf32>
    %71 = arith.subf %56, %70 : vector<8x256xf32>
    %cst_33 = arith.constant 9.99999974E-6 : f32
    %72 = vector.broadcast %cst_33 : f32 to vector<8x1xf32>
    %73 = arith.addf %69, %72 : vector<8x1xf32>
    %74 = math.rsqrt %73 : vector<8x1xf32>
    %75 = vector.broadcast %74 : vector<8x1xf32> to vector<8x256xf32>
    %76 = arith.mulf %71, %75 : vector<8x256xf32>
    %77 = vector.broadcast %57 : vector<1x256xf32> to vector<8x256xf32>
    %78 = arith.mulf %76, %77 : vector<8x256xf32>
    %79 = vector.broadcast %58 : vector<1x256xf32> to vector<8x256xf32>
    %80 = arith.addf %78, %79 : vector<8x256xf32>
    %cst_34 = arith.constant 0.000000e+00 : f32
    %81 = vector.broadcast %cst_34 : f32 to vector<8x256xf32>
    %82 = arith.maximumf %80, %81 : vector<8x256xf32>
    %83 = vector.extract_strided_slice %26 {offsets = [0, 512], sizes = [8, 256], strides = [1, 1]} : vector<8x768xf32> to vector<8x256xf32>
    %84 = vector.extract_strided_slice %27 {offsets = [0, 512], sizes = [1, 256], strides = [1, 1]} : vector<1x768xf32> to vector<1x256xf32>
    %85 = vector.extract_strided_slice %28 {offsets = [0, 512], sizes = [1, 256], strides = [1, 1]} : vector<1x768xf32> to vector<1x256xf32>
    %cst_35 = arith.constant dense<0.000000e+00> : vector<8xf32>
    %86 = vector.multi_reduction <add>, %83, %cst_35 [1] : vector<8x256xf32> to vector<8xf32>
    %87 = vector.shape_cast %86 : vector<8xf32> to vector<8x1xf32>
    %cst_36 = arith.constant 2.560000e+02 : f32
    %88 = vector.broadcast %cst_36 : f32 to vector<8x1xf32>
    %89 = arith.divf %87, %88 : vector<8x1xf32>
    %90 = vector.broadcast %89 : vector<8x1xf32> to vector<8x256xf32>
    %91 = arith.subf %83, %90 : vector<8x256xf32>
    %92 = arith.mulf %91, %91 : vector<8x256xf32>
    %cst_37 = arith.constant dense<0.000000e+00> : vector<8xf32>
    %93 = vector.multi_reduction <add>, %92, %cst_37 [1] : vector<8x256xf32> to vector<8xf32>
    %94 = vector.shape_cast %93 : vector<8xf32> to vector<8x1xf32>
    %cst_38 = arith.constant 2.560000e+02 : f32
    %95 = vector.broadcast %cst_38 : f32 to vector<8x1xf32>
    %96 = arith.divf %94, %95 : vector<8x1xf32>
    %97 = vector.broadcast %89 : vector<8x1xf32> to vector<8x256xf32>
    %98 = arith.subf %83, %97 : vector<8x256xf32>
    %cst_39 = arith.constant 9.99999974E-6 : f32
    %99 = vector.broadcast %cst_39 : f32 to vector<8x1xf32>
    %100 = arith.addf %96, %99 : vector<8x1xf32>
    %101 = math.rsqrt %100 : vector<8x1xf32>
    %102 = vector.broadcast %101 : vector<8x1xf32> to vector<8x256xf32>
    %103 = arith.mulf %98, %102 : vector<8x256xf32>
    %104 = vector.broadcast %84 : vector<1x256xf32> to vector<8x256xf32>
    %105 = arith.mulf %103, %104 : vector<8x256xf32>
    %106 = vector.broadcast %85 : vector<1x256xf32> to vector<8x256xf32>
    %107 = arith.addf %105, %106 : vector<8x256xf32>
    %cst_40 = arith.constant 0.000000e+00 : f32
    %108 = vector.broadcast %cst_40 : f32 to vector<8x256xf32>
    %109 = arith.maximumf %107, %108 : vector<8x256xf32>
    %110 = tpu.concatenate %55, %82, %109 in 1 : vector<8x256xf32>, vector<8x256xf32>, vector<8x256xf32> -> vector<8x768xf32>
    %111 = arith.truncf %110 : vector<8x768xf32> to vector<8x768xbf16>
    %c0_41 = arith.constant 0 : index
    %c0_42 = arith.constant 0 : index
    %112 = vector.load %arg4[%c0_41, %c0_42] : memref<768x128xbf16, #tpu.memory_space<vmem>>, vector<768x128xbf16>
    %cst_43 = arith.constant dense<0.000000e+00> : vector<8x128xf32>
    %113 = tpu.matmul %111, %112, %cst_43 {dimension_numbers = #tpu.dot_dimension_numbers<[1], [0], [0], [1], [0, 0, 1, 1], [], []>} : vector<8x768xbf16>, vector<768x128xbf16>, vector<8x128xf32> -> vector<8x128xf32>
    %114 = vector.extract_strided_slice %3 {offsets = [0, 0], sizes = [1, 128], strides = [1, 1]} : vector<2x128xf32> to vector<1x128xf32>
    %115 = vector.broadcast %114 : vector<1x128xf32> to vector<8x128xf32>
    %116 = arith.addf %113, %115 : vector<8x128xf32>
    %117 = tpu.iota {dimensions = array<i32: 1>} : vector<8x128xi32>
    %118 = arith.negf %116 : vector<8x128xf32>
    %119 = math.exp %118 : vector<8x128xf32>
    %cst_44 = arith.constant 1.000000e+00 : f32
    %120 = vector.broadcast %cst_44 : f32 to vector<8x128xf32>
    %121 = arith.addf %120, %119 : vector<8x128xf32>
    %122 = arith.divf %120, %121 : vector<8x128xf32>
    %cst_45 = arith.constant 9.99999997E-7 : f32
    %cst_46 = arith.constant 0.999998986 : f32
    %123 = vector.broadcast %cst_45 : f32 to vector<8x128xf32>
    %124 = arith.maximumf %123, %122 : vector<8x128xf32>
    %125 = vector.broadcast %cst_46 : f32 to vector<8x128xf32>
    %126 = arith.minimumf %125, %124 : vector<8x128xf32>
    %c6_i32 = arith.constant 6 : i32
    %127 = vector.broadcast %c6_i32 : i32 to vector<8x128xi32>
    %128 = arith.cmpi slt, %117, %127 : vector<8x128xi32>
    %cst_47 = arith.constant -1.000000e+00 : f32
    %129 = vector.broadcast %cst_47 : f32 to vector<8x128xf32>
    %130 = arith.select %128, %126, %129 : vector<8x128xi1>, vector<8x128xf32>
    %cst_48 = arith.constant dense<0xFF800000> : vector<8xf32>
    %131 = vector.multi_reduction <maximumf>, %130, %cst_48 [1] : vector<8x128xf32> to vector<8xf32>
    %132 = vector.shape_cast %131 : vector<8xf32> to vector<8x1xf32>
    %133 = vector.broadcast %132 : vector<8x1xf32> to vector<8x128xf32>
    %134 = arith.cmpf oeq, %130, %133 : vector<8x128xf32>
    %c6_i32_49 = arith.constant 6 : i32
    %135 = vector.broadcast %c6_i32_49 : i32 to vector<8x128xi32>
    %136 = arith.select %134, %117, %135 : vector<8x128xi1>, vector<8x128xi32>
    %cst_50 = arith.constant dense<2147483647> : vector<8xi32>
    %137 = vector.multi_reduction <minsi>, %136, %cst_50 [1] : vector<8x128xi32> to vector<8xi32>
    %138 = vector.shape_cast %137 : vector<8xi32> to vector<8x1xi32>
    %c6_i32_51 = arith.constant 6 : i32
    %139 = vector.broadcast %c6_i32_51 : i32 to vector<8x1xi32>
    %140 = arith.addi %138, %139 : vector<8x1xi32>
    %141 = vector.broadcast %140 : vector<8x1xi32> to vector<8x128xi32>
    %142 = arith.cmpi eq, %117, %141 : vector<8x128xi32>
    %cst_52 = arith.constant -5.000000e-01 : f32
    %cst_53 = arith.constant 5.000000e-01 : f32
    %143 = vector.broadcast %cst_52 : f32 to vector<8x128xf32>
    %144 = arith.maximumf %143, %116 : vector<8x128xf32>
    %145 = vector.broadcast %cst_53 : f32 to vector<8x128xf32>
    %146 = arith.minimumf %145, %144 : vector<8x128xf32>
    %cst_54 = arith.constant 0.000000e+00 : f32
    %147 = vector.broadcast %cst_54 : f32 to vector<8x128xf32>
    %148 = arith.select %142, %146, %147 : vector<8x128xi1>, vector<8x128xf32>
    %cst_55 = arith.constant dense<0.000000e+00> : vector<8xf32>
    %149 = vector.multi_reduction <add>, %148, %cst_55 [1] : vector<8x128xf32> to vector<8xf32>
    %150 = vector.shape_cast %149 : vector<8xf32> to vector<8x1xf32>
    %c12_i32 = arith.constant 12 : i32
    %151 = vector.broadcast %c12_i32 : i32 to vector<8x1xi32>
    %152 = arith.addi %138, %151 : vector<8x1xi32>
    %153 = vector.broadcast %152 : vector<8x1xi32> to vector<8x128xi32>
    %154 = arith.cmpi eq, %117, %153 : vector<8x128xi32>
    %cst_56 = arith.constant 0.000000e+00 : f32
    %155 = vector.broadcast %cst_56 : f32 to vector<8x128xf32>
    %156 = arith.select %154, %116, %155 : vector<8x128xi1>, vector<8x128xf32>
    %cst_57 = arith.constant dense<0.000000e+00> : vector<8xf32>
    %157 = vector.multi_reduction <add>, %156, %cst_57 [1] : vector<8x128xf32> to vector<8xf32>
    %158 = vector.shape_cast %157 : vector<8xf32> to vector<8x1xf32>
    %159 = arith.sitofp %138 : vector<8x1xi32> to vector<8x1xf32>
    %160 = arith.addf %159, %150 : vector<8x1xf32>
    %cst_58 = arith.constant 5.000000e-01 : f32
    %161 = vector.broadcast %cst_58 : f32 to vector<8x1xf32>
    %162 = arith.addf %160, %161 : vector<8x1xf32>
    %cst_59 = arith.constant 0.52359879 : f32
    %163 = vector.broadcast %cst_59 : f32 to vector<8x1xf32>
    %164 = arith.mulf %163, %162 : vector<8x1xf32>
    %cst_60 = arith.constant 1.57079637 : f32
    %165 = vector.broadcast %cst_60 : f32 to vector<8x1xf32>
    %166 = arith.subf %164, %165 : vector<8x1xf32>
    %167 = vector.extract_strided_slice %4 {offsets = [0, 0], sizes = [1, 32], strides = [1, 1]} : vector<8x128xf32> to vector<1x32xf32>
    %168 = vector.broadcast %166 : vector<8x1xf32> to vector<8x32xf32>
    %169 = vector.broadcast %167 : vector<1x32xf32> to vector<8x32xf32>
    %170 = arith.mulf %168, %169 : vector<8x32xf32>
    %171 = vector.extract_strided_slice %4 {offsets = [1, 0], sizes = [1, 32], strides = [1, 1]} : vector<8x128xf32> to vector<1x32xf32>
    %172 = vector.broadcast %158 : vector<8x1xf32> to vector<8x32xf32>
    %173 = vector.broadcast %171 : vector<1x32xf32> to vector<8x32xf32>
    %174 = arith.mulf %172, %173 : vector<8x32xf32>
    %175 = arith.addf %170, %174 : vector<8x32xf32>
    %176 = vector.extract_strided_slice %4 {offsets = [2, 0], sizes = [1, 32], strides = [1, 1]} : vector<8x128xf32> to vector<1x32xf32>
    %177 = vector.broadcast %176 : vector<1x32xf32> to vector<8x32xf32>
    %178 = arith.addf %175, %177 : vector<8x32xf32>
    %179 = vector.extract_strided_slice %4 {offsets = [3, 0], sizes = [1, 32], strides = [1, 1]} : vector<8x128xf32> to vector<1x32xf32>
    %180 = vector.extract_strided_slice %4 {offsets = [4, 0], sizes = [1, 32], strides = [1, 1]} : vector<8x128xf32> to vector<1x32xf32>
    %cst_61 = arith.constant dense<0.000000e+00> : vector<8xf32>
    %181 = vector.multi_reduction <add>, %178, %cst_61 [1] : vector<8x32xf32> to vector<8xf32>
    %182 = vector.shape_cast %181 : vector<8xf32> to vector<8x1xf32>
    %cst_62 = arith.constant 3.200000e+01 : f32
    %183 = vector.broadcast %cst_62 : f32 to vector<8x1xf32>
    %184 = arith.divf %182, %183 : vector<8x1xf32>
    %185 = vector.broadcast %184 : vector<8x1xf32> to vector<8x32xf32>
    %186 = arith.subf %178, %185 : vector<8x32xf32>
    %187 = arith.mulf %186, %186 : vector<8x32xf32>
    %cst_63 = arith.constant dense<0.000000e+00> : vector<8xf32>
    %188 = vector.multi_reduction <add>, %187, %cst_63 [1] : vector<8x32xf32> to vector<8xf32>
    %189 = vector.shape_cast %188 : vector<8xf32> to vector<8x1xf32>
    %cst_64 = arith.constant 3.200000e+01 : f32
    %190 = vector.broadcast %cst_64 : f32 to vector<8x1xf32>
    %191 = arith.divf %189, %190 : vector<8x1xf32>
    %192 = vector.broadcast %184 : vector<8x1xf32> to vector<8x32xf32>
    %193 = arith.subf %178, %192 : vector<8x32xf32>
    %cst_65 = arith.constant 9.99999974E-6 : f32
    %194 = vector.broadcast %cst_65 : f32 to vector<8x1xf32>
    %195 = arith.addf %191, %194 : vector<8x1xf32>
    %196 = math.rsqrt %195 : vector<8x1xf32>
    %197 = vector.broadcast %196 : vector<8x1xf32> to vector<8x32xf32>
    %198 = arith.mulf %193, %197 : vector<8x32xf32>
    %199 = vector.broadcast %179 : vector<1x32xf32> to vector<8x32xf32>
    %200 = arith.mulf %198, %199 : vector<8x32xf32>
    %201 = vector.broadcast %180 : vector<1x32xf32> to vector<8x32xf32>
    %202 = arith.addf %200, %201 : vector<8x32xf32>
    %cst_66 = arith.constant 0.000000e+00 : f32
    %203 = vector.broadcast %cst_66 : f32 to vector<8x32xf32>
    %204 = arith.maximumf %202, %203 : vector<8x32xf32>
    %c0_67 = arith.constant 0 : index
    %c0_68 = arith.constant 0 : index
    %205 = vector.load %arg5[%c0_67, %c0_68] : memref<288x64xbf16, #tpu.memory_space<vmem>>, vector<288x64xbf16>
    %206 = vector.extract_strided_slice %205 {offsets = [0, 0], sizes = [256, 64], strides = [1, 1]} : vector<288x64xbf16> to vector<256x64xbf16>
    %cst_69 = arith.constant dense<0.000000e+00> : vector<8x64xf32>
    %207 = tpu.matmul %21, %206, %cst_69 {dimension_numbers = #tpu.dot_dimension_numbers<[1], [0], [0], [1], [0, 0, 1, 1], [], []>} : vector<8x256xbf16>, vector<256x64xbf16>, vector<8x64xf32> -> vector<8x64xf32>
    %208 = arith.truncf %204 : vector<8x32xf32> to vector<8x32xbf16>
    %209 = vector.extract_strided_slice %205 {offsets = [256, 0], sizes = [32, 64], strides = [1, 1]} : vector<288x64xbf16> to vector<32x64xbf16>
    %cst_70 = arith.constant dense<0.000000e+00> : vector<8x64xf32>
    %210 = tpu.matmul %208, %209, %cst_70 {dimension_numbers = #tpu.dot_dimension_numbers<[1], [0], [0], [1], [0, 0, 1, 1], [], []>} : vector<8x32xbf16>, vector<32x64xbf16>, vector<8x64xf32> -> vector<8x64xf32>
    %211 = arith.addf %207, %210 : vector<8x64xf32>
    %212 = vector.extract_strided_slice %4 {offsets = [5, 0], sizes = [1, 64], strides = [1, 1]} : vector<8x128xf32> to vector<1x64xf32>
    %213 = vector.broadcast %212 : vector<1x64xf32> to vector<8x64xf32>
    %214 = arith.addf %211, %213 : vector<8x64xf32>
    %215 = vector.extract_strided_slice %4 {offsets = [6, 0], sizes = [1, 64], strides = [1, 1]} : vector<8x128xf32> to vector<1x64xf32>
    %216 = vector.extract_strided_slice %4 {offsets = [7, 0], sizes = [1, 64], strides = [1, 1]} : vector<8x128xf32> to vector<1x64xf32>
    %cst_71 = arith.constant dense<0.000000e+00> : vector<8xf32>
    %217 = vector.multi_reduction <add>, %214, %cst_71 [1] : vector<8x64xf32> to vector<8xf32>
    %218 = vector.shape_cast %217 : vector<8xf32> to vector<8x1xf32>
    %cst_72 = arith.constant 6.400000e+01 : f32
    %219 = vector.broadcast %cst_72 : f32 to vector<8x1xf32>
    %220 = arith.divf %218, %219 : vector<8x1xf32>
    %221 = vector.broadcast %220 : vector<8x1xf32> to vector<8x64xf32>
    %222 = arith.subf %214, %221 : vector<8x64xf32>
    %223 = arith.mulf %222, %222 : vector<8x64xf32>
    %cst_73 = arith.constant dense<0.000000e+00> : vector<8xf32>
    %224 = vector.multi_reduction <add>, %223, %cst_73 [1] : vector<8x64xf32> to vector<8xf32>
    %225 = vector.shape_cast %224 : vector<8xf32> to vector<8x1xf32>
    %cst_74 = arith.constant 6.400000e+01 : f32
    %226 = vector.broadcast %cst_74 : f32 to vector<8x1xf32>
    %227 = arith.divf %225, %226 : vector<8x1xf32>
    %228 = vector.broadcast %220 : vector<8x1xf32> to vector<8x64xf32>
    %229 = arith.subf %214, %228 : vector<8x64xf32>
    %cst_75 = arith.constant 9.99999974E-6 : f32
    %230 = vector.broadcast %cst_75 : f32 to vector<8x1xf32>
    %231 = arith.addf %227, %230 : vector<8x1xf32>
    %232 = math.rsqrt %231 : vector<8x1xf32>
    %233 = vector.broadcast %232 : vector<8x1xf32> to vector<8x64xf32>
    %234 = arith.mulf %229, %233 : vector<8x64xf32>
    %235 = vector.broadcast %215 : vector<1x64xf32> to vector<8x64xf32>
    %236 = arith.mulf %234, %235 : vector<8x64xf32>
    %237 = vector.broadcast %216 : vector<1x64xf32> to vector<8x64xf32>
    %238 = arith.addf %236, %237 : vector<8x64xf32>
    %cst_76 = arith.constant 0.000000e+00 : f32
    %239 = vector.broadcast %cst_76 : f32 to vector<8x64xf32>
    %240 = arith.maximumf %238, %239 : vector<8x64xf32>
    %241 = arith.truncf %240 : vector<8x64xf32> to vector<8x64xbf16>
    %c0_77 = arith.constant 0 : index
    %c0_78 = arith.constant 0 : index
    %242 = vector.load %arg6[%c0_77, %c0_78] : memref<64x256xbf16, #tpu.memory_space<vmem>>, vector<64x256xbf16>
    %cst_79 = arith.constant dense<0.000000e+00> : vector<8x256xf32>
    %243 = tpu.matmul %241, %242, %cst_79 {dimension_numbers = #tpu.dot_dimension_numbers<[1], [0], [0], [1], [0, 0, 1, 1], [], []>} : vector<8x64xbf16>, vector<64x256xbf16>, vector<8x256xf32> -> vector<8x256xf32>
    %244 = vector.extract_strided_slice %2 {offsets = [1, 0], sizes = [1, 256], strides = [1, 1]} : vector<4x256xf32> to vector<1x256xf32>
    %245 = vector.broadcast %244 : vector<1x256xf32> to vector<8x256xf32>
    %246 = arith.addf %243, %245 : vector<8x256xf32>
    %247 = vector.extract_strided_slice %2 {offsets = [2, 0], sizes = [1, 256], strides = [1, 1]} : vector<4x256xf32> to vector<1x256xf32>
    %248 = vector.extract_strided_slice %2 {offsets = [3, 0], sizes = [1, 256], strides = [1, 1]} : vector<4x256xf32> to vector<1x256xf32>
    %cst_80 = arith.constant dense<0.000000e+00> : vector<8xf32>
    %249 = vector.multi_reduction <add>, %246, %cst_80 [1] : vector<8x256xf32> to vector<8xf32>
    %250 = vector.shape_cast %249 : vector<8xf32> to vector<8x1xf32>
    %cst_81 = arith.constant 2.560000e+02 : f32
    %251 = vector.broadcast %cst_81 : f32 to vector<8x1xf32>
    %252 = arith.divf %250, %251 : vector<8x1xf32>
    %253 = vector.broadcast %252 : vector<8x1xf32> to vector<8x256xf32>
    %254 = arith.subf %246, %253 : vector<8x256xf32>
    %255 = arith.mulf %254, %254 : vector<8x256xf32>
    %cst_82 = arith.constant dense<0.000000e+00> : vector<8xf32>
    %256 = vector.multi_reduction <add>, %255, %cst_82 [1] : vector<8x256xf32> to vector<8xf32>
    %257 = vector.shape_cast %256 : vector<8xf32> to vector<8x1xf32>
    %cst_83 = arith.constant 2.560000e+02 : f32
    %258 = vector.broadcast %cst_83 : f32 to vector<8x1xf32>
    %259 = arith.divf %257, %258 : vector<8x1xf32>
    %260 = vector.broadcast %252 : vector<8x1xf32> to vector<8x256xf32>
    %261 = arith.subf %246, %260 : vector<8x256xf32>
    %cst_84 = arith.constant 9.99999974E-6 : f32
    %262 = vector.broadcast %cst_84 : f32 to vector<8x1xf32>
    %263 = arith.addf %259, %262 : vector<8x1xf32>
    %264 = math.rsqrt %263 : vector<8x1xf32>
    %265 = vector.broadcast %264 : vector<8x1xf32> to vector<8x256xf32>
    %266 = arith.mulf %261, %265 : vector<8x256xf32>
    %267 = vector.broadcast %247 : vector<1x256xf32> to vector<8x256xf32>
    %268 = arith.mulf %266, %267 : vector<8x256xf32>
    %269 = vector.broadcast %248 : vector<1x256xf32> to vector<8x256xf32>
    %270 = arith.addf %268, %269 : vector<8x256xf32>
    %271 = arith.addf %20, %270 : vector<8x256xf32>
    %cst_85 = arith.constant 0.000000e+00 : f32
    %272 = vector.broadcast %cst_85 : f32 to vector<8x256xf32>
    %273 = arith.maximumf %271, %272 : vector<8x256xf32>
    %274 = arith.truncf %273 : vector<8x256xf32> to vector<8x256xbf16>
    %c0_86 = arith.constant 0 : index
    %c0_87 = arith.constant 0 : index
    %275 = vector.load %arg7[%c0_86, %c0_87] : memref<256x512xbf16, #tpu.memory_space<vmem>>, vector<256x512xbf16>
    %cst_88 = arith.constant dense<0.000000e+00> : vector<8x512xf32>
    %276 = tpu.matmul %274, %275, %cst_88 {dimension_numbers = #tpu.dot_dimension_numbers<[1], [0], [0], [1], [0, 0, 1, 1], [], []>} : vector<8x256xbf16>, vector<256x512xbf16>, vector<8x512xf32> -> vector<8x512xf32>
    %277 = vector.extract_strided_slice %1 {offsets = [0, 0], sizes = [1, 512], strides = [1, 1]} : vector<3x512xf32> to vector<1x512xf32>
    %278 = vector.broadcast %277 : vector<1x512xf32> to vector<8x512xf32>
    %279 = arith.addf %276, %278 : vector<8x512xf32>
    %280 = vector.extract_strided_slice %1 {offsets = [1, 0], sizes = [1, 512], strides = [1, 1]} : vector<3x512xf32> to vector<1x512xf32>
    %281 = vector.extract_strided_slice %1 {offsets = [2, 0], sizes = [1, 512], strides = [1, 1]} : vector<3x512xf32> to vector<1x512xf32>
    %282 = vector.extract_strided_slice %279 {offsets = [0, 0], sizes = [8, 256], strides = [1, 1]} : vector<8x512xf32> to vector<8x256xf32>
    %283 = vector.extract_strided_slice %280 {offsets = [0, 0], sizes = [1, 256], strides = [1, 1]} : vector<1x512xf32> to vector<1x256xf32>
    %284 = vector.extract_strided_slice %281 {offsets = [0, 0], sizes = [1, 256], strides = [1, 1]} : vector<1x512xf32> to vector<1x256xf32>
    %cst_89 = arith.constant dense<0.000000e+00> : vector<8xf32>
    %285 = vector.multi_reduction <add>, %282, %cst_89 [1] : vector<8x256xf32> to vector<8xf32>
    %286 = vector.shape_cast %285 : vector<8xf32> to vector<8x1xf32>
    %cst_90 = arith.constant 2.560000e+02 : f32
    %287 = vector.broadcast %cst_90 : f32 to vector<8x1xf32>
    %288 = arith.divf %286, %287 : vector<8x1xf32>
    %289 = vector.broadcast %288 : vector<8x1xf32> to vector<8x256xf32>
    %290 = arith.subf %282, %289 : vector<8x256xf32>
    %291 = arith.mulf %290, %290 : vector<8x256xf32>
    %cst_91 = arith.constant dense<0.000000e+00> : vector<8xf32>
    %292 = vector.multi_reduction <add>, %291, %cst_91 [1] : vector<8x256xf32> to vector<8xf32>
    %293 = vector.shape_cast %292 : vector<8xf32> to vector<8x1xf32>
    %cst_92 = arith.constant 2.560000e+02 : f32
    %294 = vector.broadcast %cst_92 : f32 to vector<8x1xf32>
    %295 = arith.divf %293, %294 : vector<8x1xf32>
    %296 = vector.broadcast %288 : vector<8x1xf32> to vector<8x256xf32>
    %297 = arith.subf %282, %296 : vector<8x256xf32>
    %cst_93 = arith.constant 9.99999974E-6 : f32
    %298 = vector.broadcast %cst_93 : f32 to vector<8x1xf32>
    %299 = arith.addf %295, %298 : vector<8x1xf32>
    %300 = math.rsqrt %299 : vector<8x1xf32>
    %301 = vector.broadcast %300 : vector<8x1xf32> to vector<8x256xf32>
    %302 = arith.mulf %297, %301 : vector<8x256xf32>
    %303 = vector.broadcast %283 : vector<1x256xf32> to vector<8x256xf32>
    %304 = arith.mulf %302, %303 : vector<8x256xf32>
    %305 = vector.broadcast %284 : vector<1x256xf32> to vector<8x256xf32>
    %306 = arith.addf %304, %305 : vector<8x256xf32>
    %cst_94 = arith.constant 0.000000e+00 : f32
    %307 = vector.broadcast %cst_94 : f32 to vector<8x256xf32>
    %308 = arith.maximumf %306, %307 : vector<8x256xf32>
    %309 = vector.extract_strided_slice %279 {offsets = [0, 256], sizes = [8, 256], strides = [1, 1]} : vector<8x512xf32> to vector<8x256xf32>
    %310 = vector.extract_strided_slice %280 {offsets = [0, 256], sizes = [1, 256], strides = [1, 1]} : vector<1x512xf32> to vector<1x256xf32>
    %311 = vector.extract_strided_slice %281 {offsets = [0, 256], sizes = [1, 256], strides = [1, 1]} : vector<1x512xf32> to vector<1x256xf32>
    %cst_95 = arith.constant dense<0.000000e+00> : vector<8xf32>
    %312 = vector.multi_reduction <add>, %309, %cst_95 [1] : vector<8x256xf32> to vector<8xf32>
    %313 = vector.shape_cast %312 : vector<8xf32> to vector<8x1xf32>
    %cst_96 = arith.constant 2.560000e+02 : f32
    %314 = vector.broadcast %cst_96 : f32 to vector<8x1xf32>
    %315 = arith.divf %313, %314 : vector<8x1xf32>
    %316 = vector.broadcast %315 : vector<8x1xf32> to vector<8x256xf32>
    %317 = arith.subf %309, %316 : vector<8x256xf32>
    %318 = arith.mulf %317, %317 : vector<8x256xf32>
    %cst_97 = arith.constant dense<0.000000e+00> : vector<8xf32>
    %319 = vector.multi_reduction <add>, %318, %cst_97 [1] : vector<8x256xf32> to vector<8xf32>
    %320 = vector.shape_cast %319 : vector<8xf32> to vector<8x1xf32>
    %cst_98 = arith.constant 2.560000e+02 : f32
    %321 = vector.broadcast %cst_98 : f32 to vector<8x1xf32>
    %322 = arith.divf %320, %321 : vector<8x1xf32>
    %323 = vector.broadcast %315 : vector<8x1xf32> to vector<8x256xf32>
    %324 = arith.subf %309, %323 : vector<8x256xf32>
    %cst_99 = arith.constant 9.99999974E-6 : f32
    %325 = vector.broadcast %cst_99 : f32 to vector<8x1xf32>
    %326 = arith.addf %322, %325 : vector<8x1xf32>
    %327 = math.rsqrt %326 : vector<8x1xf32>
    %328 = vector.broadcast %327 : vector<8x1xf32> to vector<8x256xf32>
    %329 = arith.mulf %324, %328 : vector<8x256xf32>
    %330 = vector.broadcast %310 : vector<1x256xf32> to vector<8x256xf32>
    %331 = arith.mulf %329, %330 : vector<8x256xf32>
    %332 = vector.broadcast %311 : vector<1x256xf32> to vector<8x256xf32>
    %333 = arith.addf %331, %332 : vector<8x256xf32>
    %cst_100 = arith.constant 0.000000e+00 : f32
    %334 = vector.broadcast %cst_100 : f32 to vector<8x256xf32>
    %335 = arith.maximumf %333, %334 : vector<8x256xf32>
    %336 = tpu.concatenate %308, %335 in 1 : vector<8x256xf32>, vector<8x256xf32> -> vector<8x512xf32>
    %337 = arith.truncf %336 : vector<8x512xf32> to vector<8x512xbf16>
    %c0_101 = arith.constant 0 : index
    %c0_102 = arith.constant 0 : index
    %338 = vector.load %arg8[%c0_101, %c0_102] : memref<512x128xbf16, #tpu.memory_space<vmem>>, vector<512x128xbf16>
    %cst_103 = arith.constant dense<0.000000e+00> : vector<8x128xf32>
    %339 = tpu.matmul %337, %338, %cst_103 {dimension_numbers = #tpu.dot_dimension_numbers<[1], [0], [0], [1], [0, 0, 1, 1], [], []>} : vector<8x512xbf16>, vector<512x128xbf16>, vector<8x128xf32> -> vector<8x128xf32>
    %340 = vector.extract_strided_slice %3 {offsets = [1, 0], sizes = [1, 128], strides = [1, 1]} : vector<2x128xf32> to vector<1x128xf32>
    %341 = vector.broadcast %340 : vector<1x128xf32> to vector<8x128xf32>
    %342 = arith.addf %339, %341 : vector<8x128xf32>
    %343 = arith.addf %116, %342 : vector<8x128xf32>
    %c0_104 = arith.constant 0 : index
    %c0_105 = arith.constant 0 : index
    %344 = vector.load %arg15[%c0_104, %c0_105] : memref<8x128xf32, #tpu.memory_space<vmem>>, vector<8x128xf32>
    tpu.vector_store %arg15[%c0_104, %c0_105], %343 {strides = array<i32>} : memref<8x128xf32, #tpu.memory_space<vmem>>, vector<8x128xf32>,
    return
  }
  func.func @transform_0(%arg0: i32) -> (i32, i32, i32) {
    %c0_i32 = arith.constant 0 : i32
    %c0_i32_0 = arith.constant 0 : i32
    %c0_i32_1 = arith.constant 0 : i32
    return %arg0, %c0_i32, %c0_i32_0 : i32, i32, i32
  }
  func.func @transform_1(%arg0: i32) -> (i32, i32) {
    %c0_i32 = arith.constant 0 : i32
    %c0_i32_0 = arith.constant 0 : i32
    %c0_i32_1 = arith.constant 0 : i32
    return %c0_i32, %c0_i32_0 : i32, i32
  }
  func.func @transform_2(%arg0: i32) -> (i32, i32) {
    %c0_i32 = arith.constant 0 : i32
    %c0_i32_0 = arith.constant 0 : i32
    %c0_i32_1 = arith.constant 0 : i32
    return %c0_i32, %c0_i32_0 : i32, i32
  }
  func.func @transform_3(%arg0: i32) -> (i32, i32) {
    %c0_i32 = arith.constant 0 : i32
    %c0_i32_0 = arith.constant 0 : i32
    %c0_i32_1 = arith.constant 0 : i32
    return %c0_i32, %c0_i32_0 : i32, i32
  }
  func.func @transform_4(%arg0: i32) -> (i32, i32) {
    %c0_i32 = arith.constant 0 : i32
    %c0_i32_0 = arith.constant 0 : i32
    %c0_i32_1 = arith.constant 0 : i32
    return %c0_i32, %c0_i32_0 : i32, i32
  }
  func.func @transform_5(%arg0: i32) -> (i32, i32) {
    %c0_i32 = arith.constant 0 : i32
    %c0_i32_0 = arith.constant 0 : i32
    %c0_i32_1 = arith.constant 0 : i32
    return %c0_i32, %c0_i32_0 : i32, i32
  }
  func.func @transform_6(%arg0: i32) -> (i32, i32) {
    %c0_i32 = arith.constant 0 : i32
    %c0_i32_0 = arith.constant 0 : i32
    %c0_i32_1 = arith.constant 0 : i32
    return %c0_i32, %c0_i32_0 : i32, i32
  }
  func.func @transform_7(%arg0: i32) -> (i32, i32) {
    %c0_i32 = arith.constant 0 : i32
    %c0_i32_0 = arith.constant 0 : i32
    %c0_i32_1 = arith.constant 0 : i32
    return %c0_i32, %c0_i32_0 : i32, i32
  }
  func.func @transform_8(%arg0: i32) -> (i32, i32) {
    %c0_i32 = arith.constant 0 : i32
    %c0_i32_0 = arith.constant 0 : i32
    %c0_i32_1 = arith.constant 0 : i32
    return %c0_i32, %c0_i32_0 : i32, i32
  }
  func.func @transform_9(%arg0: i32) -> (i32, i32) {
    %c0_i32 = arith.constant 0 : i32
    %c0_i32_0 = arith.constant 0 : i32
    %c0_i32_1 = arith.constant 0 : i32
    return %c0_i32, %c0_i32_0 : i32, i32
  }
  func.func @transform_10(%arg0: i32) -> (i32, i32) {
    %c0_i32 = arith.constant 0 : i32
    %c0_i32_0 = arith.constant 0 : i32
    %c0_i32_1 = arith.constant 0 : i32
    return %c0_i32, %c0_i32_0 : i32, i32
  }
  func.func @transform_11(%arg0: i32) -> (i32, i32) {
    %c0_i32 = arith.constant 0 : i32
    %c0_i32_0 = arith.constant 0 : i32
    %c0_i32_1 = arith.constant 0 : i32
    return %c0_i32, %c0_i32_0 : i32, i32
  }
  func.func @transform_12(%arg0: i32) -> (i32, i32) {
    %c0_i32 = arith.constant 0 : i32
    %c0_i32_0 = arith.constant 0 : i32
    %c0_i32_1 = arith.constant 0 : i32
    return %c0_i32, %c0_i32_0 : i32, i32
  }
  func.func @transform_13(%arg0: i32) -> (i32, i32, i32) {
    %c0_i32 = arith.constant 0 : i32
    %c0_i32_0 = arith.constant 0 : i32
    %c0_i32_1 = arith.constant 0 : i32
    return %arg0, %c0_i32, %c0_i32_0 : i32, i32, i32
  }
  func.func @transform_14(%arg0: i32) -> (i32, i32) {
    %c0_i32 = arith.constant 0 : i32
    %c0_i32_0 = arith.constant 0 : i32
    return %arg0, %c0_i32 : i32, i32
  }
}

</mosaic_0001>

<bundles_post_ra>
// kernel: patch_multi_grasp_net_forward.1
= control target key start
LH: loop header
LB: loop body
LE: loop exit
PB: predicated region body
PF: predicated region fallthrough
CT: control target
= control target key end

     0   :  { %s13738_s0 = inlined_call_operand.vmem [shape: f32[16,256,6], index: 0, kind: input, shape index: {}]   ;;  %s13739_s1 = inlined_call_operand.vmem [shape: bf16[6,256], index: 1, kind: input, shape index: {}]   ;;  %s13740_s2 = inlined_call_operand.vmem [shape: bf16[256,768], index: 2, kind: input, shape index: {}]   ;;  %s13741_s3 = inlined_call_operand.vmem [shape: bf16[768,128], index: 3, kind: input, shape index: {}]   ;;  %s13742_s4 = inlined_call_operand.vmem [shape: bf16[288,64], index: 4, kind: input, shape index: {}]   ;;  %s13743_s5 = inlined_call_operand.vmem [shape: bf16[64,256], index: 5, kind: input, shape index: {}]   ;;  %s13744_s6 = inlined_call_operand.vmem [shape: bf16[256,512], index: 6, kind: input, shape index: {}]   ;;  %s13745_s7 = inlined_call_operand.vmem [shape: bf16[512,128], index: 7, kind: input, shape index: {}]   ;;  %s13746_s8 = inlined_call_operand.vmem [shape: f32[3,768], index: 8, kind: input, shape index: {}]   ;;  %s13747_s9 = inlined_call_operand.vmem [shape: f32[3,512], index: 9, kind: input, shape index: {}]   ;;  %s13748_s10 = inlined_call_operand.vmem [shape: f32[4,256], index: 10, kind: input, shape index: {}]   ;;  %s13749_s11 = inlined_call_operand.vmem [shape: f32[2,128], index: 11, kind: input, shape index: {}]   ;;  %s13750_s12 = inlined_call_operand.vmem [shape: f32[8,128], index: 12, kind: input, shape index: {}]   ;;  %s13751_s13 = inlined_call_operand.hbm [shape: bf16[16,256,256], index: 13, kind: output, shape index: {0}]   ;;  %s13752_s14 = inlined_call_operand.vmem [shape: f32[16,128], index: 14, kind: output, shape index: {1}]  }
   0x1   :  { %13806 = sst [smem:[#allocation13_spill]] %s13738_s0 }
   0x2   :  { %13807 = sst [smem:[#allocation14_spill]] %s13739_s1 }
   0x3   :  { %13808 = sst [smem:[#allocation15_spill]] %s13740_s2 }
   0x4   :  { %20 = vsyncpa [#allocation3], 0 }
   0x5   :  { %22 = vsyncpa [#allocation3 + $0x1], 0  ;;  %s10407_s29 = smov 0   ;;  %s10409_s30 = smov 0  }
   0x6   :  { %s10411_s15 = smov 0   ;;  %s10413_s16 = smov 0  }
   0x7 LB: > { %13809 = sst [smem:[#allocation5_spill]] %s10320_s15  ;;  %s10428_s17 = sadd.s32 4294967295, %s10324_s16   ;;  %s10324_s16 = sphi %s10413_s16, %s13881_s16   ;;  %s10320_s15 = sphi %s10411_s15, %s13880_s15   ;;  %s10316_s30 = sphi %s10409_s30, %s13879_s30   ;;  %s10312_s29 = sphi %s10407_s29, %s13878_s29  }
   0x8   : > { %s8769_s18 = sadd.s32 4294967294, %s10324_s16   ;;  %s10432_s19 = sadd.s32 1, %s10324_s16  }
   0x9   : > { %s313_s20 = sadd.s32 1, %s10320_s15  ;;  %s310_s21 = ssub.s32 %s10324_s16, %s10432_s19 }
   0xa   : > { %p323_p0 = scmp.ne.s32.totalorder %s10320_s15, %s10316_s30  ;;  %p311_p1 = scmp.eq.s32.totalorder %s310_s21, 0 }
   0xb   : > { %p324_p2 = scmp.eq.s32.totalorder %s10428_s17, 1  ;;  %p329_p3 = scmp.ne.s32.totalorder %s10316_s30, %s10312_s29 }
   0xc   : > { %p330_p4 = scmp.eq.s32.totalorder %s8769_s18, 1  ;;  %p8772_p7 = scmp.ge.s32.totalorder %s10324_s16, 1 }
   0xd   : > { %s10443_s22 = scalar_select %p311_p1, %s10320_s15, %s313_s20  }
   0xe   : > { %p10445_p5 = por %p324_p2, %p323_p0  ;;  %p10449_p6 = por %p330_p4, %p329_p3 }
   0xf   : > { %13810 = sst [smem:[#allocation6_spill]] %s10443_s22  ;;  %p420_p8 = scmp.lt.s32.totalorder %s10324_s16, 3 }
  0x11   : > { %p421_p9 = pnand %p8772_p7, %p420_p8 }
  0x13   : > { %424 = sbr.rel (%p421_p9) target bundleno = 4654 (0x122e), region = 72 }
  0x18   : > { %s13813_s1 = sld [smem:[#allocation14_spill]]  ;;  %vm1286_vm0 = vcmask 1042432   ;;  %s8774_s27 = sshll.u32 %s10428_s17, 3  ;;  %v13763_v3 = vmov 0   ;;  %vm901_vm1 = vcmask 48128   ;;  %vm5720_vm2 = vcmask 1041409  }
  0x19   : > { %1325 = vmatprep.mubr.bf16.mxu0 %v13763_v3  ;;  %p472_p10 = scmp.lt.s32.totalorder %s8774_s27, 15  ;;  %2265 = vmatprep.mubr.bf16.mxu1 %v13763_v3  ;;  %s13814_s0 = sld [smem:[#allocation13_spill]]  ;;  %vm5722_vm3 = vcmask 1042434   ;;  %vm5724_vm4 = vcmask 1043459   ;;  %vm5726_vm5 = vcmask 1044484   ;;  %vm5728_vm6 = vcmask 1045509  }
  0x1a   : > { %s13821_s2 = sld [smem:[#allocation15_spill]]  ;;  %vm5730_vm7 = vcmask 1046534   ;;  %vm5732_vm8 = vcmask 1047559   ;;  %vm7099_vm14 = vcmask 261120   ;;  %vm10328_vm15 = vmmov 0   ;;  %s9700_s15 = sshll.u32 %s10428_s17, 15 }
  0x1b   : > { %s13883_s27 = smov (!%p472_p10, %s8774_s27), 15  ;;  %s13681_s20 = scalar_lea.hbm %s13751_s13, %s9700_s15 }
  0x1c   : > { %s9442_s28 = sshll.u32 %s13883_s27, 8  ;;  %s13762_s27 = sand.u32 1, %s10316_s30  }
  0x1d   : > { %s13875_s26 = sand.u32 1, %s10316_s30  }
  0x1e   : > { %v876_v0 = vld [vmem:[%s13813_s1] sm:$0x77]  ;;  %s10329_s1 = smov [#allocation2]  }
  0x1f   : > { %v8779_v1 = vcombine.high %v876_v0, %v876_v0  ;;  %v8778_v2 = vcombine.low %v876_v0, %v876_v0  ;;  %s10464_s21 = scalar_lea.vmem %s13814_s0, %s9442_s28  ;;  %s8773_s28 = sshll.u32 %s13762_s27, 11 }
  0x20   : > { %v492_v5 = vld [vmem:[%s10464_s21] sm:$0xff]  ;;  %v493_v6 = vld [vmem:[%s10464_s21 + $0x8] sm:$0xff]  ;;  %v494_v8 = vld [vmem:[%s10464_s21 + $0x10] sm:$0xff]  ;;  %s10596_s18 = scalar_lea.vmem [#allocation2], %s8773_s28  ;;  %s13688_s0 = scalar_lea.sflag [#allocation3], %s13875_s26 }
  0x21   : > { %8780 = vmatprep.subr.msk.bf16.mxu0 %vm1286_vm0, %v8779_v1  ;;  %v1288_v4 = vsel %vm1286_vm0, %v8778_v2, 0  ;;  %9844 = vmatprep.subr.msk.bf16.mxu1 %vm1286_vm0, %v8779_v1  ;;  %v748_v7 = vpack.c.bf16 %v493_v6, %v492_v5  ;;  %v495_v9 = vld [vmem:[%s10464_s21 + $0x18] sm:$0xff]  ;;  %v496_v11 = vld [vmem:[%s10464_s21 + $0x20] sm:$0xff]  ;;  %v497_v12 = vld [vmem:[%s10464_s21 + $0x28] sm:$0xff]  ;;  %vm7358_vm0 = vcmask 523264   ;;  %s8680_s25 = sshll.u32 %s10596_s18, 4  ;;  %s13684_s25 = int_to_ptr.vmem [resolvable:$true] %s8680_s25 }
  0x22   : > { %1308 = vmatpush1.bf16.msra.mxu0 %v1288_v4  ;;  %9845 = vmatpush1.bf16.msra.mxu1 %v1288_v4  ;;  %v749_v10 = vpack.c.bf16 %v495_v9, %v494_v8  ;;  %v750_v13 = vpack.c.bf16 %v497_v12, %v496_v11  ;;  %v498_v14 = vld [vmem:[%s10464_s21 + $0x30] sm:$0xff]  ;;  %v499_v15 = vld [vmem:[%s10464_s21 + $0x38] sm:$0xff]  ;;  %v500_v17 = vld [vmem:[%s10464_s21 + $0x40] sm:$0xff]  ;;  %v13753_v11 = vlaneseq  ;;  %s10264_s28 = scalar_lea.vmem %s13684_s25, 32768 }
  0x23   : > { %v751_v16 = vpack.c.bf16 %v499_v15, %v498_v14  ;;  %v501_v18 = vld [vmem:[%s10464_s21 + $0x48] sm:$0xff]  ;;  %v502_v20 = vld [vmem:[%s10464_s21 + $0x50] sm:$0xff]  ;;  %v503_v21 = vld [vmem:[%s10464_s21 + $0x58] sm:$0xff]  ;;  %p10265_p11 = scmp.ne.s32.totalorder %s13684_s25, %s10264_s28 }
  0x24   : > { %v752_v19 = vpack.c.bf16 %v501_v18, %v500_v17  ;;  %v753_v22 = vpack.c.bf16 %v503_v21, %v502_v20  ;;  %v504_v23 = vld [vmem:[%s10464_s21 + $0x60] sm:$0xff]  ;;  %v505_v24 = vld [vmem:[%s10464_s21 + $0x68] sm:$0xff]  ;;  %v506_v26 = vld [vmem:[%s10464_s21 + $0x70] sm:$0xff]  ;;  %v10561_v14 = vshrl.u32 %v13753_v11, 7 }
  0x25   : > { %8781 = vmatmul.mubr.msk.bf16.vlgmr.msra.gmra.mxu0 %vm901_vm1, %v748_v7  ;;  %v754_v25 = vpack.c.bf16 %v505_v24, %v504_v23  ;;  %v507_v27 = vld [vmem:[%s10464_s21 + $0x78] sm:$0xff]  ;;  %v508_v29 = vld [vmem:[%s10464_s21 + $0x80] sm:$0xff]  ;;  %v509_v30 = vld [vmem:[%s10464_s21 + $0x88] sm:$0xff]  ;;  %p10266_p12 = pnand %p10265_p11, %p10445_p5 }
  0x26   : > { %1335 = vmatprep.mubr.bf16.mxu0 %v13763_v3  ;;  %v755_v28 = vpack.c.bf16 %v507_v27, %v506_v26  ;;  %v756_v31 = vpack.c.bf16 %v509_v30, %v508_v29  ;;  %v510_v32 = vld [vmem:[%s10464_s21 + $0x90] sm:$0xff]  ;;  %v511_v33 = vld [vmem:[%s10464_s21 + $0x98] sm:$0xff]  ;;  %v512_v35 = vld [vmem:[%s10464_s21 + $0xa0] sm:$0xff]  ;;  %13815 = vst [vmem:[#allocation7_spill] sm:$0xff] %v10561_v14  ;;  %v10570_v18 = vsub.s32 4, %v10561_v14 }
  0x27   : > { %v757_v34 = vpack.c.bf16 %v511_v33, %v510_v32  ;;  %v513_v36 = vld [vmem:[%s10464_s21 + $0xa8] sm:$0xff]  ;;  %v514_v38 = vld [vmem:[%s10464_s21 + $0xb0] sm:$0xff]  ;;  %v515_v39 = vld [vmem:[%s10464_s21 + $0xb8] sm:$0xff]  ;;  %p10267_p13 = pneg %p10266_p12 }
  0x28   : > { %v758_v37 = vpack.c.bf16 %v513_v36, %v512_v35  ;;  %v759_v40 = vpack.c.bf16 %v515_v39, %v514_v38  ;;  %v516_v41 = vld [vmem:[%s10464_s21 + $0xc0] sm:$0xff]  ;;  %v517_v42 = vld [vmem:[%s10464_s21 + $0xc8] sm:$0xff]  ;;  %v518_v44 = vld [vmem:[%s10464_s21 + $0xd0] sm:$0xff]  ;;  %13817 = vst [vmem:[#allocation9_spill] sm:$0xff] %v10570_v18 }
  0x29   : > { %v760_v43 = vpack.c.bf16 %v517_v42, %v516_v41  ;;  %v519_v45 = vld [vmem:[%s10464_s21 + $0xd8] sm:$0xff]  ;;  %v520_v47 = vld [vmem:[%s10464_s21 + $0xe0] sm:$0xff]  ;;  %v521_v48 = vld [vmem:[%s10464_s21 + $0xe8] sm:$0xff] }
  0x2a   : > { %v761_v46 = vpack.c.bf16 %v519_v45, %v518_v44  ;;  %v762_v49 = vpack.c.bf16 %v521_v48, %v520_v47  ;;  %v522_v50 = vld [vmem:[%s10464_s21 + $0xf0] sm:$0xff]  ;;  %v523_v51 = vld [vmem:[%s10464_s21 + $0xf8] sm:$0xff]  ;;  %v524_v53 = vld [vmem:[%s10464_s21 + $0x100] sm:$0xff] }
  0x2b   : > { %v763_v52 = vpack.c.bf16 %v523_v51, %v522_v50  ;;  %v525_v54 = vld [vmem:[%s10464_s21 + $0x108] sm:$0xff]  ;;  %v526_v56 = vld [vmem:[%s10464_s21 + $0x110] sm:$0xff]  ;;  %v527_v57 = vld [vmem:[%s10464_s21 + $0x118] sm:$0xff] }
  0x2c   : > { %v764_v55 = vpack.c.bf16 %v525_v54, %v524_v53  ;;  %v765_v58 = vpack.c.bf16 %v527_v57, %v526_v56  ;;  %v528_v59 = vld [vmem:[%s10464_s21 + $0x120] sm:$0xff]  ;;  %v529_v60 = vld [vmem:[%s10464_s21 + $0x128] sm:$0xff]  ;;  %v530_v62 = vld [vmem:[%s10464_s21 + $0x130] sm:$0xff] }
  0x2d   : > { %8782 = vmatmul.mubr.msk.bf16.gmra.mxu0 %vm901_vm1, %v749_v10  ;;  %v766_v61 = vpack.c.bf16 %v529_v60, %v528_v59  ;;  %v531_v63 = vld [vmem:[%s10464_s21 + $0x138] sm:$0xff]  ;;  %v532_v1 = vld [vmem:[%s10464_s21 + $0x140] sm:$0xff]  ;;  %v533_v2 = vld [vmem:[%s10464_s21 + $0x148] sm:$0xff] }
  0x2e   : > { %1345 = vmatprep.mubr.bf16.mxu0 %v13763_v3  ;;  %v767_v0 = vpack.c.bf16 %v531_v63, %v530_v62  ;;  %v768_v4 = vpack.c.bf16 %v533_v2, %v532_v1  ;;  %v534_v5 = vld [vmem:[%s10464_s21 + $0x150] sm:$0xff]  ;;  %v535_v6 = vld [vmem:[%s10464_s21 + $0x158] sm:$0xff]  ;;  %v536_v8 = vld [vmem:[%s10464_s21 + $0x160] sm:$0xff] }
  0x2f   : > { %v769_v7 = vpack.c.bf16 %v535_v6, %v534_v5  ;;  %v537_v9 = vld [vmem:[%s10464_s21 + $0x168] sm:$0xff]  ;;  %v538_v12 = vld [vmem:[%s10464_s21 + $0x170] sm:$0xff]  ;;  %v489_v17 = vld [vmem:[%s13748_s10] sm:$0xff] }
  0x30   : > { %v770_v10 = vpack.c.bf16 %v537_v9, %v536_v8  ;;  %v540_v20 = vld [vmem:[%s10464_s21 + $0x180] sm:$0xff]  ;;  %v541_v21 = vld [vmem:[%s10464_s21 + $0x188] sm:$0xff]  ;;  %v543_v29 = vld [vmem:[%s10464_s21 + $0x198] sm:$0xff] }
  0x31   : > { %v772_v23 = vpack.c.bf16 %v541_v21, %v540_v20  ;;  %v544_v45 = vld [vmem:[%s10464_s21 + $0x1a0] sm:$0xff]  ;;  %v546_v2 = vld [vmem:[%s10464_s21 + $0x1b0] sm:$0xff] }
  0x35   : > { %8783 = vmatmul.mubr.msk.bf16.gmra.mxu0 %vm901_vm1, %v750_v13  ;;  %v539_v13 = vld [vmem:[%s10464_s21 + $0x178] sm:$0xff] }
  0x36   : > { %1355 = vmatprep.mubr.bf16.mxu0 %v13763_v3  ;;  %v771_v15 = vpack.c.bf16 %v539_v13, %v538_v12 }
  0x3d   : > { %8784 = vmatmul.mubr.msk.bf16.gmra.mxu0 %vm901_vm1, %v751_v16  ;;  %v10564_v16 = vsub.s32 0, %v10561_v14 }
  0x3e   : > { %1365 = vmatprep.mubr.bf16.mxu0 %v13763_v3 }
  0x3f   : > { %13816 = vst [vmem:[#allocation8_spill] sm:$0xff] %v10564_v16 }
  0x45   : > { %8785 = vmatmul.mubr.msk.bf16.gmra.mxu0 %vm901_vm1, %v752_v19  ;;  %v881_v19 = vrot.slane %v489_v17, %v10564_v16 }
  0x46   : > { %1375 = vmatprep.mubr.bf16.mxu0 %v13763_v3 }
  0x47   : > { %v10579_v24 = vrot.slane %v881_v19, %v10564_v16 }
  0x4d   : > { %8786 = vmatmul.mubr.msk.bf16.gmra.mxu0 %vm901_vm1, %v753_v22  ;;  %v885_v22 = vrot.slane %v489_v17, %v10570_v18 }
  0x4e   : > { %1385 = vmatprep.mubr.bf16.mxu0 %v13763_v3 }
  0x55   : > { %8787 = vmatmul.mubr.msk.bf16.gmra.mxu0 %vm901_vm1, %v754_v25  ;;  %v10582_v25 = vrot.slane %v885_v22, %v10564_v16 }
  0x56   : > { %1395 = vmatprep.mubr.bf16.mxu0 %v13763_v3 }
  0x5d   : > { %8788 = vmatmul.mubr.msk.bf16.gmra.mxu0 %vm901_vm1, %v755_v28  ;;  %v542_v28 = vld [vmem:[%s10464_s21 + $0x190] sm:$0xff] }
  0x5e   : > { %1405 = vmatprep.mubr.bf16.mxu0 %v13763_v3  ;;  %v773_v33 = vpack.c.bf16 %v543_v29, %v542_v28 }
  0x65   : > { %8789 = vmatmul.mubr.msk.bf16.gmra.mxu0 %vm901_vm1, %v756_v31 }
  0x66   : > { %1415 = vmatprep.mubr.bf16.mxu0 %v13763_v3 }
  0x6d   : > { %8790 = vmatmul.mubr.msk.bf16.gmra.mxu0 %vm901_vm1, %v757_v34 }
  0x6e   : > { %1425 = vmatprep.mubr.bf16.mxu0 %v13763_v3 }
  0x75   : > { %8791 = vmatmul.mubr.msk.bf16.gmra.mxu0 %vm901_vm1, %v758_v37 }
  0x76   : > { %1435 = vmatprep.mubr.bf16.mxu0 %v13763_v3 }
  0x7d   : > { %8792 = vmatmul.mubr.msk.bf16.gmra.mxu0 %vm901_vm1, %v759_v40 }
  0x7e   : > { %1445 = vmatprep.mubr.bf16.mxu0 %v13763_v3 }
  0x85   : > { %8793 = vmatmul.mubr.msk.bf16.gmra.mxu0 %vm901_vm1, %v760_v43 }
  0x86   : > { %1455 = vmatprep.mubr.bf16.mxu0 %v13763_v3 }
  0x8d   : > { %8794 = vmatmul.mubr.msk.bf16.gmra.mxu0 %vm901_vm1, %v761_v46  ;;  %v545_v46 = vld [vmem:[%s10464_s21 + $0x1a8] sm:$0xff] }
  0x8e   : > { %1465 = vmatprep.mubr.bf16.mxu0 %v13763_v3  ;;  %v774_v53 = vpack.c.bf16 %v545_v46, %v544_v45 }
  0x95   : > { %8795 = vmatmul.mubr.msk.bf16.gmra.mxu0 %vm901_vm1, %v762_v49 }
  0x96   : > { %1475 = vmatprep.mubr.bf16.mxu0 %v13763_v3 }
  0x9d   : > { %8796 = vmatmul.mubr.msk.bf16.gmra.mxu0 %vm901_vm1, %v763_v52 }
  0x9e   : > { %1485 = vmatprep.mubr.bf16.mxu0 %v13763_v3 }
  0xa5   : > { %8797 = vmatmul.mubr.msk.bf16.gmra.mxu0 %vm901_vm1, %v764_v55 }
  0xa6   : > { %1495 = vmatprep.mubr.bf16.mxu0 %v13763_v3 }
  0xad   : > { %8798 = vmatmul.mubr.msk.bf16.gmra.mxu0 %vm901_vm1, %v765_v58 }
  0xae   : > { %1505 = vmatprep.mubr.bf16.mxu0 %v13763_v3 }
  0xb5   : > { %8799 = vmatmul.mubr.msk.bf16.gmra.mxu0 %vm901_vm1, %v766_v61 }
  0xb6   : > { %1515 = vmatprep.mubr.bf16.mxu0 %v13763_v3 }
  0xbd   : > { %8800 = vmatmul.mubr.msk.bf16.gmra.mxu0 %vm901_vm1, %v767_v0 }
  0xbe   : > { %1525 = vmatprep.mubr.bf16.mxu0 %v13763_v3 }
  0xc5   : > { %8801 = vmatmul.mubr.msk.bf16.gmra.mxu0 %vm901_vm1, %v768_v4  ;;  %v547_v4 = vld [vmem:[%s10464_s21 + $0x1b8] sm:$0xff] }
  0xc6   : > { %1535 = vmatprep.mubr.bf16.mxu0 %v13763_v3  ;;  %v775_v12 = vpack.c.bf16 %v547_v4, %v546_v2 }
  0xcd   : > { %8802 = vmatmul.mubr.msk.bf16.gmra.mxu0 %vm901_vm1, %v769_v7 }
  0xce   : > { %1545 = vmatprep.mubr.bf16.mxu0 %v13763_v3 }
  0xd5   : > { %8803 = vmatmul.mubr.msk.bf16.gmra.mxu0 %vm901_vm1, %v770_v10 }
  0xd6   : > { %1555 = vmatprep.mubr.bf16.mxu0 %v13763_v3 }
  0xdd   : > { %8804 = vmatmul.mubr.msk.bf16.gmra.mxu0 %vm901_vm1, %v771_v15 }
  0xde   : > { %1565 = vmatprep.mubr.bf16.mxu0 %v13763_v3 }
  0xe5   : > { %v1327_v26 = vpop.f32.mrf.mxu0  ;;  %8805 = vmatmul.mubr.msk.bf16.gmra.mxu0 %vm901_vm1, %v772_v23 }
  0xe6   : > { %v1328_v27 = vadd.f32 %v1327_v26, %v10579_v24  ;;  %1575 = vmatprep.mubr.bf16.mxu0 %v13763_v3 }
  0xe7   : > { %v1329_v30 = vpop.f32.mrf.mxu0 }
  0xe8   : > { %v1330_v31 = vadd.f32 %v1329_v30, %v10582_v25  ;;  %v2606_v34 = vmax.f32 %v1328_v27, 0.0  ;;  %v548_v30 = vld [vmem:[%s10464_s21 + $0x1c0] sm:$0xff] }
  0xe9   : > { %v1331_v32 = vpop.f32.mrf.mxu0 }
  0xea   : > { %v2607_v35 = vmax.f32 %v1330_v31, 0.0  ;;  %v1332_v36 = vadd.f32 %v1331_v32, %v10579_v24  ;;  %v549_v31 = vld [vmem:[%s10464_s21 + $0x1c8] sm:$0xff] }
  0xeb   : > { %v1333_v37 = vpop.f32.mrf.mxu0 }
  0xec   : > { %v9443_v38 = vpack.c.bf16 %v2607_v35, %v2606_v34  ;;  %v2608_v39 = vmax.f32 %v1332_v36, 0.0  ;;  %v1334_v40 = vadd.f32 %v1333_v37, %v10582_v25 }
  0xed   : > { %v1337_v41 = vpop.f32.mrf.mxu0  ;;  %8806 = vmatmul.mubr.msk.bf16.gmra.mxu0 %vm901_vm1, %v773_v33 }
  0xee   : > { %4654 = vst [vmem:[%s10596_s18] sm:$0xff] %v9443_v38  ;;  %v4910_v42 = vadd.f32 %v2608_v39, %v2606_v34  ;;  %v2609_v43 = vmax.f32 %v1334_v40, 0.0  ;;  %v1338_v44 = vadd.f32 %v1337_v41, %v10579_v24  ;;  %1585 = vmatprep.mubr.bf16.mxu0 %v13763_v3  ;;  %v776_v38 = vpack.c.bf16 %v549_v31, %v548_v30 }
  0xef   : > { %v1339_v47 = vpop.f32.mrf.mxu0 }
  0xf0   : > { %v9444_v48 = vpack.c.bf16 %v2609_v43, %v2608_v39  ;;  %v4947_v49 = vadd.f32 %v2609_v43, %v2607_v35  ;;  %v2610_v50 = vmax.f32 %v1338_v44, 0.0  ;;  %v1340_v51 = vadd.f32 %v1339_v47, %v10582_v25 }
  0xf1   : > { %v1341_v52 = vpop.f32.mrf.mxu0 }
  0xf2   : > { %4655 = vst [vmem:[%s10596_s18 + $0x8] sm:$0xff] %v9444_v48  ;;  %v4911_v54 = vadd.f32 %v4910_v42, %v2610_v50  ;;  %v2611_v55 = vmax.f32 %v1340_v51, 0.0  ;;  %v1342_v56 = vadd.f32 %v1341_v52, %v10579_v24  ;;  %v550_v51 = vld [vmem:[%s10464_s21 + $0x1d0] sm:$0xff]  ;;  %v551_v52 = vld [vmem:[%s10464_s21 + $0x1d8] sm:$0xff] }
  0xf3   : > { %v1343_v57 = vpop.f32.mrf.mxu0 }
  0xf4   : > { %v9445_v58 = vpack.c.bf16 %v2611_v55, %v2610_v50  ;;  %v4948_v59 = vadd.f32 %v4947_v49, %v2611_v55  ;;  %v2612_v60 = vmax.f32 %v1342_v56, 0.0  ;;  %v1344_v61 = vadd.f32 %v1343_v57, %v10582_v25 }
  0xf5   : > { %v1347_v62 = vpop.f32.mrf.mxu0  ;;  %8807 = vmatmul.mubr.msk.bf16.gmra.mxu0 %vm901_vm1, %v774_v53 }
  0xf6   : > { %4656 = vst [vmem:[%s10596_s18 + $0x10] sm:$0xff] %v9445_v58  ;;  %v4912_v63 = vadd.f32 %v4911_v54, %v2612_v60  ;;  %v2613_v0 = vmax.f32 %v1344_v61, 0.0  ;;  %v1348_v1 = vadd.f32 %v1347_v62, %v10579_v24  ;;  %1595 = vmatprep.mubr.bf16.mxu0 %v13763_v3 }
  0xf7   : > { %v1349_v5 = vpop.f32.mrf.mxu0 }
  0xf8   : > { %v9446_v6 = vpack.c.bf16 %v2613_v0, %v2612_v60  ;;  %v4949_v7 = vadd.f32 %v4948_v59, %v2613_v0  ;;  %v2614_v8 = vmax.f32 %v1348_v1, 0.0  ;;  %v1350_v9 = vadd.f32 %v1349_v5, %v10582_v25 }
  0xf9   : > { %v1351_v10 = vpop.f32.mrf.mxu0  ;;  %v777_v59 = vpack.c.bf16 %v551_v52, %v550_v51 }
  0xfa   : > { %4657 = vst [vmem:[%s10596_s18 + $0x18] sm:$0xff] %v9446_v6  ;;  %v4913_v13 = vadd.f32 %v4912_v63, %v2614_v8  ;;  %v2615_v15 = vmax.f32 %v1350_v9, 0.0  ;;  %v1352_v17 = vadd.f32 %v1351_v10, %v10579_v24  ;;  %v552_v9 = vld [vmem:[%s10464_s21 + $0x1e0] sm:$0xff]  ;;  %v553_v10 = vld [vmem:[%s10464_s21 + $0x1e8] sm:$0xff] }
  0xfb   : > { %v1353_v19 = vpop.f32.mrf.mxu0 }
  0xfc   : > { %v9447_v20 = vpack.c.bf16 %v2615_v15, %v2614_v8  ;;  %v4950_v21 = vadd.f32 %v4949_v7, %v2615_v15  ;;  %v2616_v22 = vmax.f32 %v1352_v17, 0.0  ;;  %v1354_v23 = vadd.f32 %v1353_v19, %v10582_v25 }
  0xfd   : > { %v1357_v26 = vpop.f32.mrf.mxu0  ;;  %8808 = vmatmul.mubr.msk.bf16.gmra.mxu0 %vm901_vm1, %v775_v12 }
  0xfe   : > { %4658 = vst [vmem:[%s10596_s18 + $0x20] sm:$0xff] %v9447_v20  ;;  %v4914_v27 = vadd.f32 %v4913_v13, %v2616_v22  ;;  %v2617_v28 = vmax.f32 %v1354_v23, 0.0  ;;  %v1358_v29 = vadd.f32 %v1357_v26, %v10579_v24  ;;  %1605 = vmatprep.mubr.bf16.mxu0 %v13763_v3 }
  0xff   : > { %v1359_v32 = vpop.f32.mrf.mxu0 }
 0x100   : > { %v9448_v33 = vpack.c.bf16 %v2617_v28, %v2616_v22  ;;  %v4951_v34 = vadd.f32 %v4950_v21, %v2617_v28  ;;  %v2618_v35 = vmax.f32 %v1358_v29, 0.0  ;;  %v1360_v36 = vadd.f32 %v1359_v32, %v10582_v25 }
 0x101   : > { %v1361_v37 = vpop.f32.mrf.mxu0  ;;  %v778_v21 = vpack.c.bf16 %v553_v10, %v552_v9 }
 0x102   : > { %4659 = vst [vmem:[%s10596_s18 + $0x28] sm:$0xff] %v9448_v33  ;;  %v4915_v39 = vadd.f32 %v4914_v27, %v2618_v35  ;;  %v2619_v40 = vmax.f32 %v1360_v36, 0.0  ;;  %v1362_v41 = vadd.f32 %v1361_v37, %v10579_v24  ;;  %v554_v36 = vld [vmem:[%s10464_s21 + $0x1f0] sm:$0xff]  ;;  %v555_v37 = vld [vmem:[%s10464_s21 + $0x1f8] sm:$0xff] }
 0x103   : > { %v1363_v42 = vpop.f32.mrf.mxu0 }
 0x104   : > { %v9449_v43 = vpack.c.bf16 %v2619_v40, %v2618_v35  ;;  %v4952_v44 = vadd.f32 %v4951_v34, %v2619_v40  ;;  %v2620_v45 = vmax.f32 %v1362_v41, 0.0  ;;  %v1364_v46 = vadd.f32 %v1363_v42, %v10582_v25 }
 0x105   : > { %v1367_v47 = vpop.f32.mrf.mxu0  ;;  %8809 = vmatmul.mubr.msk.bf16.gmra.mxu0 %vm901_vm1, %v776_v38 }
 0x106   : > { %4660 = vst [vmem:[%s10596_s18 + $0x30] sm:$0xff] %v9449_v43  ;;  %v4916_v48 = vadd.f32 %v4915_v39, %v2620_v45  ;;  %v2621_v49 = vmax.f32 %v1364_v46, 0.0  ;;  %v1368_v50 = vadd.f32 %v1367_v47, %v10579_v24  ;;  %1615 = vmatprep.mubr.bf16.mxu0 %v13763_v3 }
 0x107   : > { %v1369_v53 = vpop.f32.mrf.mxu0 }
 0x108   : > { %v9450_v54 = vpack.c.bf16 %v2621_v49, %v2620_v45  ;;  %v4953_v55 = vadd.f32 %v4952_v44, %v2621_v49  ;;  %v2622_v56 = vmax.f32 %v1368_v50, 0.0  ;;  %v1370_v57 = vadd.f32 %v1369_v53, %v10582_v25 }
 0x109   : > { %v1371_v58 = vpop.f32.mrf.mxu0  ;;  %v779_v44 = vpack.c.bf16 %v555_v37, %v554_v36 }
 0x10a   : > { %4661 = vst [vmem:[%s10596_s18 + $0x38] sm:$0xff] %v9450_v54  ;;  %v4917_v60 = vadd.f32 %v4916_v48, %v2622_v56  ;;  %v2623_v61 = vmax.f32 %v1370_v57, 0.0  ;;  %v1372_v62 = vadd.f32 %v1371_v58, %v10579_v24  ;;  %v556_v57 = vld [vmem:[%s10464_s21 + $0x200] sm:$0xff]  ;;  %v557_v58 = vld [vmem:[%s10464_s21 + $0x208] sm:$0xff] }
 0x10b   : > { %v1373_v63 = vpop.f32.mrf.mxu0 }
 0x10c   : > { %v9451_v0 = vpack.c.bf16 %v2623_v61, %v2622_v56  ;;  %v4954_v1 = vadd.f32 %v4953_v55, %v2623_v61  ;;  %v2624_v2 = vmax.f32 %v1372_v62, 0.0  ;;  %v1374_v4 = vadd.f32 %v1373_v63, %v10582_v25 }
 0x10d   : > { %v1377_v5 = vpop.f32.mrf.mxu0  ;;  %8810 = vmatmul.mubr.msk.bf16.gmra.mxu0 %vm901_vm1, %v777_v59 }
 0x10e   : > { %4662 = vst [vmem:[%s10596_s18 + $0x40] sm:$0xff] %v9451_v0  ;;  %v4918_v6 = vadd.f32 %v4917_v60, %v2624_v2  ;;  %v2625_v7 = vmax.f32 %v1374_v4, 0.0  ;;  %v1378_v8 = vadd.f32 %v1377_v5, %v10579_v24  ;;  %1625 = vmatprep.mubr.bf16.mxu0 %v13763_v3 }
 0x10f   : > { %v1379_v12 = vpop.f32.mrf.mxu0 }
 0x110   : > { %v9452_v13 = vpack.c.bf16 %v2625_v7, %v2624_v2  ;;  %v4955_v15 = vadd.f32 %v4954_v1, %v2625_v7  ;;  %v2626_v17 = vmax.f32 %v1378_v8, 0.0  ;;  %v1380_v19 = vadd.f32 %v1379_v12, %v10582_v25 }
 0x111   : > { %v1381_v20 = vpop.f32.mrf.mxu0  ;;  %v780_v1 = vpack.c.bf16 %v557_v58, %v556_v57 }
 0x112   : > { %4663 = vst [vmem:[%s10596_s18 + $0x48] sm:$0xff] %v9452_v13  ;;  %v4919_v22 = vadd.f32 %v4918_v6, %v2626_v17  ;;  %v2627_v23 = vmax.f32 %v1380_v19, 0.0  ;;  %v1382_v26 = vadd.f32 %v1381_v20, %v10579_v24  ;;  %v558_v19 = vld [vmem:[%s10464_s21 + $0x210] sm:$0xff]  ;;  %v559_v20 = vld [vmem:[%s10464_s21 + $0x218] sm:$0xff] }
 0x113   : > { %v1383_v27 = vpop.f32.mrf.mxu0 }
 0x114   : > { %v9453_v28 = vpack.c.bf16 %v2627_v23, %v2626_v17  ;;  %v4956_v29 = vadd.f32 %v4955_v15, %v2627_v23  ;;  %v2628_v30 = vmax.f32 %v1382_v26, 0.0  ;;  %v1384_v31 = vadd.f32 %v1383_v27, %v10582_v25 }
 0x115   : > { %v1387_v32 = vpop.f32.mrf.mxu0  ;;  %8811 = vmatmul.mubr.msk.bf16.gmra.mxu0 %vm901_vm1, %v778_v21 }
 0x116   : > { %4664 = vst [vmem:[%s10596_s18 + $0x50] sm:$0xff] %v9453_v28  ;;  %v4920_v33 = vadd.f32 %v4919_v22, %v2628_v30  ;;  %v2629_v34 = vmax.f32 %v1384_v31, 0.0  ;;  %v1388_v35 = vadd.f32 %v1387_v32, %v10579_v24  ;;  %1635 = vmatprep.mubr.bf16.mxu0 %v13763_v3 }
 0x117   : > { %v1389_v38 = vpop.f32.mrf.mxu0 }
 0x118   : > { %v9454_v39 = vpack.c.bf16 %v2629_v34, %v2628_v30  ;;  %v4957_v40 = vadd.f32 %v4956_v29, %v2629_v34  ;;  %v2630_v41 = vmax.f32 %v1388_v35, 0.0  ;;  %v1390_v42 = vadd.f32 %v1389_v38, %v10582_v25 }
 0x119   : > { %v1391_v43 = vpop.f32.mrf.mxu0  ;;  %v781_v29 = vpack.c.bf16 %v559_v20, %v558_v19 }
 0x11a   : > { %4665 = vst [vmem:[%s10596_s18 + $0x58] sm:$0xff] %v9454_v39  ;;  %v4921_v45 = vadd.f32 %v4920_v33, %v2630_v41  ;;  %v2631_v46 = vmax.f32 %v1390_v42, 0.0  ;;  %v1392_v47 = vadd.f32 %v1391_v43, %v10579_v24  ;;  %v560_v42 = vld [vmem:[%s10464_s21 + $0x220] sm:$0xff]  ;;  %v561_v43 = vld [vmem:[%s10464_s21 + $0x228] sm:$0xff] }
 0x11b   : > { %v1393_v48 = vpop.f32.mrf.mxu0 }
 0x11c   : > { %v9455_v49 = vpack.c.bf16 %v2631_v46, %v2630_v41  ;;  %v4958_v50 = vadd.f32 %v4957_v40, %v2631_v46  ;;  %v2632_v51 = vmax.f32 %v1392_v47, 0.0  ;;  %v1394_v52 = vadd.f32 %v1393_v48, %v10582_v25 }
 0x11d   : > { %v1397_v53 = vpop.f32.mrf.mxu0  ;;  %8812 = vmatmul.mubr.msk.bf16.gmra.mxu0 %vm901_vm1, %v779_v44 }
 0x11e   : > { %4666 = vst [vmem:[%s10596_s18 + $0x60] sm:$0xff] %v9455_v49  ;;  %v4922_v54 = vadd.f32 %v4921_v45, %v2632_v51  ;;  %v2633_v55 = vmax.f32 %v1394_v52, 0.0  ;;  %v1398_v56 = vadd.f32 %v1397_v53, %v10579_v24  ;;  %1645 = vmatprep.mubr.bf16.mxu0 %v13763_v3 }
 0x11f   : > { %v1399_v59 = vpop.f32.mrf.mxu0 }
 0x120   : > { %v9456_v60 = vpack.c.bf16 %v2633_v55, %v2632_v51  ;;  %v4959_v61 = vadd.f32 %v4958_v50, %v2633_v55  ;;  %v2634_v62 = vmax.f32 %v1398_v56, 0.0  ;;  %v1400_v63 = vadd.f32 %v1399_v59, %v10582_v25 }
 0x121   : > { %v1401_v0 = vpop.f32.mrf.mxu0  ;;  %v782_v50 = vpack.c.bf16 %v561_v43, %v560_v42 }
 0x122   : > { %4667 = vst [vmem:[%s10596_s18 + $0x68] sm:$0xff] %v9456_v60  ;;  %v4923_v2 = vadd.f32 %v4922_v54, %v2634_v62  ;;  %v2635_v4 = vmax.f32 %v1400_v63, 0.0  ;;  %v1402_v5 = vadd.f32 %v1401_v0, %v10579_v24  ;;  %v562_v63 = vld [vmem:[%s10464_s21 + $0x230] sm:$0xff]  ;;  %v563_v0 = vld [vmem:[%s10464_s21 + $0x238] sm:$0xff] }
 0x123   : > { %v1403_v6 = vpop.f32.mrf.mxu0 }
 0x124   : > { %v9457_v7 = vpack.c.bf16 %v2635_v4, %v2634_v62  ;;  %v4960_v8 = vadd.f32 %v4959_v61, %v2635_v4  ;;  %v2636_v9 = vmax.f32 %v1402_v5, 0.0  ;;  %v1404_v10 = vadd.f32 %v1403_v6, %v10582_v25 }
 0x125   : > { %v1407_v12 = vpop.f32.mrf.mxu0  ;;  %8813 = vmatmul.mubr.msk.bf16.gmra.mxu0 %vm901_vm1, %v780_v1 }
 0x126   : > { %4668 = vst [vmem:[%s10596_s18 + $0x70] sm:$0xff] %v9457_v7  ;;  %v4924_v13 = vadd.f32 %v4923_v2, %v2636_v9  ;;  %v2637_v15 = vmax.f32 %v1404_v10, 0.0  ;;  %v1408_v17 = vadd.f32 %v1407_v12, %v10579_v24  ;;  %1655 = vmatprep.mubr.bf16.mxu0 %v13763_v3 }
 0x127   : > { %v1409_v21 = vpop.f32.mrf.mxu0 }
 0x128   : > { %v9458_v22 = vpack.c.bf16 %v2637_v15, %v2636_v9  ;;  %v4961_v23 = vadd.f32 %v4960_v8, %v2637_v15  ;;  %v2638_v26 = vmax.f32 %v1408_v17, 0.0  ;;  %v1410_v27 = vadd.f32 %v1409_v21, %v10582_v25 }
 0x129   : > { %v1411_v28 = vpop.f32.mrf.mxu0  ;;  %v783_v8 = vpack.c.bf16 %v563_v0, %v562_v63 }
 0x12a   : > { %4669 = vst [vmem:[%s10596_s18 + $0x78] sm:$0xff] %v9458_v22  ;;  %v4925_v30 = vadd.f32 %v4924_v13, %v2638_v26  ;;  %v2639_v31 = vmax.f32 %v1410_v27, 0.0  ;;  %v1412_v32 = vadd.f32 %v1411_v28, %v10579_v24  ;;  %v564_v27 = vld [vmem:[%s10464_s21 + $0x240] sm:$0xff]  ;;  %v565_v28 = vld [vmem:[%s10464_s21 + $0x248] sm:$0xff] }
 0x12b   : > { %v1413_v33 = vpop.f32.mrf.mxu0 }
 0x12c   : > { %v9459_v34 = vpack.c.bf16 %v2639_v31, %v2638_v26  ;;  %v4962_v35 = vadd.f32 %v4961_v23, %v2639_v31  ;;  %v2640_v36 = vmax.f32 %v1412_v32, 0.0  ;;  %v1414_v37 = vadd.f32 %v1413_v33, %v10582_v25 }
 0x12d   : > { %v1417_v38 = vpop.f32.mrf.mxu0  ;;  %8814 = vmatmul.mubr.msk.bf16.gmra.mxu0 %vm901_vm1, %v781_v29 }
 0x12e   : > { %4670 = vst [vmem:[%s10596_s18 + $0x80] sm:$0xff] %v9459_v34  ;;  %v4926_v39 = vadd.f32 %v4925_v30, %v2640_v36  ;;  %v2641_v40 = vmax.f32 %v1414_v37, 0.0  ;;  %v1418_v41 = vadd.f32 %v1417_v38, %v10579_v24  ;;  %1665 = vmatprep.mubr.bf16.mxu0 %v13763_v3 }
 0x12f   : > { %v1419_v44 = vpop.f32.mrf.mxu0 }
 0x130   : > { %v9460_v45 = vpack.c.bf16 %v2641_v40, %v2640_v36  ;;  %v4963_v46 = vadd.f32 %v4962_v35, %v2641_v40  ;;  %v2642_v47 = vmax.f32 %v1418_v41, 0.0  ;;  %v1420_v48 = vadd.f32 %v1419_v44, %v10582_v25 }
 0x131   : > { %v1421_v49 = vpop.f32.mrf.mxu0  ;;  %v784_v35 = vpack.c.bf16 %v565_v28, %v564_v27 }
 0x132   : > { %4671 = vst [vmem:[%s10596_s18 + $0x88] sm:$0xff] %v9460_v45  ;;  %v4927_v51 = vadd.f32 %v4926_v39, %v2642_v47  ;;  %v2643_v52 = vmax.f32 %v1420_v48, 0.0  ;;  %v1422_v53 = vadd.f32 %v1421_v49, %v10579_v24  ;;  %v680_v45 = vld [vmem:[%s10464_s21 + $0x5e0] sm:$0xff] }
 0x133   : > { %v1423_v54 = vpop.f32.mrf.mxu0 }
 0x134   : > { %v9461_v55 = vpack.c.bf16 %v2643_v52, %v2642_v47  ;;  %v4964_v56 = vadd.f32 %v4963_v46, %v2643_v52  ;;  %v2644_v57 = vmax.f32 %v1422_v53, 0.0  ;;  %v1424_v58 = vadd.f32 %v1423_v54, %v10582_v25  ;;  %v681_v46 = vld [vmem:[%s10464_s21 + $0x5e8] sm:$0xff] }
 0x135   : > { %v1427_v59 = vpop.f32.mrf.mxu0  ;;  %8815 = vmatmul.mubr.msk.bf16.gmra.mxu0 %vm901_vm1, %v782_v50  ;;  %v566_v50 = vld [vmem:[%s10464_s21 + $0x250] sm:$0xff]  ;;  %v842_v52 = vpack.c.bf16 %v681_v46, %v680_v45 }
 0x136   : > { %4672 = vst [vmem:[%s10596_s18 + $0x90] sm:$0xff] %v9461_v55  ;;  %v4928_v60 = vadd.f32 %v4927_v51, %v2644_v57  ;;  %v2645_v61 = vmax.f32 %v1424_v58, 0.0  ;;  %v1428_v62 = vadd.f32 %v1427_v59, %v10579_v24  ;;  %1675 = vmatprep.mubr.bf16.mxu0 %v13763_v3  ;;  %v567_v51 = vld [vmem:[%s10464_s21 + $0x258] sm:$0xff] }
 0x137   : > { %v1429_v1 = vpop.f32.mrf.mxu0  ;;  %8875 = vmatmul.mubr.msk.bf16.vlgmr.msra.gmra.mxu1 %vm901_vm1, %v842_v52  ;;  %v785_v59 = vpack.c.bf16 %v567_v51, %v566_v50 }
 0x138   : > { %v9462_v2 = vpack.c.bf16 %v2645_v61, %v2644_v57  ;;  %v4965_v4 = vadd.f32 %v4964_v56, %v2645_v61  ;;  %v2646_v5 = vmax.f32 %v1428_v62, 0.0  ;;  %v1430_v6 = vadd.f32 %v1429_v1, %v10582_v25  ;;  %2275 = vmatprep.mubr.bf16.mxu1 %v13763_v3 }
 0x139   : > { %v1431_v7 = vpop.f32.mrf.mxu0 }
 0x13a   : > { %4673 = vst [vmem:[%s10596_s18 + $0x98] sm:$0xff] %v9462_v2  ;;  %v4929_v9 = vadd.f32 %v4928_v60, %v2646_v5  ;;  %v2647_v10 = vmax.f32 %v1430_v6, 0.0  ;;  %v1432_v12 = vadd.f32 %v1431_v7, %v10579_v24  ;;  %v682_v6 = vld [vmem:[%s10464_s21 + $0x5f0] sm:$0xff]  ;;  %v683_v7 = vld [vmem:[%s10464_s21 + $0x5f8] sm:$0xff] }
 0x13b   : > { %v1433_v13 = vpop.f32.mrf.mxu0 }
 0x13c   : > { %v9463_v15 = vpack.c.bf16 %v2647_v10, %v2646_v5  ;;  %v4966_v17 = vadd.f32 %v4965_v4, %v2647_v10  ;;  %v2648_v19 = vmax.f32 %v1432_v12, 0.0  ;;  %v1434_v20 = vadd.f32 %v1433_v13, %v10582_v25  ;;  %v568_v12 = vld [vmem:[%s10464_s21 + $0x260] sm:$0xff]  ;;  %v569_v13 = vld [vmem:[%s10464_s21 + $0x268] sm:$0xff] }
 0x13d   : > { %v1437_v21 = vpop.f32.mrf.mxu0  ;;  %8816 = vmatmul.mubr.msk.bf16.gmra.mxu0 %vm901_vm1, %v783_v8 }
 0x13e   : > { %4674 = vst [vmem:[%s10596_s18 + $0xa0] sm:$0xff] %v9463_v15  ;;  %v4930_v22 = vadd.f32 %v4929_v9, %v2648_v19  ;;  %v2649_v23 = vmax.f32 %v1434_v20, 0.0  ;;  %v1438_v26 = vadd.f32 %v1437_v21, %v10579_v24  ;;  %1685 = vmatprep.mubr.bf16.mxu0 %v13763_v3  ;;  %v843_v15 = vpack.c.bf16 %v683_v7, %v682_v6 }
 0x13f   : > { %v1439_v29 = vpop.f32.mrf.mxu0 }
 0x140   : > { %v9464_v30 = vpack.c.bf16 %v2649_v23, %v2648_v19  ;;  %v4967_v31 = vadd.f32 %v4966_v17, %v2649_v23  ;;  %v2650_v32 = vmax.f32 %v1438_v26, 0.0  ;;  %v1440_v33 = vadd.f32 %v1439_v29, %v10582_v25  ;;  %8876 = vmatmul.mubr.msk.bf16.gmra.mxu1 %vm901_vm1, %v843_v15 }
 0x141   : > { %v1441_v34 = vpop.f32.mrf.mxu0  ;;  %v786_v26 = vpack.c.bf16 %v569_v13, %v568_v12  ;;  %2285 = vmatprep.mubr.bf16.mxu1 %v13763_v3 }
 0x142   : > { %4675 = vst [vmem:[%s10596_s18 + $0xa8] sm:$0xff] %v9464_v30  ;;  %v4931_v36 = vadd.f32 %v4930_v22, %v2650_v32  ;;  %v2651_v37 = vmax.f32 %v1440_v33, 0.0  ;;  %v1442_v38 = vadd.f32 %v1441_v34, %v10579_v24 }
 0x143   : > { %v1443_v39 = vpop.f32.mrf.mxu0 }
 0x144   : > { %v9465_v40 = vpack.c.bf16 %v2651_v37, %v2650_v32  ;;  %v4968_v41 = vadd.f32 %v4967_v31, %v2651_v37  ;;  %v2652_v42 = vmax.f32 %v1442_v38, 0.0  ;;  %v1444_v43 = vadd.f32 %v1443_v39, %v10582_v25  ;;  %v685_v37 = vld [vmem:[%s10464_s21 + $0x608] sm:$0xff] }
 0x145   : > { %v1447_v44 = vpop.f32.mrf.mxu0  ;;  %8817 = vmatmul.mubr.msk.bf16.gmra.mxu0 %vm901_vm1, %v784_v35 }
 0x146   : > { %4676 = vst [vmem:[%s10596_s18 + $0xb0] sm:$0xff] %v9465_v40  ;;  %v4932_v47 = vadd.f32 %v4931_v36, %v2652_v42  ;;  %v2653_v48 = vmax.f32 %v1444_v43, 0.0  ;;  %v1448_v49 = vadd.f32 %v1447_v44, %v10579_v24  ;;  %1695 = vmatprep.mubr.bf16.mxu0 %v13763_v3  ;;  %v684_v36 = vld [vmem:[%s10464_s21 + $0x600] sm:$0xff] }
 0x147   : > { %v1449_v53 = vpop.f32.mrf.mxu0  ;;  %v844_v43 = vpack.c.bf16 %v685_v37, %v684_v36 }
 0x148   : > { %v9466_v54 = vpack.c.bf16 %v2653_v48, %v2652_v42  ;;  %v4969_v55 = vadd.f32 %v4968_v41, %v2653_v48  ;;  %v2654_v56 = vmax.f32 %v1448_v49, 0.0  ;;  %v1450_v57 = vadd.f32 %v1449_v53, %v10582_v25  ;;  %v570_v41 = vld [vmem:[%s10464_s21 + $0x270] sm:$0xff]  ;;  %v571_v42 = vld [vmem:[%s10464_s21 + $0x278] sm:$0xff] }
 0x149   : > { %v1451_v58 = vpop.f32.mrf.mxu0  ;;  %8877 = vmatmul.mubr.msk.bf16.gmra.mxu1 %vm901_vm1, %v844_v43  ;;  %v787_v50 = vpack.c.bf16 %v571_v42, %v570_v41 }
 0x14a   : > { %4677 = vst [vmem:[%s10596_s18 + $0xb8] sm:$0xff] %v9466_v54  ;;  %v4933_v60 = vadd.f32 %v4932_v47, %v2654_v56  ;;  %v2655_v61 = vmax.f32 %v1450_v57, 0.0  ;;  %v1452_v62 = vadd.f32 %v1451_v58, %v10579_v24  ;;  %2295 = vmatprep.mubr.bf16.mxu1 %v13763_v3 }
 0x14b   : > { %v1453_v63 = vpop.f32.mrf.mxu0 }
 0x14c   : > { %v9467_v0 = vpack.c.bf16 %v2655_v61, %v2654_v56  ;;  %v4970_v1 = vadd.f32 %v4969_v55, %v2655_v61  ;;  %v2656_v2 = vmax.f32 %v1452_v62, 0.0  ;;  %v1454_v4 = vadd.f32 %v1453_v63, %v10582_v25  ;;  %v687_v61 = vld [vmem:[%s10464_s21 + $0x618] sm:$0xff] }
 0x14d   : > { %v1457_v5 = vpop.f32.mrf.mxu0  ;;  %8818 = vmatmul.mubr.msk.bf16.gmra.mxu0 %vm901_vm1, %v785_v59 }
 0x14e   : > { %4678 = vst [vmem:[%s10596_s18 + $0xc0] sm:$0xff] %v9467_v0  ;;  %v4934_v8 = vadd.f32 %v4933_v60, %v2656_v2  ;;  %v2657_v9 = vmax.f32 %v1454_v4, 0.0  ;;  %v1458_v10 = vadd.f32 %v1457_v5, %v10579_v24  ;;  %1705 = vmatprep.mubr.bf16.mxu0 %v13763_v3  ;;  %v686_v60 = vld [vmem:[%s10464_s21 + $0x610] sm:$0xff] }
 0x14f   : > { %v1459_v17 = vpop.f32.mrf.mxu0  ;;  %v845_v4 = vpack.c.bf16 %v687_v61, %v686_v60 }
 0x150   : > { %v9468_v19 = vpack.c.bf16 %v2657_v9, %v2656_v2  ;;  %v4971_v20 = vadd.f32 %v4970_v1, %v2657_v9  ;;  %v2658_v21 = vmax.f32 %v1458_v10, 0.0  ;;  %v1460_v22 = vadd.f32 %v1459_v17, %v10582_v25  ;;  %v572_v1 = vld [vmem:[%s10464_s21 + $0x280] sm:$0xff]  ;;  %v573_v2 = vld [vmem:[%s10464_s21 + $0x288] sm:$0xff] }
 0x151   : > { %v1461_v23 = vpop.f32.mrf.mxu0  ;;  %8878 = vmatmul.mubr.msk.bf16.gmra.mxu1 %vm901_vm1, %v845_v4  ;;  %v788_v12 = vpack.c.bf16 %v573_v2, %v572_v1 }
 0x152   : > { %4679 = vst [vmem:[%s10596_s18 + $0xc8] sm:$0xff] %v9468_v19  ;;  %v4935_v27 = vadd.f32 %v4934_v8, %v2658_v21  ;;  %v2659_v28 = vmax.f32 %v1460_v22, 0.0  ;;  %v1462_v29 = vadd.f32 %v1461_v23, %v10579_v24  ;;  %2305 = vmatprep.mubr.bf16.mxu1 %v13763_v3 }
 0x153   : > { %v1463_v30 = vpop.f32.mrf.mxu0 }
 0x154   : > { %v9469_v31 = vpack.c.bf16 %v2659_v28, %v2658_v21  ;;  %v4972_v32 = vadd.f32 %v4971_v20, %v2659_v28  ;;  %v2660_v33 = vmax.f32 %v1462_v29, 0.0  ;;  %v1464_v34 = vadd.f32 %v1463_v30, %v10582_v25  ;;  %v689_v28 = vld [vmem:[%s10464_s21 + $0x628] sm:$0xff] }
 0x155   : > { %v1467_v35 = vpop.f32.mrf.mxu0  ;;  %8819 = vmatmul.mubr.msk.bf16.gmra.mxu0 %vm901_vm1, %v786_v26 }
 0x156   : > { %4680 = vst [vmem:[%s10596_s18 + $0xd0] sm:$0xff] %v9469_v31  ;;  %v4936_v38 = vadd.f32 %v4935_v27, %v2660_v33  ;;  %v2661_v39 = vmax.f32 %v1464_v34, 0.0  ;;  %v1468_v40 = vadd.f32 %v1467_v35, %v10579_v24  ;;  %1715 = vmatprep.mubr.bf16.mxu0 %v13763_v3  ;;  %v688_v27 = vld [vmem:[%s10464_s21 + $0x620] sm:$0xff]  ;;  %v574_v31 = vld [vmem:[%s10464_s21 + $0x290] sm:$0xff] }
 0x157   : > { %v1469_v44 = vpop.f32.mrf.mxu0 }
 0x158   : > { %v9470_v45 = vpack.c.bf16 %v2661_v39, %v2660_v33  ;;  %v4973_v46 = vadd.f32 %v4972_v32, %v2661_v39  ;;  %v2662_v47 = vmax.f32 %v1468_v40, 0.0  ;;  %v1470_v48 = vadd.f32 %v1469_v44, %v10582_v25  ;;  %v575_v32 = vld [vmem:[%s10464_s21 + $0x298] sm:$0xff] }
 0x159   : > { %v1471_v49 = vpop.f32.mrf.mxu0  ;;  %v846_v33 = vpack.c.bf16 %v689_v28, %v688_v27  ;;  %v789_v40 = vpack.c.bf16 %v575_v32, %v574_v31 }
 0x15a   : > { %4681 = vst [vmem:[%s10596_s18 + $0xd8] sm:$0xff] %v9470_v45  ;;  %v4937_v51 = vadd.f32 %v4936_v38, %v2662_v47  ;;  %v2663_v52 = vmax.f32 %v1470_v48, 0.0  ;;  %v1472_v53 = vadd.f32 %v1471_v49, %v10579_v24  ;;  %v690_v49 = vld [vmem:[%s10464_s21 + $0x630] sm:$0xff] }
 0x15b   : > { %v1473_v54 = vpop.f32.mrf.mxu0  ;;  %8879 = vmatmul.mubr.msk.bf16.gmra.mxu1 %vm901_vm1, %v846_v33 }
 0x15c   : > { %v9471_v55 = vpack.c.bf16 %v2663_v52, %v2662_v47  ;;  %v4974_v56 = vadd.f32 %v4973_v46, %v2663_v52  ;;  %v2664_v57 = vmax.f32 %v1472_v53, 0.0  ;;  %v1474_v58 = vadd.f32 %v1473_v54, %v10582_v25  ;;  %2315 = vmatprep.mubr.bf16.mxu1 %v13763_v3  ;;  %v576_v53 = vld [vmem:[%s10464_s21 + $0x2a0] sm:$0xff]  ;;  %v577_v54 = vld [vmem:[%s10464_s21 + $0x2a8] sm:$0xff] }
 0x15d   : > { %v1477_v59 = vpop.f32.mrf.mxu0  ;;  %8820 = vmatmul.mubr.msk.bf16.gmra.mxu0 %vm901_vm1, %v787_v50  ;;  %v691_v50 = vld [vmem:[%s10464_s21 + $0x638] sm:$0xff] }
 0x15e   : > { %4682 = vst [vmem:[%s10596_s18 + $0xe0] sm:$0xff] %v9471_v55  ;;  %v4938_v62 = vadd.f32 %v4937_v51, %v2664_v57  ;;  %v2665_v63 = vmax.f32 %v1474_v58, 0.0  ;;  %v1478_v0 = vadd.f32 %v1477_v59, %v10579_v24  ;;  %1725 = vmatprep.mubr.bf16.mxu0 %v13763_v3 }
 0x15f   : > { %v1479_v5 = vpop.f32.mrf.mxu0 }
 0x160   : > { %v9472_v6 = vpack.c.bf16 %v2665_v63, %v2664_v57  ;;  %v4975_v7 = vadd.f32 %v4974_v56, %v2665_v63  ;;  %v2666_v8 = vmax.f32 %v1478_v0, 0.0  ;;  %v1480_v9 = vadd.f32 %v1479_v5, %v10582_v25 }
 0x161   : > { %v1481_v10 = vpop.f32.mrf.mxu0  ;;  %v847_v57 = vpack.c.bf16 %v691_v50, %v690_v49  ;;  %v790_v63 = vpack.c.bf16 %v577_v54, %v576_v53 }
 0x162   : > { %4683 = vst [vmem:[%s10596_s18 + $0xe8] sm:$0xff] %v9472_v6  ;;  %v4939_v13 = vadd.f32 %v4938_v62, %v2666_v8  ;;  %v2667_v15 = vmax.f32 %v1480_v9, 0.0  ;;  %v1482_v17 = vadd.f32 %v1481_v10, %v10579_v24  ;;  %v692_v10 = vld [vmem:[%s10464_s21 + $0x640] sm:$0xff] }
 0x163   : > { %v1483_v19 = vpop.f32.mrf.mxu0  ;;  %8880 = vmatmul.mubr.msk.bf16.gmra.mxu1 %vm901_vm1, %v847_v57 }
 0x164   : > { %v9473_v20 = vpack.c.bf16 %v2667_v15, %v2666_v8  ;;  %v4976_v21 = vadd.f32 %v4975_v7, %v2667_v15  ;;  %v2668_v22 = vmax.f32 %v1482_v17, 0.0  ;;  %v1484_v23 = vadd.f32 %v1483_v19, %v10582_v25  ;;  %2325 = vmatprep.mubr.bf16.mxu1 %v13763_v3  ;;  %v578_v17 = vld [vmem:[%s10464_s21 + $0x2b0] sm:$0xff]  ;;  %v579_v19 = vld [vmem:[%s10464_s21 + $0x2b8] sm:$0xff] }
 0x165   : > { %v1487_v26 = vpop.f32.mrf.mxu0  ;;  %8821 = vmatmul.mubr.msk.bf16.gmra.mxu0 %vm901_vm1, %v788_v12  ;;  %v693_v12 = vld [vmem:[%s10464_s21 + $0x648] sm:$0xff]  ;;  %v791_v31 = vpack.c.bf16 %v579_v19, %v578_v17 }
 0x166   : > { %4684 = vst [vmem:[%s10596_s18 + $0xf0] sm:$0xff] %v9473_v20  ;;  %v10767_v29 = vadd.f32 %v4939_v13, %v2668_v22  ;;  %v2669_v30 = vmax.f32 %v1484_v23, 0.0  ;;  %1735 = vmatprep.mubr.bf16.mxu0 %v13763_v3  ;;  %v1488_v34 = vadd.f32 %v1487_v26, %v10579_v24 }
 0x167   : > { %v1489_v35 = vpop.f32.mrf.mxu0 }
 0x168   : > { %v9474_v36 = vpack.c.bf16 %v2669_v30, %v2668_v22  ;;  %v10773_v37 = vadd.f32 %v4976_v21, %v2669_v30  ;;  %v1490_v38 = vadd.f32 %v1489_v35, %v10582_v25  ;;  %v2670_v42 = vmax.f32 %v1488_v34, 0.0 }
 0x169   : > { %v1491_v39 = vpop.f32.mrf.mxu0  ;;  %v848_v22 = vpack.c.bf16 %v693_v12, %v692_v10 }
 0x16a   : > { %4685 = vst [vmem:[%s10596_s18 + $0xf8] sm:$0xff] %v9474_v36  ;;  %v1492_v41 = vadd.f32 %v1491_v39, %v10579_v24  ;;  %v2671_v43 = vmax.f32 %v1490_v38, 0.0 }
 0x16b   : > { %v1493_v44 = vpop.f32.mrf.mxu0  ;;  %8881 = vmatmul.mubr.msk.bf16.gmra.mxu1 %vm901_vm1, %v848_v22 }
 0x16c   : > { %v2672_v45 = vmax.f32 %v1492_v41, 0.0  ;;  %v1494_v46 = vadd.f32 %v1493_v44, %v10582_v25  ;;  %v9475_v47 = vpack.c.bf16 %v2671_v43, %v2670_v42  ;;  %2335 = vmatprep.mubr.bf16.mxu1 %v13763_v3 }
 0x16d   : > { %v1497_v48 = vpop.f32.mrf.mxu0  ;;  %8822 = vmatmul.mubr.msk.bf16.gmra.mxu0 %vm901_vm1, %v789_v40 }
 0x16e   : > { %v4984_v51 = vadd.f32 %v2672_v45, %v2670_v42  ;;  %v2673_v52 = vmax.f32 %v1494_v46, 0.0  ;;  %1745 = vmatprep.mubr.bf16.mxu0 %v13763_v3  ;;  %4686 = vst [vmem:[%s10596_s18 + $0x100] sm:$0xff] %v9475_v47  ;;  %v1498_v55 = vadd.f32 %v1497_v48, %v10579_v24  ;;  %v694_v42 = vld [vmem:[%s10464_s21 + $0x650] sm:$0xff]  ;;  %v580_v47 = vld [vmem:[%s10464_s21 + $0x2c0] sm:$0xff]  ;;  %v581_v48 = vld [vmem:[%s10464_s21 + $0x2c8] sm:$0xff] }
 0x16f   : > { %v1499_v56 = vpop.f32.mrf.mxu0 }
 0x170   : > { %v9476_v58 = vpack.c.bf16 %v2673_v52, %v2672_v45  ;;  %v5021_v59 = vadd.f32 %v2673_v52, %v2671_v43  ;;  %v2674_v60 = vmax.f32 %v1498_v55, 0.0  ;;  %v1500_v61 = vadd.f32 %v1499_v56, %v10582_v25  ;;  %v695_v43 = vld [vmem:[%s10464_s21 + $0x658] sm:$0xff] }
 0x171   : > { %v1501_v62 = vpop.f32.mrf.mxu0  ;;  %v849_v49 = vpack.c.bf16 %v695_v43, %v694_v42  ;;  %v792_v56 = vpack.c.bf16 %v581_v48, %v580_v47 }
 0x172   : > { %4687 = vst [vmem:[%s10596_s18 + $0x108] sm:$0xff] %v9476_v58  ;;  %v1502_v0 = vadd.f32 %v1501_v62, %v10579_v24  ;;  %v4985_v1 = vadd.f32 %v4984_v51, %v2674_v60  ;;  %v2675_v2 = vmax.f32 %v1500_v61, 0.0 }
 0x173   : > { %v1503_v4 = vpop.f32.mrf.mxu0  ;;  %8882 = vmatmul.mubr.msk.bf16.gmra.mxu1 %vm901_vm1, %v849_v49 }
 0x174   : > { %v2676_v5 = vmax.f32 %v1502_v0, 0.0  ;;  %v1504_v6 = vadd.f32 %v1503_v4, %v10582_v25  ;;  %v9477_v7 = vpack.c.bf16 %v2675_v2, %v2674_v60  ;;  %v5022_v8 = vadd.f32 %v5021_v59, %v2675_v2  ;;  %2345 = vmatprep.mubr.bf16.mxu1 %v13763_v3  ;;  %v696_v2 = vld [vmem:[%s10464_s21 + $0x660] sm:$0xff]  ;;  %v697_v4 = vld [vmem:[%s10464_s21 + $0x668] sm:$0xff] }
 0x175   : > { %v1507_v9 = vpop.f32.mrf.mxu0  ;;  %8823 = vmatmul.mubr.msk.bf16.gmra.mxu0 %vm901_vm1, %v790_v63  ;;  %v850_v10 = vpack.c.bf16 %v697_v4, %v696_v2 }
 0x176   : > { %v4986_v13 = vadd.f32 %v4985_v1, %v2676_v5  ;;  %v2677_v15 = vmax.f32 %v1504_v6, 0.0  ;;  %1755 = vmatprep.mubr.bf16.mxu0 %v13763_v3  ;;  %4688 = vst [vmem:[%s10596_s18 + $0x110] sm:$0xff] %v9477_v7  ;;  %v1508_v20 = vadd.f32 %v1507_v9, %v10579_v24  ;;  %v583_v9 = vld [vmem:[%s10464_s21 + $0x2d8] sm:$0xff] }
 0x177   : > { %v1509_v21 = vpop.f32.mrf.mxu0 }
 0x178   : > { %v9478_v23 = vpack.c.bf16 %v2677_v15, %v2676_v5  ;;  %v5023_v26 = vadd.f32 %v5022_v8, %v2677_v15  ;;  %v2678_v27 = vmax.f32 %v1508_v20, 0.0  ;;  %v1510_v28 = vadd.f32 %v1509_v21, %v10582_v25  ;;  %v582_v8 = vld [vmem:[%s10464_s21 + $0x2d0] sm:$0xff] }
 0x179   : > { %v1511_v30 = vpop.f32.mrf.mxu0  ;;  %v793_v21 = vpack.c.bf16 %v583_v9, %v582_v8 }
 0x17a   : > { %4689 = vst [vmem:[%s10596_s18 + $0x118] sm:$0xff] %v9478_v23  ;;  %v1512_v32 = vadd.f32 %v1511_v30, %v10579_v24  ;;  %v4987_v33 = vadd.f32 %v4986_v13, %v2678_v27  ;;  %v2679_v34 = vmax.f32 %v1510_v28, 0.0 }
 0x17b   : > { %v1513_v35 = vpop.f32.mrf.mxu0  ;;  %8883 = vmatmul.mubr.msk.bf16.gmra.mxu1 %vm901_vm1, %v850_v10 }
 0x17c   : > { %v2680_v36 = vmax.f32 %v1512_v32, 0.0  ;;  %v1514_v38 = vadd.f32 %v1513_v35, %v10582_v25  ;;  %v9479_v39 = vpack.c.bf16 %v2679_v34, %v2678_v27  ;;  %v5024_v40 = vadd.f32 %v5023_v26, %v2679_v34  ;;  %2355 = vmatprep.mubr.bf16.mxu1 %v13763_v3  ;;  %v698_v34 = vld [vmem:[%s10464_s21 + $0x670] sm:$0xff]  ;;  %v699_v35 = vld [vmem:[%s10464_s21 + $0x678] sm:$0xff] }
 0x17d   : > { %v1517_v41 = vpop.f32.mrf.mxu0  ;;  %8824 = vmatmul.mubr.msk.bf16.gmra.mxu0 %vm901_vm1, %v791_v31  ;;  %v851_v42 = vpack.c.bf16 %v699_v35, %v698_v34 }
 0x17e   : > { %v4988_v44 = vadd.f32 %v4987_v33, %v2680_v36  ;;  %v2681_v45 = vmax.f32 %v1514_v38, 0.0  ;;  %v1518_v46 = vadd.f32 %v1517_v41, %v10579_v24  ;;  %1765 = vmatprep.mubr.bf16.mxu0 %v13763_v3  ;;  %4690 = vst [vmem:[%s10596_s18 + $0x120] sm:$0xff] %v9479_v39  ;;  %v585_v41 = vld [vmem:[%s10464_s21 + $0x2e8] sm:$0xff] }
 0x17f   : > { %v1519_v50 = vpop.f32.mrf.mxu0 }
 0x180   : > { %v9480_v51 = vpack.c.bf16 %v2681_v45, %v2680_v36  ;;  %v5025_v52 = vadd.f32 %v5024_v40, %v2681_v45  ;;  %v2682_v53 = vmax.f32 %v1518_v46, 0.0  ;;  %v1520_v54 = vadd.f32 %v1519_v50, %v10582_v25  ;;  %v584_v40 = vld [vmem:[%s10464_s21 + $0x2e0] sm:$0xff] }
 0x181   : > { %v1521_v55 = vpop.f32.mrf.mxu0  ;;  %v794_v49 = vpack.c.bf16 %v585_v41, %v584_v40 }
 0x182   : > { %4691 = vst [vmem:[%s10596_s18 + $0x128] sm:$0xff] %v9480_v51  ;;  %v4989_v57 = vadd.f32 %v4988_v44, %v2682_v53  ;;  %v2683_v58 = vmax.f32 %v1520_v54, 0.0  ;;  %v1522_v59 = vadd.f32 %v1521_v55, %v10579_v24 }
 0x183   : > { %v1523_v60 = vpop.f32.mrf.mxu0  ;;  %8884 = vmatmul.mubr.msk.bf16.gmra.mxu1 %vm901_vm1, %v851_v42 }
 0x184   : > { %v9481_v61 = vpack.c.bf16 %v2683_v58, %v2682_v53  ;;  %v5026_v62 = vadd.f32 %v5025_v52, %v2683_v58  ;;  %v2684_v63 = vmax.f32 %v1522_v59, 0.0  ;;  %v1524_v0 = vadd.f32 %v1523_v60, %v10582_v25  ;;  %2365 = vmatprep.mubr.bf16.mxu1 %v13763_v3  ;;  %v700_v59 = vld [vmem:[%s10464_s21 + $0x680] sm:$0xff]  ;;  %v701_v60 = vld [vmem:[%s10464_s21 + $0x688] sm:$0xff] }
 0x185   : > { %v1527_v1 = vpop.f32.mrf.mxu0  ;;  %8825 = vmatmul.mubr.msk.bf16.gmra.mxu0 %vm901_vm1, %v792_v56  ;;  %v852_v2 = vpack.c.bf16 %v701_v60, %v700_v59 }
 0x186   : > { %4692 = vst [vmem:[%s10596_s18 + $0x130] sm:$0xff] %v9481_v61  ;;  %v4990_v5 = vadd.f32 %v4989_v57, %v2684_v63  ;;  %v2685_v6 = vmax.f32 %v1524_v0, 0.0  ;;  %v1528_v7 = vadd.f32 %v1527_v1, %v10579_v24  ;;  %1775 = vmatprep.mubr.bf16.mxu0 %v13763_v3  ;;  %v586_v0 = vld [vmem:[%s10464_s21 + $0x2f0] sm:$0xff]  ;;  %v587_v1 = vld [vmem:[%s10464_s21 + $0x2f8] sm:$0xff] }
 0x187   : > { %v1529_v12 = vpop.f32.mrf.mxu0  ;;  %v795_v10 = vpack.c.bf16 %v587_v1, %v586_v0 }
 0x188   : > { %v9482_v13 = vpack.c.bf16 %v2685_v6, %v2684_v63  ;;  %v5027_v15 = vadd.f32 %v5026_v62, %v2685_v6  ;;  %v2686_v17 = vmax.f32 %v1528_v7, 0.0  ;;  %v1530_v19 = vadd.f32 %v1529_v12, %v10582_v25 }
 0x189   : > { %v1531_v20 = vpop.f32.mrf.mxu0 }
 0x18a   : > { %4693 = vst [vmem:[%s10596_s18 + $0x138] sm:$0xff] %v9482_v13  ;;  %v4991_v22 = vadd.f32 %v4990_v5, %v2686_v17  ;;  %v2687_v23 = vmax.f32 %v1530_v19, 0.0  ;;  %v1532_v26 = vadd.f32 %v1531_v20, %v10579_v24 }
 0x18b   : > { %v1533_v27 = vpop.f32.mrf.mxu0  ;;  %8885 = vmatmul.mubr.msk.bf16.gmra.mxu1 %vm901_vm1, %v852_v2 }
 0x18c   : > { %v9483_v28 = vpack.c.bf16 %v2687_v23, %v2686_v17  ;;  %v5028_v30 = vadd.f32 %v5027_v15, %v2687_v23  ;;  %v2688_v31 = vmax.f32 %v1532_v26, 0.0  ;;  %v1534_v32 = vadd.f32 %v1533_v27, %v10582_v25  ;;  %2375 = vmatprep.mubr.bf16.mxu1 %v13763_v3  ;;  %v702_v26 = vld [vmem:[%s10464_s21 + $0x690] sm:$0xff]  ;;  %v703_v27 = vld [vmem:[%s10464_s21 + $0x698] sm:$0xff] }
 0x18d   : > { %v1537_v33 = vpop.f32.mrf.mxu0  ;;  %8826 = vmatmul.mubr.msk.bf16.gmra.mxu0 %vm901_vm1, %v793_v21  ;;  %v853_v34 = vpack.c.bf16 %v703_v27, %v702_v26 }
 0x18e   : > { %4694 = vst [vmem:[%s10596_s18 + $0x140] sm:$0xff] %v9483_v28  ;;  %v4992_v36 = vadd.f32 %v4991_v22, %v2688_v31  ;;  %v2689_v38 = vmax.f32 %v1534_v32, 0.0  ;;  %v1538_v39 = vadd.f32 %v1537_v33, %v10579_v24  ;;  %1785 = vmatprep.mubr.bf16.mxu0 %v13763_v3  ;;  %v588_v32 = vld [vmem:[%s10464_s21 + $0x300] sm:$0xff]  ;;  %v589_v33 = vld [vmem:[%s10464_s21 + $0x308] sm:$0xff] }
 0x18f   : > { %v1539_v43 = vpop.f32.mrf.mxu0  ;;  %v796_v42 = vpack.c.bf16 %v589_v33, %v588_v32 }
 0x190   : > { %v9484_v44 = vpack.c.bf16 %v2689_v38, %v2688_v31  ;;  %v5029_v45 = vadd.f32 %v5028_v30, %v2689_v38  ;;  %v2690_v46 = vmax.f32 %v1538_v39, 0.0  ;;  %v1540_v47 = vadd.f32 %v1539_v43, %v10582_v25 }
 0x191   : > { %v1541_v48 = vpop.f32.mrf.mxu0 }
 0x192   : > { %4695 = vst [vmem:[%s10596_s18 + $0x148] sm:$0xff] %v9484_v44  ;;  %v4993_v50 = vadd.f32 %v4992_v36, %v2690_v46  ;;  %v2691_v51 = vmax.f32 %v1540_v47, 0.0  ;;  %v1542_v52 = vadd.f32 %v1541_v48, %v10579_v24 }
 0x193   : > { %v1543_v53 = vpop.f32.mrf.mxu0  ;;  %8886 = vmatmul.mubr.msk.bf16.gmra.mxu1 %vm901_vm1, %v853_v34 }
 0x194   : > { %v9485_v54 = vpack.c.bf16 %v2691_v51, %v2690_v46  ;;  %v5030_v55 = vadd.f32 %v5029_v45, %v2691_v51  ;;  %v2692_v56 = vmax.f32 %v1542_v52, 0.0  ;;  %v1544_v57 = vadd.f32 %v1543_v53, %v10582_v25  ;;  %2385 = vmatprep.mubr.bf16.mxu1 %v13763_v3  ;;  %v704_v52 = vld [vmem:[%s10464_s21 + $0x6a0] sm:$0xff]  ;;  %v705_v53 = vld [vmem:[%s10464_s21 + $0x6a8] sm:$0xff] }
 0x195   : > { %v1547_v58 = vpop.f32.mrf.mxu0  ;;  %8827 = vmatmul.mubr.msk.bf16.gmra.mxu0 %vm901_vm1, %v794_v49  ;;  %v854_v59 = vpack.c.bf16 %v705_v53, %v704_v52 }
 0x196   : > { %4696 = vst [vmem:[%s10596_s18 + $0x150] sm:$0xff] %v9485_v54  ;;  %v4994_v61 = vadd.f32 %v4993_v50, %v2692_v56  ;;  %v2693_v62 = vmax.f32 %v1544_v57, 0.0  ;;  %v1548_v63 = vadd.f32 %v1547_v58, %v10579_v24  ;;  %1795 = vmatprep.mubr.bf16.mxu0 %v13763_v3  ;;  %v590_v57 = vld [vmem:[%s10464_s21 + $0x310] sm:$0xff]  ;;  %v591_v58 = vld [vmem:[%s10464_s21 + $0x318] sm:$0xff] }
 0x197   : > { %v1549_v4 = vpop.f32.mrf.mxu0  ;;  %v797_v2 = vpack.c.bf16 %v591_v58, %v590_v57 }
 0x198   : > { %v9486_v5 = vpack.c.bf16 %v2693_v62, %v2692_v56  ;;  %v5031_v6 = vadd.f32 %v5030_v55, %v2693_v62  ;;  %v2694_v7 = vmax.f32 %v1548_v63, 0.0  ;;  %v1550_v8 = vadd.f32 %v1549_v4, %v10582_v25 }
 0x199   : > { %v1551_v9 = vpop.f32.mrf.mxu0 }
 0x19a   : > { %4697 = vst [vmem:[%s10596_s18 + $0x158] sm:$0xff] %v9486_v5  ;;  %v4995_v12 = vadd.f32 %v4994_v61, %v2694_v7  ;;  %v2695_v13 = vmax.f32 %v1550_v8, 0.0  ;;  %v1552_v15 = vadd.f32 %v1551_v9, %v10579_v24 }
 0x19b   : > { %v1553_v17 = vpop.f32.mrf.mxu0  ;;  %8887 = vmatmul.mubr.msk.bf16.gmra.mxu1 %vm901_vm1, %v854_v59 }
 0x19c   : > { %v9487_v19 = vpack.c.bf16 %v2695_v13, %v2694_v7  ;;  %v5032_v20 = vadd.f32 %v5031_v6, %v2695_v13  ;;  %v2696_v21 = vmax.f32 %v1552_v15, 0.0  ;;  %v1554_v22 = vadd.f32 %v1553_v17, %v10582_v25  ;;  %2395 = vmatprep.mubr.bf16.mxu1 %v13763_v3  ;;  %v706_v15 = vld [vmem:[%s10464_s21 + $0x6b0] sm:$0xff]  ;;  %v707_v17 = vld [vmem:[%s10464_s21 + $0x6b8] sm:$0xff] }
 0x19d   : > { %v1557_v23 = vpop.f32.mrf.mxu0  ;;  %8828 = vmatmul.mubr.msk.bf16.gmra.mxu0 %vm901_vm1, %v795_v10  ;;  %v855_v26 = vpack.c.bf16 %v707_v17, %v706_v15 }
 0x19e   : > { %4698 = vst [vmem:[%s10596_s18 + $0x160] sm:$0xff] %v9487_v19  ;;  %v4996_v28 = vadd.f32 %v4995_v12, %v2696_v21  ;;  %v2697_v30 = vmax.f32 %v1554_v22, 0.0  ;;  %v1558_v31 = vadd.f32 %v1557_v23, %v10579_v24  ;;  %1805 = vmatprep.mubr.bf16.mxu0 %v13763_v3  ;;  %v592_v22 = vld [vmem:[%s10464_s21 + $0x320] sm:$0xff]  ;;  %v593_v23 = vld [vmem:[%s10464_s21 + $0x328] sm:$0xff] }
 0x19f   : > { %v1559_v35 = vpop.f32.mrf.mxu0  ;;  %v798_v34 = vpack.c.bf16 %v593_v23, %v592_v22 }
 0x1a0   : > { %v9488_v36 = vpack.c.bf16 %v2697_v30, %v2696_v21  ;;  %v5033_v38 = vadd.f32 %v5032_v20, %v2697_v30  ;;  %v2698_v39 = vmax.f32 %v1558_v31, 0.0  ;;  %v1560_v40 = vadd.f32 %v1559_v35, %v10582_v25 }
 0x1a1   : > { %v1561_v41 = vpop.f32.mrf.mxu0 }
 0x1a2   : > { %4699 = vst [vmem:[%s10596_s18 + $0x168] sm:$0xff] %v9488_v36  ;;  %v4997_v43 = vadd.f32 %v4996_v28, %v2698_v39  ;;  %v2699_v44 = vmax.f32 %v1560_v40, 0.0  ;;  %v1562_v45 = vadd.f32 %v1561_v41, %v10579_v24 }
 0x1a3   : > { %v1563_v46 = vpop.f32.mrf.mxu0  ;;  %8888 = vmatmul.mubr.msk.bf16.gmra.mxu1 %vm901_vm1, %v855_v26 }
 0x1a4   : > { %v9489_v47 = vpack.c.bf16 %v2699_v44, %v2698_v39  ;;  %v5034_v48 = vadd.f32 %v5033_v38, %v2699_v44  ;;  %v2700_v49 = vmax.f32 %v1562_v45, 0.0  ;;  %v1564_v50 = vadd.f32 %v1563_v46, %v10582_v25  ;;  %2405 = vmatprep.mubr.bf16.mxu1 %v13763_v3  ;;  %v708_v45 = vld [vmem:[%s10464_s21 + $0x6c0] sm:$0xff]  ;;  %v709_v46 = vld [vmem:[%s10464_s21 + $0x6c8] sm:$0xff] }
 0x1a5   : > { %v1567_v51 = vpop.f32.mrf.mxu0  ;;  %8829 = vmatmul.mubr.msk.bf16.gmra.mxu0 %vm901_vm1, %v796_v42  ;;  %v856_v52 = vpack.c.bf16 %v709_v46, %v708_v45 }
 0x1a6   : > { %4700 = vst [vmem:[%s10596_s18 + $0x170] sm:$0xff] %v9489_v47  ;;  %v4998_v54 = vadd.f32 %v4997_v43, %v2700_v49  ;;  %v2701_v55 = vmax.f32 %v1564_v50, 0.0  ;;  %v1568_v56 = vadd.f32 %v1567_v51, %v10579_v24  ;;  %1815 = vmatprep.mubr.bf16.mxu0 %v13763_v3  ;;  %v594_v50 = vld [vmem:[%s10464_s21 + $0x330] sm:$0xff]  ;;  %v595_v51 = vld [vmem:[%s10464_s21 + $0x338] sm:$0xff] }
 0x1a7   : > { %v1569_v60 = vpop.f32.mrf.mxu0  ;;  %v799_v59 = vpack.c.bf16 %v595_v51, %v594_v50 }
 0x1a8   : > { %v9490_v61 = vpack.c.bf16 %v2701_v55, %v2700_v49  ;;  %v5035_v62 = vadd.f32 %v5034_v48, %v2701_v55  ;;  %v2702_v63 = vmax.f32 %v1568_v56, 0.0  ;;  %v1570_v0 = vadd.f32 %v1569_v60, %v10582_v25 }
 0x1a9   : > { %v1571_v1 = vpop.f32.mrf.mxu0 }
 0x1aa   : > { %4701 = vst [vmem:[%s10596_s18 + $0x178] sm:$0xff] %v9490_v61  ;;  %v4999_v4 = vadd.f32 %v4998_v54, %v2702_v63  ;;  %v2703_v5 = vmax.f32 %v1570_v0, 0.0  ;;  %v1572_v6 = vadd.f32 %v1571_v1, %v10579_v24 }
 0x1ab   : > { %v1573_v7 = vpop.f32.mrf.mxu0  ;;  %8889 = vmatmul.mubr.msk.bf16.gmra.mxu1 %vm901_vm1, %v856_v52 }
 0x1ac   : > { %v9491_v8 = vpack.c.bf16 %v2703_v5, %v2702_v63  ;;  %v5036_v9 = vadd.f32 %v5035_v62, %v2703_v5  ;;  %v2704_v10 = vmax.f32 %v1572_v6, 0.0  ;;  %v1574_v12 = vadd.f32 %v1573_v7, %v10582_v25  ;;  %2415 = vmatprep.mubr.bf16.mxu1 %v13763_v3  ;;  %v710_v6 = vld [vmem:[%s10464_s21 + $0x6d0] sm:$0xff]  ;;  %v711_v7 = vld [vmem:[%s10464_s21 + $0x6d8] sm:$0xff] }
 0x1ad   : > { %v1577_v13 = vpop.f32.mrf.mxu0  ;;  %8830 = vmatmul.mubr.msk.bf16.gmra.mxu0 %vm901_vm1, %v797_v2  ;;  %v857_v15 = vpack.c.bf16 %v711_v7, %v710_v6 }
 0x1ae   : > { %4702 = vst [vmem:[%s10596_s18 + $0x180] sm:$0xff] %v9491_v8  ;;  %v5000_v19 = vadd.f32 %v4999_v4, %v2704_v10  ;;  %v2705_v20 = vmax.f32 %v1574_v12, 0.0  ;;  %v1578_v21 = vadd.f32 %v1577_v13, %v10579_v24  ;;  %1825 = vmatprep.mubr.bf16.mxu0 %v13763_v3  ;;  %v596_v12 = vld [vmem:[%s10464_s21 + $0x340] sm:$0xff]  ;;  %v597_v13 = vld [vmem:[%s10464_s21 + $0x348] sm:$0xff] }
 0x1af   : > { %v1579_v27 = vpop.f32.mrf.mxu0  ;;  %v800_v26 = vpack.c.bf16 %v597_v13, %v596_v12 }
 0x1b0   : > { %v9492_v28 = vpack.c.bf16 %v2705_v20, %v2704_v10  ;;  %v5037_v30 = vadd.f32 %v5036_v9, %v2705_v20  ;;  %v2706_v31 = vmax.f32 %v1578_v21, 0.0  ;;  %v1580_v32 = vadd.f32 %v1579_v27, %v10582_v25 }
 0x1b1   : > { %v1581_v33 = vpop.f32.mrf.mxu0 }
 0x1b2   : > { %4703 = vst [vmem:[%s10596_s18 + $0x188] sm:$0xff] %v9492_v28  ;;  %v5001_v35 = vadd.f32 %v5000_v19, %v2706_v31  ;;  %v2707_v36 = vmax.f32 %v1580_v32, 0.0  ;;  %v1582_v38 = vadd.f32 %v1581_v33, %v10579_v24 }
 0x1b3   : > { %v1583_v39 = vpop.f32.mrf.mxu0  ;;  %8890 = vmatmul.mubr.msk.bf16.gmra.mxu1 %vm901_vm1, %v857_v15 }
 0x1b4   : > { %v9493_v40 = vpack.c.bf16 %v2707_v36, %v2706_v31  ;;  %v5038_v41 = vadd.f32 %v5037_v30, %v2707_v36  ;;  %v2708_v42 = vmax.f32 %v1582_v38, 0.0  ;;  %v1584_v43 = vadd.f32 %v1583_v39, %v10582_v25  ;;  %2425 = vmatprep.mubr.bf16.mxu1 %v13763_v3  ;;  %v712_v38 = vld [vmem:[%s10464_s21 + $0x6e0] sm:$0xff]  ;;  %v713_v39 = vld [vmem:[%s10464_s21 + $0x6e8] sm:$0xff] }
 0x1b5   : > { %v1587_v44 = vpop.f32.mrf.mxu0  ;;  %8831 = vmatmul.mubr.msk.bf16.gmra.mxu0 %vm901_vm1, %v798_v34  ;;  %v858_v45 = vpack.c.bf16 %v713_v39, %v712_v38 }
 0x1b6   : > { %4704 = vst [vmem:[%s10596_s18 + $0x190] sm:$0xff] %v9493_v40  ;;  %v5002_v47 = vadd.f32 %v5001_v35, %v2708_v42  ;;  %v2709_v48 = vmax.f32 %v1584_v43, 0.0  ;;  %v1588_v49 = vadd.f32 %v1587_v44, %v10579_v24  ;;  %1835 = vmatprep.mubr.bf16.mxu0 %v13763_v3  ;;  %v598_v43 = vld [vmem:[%s10464_s21 + $0x350] sm:$0xff]  ;;  %v599_v44 = vld [vmem:[%s10464_s21 + $0x358] sm:$0xff] }
 0x1b7   : > { %v1589_v53 = vpop.f32.mrf.mxu0  ;;  %v801_v52 = vpack.c.bf16 %v599_v44, %v598_v43 }
 0x1b8   : > { %v9494_v54 = vpack.c.bf16 %v2709_v48, %v2708_v42  ;;  %v5039_v55 = vadd.f32 %v5038_v41, %v2709_v48  ;;  %v2710_v56 = vmax.f32 %v1588_v49, 0.0  ;;  %v1590_v57 = vadd.f32 %v1589_v53, %v10582_v25 }
 0x1b9   : > { %v1591_v58 = vpop.f32.mrf.mxu0 }
 0x1ba   : > { %4705 = vst [vmem:[%s10596_s18 + $0x198] sm:$0xff] %v9494_v54  ;;  %v5003_v60 = vadd.f32 %v5002_v47, %v2710_v56  ;;  %v2711_v61 = vmax.f32 %v1590_v57, 0.0  ;;  %v1592_v62 = vadd.f32 %v1591_v58, %v10579_v24 }
 0x1bb   : > { %v1593_v63 = vpop.f32.mrf.mxu0  ;;  %8891 = vmatmul.mubr.msk.bf16.gmra.mxu1 %vm901_vm1, %v858_v45 }
 0x1bc   : > { %v9495_v0 = vpack.c.bf16 %v2711_v61, %v2710_v56  ;;  %v5040_v1 = vadd.f32 %v5039_v55, %v2711_v61  ;;  %v2712_v2 = vmax.f32 %v1592_v62, 0.0  ;;  %v1594_v4 = vadd.f32 %v1593_v63, %v10582_v25  ;;  %2435 = vmatprep.mubr.bf16.mxu1 %v13763_v3  ;;  %v714_v62 = vld [vmem:[%s10464_s21 + $0x6f0] sm:$0xff]  ;;  %v715_v63 = vld [vmem:[%s10464_s21 + $0x6f8] sm:$0xff] }
 0x1bd   : > { %v1597_v5 = vpop.f32.mrf.mxu0  ;;  %8832 = vmatmul.mubr.msk.bf16.gmra.mxu0 %vm901_vm1, %v799_v59  ;;  %v859_v6 = vpack.c.bf16 %v715_v63, %v714_v62 }
 0x1be   : > { %4706 = vst [vmem:[%s10596_s18 + $0x1a0] sm:$0xff] %v9495_v0  ;;  %v5004_v8 = vadd.f32 %v5003_v60, %v2712_v2  ;;  %v2713_v9 = vmax.f32 %v1594_v4, 0.0  ;;  %v1598_v10 = vadd.f32 %v1597_v5, %v10579_v24  ;;  %1845 = vmatprep.mubr.bf16.mxu0 %v13763_v3  ;;  %v600_v4 = vld [vmem:[%s10464_s21 + $0x360] sm:$0xff]  ;;  %v601_v5 = vld [vmem:[%s10464_s21 + $0x368] sm:$0xff] }
 0x1bf   : > { %v1599_v17 = vpop.f32.mrf.mxu0  ;;  %v802_v15 = vpack.c.bf16 %v601_v5, %v600_v4 }
 0x1c0   : > { %v9496_v19 = vpack.c.bf16 %v2713_v9, %v2712_v2  ;;  %v5041_v20 = vadd.f32 %v5040_v1, %v2713_v9  ;;  %v2714_v21 = vmax.f32 %v1598_v10, 0.0  ;;  %v1600_v22 = vadd.f32 %v1599_v17, %v10582_v25 }
 0x1c1   : > { %v1601_v23 = vpop.f32.mrf.mxu0 }
 0x1c2   : > { %4707 = vst [vmem:[%s10596_s18 + $0x1a8] sm:$0xff] %v9496_v19  ;;  %v5005_v27 = vadd.f32 %v5004_v8, %v2714_v21  ;;  %v2715_v28 = vmax.f32 %v1600_v22, 0.0  ;;  %v1602_v30 = vadd.f32 %v1601_v23, %v10579_v24 }
 0x1c3   : > { %v1603_v31 = vpop.f32.mrf.mxu0  ;;  %8892 = vmatmul.mubr.msk.bf16.gmra.mxu1 %vm901_vm1, %v859_v6 }
 0x1c4   : > { %v9497_v32 = vpack.c.bf16 %v2715_v28, %v2714_v21  ;;  %v5042_v33 = vadd.f32 %v5041_v20, %v2715_v28  ;;  %v2716_v34 = vmax.f32 %v1602_v30, 0.0  ;;  %v1604_v35 = vadd.f32 %v1603_v31, %v10582_v25  ;;  %2445 = vmatprep.mubr.bf16.mxu1 %v13763_v3  ;;  %v716_v30 = vld [vmem:[%s10464_s21 + $0x700] sm:$0xff]  ;;  %v717_v31 = vld [vmem:[%s10464_s21 + $0x708] sm:$0xff] }
 0x1c5   : > { %v1607_v36 = vpop.f32.mrf.mxu0  ;;  %8833 = vmatmul.mubr.msk.bf16.gmra.mxu0 %vm901_vm1, %v800_v26  ;;  %v860_v38 = vpack.c.bf16 %v717_v31, %v716_v30 }
 0x1c6   : > { %4708 = vst [vmem:[%s10596_s18 + $0x1b0] sm:$0xff] %v9497_v32  ;;  %v5006_v40 = vadd.f32 %v5005_v27, %v2716_v34  ;;  %v2717_v41 = vmax.f32 %v1604_v35, 0.0  ;;  %v1608_v42 = vadd.f32 %v1607_v36, %v10579_v24  ;;  %1855 = vmatprep.mubr.bf16.mxu0 %v13763_v3  ;;  %v602_v35 = vld [vmem:[%s10464_s21 + $0x370] sm:$0xff]  ;;  %v603_v36 = vld [vmem:[%s10464_s21 + $0x378] sm:$0xff] }
 0x1c7   : > { %v1609_v46 = vpop.f32.mrf.mxu0  ;;  %v803_v45 = vpack.c.bf16 %v603_v36, %v602_v35 }
 0x1c8   : > { %v9498_v47 = vpack.c.bf16 %v2717_v41, %v2716_v34  ;;  %v5043_v48 = vadd.f32 %v5042_v33, %v2717_v41  ;;  %v2718_v49 = vmax.f32 %v1608_v42, 0.0  ;;  %v1610_v50 = vadd.f32 %v1609_v46, %v10582_v25 }
 0x1c9   : > { %v1611_v51 = vpop.f32.mrf.mxu0 }
 0x1ca   : > { %4709 = vst [vmem:[%s10596_s18 + $0x1b8] sm:$0xff] %v9498_v47  ;;  %v5007_v53 = vadd.f32 %v5006_v40, %v2718_v49  ;;  %v2719_v54 = vmax.f32 %v1610_v50, 0.0  ;;  %v1612_v55 = vadd.f32 %v1611_v51, %v10579_v24 }
 0x1cb   : > { %v1613_v56 = vpop.f32.mrf.mxu0  ;;  %8893 = vmatmul.mubr.msk.bf16.gmra.mxu1 %vm901_vm1, %v860_v38 }
 0x1cc   : > { %v9499_v57 = vpack.c.bf16 %v2719_v54, %v2718_v49  ;;  %v5044_v58 = vadd.f32 %v5043_v48, %v2719_v54  ;;  %v2720_v59 = vmax.f32 %v1612_v55, 0.0  ;;  %v1614_v60 = vadd.f32 %v1613_v56, %v10582_v25  ;;  %2455 = vmatprep.mubr.bf16.mxu1 %v13763_v3  ;;  %v718_v55 = vld [vmem:[%s10464_s21 + $0x710] sm:$0xff]  ;;  %v719_v56 = vld [vmem:[%s10464_s21 + $0x718] sm:$0xff] }
 0x1cd   : > { %v1617_v61 = vpop.f32.mrf.mxu0  ;;  %8834 = vmatmul.mubr.msk.bf16.gmra.mxu0 %vm901_vm1, %v801_v52  ;;  %v861_v62 = vpack.c.bf16 %v719_v56, %v718_v55 }
 0x1ce   : > { %4710 = vst [vmem:[%s10596_s18 + $0x1c0] sm:$0xff] %v9499_v57  ;;  %v5008_v0 = vadd.f32 %v5007_v53, %v2720_v59  ;;  %v2721_v1 = vmax.f32 %v1614_v60, 0.0  ;;  %v1618_v2 = vadd.f32 %v1617_v61, %v10579_v24  ;;  %1865 = vmatprep.mubr.bf16.mxu0 %v13763_v3  ;;  %v604_v60 = vld [vmem:[%s10464_s21 + $0x380] sm:$0xff]  ;;  %v605_v61 = vld [vmem:[%s10464_s21 + $0x388] sm:$0xff] }
 0x1cf   : > { %v1619_v7 = vpop.f32.mrf.mxu0  ;;  %v804_v6 = vpack.c.bf16 %v605_v61, %v604_v60 }
 0x1d0   : > { %v9500_v8 = vpack.c.bf16 %v2721_v1, %v2720_v59  ;;  %v5045_v9 = vadd.f32 %v5044_v58, %v2721_v1  ;;  %v2722_v10 = vmax.f32 %v1618_v2, 0.0  ;;  %v1620_v12 = vadd.f32 %v1619_v7, %v10582_v25 }
 0x1d1   : > { %v1621_v13 = vpop.f32.mrf.mxu0 }
 0x1d2   : > { %4711 = vst [vmem:[%s10596_s18 + $0x1c8] sm:$0xff] %v9500_v8  ;;  %v5009_v17 = vadd.f32 %v5008_v0, %v2722_v10  ;;  %v2723_v19 = vmax.f32 %v1620_v12, 0.0  ;;  %v1622_v20 = vadd.f32 %v1621_v13, %v10579_v24 }
 0x1d3   : > { %v1623_v21 = vpop.f32.mrf.mxu0  ;;  %8894 = vmatmul.mubr.msk.bf16.gmra.mxu1 %vm901_vm1, %v861_v62 }
 0x1d4   : > { %v9501_v22 = vpack.c.bf16 %v2723_v19, %v2722_v10  ;;  %v5046_v23 = vadd.f32 %v5045_v9, %v2723_v19  ;;  %v2724_v26 = vmax.f32 %v1622_v20, 0.0  ;;  %v1624_v27 = vadd.f32 %v1623_v21, %v10582_v25  ;;  %2465 = vmatprep.mubr.bf16.mxu1 %v13763_v3  ;;  %v720_v20 = vld [vmem:[%s10464_s21 + $0x720] sm:$0xff]  ;;  %v721_v21 = vld [vmem:[%s10464_s21 + $0x728] sm:$0xff] }
 0x1d5   : > { %v1627_v28 = vpop.f32.mrf.mxu0  ;;  %8835 = vmatmul.mubr.msk.bf16.gmra.mxu0 %vm901_vm1, %v802_v15 }
 0x1d6   : > { %4712 = vst [vmem:[%s10596_s18 + $0x1d0] sm:$0xff] %v9501_v22  ;;  %v5010_v32 = vadd.f32 %v5009_v17, %v2724_v26  ;;  %v2725_v33 = vmax.f32 %v1624_v27, 0.0  ;;  %v1628_v34 = vadd.f32 %v1627_v28, %v10579_v24  ;;  %1875 = vmatprep.mubr.bf16.mxu0 %v13763_v3  ;;  %v607_v27 = vld [vmem:[%s10464_s21 + $0x398] sm:$0xff]  ;;  %v862_v28 = vpack.c.bf16 %v721_v21, %v720_v20 }
 0x1d7   : > { %v1629_v39 = vpop.f32.mrf.mxu0 }
 0x1d8   : > { %v9502_v40 = vpack.c.bf16 %v2725_v33, %v2724_v26  ;;  %v5047_v41 = vadd.f32 %v5046_v23, %v2725_v33  ;;  %v2726_v42 = vmax.f32 %v1628_v34, 0.0  ;;  %v1630_v43 = vadd.f32 %v1629_v39, %v10582_v25  ;;  %v606_v26 = vld [vmem:[%s10464_s21 + $0x390] sm:$0xff] }
 0x1d9   : > { %v1631_v44 = vpop.f32.mrf.mxu0  ;;  %v805_v36 = vpack.c.bf16 %v607_v27, %v606_v26 }
 0x1da   : > { %4713 = vst [vmem:[%s10596_s18 + $0x1d8] sm:$0xff] %v9502_v40  ;;  %v5011_v46 = vadd.f32 %v5010_v32, %v2726_v42  ;;  %v2727_v47 = vmax.f32 %v1630_v43, 0.0  ;;  %v1632_v48 = vadd.f32 %v1631_v44, %v10579_v24 }
 0x1db   : > { %v1633_v49 = vpop.f32.mrf.mxu0  ;;  %8895 = vmatmul.mubr.msk.bf16.gmra.mxu1 %vm901_vm1, %v862_v28 }
 0x1dc   : > { %v9503_v50 = vpack.c.bf16 %v2727_v47, %v2726_v42  ;;  %v5048_v51 = vadd.f32 %v5047_v41, %v2727_v47  ;;  %v2728_v52 = vmax.f32 %v1632_v48, 0.0  ;;  %v1634_v53 = vadd.f32 %v1633_v49, %v10582_v25  ;;  %2475 = vmatprep.mubr.bf16.mxu1 %v13763_v3  ;;  %v723_v47 = vld [vmem:[%s10464_s21 + $0x738] sm:$0xff] }
 0x1dd   : > { %v1637_v54 = vpop.f32.mrf.mxu0  ;;  %8836 = vmatmul.mubr.msk.bf16.gmra.mxu0 %vm901_vm1, %v803_v45 }
 0x1de   : > { %4714 = vst [vmem:[%s10596_s18 + $0x1e0] sm:$0xff] %v9503_v50  ;;  %v5012_v57 = vadd.f32 %v5011_v46, %v2728_v52  ;;  %v2729_v58 = vmax.f32 %v1634_v53, 0.0  ;;  %v1638_v59 = vadd.f32 %v1637_v54, %v10579_v24  ;;  %1885 = vmatprep.mubr.bf16.mxu0 %v13763_v3  ;;  %v722_v46 = vld [vmem:[%s10464_s21 + $0x730] sm:$0xff]  ;;  %v608_v50 = vld [vmem:[%s10464_s21 + $0x3a0] sm:$0xff] }
 0x1df   : > { %v1639_v63 = vpop.f32.mrf.mxu0  ;;  %v863_v54 = vpack.c.bf16 %v723_v47, %v722_v46  ;;  %v612_v46 = vld [vmem:[%s10464_s21 + $0x3c0] sm:$0xff]  ;;  %v613_v47 = vld [vmem:[%s10464_s21 + $0x3c8] sm:$0xff] }
 0x1e0   : > { %v9504_v0 = vpack.c.bf16 %v2729_v58, %v2728_v52  ;;  %v5049_v1 = vadd.f32 %v5048_v51, %v2729_v58  ;;  %v2730_v2 = vmax.f32 %v1638_v59, 0.0  ;;  %v1640_v4 = vadd.f32 %v1639_v63, %v10582_v25  ;;  %v609_v51 = vld [vmem:[%s10464_s21 + $0x3a8] sm:$0xff] }
 0x1e1   : > { %v1641_v5 = vpop.f32.mrf.mxu0  ;;  %v806_v60 = vpack.c.bf16 %v609_v51, %v608_v50 }
 0x1e2   : > { %4715 = vst [vmem:[%s10596_s18 + $0x1e8] sm:$0xff] %v9504_v0  ;;  %v5013_v7 = vadd.f32 %v5012_v57, %v2730_v2  ;;  %v2731_v8 = vmax.f32 %v1640_v4, 0.0  ;;  %v1642_v9 = vadd.f32 %v1641_v5, %v10579_v24 }
 0x1e3   : > { %v1643_v10 = vpop.f32.mrf.mxu0  ;;  %8896 = vmatmul.mubr.msk.bf16.gmra.mxu1 %vm901_vm1, %v863_v54 }
 0x1e4   : > { %v9505_v12 = vpack.c.bf16 %v2731_v8, %v2730_v2  ;;  %v5050_v13 = vadd.f32 %v5049_v1, %v2731_v8  ;;  %v2732_v15 = vmax.f32 %v1642_v9, 0.0  ;;  %v1644_v17 = vadd.f32 %v1643_v10, %v10582_v25  ;;  %2485 = vmatprep.mubr.bf16.mxu1 %v13763_v3  ;;  %v725_v8 = vld [vmem:[%s10464_s21 + $0x748] sm:$0xff] }
 0x1e5   : > { %v1647_v19 = vpop.f32.mrf.mxu0  ;;  %8837 = vmatmul.mubr.msk.bf16.gmra.mxu0 %vm901_vm1, %v804_v6 }
 0x1e6   : > { %4716 = vst [vmem:[%s10596_s18 + $0x1f0] sm:$0xff] %v9505_v12  ;;  %v10995_v22 = vadd.f32 %v5013_v7, %v2732_v15  ;;  %v2733_v23 = vmax.f32 %v1644_v17, 0.0  ;;  %1895 = vmatprep.mubr.bf16.mxu0 %v13763_v3  ;;  %v1648_v30 = vadd.f32 %v1647_v19, %v10579_v24  ;;  %v724_v7 = vld [vmem:[%s10464_s21 + $0x740] sm:$0xff]  ;;  %v610_v12 = vld [vmem:[%s10464_s21 + $0x3b0] sm:$0xff] }
 0x1e7   : > { %v1649_v31 = vpop.f32.mrf.mxu0  ;;  %v864_v19 = vpack.c.bf16 %v725_v8, %v724_v7  ;;  %v614_v7 = vld [vmem:[%s10464_s21 + $0x3d0] sm:$0xff]  ;;  %v615_v8 = vld [vmem:[%s10464_s21 + $0x3d8] sm:$0xff] }
 0x1e8   : > { %v9506_v32 = vpack.c.bf16 %v2733_v23, %v2732_v15  ;;  %v11001_v33 = vadd.f32 %v5050_v13, %v2733_v23  ;;  %v1650_v34 = vadd.f32 %v1649_v31, %v10582_v25  ;;  %v2734_v39 = vmax.f32 %v1648_v30, 0.0  ;;  %v611_v13 = vld [vmem:[%s10464_s21 + $0x3b8] sm:$0xff] }
 0x1e9   : > { %v1651_v35 = vpop.f32.mrf.mxu0  ;;  %v807_v28 = vpack.c.bf16 %v611_v13, %v610_v12 }
 0x1ea   : > { %4717 = vst [vmem:[%s10596_s18 + $0x1f8] sm:$0xff] %v9506_v32  ;;  %v1652_v38 = vadd.f32 %v1651_v35, %v10579_v24  ;;  %v2735_v40 = vmax.f32 %v1650_v34, 0.0 }
 0x1eb   : > { %v1653_v41 = vpop.f32.mrf.mxu0  ;;  %8897 = vmatmul.mubr.msk.bf16.gmra.mxu1 %vm901_vm1, %v864_v19 }
 0x1ec   : > { %v2736_v42 = vmax.f32 %v1652_v38, 0.0  ;;  %v1654_v43 = vadd.f32 %v1653_v41, %v10582_v25  ;;  %v9507_v44 = vpack.c.bf16 %v2735_v40, %v2734_v39  ;;  %2495 = vmatprep.mubr.bf16.mxu1 %v13763_v3  ;;  %v726_v41 = vld [vmem:[%s10464_s21 + $0x750] sm:$0xff] }
 0x1ed   : > { %v1657_v45 = vpop.f32.mrf.mxu0  ;;  %8838 = vmatmul.mubr.msk.bf16.gmra.mxu0 %vm901_vm1, %v805_v36 }
 0x1ee   : > { %v5058_v48 = vadd.f32 %v2736_v42, %v2734_v39  ;;  %v2737_v49 = vmax.f32 %v1654_v43, 0.0  ;;  %1905 = vmatprep.mubr.bf16.mxu0 %v13763_v3  ;;  %4718 = vst [vmem:[%s10596_s18 + $0x200] sm:$0xff] %v9507_v44  ;;  %v1658_v52 = vadd.f32 %v1657_v45, %v10579_v24 }
 0x1ef   : > { %v1659_v53 = vpop.f32.mrf.mxu0 }
 0x1f0   : > { %v9508_v55 = vpack.c.bf16 %v2737_v49, %v2736_v42  ;;  %v5095_v56 = vadd.f32 %v2737_v49, %v2735_v40  ;;  %v2738_v57 = vmax.f32 %v1658_v52, 0.0  ;;  %v1660_v58 = vadd.f32 %v1659_v53, %v10582_v25  ;;  %v727_v42 = vld [vmem:[%s10464_s21 + $0x758] sm:$0xff] }
 0x1f1   : > { %v1661_v59 = vpop.f32.mrf.mxu0 }
 0x1f2   : > { %4719 = vst [vmem:[%s10596_s18 + $0x208] sm:$0xff] %v9508_v55  ;;  %v1662_v61 = vadd.f32 %v1661_v59, %v10579_v24  ;;  %v5059_v62 = vadd.f32 %v5058_v48, %v2738_v57  ;;  %v2739_v63 = vmax.f32 %v1660_v58, 0.0  ;;  %v865_v48 = vpack.c.bf16 %v727_v42, %v726_v41 }
 0x1f3   : > { %v1663_v0 = vpop.f32.mrf.mxu0  ;;  %v808_v55 = vpack.c.bf16 %v613_v47, %v612_v46 }
 0x1f4   : > { %v2740_v1 = vmax.f32 %v1662_v61, 0.0  ;;  %v1664_v2 = vadd.f32 %v1663_v0, %v10582_v25  ;;  %v9509_v4 = vpack.c.bf16 %v2739_v63, %v2738_v57  ;;  %v5096_v5 = vadd.f32 %v5095_v56, %v2739_v63  ;;  %8898 = vmatmul.mubr.msk.bf16.gmra.mxu1 %vm901_vm1, %v865_v48 }
 0x1f5   : > { %v1667_v6 = vpop.f32.mrf.mxu0  ;;  %8839 = vmatmul.mubr.msk.bf16.gmra.mxu0 %vm901_vm1, %v806_v60  ;;  %2505 = vmatprep.mubr.bf16.mxu1 %v13763_v3 }
 0x1f6   : > { %v5060_v9 = vadd.f32 %v5059_v62, %v2740_v1  ;;  %v2741_v10 = vmax.f32 %v1664_v2, 0.0  ;;  %1915 = vmatprep.mubr.bf16.mxu0 %v13763_v3  ;;  %4720 = vst [vmem:[%s10596_s18 + $0x210] sm:$0xff] %v9509_v4  ;;  %v1668_v15 = vadd.f32 %v1667_v6, %v10579_v24  ;;  %v729_v2 = vld [vmem:[%s10464_s21 + $0x768] sm:$0xff] }
 0x1f7   : > { %v1669_v17 = vpop.f32.mrf.mxu0  ;;  %v2267_v19 = vpop.f32.mrf.mxu1 }
 0x1f8   : > { %v9510_v20 = vpack.c.bf16 %v2741_v10, %v2740_v1  ;;  %v5097_v21 = vadd.f32 %v5096_v5, %v2741_v10  ;;  %v2742_v23 = vmax.f32 %v1668_v15, 0.0  ;;  %v1670_v26 = vadd.f32 %v1669_v17, %v10582_v25  ;;  %v728_v1 = vld [vmem:[%s10464_s21 + $0x760] sm:$0xff] }
 0x1f9   : > { %v1671_v27 = vpop.f32.mrf.mxu0  ;;  %v11074_v46 = vadd.f32 %v2267_v19, %v10579_v24 }
 0x1fa   : > { %4721 = vst [vmem:[%s10596_s18 + $0x218] sm:$0xff] %v9510_v20  ;;  %v1672_v30 = vadd.f32 %v1671_v27, %v10579_v24  ;;  %v5061_v31 = vadd.f32 %v5060_v9, %v2742_v23  ;;  %v2743_v32 = vmax.f32 %v1670_v26, 0.0  ;;  %v866_v9 = vpack.c.bf16 %v729_v2, %v728_v1 }
 0x1fb   : > { %v1673_v34 = vpop.f32.mrf.mxu0 }
 0x1fc   : > { %v2744_v35 = vmax.f32 %v1672_v30, 0.0  ;;  %v1674_v36 = vadd.f32 %v1673_v34, %v10582_v25  ;;  %v9511_v38 = vpack.c.bf16 %v2743_v32, %v2742_v23  ;;  %v5098_v39 = vadd.f32 %v5097_v21, %v2743_v32  ;;  %8899 = vmatmul.mubr.msk.bf16.gmra.mxu1 %vm901_vm1, %v866_v9 }
 0x1fd   : > { %v1677_v40 = vpop.f32.mrf.mxu0  ;;  %8840 = vmatmul.mubr.msk.bf16.gmra.mxu0 %vm901_vm1, %v807_v28  ;;  %v809_v21 = vpack.c.bf16 %v615_v8, %v614_v7  ;;  %v2269_v28 = vpop.f32.mrf.mxu1  ;;  %2515 = vmatprep.mubr.bf16.mxu1 %v13763_v3 }
 0x1fe   : > { %v5062_v43 = vadd.f32 %v5061_v31, %v2744_v35  ;;  %v2745_v44 = vmax.f32 %v1674_v36, 0.0  ;;  %v1678_v45 = vadd.f32 %v1677_v40, %v10579_v24  ;;  %1925 = vmatprep.mubr.bf16.mxu0 %v13763_v3  ;;  %4722 = vst [vmem:[%s10596_s18 + $0x220] sm:$0xff] %v9511_v38  ;;  %v731_v40 = vld [vmem:[%s10464_s21 + $0x778] sm:$0xff] }
 0x1ff   : > { %v1679_v49 = vpop.f32.mrf.mxu0  ;;  %v2271_v36 = vpop.f32.mrf.mxu1 }
 0x200   : > { %v9512_v50 = vpack.c.bf16 %v2745_v44, %v2744_v35  ;;  %v5099_v51 = vadd.f32 %v5098_v39, %v2745_v44  ;;  %v2746_v52 = vmax.f32 %v1678_v45, 0.0  ;;  %v1680_v53 = vadd.f32 %v1679_v49, %v10582_v25  ;;  %v730_v39 = vld [vmem:[%s10464_s21 + $0x770] sm:$0xff]  ;;  %v616_v44 = vld [vmem:[%s10464_s21 + $0x3e0] sm:$0xff]  ;;  %v617_v45 = vld [vmem:[%s10464_s21 + $0x3e8] sm:$0xff] }
 0x201   : > { %v1681_v54 = vpop.f32.mrf.mxu0  ;;  %v2273_v47 = vpop.f32.mrf.mxu1  ;;  %v11077_v49 = vadd.f32 %v2269_v28, %v10582_v25 }
 0x202   : > { %4723 = vst [vmem:[%s10596_s18 + $0x228] sm:$0xff] %v9512_v50  ;;  %v5063_v56 = vadd.f32 %v5062_v43, %v2746_v52  ;;  %v2747_v57 = vmax.f32 %v1680_v53, 0.0  ;;  %v1682_v58 = vadd.f32 %v1681_v54, %v10579_v24  ;;  %v867_v50 = vpack.c.bf16 %v731_v40, %v730_v39 }
 0x203   : > { %v1683_v59 = vpop.f32.mrf.mxu0 }
 0x204   : > { %v9513_v60 = vpack.c.bf16 %v2747_v57, %v2746_v52  ;;  %v5100_v61 = vadd.f32 %v5099_v51, %v2747_v57  ;;  %v2748_v62 = vmax.f32 %v1682_v58, 0.0  ;;  %v1684_v63 = vadd.f32 %v1683_v59, %v10582_v25  ;;  %8900 = vmatmul.mubr.msk.bf16.gmra.mxu1 %vm901_vm1, %v867_v50 }
 0x205   : > { %v1687_v0 = vpop.f32.mrf.mxu0  ;;  %8841 = vmatmul.mubr.msk.bf16.gmra.mxu0 %vm901_vm1, %v808_v55  ;;  %v2277_v55 = vpop.f32.mrf.mxu1  ;;  %v810_v57 = vpack.c.bf16 %v617_v45, %v616_v44  ;;  %v13761_v58 = vmax.f32 %v11074_v46, 0.0  ;;  %v13759_v59 = vmax.f32 %v11077_v49, 0.0  ;;  %2525 = vmatprep.mubr.bf16.mxu1 %v13763_v3 }
 0x206   : > { %4724 = vst [vmem:[%s10596_s18 + $0x230] sm:$0xff] %v9513_v60  ;;  %v5064_v4 = vadd.f32 %v5063_v56, %v2748_v62  ;;  %v2749_v5 = vmax.f32 %v1684_v63, 0.0  ;;  %v1688_v6 = vadd.f32 %v1687_v0, %v10579_v24  ;;  %1935 = vmatprep.mubr.bf16.mxu0 %v13763_v3  ;;  %v11086_v63 = vadd.f32 %v2271_v36, %v10579_v24 }
 0x207   : > { %v1689_v10 = vpop.f32.mrf.mxu0  ;;  %v2279_v0 = vpop.f32.mrf.mxu1  ;;  %v9631_v2 = vpack.c.bf16 %v13759_v59, %v13761_v58 }
 0x208   : > { %v9514_v12 = vpack.c.bf16 %v2749_v5, %v2748_v62  ;;  %v5101_v13 = vadd.f32 %v5100_v61, %v2749_v5  ;;  %v2750_v15 = vmax.f32 %v1688_v6, 0.0  ;;  %v1690_v17 = vadd.f32 %v1689_v10, %v10582_v25 }
 0x209   : > { %v1691_v20 = vpop.f32.mrf.mxu0  ;;  %v2281_v9 = vpop.f32.mrf.mxu1  ;;  %4842 = vst [vmem:[%s10596_s18 + $0x5e0] sm:$0xff] %v9631_v2  ;;  %v734_v2 = vld [vmem:[%s10464_s21 + $0x790] sm:$0xff] }
 0x20a   : > { %4725 = vst [vmem:[%s10596_s18 + $0x238] sm:$0xff] %v9514_v12  ;;  %v5065_v23 = vadd.f32 %v5064_v4, %v2750_v15  ;;  %v2751_v26 = vmax.f32 %v1690_v17, 0.0  ;;  %v1692_v27 = vadd.f32 %v1691_v20, %v10579_v24  ;;  %v11094_v4 = vadd.f32 %v2273_v47, %v10582_v25  ;;  %v733_v17 = vld [vmem:[%s10464_s21 + $0x788] sm:$0xff] }
 0x20b   : > { %v1693_v30 = vpop.f32.mrf.mxu0  ;;  %v13760_v12 = vmax.f32 %v11086_v63, 0.0  ;;  %v2283_v28 = vpop.f32.mrf.mxu1  ;;  %v11126_v50 = vadd.f32 %v2281_v9, %v10579_v24  ;;  %v620_v9 = vld [vmem:[%s10464_s21 + $0x400] sm:$0xff] }
 0x20c   : > { %v9515_v31 = vpack.c.bf16 %v2751_v26, %v2750_v15  ;;  %v5102_v32 = vadd.f32 %v5101_v13, %v2751_v26  ;;  %v2752_v34 = vmax.f32 %v1692_v27, 0.0  ;;  %v1694_v35 = vadd.f32 %v1693_v30, %v10582_v25  ;;  %v732_v15 = vld [vmem:[%s10464_s21 + $0x780] sm:$0xff]  ;;  %v619_v26 = vld [vmem:[%s10464_s21 + $0x3f8] sm:$0xff] }
 0x20d   : > { %v1697_v38 = vpop.f32.mrf.mxu0  ;;  %8842 = vmatmul.mubr.msk.bf16.gmra.mxu0 %vm901_vm1, %v809_v21  ;;  %v13757_v13 = vmax.f32 %v11094_v4, 0.0  ;;  %v11109_v27 = vadd.f32 %v2277_v55, %v10579_v24  ;;  %v2287_v40 = vpop.f32.mrf.mxu1  ;;  %13819 = vst [vmem:[#allocation11_spill] sm:$0xff] %v11126_v50 }
 0x20e   : > { %4726 = vst [vmem:[%s10596_s18 + $0x240] sm:$0xff] %v9515_v31  ;;  %v5066_v41 = vadd.f32 %v5065_v23, %v2752_v34  ;;  %v2753_v42 = vmax.f32 %v1694_v35, 0.0  ;;  %v1698_v43 = vadd.f32 %v1697_v38, %v10579_v24  ;;  %1945 = vmatprep.mubr.bf16.mxu0 %v13763_v3  ;;  %v618_v23 = vld [vmem:[%s10464_s21 + $0x3f0] sm:$0xff] }
 0x20f   : > { %v1699_v48 = vpop.f32.mrf.mxu0  ;;  %v9632_v31 = vpack.c.bf16 %v13757_v13, %v13760_v12 }
 0x210   : > { %v9516_v51 = vpack.c.bf16 %v2753_v42, %v2752_v34  ;;  %v5103_v52 = vadd.f32 %v5102_v32, %v2753_v42  ;;  %v2754_v53 = vmax.f32 %v1698_v43, 0.0  ;;  %v1700_v54 = vadd.f32 %v1699_v48, %v10582_v25 }
 0x211   : > { %v1701_v56 = vpop.f32.mrf.mxu0  ;;  %v11116_v32 = vadd.f32 %v2279_v0, %v10582_v25  ;;  %v868_v34 = vpack.c.bf16 %v733_v17, %v732_v15  ;;  %v811_v42 = vpack.c.bf16 %v619_v26, %v618_v23  ;;  %4843 = vst [vmem:[%s10596_s18 + $0x5e8] sm:$0xff] %v9632_v31  ;;  %v13758_v43 = vmax.f32 %v11109_v27, 0.0 }
 0x212   : > { %4727 = vst [vmem:[%s10596_s18 + $0x248] sm:$0xff] %v9516_v51  ;;  %v5067_v60 = vadd.f32 %v5066_v41, %v2754_v53  ;;  %v2755_v61 = vmax.f32 %v1700_v54, 0.0  ;;  %v1702_v62 = vadd.f32 %v1701_v56, %v10579_v24  ;;  %v2289_v51 = vpop.f32.mrf.mxu1  ;;  %v11134_v54 = vadd.f32 %v2283_v28, %v10582_v25 }
 0x213   : > { %v1703_v1 = vpop.f32.mrf.mxu0  ;;  %13818 = vst [vmem:[#allocation10_spill] sm:$0xff] %v11116_v32  ;;  %v13755_v44 = vmax.f32 %v11116_v32, 0.0  ;;  %8901 = vmatmul.mubr.msk.bf16.gmra.mxu1 %vm901_vm1, %v868_v34  ;;  %v13756_v0 = vmax.f32 %v11126_v50, 0.0  ;;  %v2288_v15 = vadd.f32 %v2287_v40, %v10579_v24 }
 0x214   : > { %v9517_v5 = vpack.c.bf16 %v2755_v61, %v2754_v53  ;;  %v5104_v6 = vadd.f32 %v5103_v52, %v2755_v61  ;;  %v2756_v7 = vmax.f32 %v1702_v62, 0.0  ;;  %v1704_v8 = vadd.f32 %v1703_v1, %v10582_v25  ;;  %2535 = vmatprep.mubr.bf16.mxu1 %v13763_v3  ;;  %13820 = vst [vmem:[#allocation12_spill] sm:$0xff] %v11134_v54  ;;  %v2291_v61 = vpop.f32.mrf.mxu1 }
 0x215   : > { %v1707_v10 = vpop.f32.mrf.mxu0  ;;  %8843 = vmatmul.mubr.msk.bf16.gmra.mxu0 %vm901_vm1, %v810_v57  ;;  %v9633_v53 = vpack.c.bf16 %v13755_v44, %v13758_v43  ;;  %v13754_v1 = vmax.f32 %v11134_v54, 0.0 }
 0x216   : > { %4728 = vst [vmem:[%s10596_s18 + $0x250] sm:$0xff] %v9517_v5  ;;  %v5068_v19 = vadd.f32 %v5067_v60, %v2756_v7  ;;  %v2757_v20 = vmax.f32 %v1704_v8, 0.0  ;;  %v1708_v21 = vadd.f32 %v1707_v10, %v10579_v24  ;;  %1955 = vmatprep.mubr.bf16.mxu0 %v13763_v3  ;;  %v735_v5 = vld [vmem:[%s10464_s21 + $0x798] sm:$0xff]  ;;  %v621_v10 = vld [vmem:[%s10464_s21 + $0x408] sm:$0xff]  ;;  %v2293_v17 = vpop.f32.mrf.mxu1 }
 0x217   : > { %v1709_v30 = vpop.f32.mrf.mxu0  ;;  %4844 = vst [vmem:[%s10596_s18 + $0x5f0] sm:$0xff] %v9633_v53  ;;  %v869_v23 = vpack.c.bf16 %v735_v5, %v734_v2 }
 0x218   : > { %v9518_v35 = vpack.c.bf16 %v2757_v20, %v2756_v7  ;;  %v5105_v36 = vadd.f32 %v5104_v6, %v2757_v20  ;;  %v2758_v38 = vmax.f32 %v1708_v21, 0.0  ;;  %v1710_v39 = vadd.f32 %v1709_v30, %v10582_v25  ;;  %v2297_v34 = vpop.f32.mrf.mxu1 }
 0x219   : > { %v1711_v41 = vpop.f32.mrf.mxu0  ;;  %v9634_v20 = vpack.c.bf16 %v13754_v1, %v13756_v0  ;;  %v2290_v21 = vadd.f32 %v2289_v51, %v10582_v25 }
 0x21a   : > { %4729 = vst [vmem:[%s10596_s18 + $0x258] sm:$0xff] %v9518_v35  ;;  %v5069_v45 = vadd.f32 %v5068_v19, %v2758_v38  ;;  %v2759_v47 = vmax.f32 %v1710_v39, 0.0  ;;  %v1712_v48 = vadd.f32 %v1711_v41, %v10579_v24 }
 0x21b   : > { %v1713_v52 = vpop.f32.mrf.mxu0  ;;  %4845 = vst [vmem:[%s10596_s18 + $0x5f8] sm:$0xff] %v9634_v20  ;;  %v2991_v39 = vmax.f32 %v2290_v21, 0.0  ;;  %8902 = vmatmul.mubr.msk.bf16.gmra.mxu1 %vm901_vm1, %v869_v23 }
 0x21c   : > { %v9519_v55 = vpack.c.bf16 %v2759_v47, %v2758_v38  ;;  %v5106_v56 = vadd.f32 %v5105_v36, %v2759_v47  ;;  %v2760_v57 = vmax.f32 %v1712_v48, 0.0  ;;  %v1714_v60 = vadd.f32 %v1713_v52, %v10582_v25  ;;  %v2299_v47 = vpop.f32.mrf.mxu1  ;;  %2545 = vmatprep.mubr.bf16.mxu1 %v13763_v3 }
 0x21d   : > { %v1717_v62 = vpop.f32.mrf.mxu0  ;;  %8844 = vmatmul.mubr.msk.bf16.gmra.mxu0 %vm901_vm1, %v811_v42  ;;  %v812_v36 = vpack.c.bf16 %v621_v10, %v620_v9  ;;  %v2990_v38 = vmax.f32 %v2288_v15, 0.0  ;;  %v2294_v52 = vadd.f32 %v2293_v17, %v10582_v25  ;;  %v623_v9 = vld [vmem:[%s10464_s21 + $0x418] sm:$0xff]  ;;  %v2298_v10 = vadd.f32 %v2297_v34, %v10579_v24  ;;  %v736_v17 = vld [vmem:[%s10464_s21 + $0x7a0] sm:$0xff] }
 0x21e   : > { %4730 = vst [vmem:[%s10596_s18 + $0x260] sm:$0xff] %v9519_v55  ;;  %v5070_v6 = vadd.f32 %v5069_v45, %v2760_v57  ;;  %v2761_v7 = vmax.f32 %v1714_v60, 0.0  ;;  %v1718_v8 = vadd.f32 %v1717_v62, %v10579_v24  ;;  %1965 = vmatprep.mubr.bf16.mxu0 %v13763_v3  ;;  %v2292_v45 = vadd.f32 %v2291_v61, %v10579_v24  ;;  %v2301_v60 = vpop.f32.mrf.mxu1  ;;  %v622_v61 = vld [vmem:[%s10464_s21 + $0x410] sm:$0xff] }
 0x21f   : > { %v1719_v19 = vpop.f32.mrf.mxu0  ;;  %v9635_v51 = vpack.c.bf16 %v2991_v39, %v2990_v38  ;;  %v2993_v5 = vmax.f32 %v2294_v52, 0.0  ;;  %v2994_v34 = vmax.f32 %v2298_v10, 0.0 }
 0x220   : > { %v9520_v26 = vpack.c.bf16 %v2761_v7, %v2760_v57  ;;  %v5107_v28 = vadd.f32 %v5106_v56, %v2761_v7  ;;  %v2762_v30 = vmax.f32 %v1718_v8, 0.0  ;;  %v1720_v31 = vadd.f32 %v1719_v19, %v10582_v25  ;;  %v2303_v15 = vpop.f32.mrf.mxu1  ;;  %v737_v19 = vld [vmem:[%s10464_s21 + $0x7a8] sm:$0xff] }
 0x221   : > { %v1721_v35 = vpop.f32.mrf.mxu0  ;;  %4846 = vst [vmem:[%s10596_s18 + $0x600] sm:$0xff] %v9635_v51  ;;  %v2992_v2 = vmax.f32 %v2292_v45, 0.0 }
 0x222   : > { %4731 = vst [vmem:[%s10596_s18 + $0x268] sm:$0xff] %v9520_v26  ;;  %v5071_v40 = vadd.f32 %v5070_v6, %v2762_v30  ;;  %v2763_v41 = vmax.f32 %v1720_v31, 0.0  ;;  %v1722_v42 = vadd.f32 %v1721_v35, %v10579_v24  ;;  %v5391_v26 = vadd.f32 %v2993_v5, %v2991_v39 }
 0x223   : > { %v1723_v48 = vpop.f32.mrf.mxu0  ;;  %v5354_v21 = vadd.f32 %v2992_v2, %v2990_v38  ;;  %v9636_v23 = vpack.c.bf16 %v2993_v5, %v2992_v2  ;;  %v2302_v39 = vadd.f32 %v2301_v60, %v10579_v24 }
 0x224   : > { %v9521_v53 = vpack.c.bf16 %v2763_v41, %v2762_v30  ;;  %v5108_v55 = vadd.f32 %v5107_v28, %v2763_v41  ;;  %v2764_v56 = vmax.f32 %v1722_v42, 0.0  ;;  %v1724_v57 = vadd.f32 %v1723_v48, %v10582_v25 }
 0x225   : > { %v1727_v62 = vpop.f32.mrf.mxu0  ;;  %8845 = vmatmul.mubr.msk.bf16.gmra.mxu0 %vm901_vm1, %v812_v36  ;;  %v2300_v28 = vadd.f32 %v2299_v47, %v10582_v25  ;;  %v813_v42 = vpack.c.bf16 %v623_v9, %v622_v61  ;;  %4847 = vst [vmem:[%s10596_s18 + $0x608] sm:$0xff] %v9636_v23  ;;  %v870_v48 = vpack.c.bf16 %v737_v19, %v736_v17  ;;  %v2996_v9 = vmax.f32 %v2302_v39, 0.0 }
 0x226   : > { %4732 = vst [vmem:[%s10596_s18 + $0x270] sm:$0xff] %v9521_v53  ;;  %v5072_v6 = vadd.f32 %v5071_v40, %v2764_v56  ;;  %v2765_v7 = vmax.f32 %v1724_v57, 0.0  ;;  %v1728_v8 = vadd.f32 %v1727_v62, %v10579_v24  ;;  %1975 = vmatprep.mubr.bf16.mxu0 %v13763_v3  ;;  %v2307_v40 = vpop.f32.mrf.mxu1  ;;  %v2304_v62 = vadd.f32 %v2303_v15, %v10582_v25 }
 0x227   : > { %v1729_v20 = vpop.f32.mrf.mxu0  ;;  %v2995_v45 = vmax.f32 %v2300_v28, 0.0  ;;  %8903 = vmatmul.mubr.msk.bf16.gmra.mxu1 %vm901_vm1, %v870_v48  ;;  %v739_v28 = vld [vmem:[%s10464_s21 + $0x7b8] sm:$0xff] }
 0x228   : > { %v9522_v30 = vpack.c.bf16 %v2765_v7, %v2764_v56  ;;  %v5109_v31 = vadd.f32 %v5108_v55, %v2765_v7  ;;  %v2766_v35 = vmax.f32 %v1728_v8, 0.0  ;;  %v1730_v36 = vadd.f32 %v1729_v20, %v10582_v25  ;;  %v2309_v47 = vpop.f32.mrf.mxu1  ;;  %2555 = vmatprep.mubr.bf16.mxu1 %v13763_v3  ;;  %v624_v8 = vld [vmem:[%s10464_s21 + $0x420] sm:$0xff]  ;;  %v625_v20 = vld [vmem:[%s10464_s21 + $0x428] sm:$0xff] }
 0x229   : > { %v1731_v41 = vpop.f32.mrf.mxu0  ;;  %v5355_v55 = vadd.f32 %v5354_v21, %v2994_v34  ;;  %v9637_v56 = vpack.c.bf16 %v2995_v45, %v2994_v34  ;;  %v5392_v57 = vadd.f32 %v5391_v26, %v2995_v45  ;;  %v2997_v10 = vmax.f32 %v2304_v62, 0.0  ;;  %v738_v26 = vld [vmem:[%s10464_s21 + $0x7b0] sm:$0xff] }
 0x22a   : > { %4733 = vst [vmem:[%s10596_s18 + $0x278] sm:$0xff] %v9522_v30  ;;  %v5073_v51 = vadd.f32 %v5072_v6, %v2766_v35  ;;  %v2767_v52 = vmax.f32 %v1730_v36, 0.0  ;;  %v1732_v38 = vadd.f32 %v1731_v41, %v10579_v24  ;;  %v2311_v7 = vpop.f32.mrf.mxu1  ;;  %v2308_v21 = vadd.f32 %v2307_v40, %v10579_v24 }
 0x22b   : > { %v1733_v53 = vpop.f32.mrf.mxu0  ;;  %4848 = vst [vmem:[%s10596_s18 + $0x610] sm:$0xff] %v9637_v56  ;;  %v5393_v36 = vadd.f32 %v5392_v57, %v2997_v10  ;;  %v2310_v41 = vadd.f32 %v2309_v47, %v10582_v25  ;;  %v2312_v47 = vadd.f32 %v2311_v7, %v10579_v24 }
 0x22c   : > { %v9523_v61 = vpack.c.bf16 %v2767_v52, %v2766_v35  ;;  %v5110_v2 = vadd.f32 %v5109_v31, %v2767_v52  ;;  %v2768_v5 = vmax.f32 %v1732_v38, 0.0  ;;  %v1734_v6 = vadd.f32 %v1733_v53, %v10582_v25  ;;  %v2313_v23 = vpop.f32.mrf.mxu1 }
 0x22d   : > { %v1737_v60 = vpop.f32.mrf.mxu0  ;;  %8846 = vmatmul.mubr.msk.bf16.gmra.mxu0 %vm901_vm1, %v813_v42  ;;  %v5356_v31 = vadd.f32 %v5355_v55, %v2996_v9  ;;  %v9638_v35 = vpack.c.bf16 %v2997_v10, %v2996_v9  ;;  %v814_v52 = vpack.c.bf16 %v625_v20, %v624_v8  ;;  %v2998_v38 = vmax.f32 %v2308_v21, 0.0 }
 0x22e   : > { %4734 = vst [vmem:[%s10596_s18 + $0x280] sm:$0xff] %v9523_v61  ;;  %v5074_v15 = vadd.f32 %v5073_v51, %v2768_v5  ;;  %v2769_v17 = vmax.f32 %v1734_v6, 0.0  ;;  %v1738_v19 = vadd.f32 %v1737_v60, %v10579_v24  ;;  %1985 = vmatprep.mubr.bf16.mxu0 %v13763_v3  ;;  %v2999_v40 = vmax.f32 %v2310_v41, 0.0  ;;  %v2317_v39 = vpop.f32.mrf.mxu1 }
 0x22f   : > { %v1739_v30 = vpop.f32.mrf.mxu0  ;;  %4849 = vst [vmem:[%s10596_s18 + $0x618] sm:$0xff] %v9638_v35  ;;  %v871_v53 = vpack.c.bf16 %v739_v28, %v738_v26  ;;  %v5357_v61 = vadd.f32 %v5356_v31, %v2998_v38  ;;  %v2314_v6 = vadd.f32 %v2313_v23, %v10582_v25  ;;  %v2318_v31 = vadd.f32 %v2317_v39, %v10579_v24  ;;  %v740_v35 = vld [vmem:[%s10464_s21 + $0x7c0] sm:$0xff] }
 0x230   : > { %v9524_v42 = vpack.c.bf16 %v2769_v17, %v2768_v5  ;;  %v5111_v34 = vadd.f32 %v5110_v2, %v2769_v17  ;;  %v2770_v45 = vmax.f32 %v1738_v19, 0.0  ;;  %v1740_v48 = vadd.f32 %v1739_v30, %v10582_v25  ;;  %v2319_v60 = vpop.f32.mrf.mxu1  ;;  %v626_v17 = vld [vmem:[%s10464_s21 + $0x430] sm:$0xff]  ;;  %v627_v30 = vld [vmem:[%s10464_s21 + $0x438] sm:$0xff] }
 0x231   : > { %v1741_v51 = vpop.f32.mrf.mxu0  ;;  %v9639_v2 = vpack.c.bf16 %v2999_v40, %v2998_v38  ;;  %v5394_v5 = vadd.f32 %v5393_v36, %v2999_v40  ;;  %8904 = vmatmul.mubr.msk.bf16.gmra.mxu1 %vm901_vm1, %v871_v53  ;;  %v3000_v19 = vmax.f32 %v2312_v47, 0.0  ;;  %v3001_v20 = vmax.f32 %v2314_v6, 0.0  ;;  %v741_v36 = vld [vmem:[%s10464_s21 + $0x7c8] sm:$0xff] }
 0x232   : > { %4735 = vst [vmem:[%s10596_s18 + $0x288] sm:$0xff] %v9524_v42  ;;  %v5075_v56 = vadd.f32 %v5074_v15, %v2770_v45  ;;  %v2771_v62 = vmax.f32 %v1740_v48, 0.0  ;;  %v1742_v55 = vadd.f32 %v1741_v51, %v10579_v24  ;;  %2565 = vmatprep.mubr.bf16.mxu1 %v13763_v3  ;;  %v2321_v21 = vpop.f32.mrf.mxu1  ;;  %v2320_v48 = vadd.f32 %v2319_v60, %v10582_v25 }
 0x233   : > { %v1743_v57 = vpop.f32.mrf.mxu0  ;;  %4850 = vst [vmem:[%s10596_s18 + $0x620] sm:$0xff] %v9639_v2  ;;  %v5358_v42 = vadd.f32 %v5357_v61, %v3000_v19  ;;  %v2322_v6 = vadd.f32 %v2321_v21, %v10579_v24 }
 0x234   : > { %v9525_v8 = vpack.c.bf16 %v2771_v62, %v2770_v45  ;;  %v5112_v9 = vadd.f32 %v5111_v34, %v2771_v62  ;;  %v2772_v10 = vmax.f32 %v1742_v55, 0.0  ;;  %v1744_v15 = vadd.f32 %v1743_v57, %v10582_v25  ;;  %v2323_v51 = vpop.f32.mrf.mxu1 }
 0x235   : > { %v1747_v7 = vpop.f32.mrf.mxu0  ;;  %8847 = vmatmul.mubr.msk.bf16.gmra.mxu0 %vm901_vm1, %v814_v52  ;;  %v9640_v34 = vpack.c.bf16 %v3001_v20, %v3000_v19  ;;  %v5395_v45 = vadd.f32 %v5394_v5, %v3001_v20  ;;  %v815_v62 = vpack.c.bf16 %v627_v30, %v626_v17  ;;  %v3002_v55 = vmax.f32 %v2318_v31, 0.0 }
 0x236   : > { %4736 = vst [vmem:[%s10596_s18 + $0x290] sm:$0xff] %v9525_v8  ;;  %v5076_v23 = vadd.f32 %v5075_v56, %v2772_v10  ;;  %v2773_v26 = vmax.f32 %v1744_v15, 0.0  ;;  %v1748_v28 = vadd.f32 %v1747_v7, %v10579_v24  ;;  %1995 = vmatprep.mubr.bf16.mxu0 %v13763_v3  ;;  %v3003_v39 = vmax.f32 %v2320_v48, 0.0  ;;  %v2327_v47 = vpop.f32.mrf.mxu1  ;;  %v743_v48 = vld [vmem:[%s10464_s21 + $0x7d8] sm:$0xff] }
 0x237   : > { %v1749_v41 = vpop.f32.mrf.mxu0  ;;  %4851 = vst [vmem:[%s10596_s18 + $0x628] sm:$0xff] %v9640_v34  ;;  %v872_v57 = vpack.c.bf16 %v741_v36, %v740_v35  ;;  %v5359_v8 = vadd.f32 %v5358_v42, %v3002_v55  ;;  %v2324_v15 = vadd.f32 %v2323_v51, %v10582_v25  ;;  %v629_v42 = vld [vmem:[%s10464_s21 + $0x448] sm:$0xff]  ;;  %v2328_v34 = vadd.f32 %v2327_v47, %v10579_v24 }
 0x238   : > { %v9526_v52 = vpack.c.bf16 %v2773_v26, %v2772_v10  ;;  %v5113_v38 = vadd.f32 %v5112_v9, %v2773_v26  ;;  %v2774_v40 = vmax.f32 %v1748_v28, 0.0  ;;  %v1750_v53 = vadd.f32 %v1749_v41, %v10582_v25  ;;  %v2329_v7 = vpop.f32.mrf.mxu1  ;;  %v628_v26 = vld [vmem:[%s10464_s21 + $0x440] sm:$0xff] }
 0x239   : > { %v1751_v56 = vpop.f32.mrf.mxu0  ;;  %v9641_v9 = vpack.c.bf16 %v3003_v39, %v3002_v55  ;;  %v5396_v10 = vadd.f32 %v5395_v45, %v3003_v39  ;;  %8905 = vmatmul.mubr.msk.bf16.gmra.mxu1 %vm901_vm1, %v872_v57  ;;  %v3004_v28 = vmax.f32 %v2322_v6, 0.0  ;;  %v3005_v30 = vmax.f32 %v2324_v15, 0.0  ;;  %v742_v45 = vld [vmem:[%s10464_s21 + $0x7d0] sm:$0xff] }
 0x23a   : > { %4737 = vst [vmem:[%s10596_s18 + $0x298] sm:$0xff] %v9526_v52  ;;  %v5077_v61 = vadd.f32 %v5076_v23, %v2774_v40  ;;  %v2775_v2 = vmax.f32 %v1750_v53, 0.0  ;;  %v1752_v5 = vadd.f32 %v1751_v56, %v10579_v24  ;;  %2575 = vmatprep.mubr.bf16.mxu1 %v13763_v3  ;;  %v2331_v31 = vpop.f32.mrf.mxu1  ;;  %v2330_v53 = vadd.f32 %v2329_v7, %v10582_v25 }
 0x23b   : > { %v1753_v60 = vpop.f32.mrf.mxu0  ;;  %4852 = vst [vmem:[%s10596_s18 + $0x630] sm:$0xff] %v9641_v9  ;;  %v5360_v52 = vadd.f32 %v5359_v8, %v3004_v28  ;;  %v2332_v15 = vadd.f32 %v2331_v31, %v10579_v24 }
 0x23c   : > { %v9527_v17 = vpack.c.bf16 %v2775_v2, %v2774_v40  ;;  %v5114_v19 = vadd.f32 %v5113_v38, %v2775_v2  ;;  %v2776_v20 = vmax.f32 %v1752_v5, 0.0  ;;  %v1754_v23 = vadd.f32 %v1753_v60, %v10582_v25  ;;  %v2333_v56 = vpop.f32.mrf.mxu1 }
 0x23d   : > { %v1757_v21 = vpop.f32.mrf.mxu0  ;;  %8848 = vmatmul.mubr.msk.bf16.gmra.mxu0 %vm901_vm1, %v815_v62  ;;  %v9642_v38 = vpack.c.bf16 %v3005_v30, %v3004_v28  ;;  %v5397_v40 = vadd.f32 %v5396_v10, %v3005_v30  ;;  %v816_v2 = vpack.c.bf16 %v629_v42, %v628_v26  ;;  %v3006_v5 = vmax.f32 %v2328_v34, 0.0 }
 0x23e   : > { %4738 = vst [vmem:[%s10596_s18 + $0x2a0] sm:$0xff] %v9527_v17  ;;  %v5078_v35 = vadd.f32 %v5077_v61, %v2776_v20  ;;  %v2777_v36 = vmax.f32 %v1754_v23, 0.0  ;;  %v1758_v41 = vadd.f32 %v1757_v21, %v10579_v24  ;;  %2005 = vmatprep.mubr.bf16.mxu0 %v13763_v3  ;;  %v3007_v47 = vmax.f32 %v2330_v53, 0.0  ;;  %v2337_v6 = vpop.f32.mrf.mxu1  ;;  %v745_v53 = vld [vmem:[%s10464_s21 + $0x7e8] sm:$0xff] }
 0x23f   : > { %v1759_v51 = vpop.f32.mrf.mxu0  ;;  %4853 = vst [vmem:[%s10596_s18 + $0x638] sm:$0xff] %v9642_v38  ;;  %v873_v60 = vpack.c.bf16 %v743_v48, %v742_v45  ;;  %v5361_v17 = vadd.f32 %v5360_v52, %v3006_v5  ;;  %v2334_v23 = vadd.f32 %v2333_v56, %v10582_v25  ;;  %v631_v52 = vld [vmem:[%s10464_s21 + $0x458] sm:$0xff]  ;;  %v2338_v38 = vadd.f32 %v2337_v6, %v10579_v24 }
 0x240   : > { %v9528_v62 = vpack.c.bf16 %v2777_v36, %v2776_v20  ;;  %v5115_v55 = vadd.f32 %v5114_v19, %v2777_v36  ;;  %v2778_v39 = vmax.f32 %v1758_v41, 0.0  ;;  %v1760_v57 = vadd.f32 %v1759_v51, %v10582_v25  ;;  %v2339_v21 = vpop.f32.mrf.mxu1  ;;  %v630_v36 = vld [vmem:[%s10464_s21 + $0x450] sm:$0xff] }
 0x241   : > { %v1761_v61 = vpop.f32.mrf.mxu0  ;;  %v9643_v19 = vpack.c.bf16 %v3007_v47, %v3006_v5  ;;  %v5398_v20 = vadd.f32 %v5397_v40, %v3007_v47  ;;  %8906 = vmatmul.mubr.msk.bf16.gmra.mxu1 %vm901_vm1, %v873_v60  ;;  %v3008_v41 = vmax.f32 %v2332_v15, 0.0  ;;  %v3009_v42 = vmax.f32 %v2334_v23, 0.0  ;;  %v744_v40 = vld [vmem:[%s10464_s21 + $0x7e0] sm:$0xff] }
 0x242   : > { %4739 = vst [vmem:[%s10596_s18 + $0x2a8] sm:$0xff] %v9528_v62  ;;  %v5079_v8 = vadd.f32 %v5078_v35, %v2778_v39  ;;  %v2779_v9 = vmax.f32 %v1760_v57, 0.0  ;;  %v1762_v10 = vadd.f32 %v1761_v61, %v10579_v24  ;;  %2585 = vmatprep.mubr.bf16.mxu1 %v13763_v3  ;;  %v2341_v34 = vpop.f32.mrf.mxu1  ;;  %v2340_v57 = vadd.f32 %v2339_v21, %v10582_v25 }
 0x243   : > { %v1763_v7 = vpop.f32.mrf.mxu0  ;;  %4854 = vst [vmem:[%s10596_s18 + $0x640] sm:$0xff] %v9643_v19  ;;  %v5362_v62 = vadd.f32 %v5361_v17, %v3008_v41  ;;  %v2342_v23 = vadd.f32 %v2341_v34, %v10579_v24 }
 0x244   : > { %v9529_v26 = vpack.c.bf16 %v2779_v9, %v2778_v39  ;;  %v5116_v28 = vadd.f32 %v5115_v55, %v2779_v9  ;;  %v2780_v30 = vmax.f32 %v1762_v10, 0.0  ;;  %v1764_v35 = vadd.f32 %v1763_v7, %v10582_v25  ;;  %v2343_v61 = vpop.f32.mrf.mxu1 }
 0x245   : > { %v1767_v31 = vpop.f32.mrf.mxu0  ;;  %8849 = vmatmul.mubr.msk.bf16.gmra.mxu0 %vm901_vm1, %v816_v2  ;;  %v9644_v55 = vpack.c.bf16 %v3009_v42, %v3008_v41  ;;  %v5399_v39 = vadd.f32 %v5398_v20, %v3009_v42  ;;  %v817_v9 = vpack.c.bf16 %v631_v52, %v630_v36  ;;  %v3010_v10 = vmax.f32 %v2338_v38, 0.0 }
 0x246   : > { %4740 = vst [vmem:[%s10596_s18 + $0x2b0] sm:$0xff] %v9529_v26  ;;  %v5080_v45 = vadd.f32 %v5079_v8, %v2780_v30  ;;  %v2781_v48 = vmax.f32 %v1764_v35, 0.0  ;;  %v1768_v51 = vadd.f32 %v1767_v31, %v10579_v24  ;;  %2015 = vmatprep.mubr.bf16.mxu0 %v13763_v3  ;;  %v3011_v6 = vmax.f32 %v2340_v57, 0.0  ;;  %v2347_v15 = vpop.f32.mrf.mxu1  ;;  %v747_v57 = vld [vmem:[%s10464_s21 + $0x7f8] sm:$0xff] }
 0x247   : > { %v1769_v56 = vpop.f32.mrf.mxu0  ;;  %4855 = vst [vmem:[%s10596_s18 + $0x648] sm:$0xff] %v9644_v55  ;;  %v874_v7 = vpack.c.bf16 %v745_v53, %v744_v40  ;;  %v5363_v26 = vadd.f32 %v5362_v62, %v3010_v10  ;;  %v2344_v35 = vadd.f32 %v2343_v61, %v10582_v25  ;;  %v633_v62 = vld [vmem:[%s10464_s21 + $0x468] sm:$0xff]  ;;  %v2348_v55 = vadd.f32 %v2347_v15, %v10579_v24 }
 0x248   : > { %v9530_v2 = vpack.c.bf16 %v2781_v48, %v2780_v30  ;;  %v5117_v5 = vadd.f32 %v5116_v28, %v2781_v48  ;;  %v2782_v47 = vmax.f32 %v1768_v51, 0.0  ;;  %v1770_v60 = vadd.f32 %v1769_v56, %v10582_v25  ;;  %v2349_v31 = vpop.f32.mrf.mxu1  ;;  %v632_v48 = vld [vmem:[%s10464_s21 + $0x460] sm:$0xff] }
 0x249   : > { %v1771_v8 = vpop.f32.mrf.mxu0  ;;  %v9645_v28 = vpack.c.bf16 %v3011_v6, %v3010_v10  ;;  %v5400_v30 = vadd.f32 %v5399_v39, %v3011_v6  ;;  %8907 = vmatmul.mubr.msk.bf16.gmra.mxu1 %vm901_vm1, %v874_v7  ;;  %v3012_v51 = vmax.f32 %v2342_v23, 0.0  ;;  %v3013_v52 = vmax.f32 %v2344_v35, 0.0  ;;  %v746_v39 = vld [vmem:[%s10464_s21 + $0x7f0] sm:$0xff] }
 0x24a   : > { %4741 = vst [vmem:[%s10596_s18 + $0x2b8] sm:$0xff] %v9530_v2  ;;  %v5081_v17 = vadd.f32 %v5080_v45, %v2782_v47  ;;  %v2783_v19 = vmax.f32 %v1770_v60, 0.0  ;;  %v1772_v20 = vadd.f32 %v1771_v8, %v10579_v24  ;;  %2595 = vmatprep.mubr.bf16.mxu1 %v13763_v3  ;;  %v2351_v38 = vpop.f32.mrf.mxu1  ;;  %v2350_v60 = vadd.f32 %v2349_v31, %v10582_v25 }
 0x24b   : > { %v1773_v21 = vpop.f32.mrf.mxu0  ;;  %4856 = vst [vmem:[%s10596_s18 + $0x650] sm:$0xff] %v9645_v28  ;;  %v5364_v2 = vadd.f32 %v5363_v26, %v3012_v51  ;;  %v2352_v35 = vadd.f32 %v2351_v38, %v10579_v24 }
 0x24c   : > { %v9531_v36 = vpack.c.bf16 %v2783_v19, %v2782_v47  ;;  %v5118_v41 = vadd.f32 %v5117_v5, %v2783_v19  ;;  %v2784_v42 = vmax.f32 %v1772_v20, 0.0  ;;  %v1774_v45 = vadd.f32 %v1773_v21, %v10582_v25  ;;  %v2353_v8 = vpop.f32.mrf.mxu1 }
 0x24d   : > { %v1777_v34 = vpop.f32.mrf.mxu0  ;;  %8850 = vmatmul.mubr.msk.bf16.gmra.mxu0 %vm901_vm1, %v817_v9  ;;  %v9646_v5 = vpack.c.bf16 %v3013_v52, %v3012_v51  ;;  %v5401_v47 = vadd.f32 %v5400_v30, %v3013_v52  ;;  %v818_v19 = vpack.c.bf16 %v633_v62, %v632_v48  ;;  %v3014_v20 = vmax.f32 %v2348_v55, 0.0 }
 0x24e   : > { %4742 = vst [vmem:[%s10596_s18 + $0x2c0] sm:$0xff] %v9531_v36  ;;  %v5082_v40 = vadd.f32 %v5081_v17, %v2784_v42  ;;  %v2785_v53 = vmax.f32 %v1774_v45, 0.0  ;;  %v1778_v56 = vadd.f32 %v1777_v34, %v10579_v24  ;;  %2025 = vmatprep.mubr.bf16.mxu0 %v13763_v3  ;;  %v3015_v15 = vmax.f32 %v2350_v60, 0.0  ;;  %v2357_v23 = vpop.f32.mrf.mxu1 }
 0x24f   : > { %v1779_v61 = vpop.f32.mrf.mxu0  ;;  %4857 = vst [vmem:[%s10596_s18 + $0x658] sm:$0xff] %v9646_v5  ;;  %v875_v21 = vpack.c.bf16 %v747_v57, %v746_v39  ;;  %v5365_v36 = vadd.f32 %v5364_v2, %v3014_v20  ;;  %v2354_v45 = vadd.f32 %v2353_v8, %v10582_v25  ;;  %v3016_v38 = vmax.f32 %v2352_v35, 0.0  ;;  %v635_v2 = vld [vmem:[%s10464_s21 + $0x478] sm:$0xff] }
 0x250   : > { %v9532_v9 = vpack.c.bf16 %v2785_v53, %v2784_v42  ;;  %v5119_v10 = vadd.f32 %v5118_v41, %v2785_v53  ;;  %v2786_v6 = vmax.f32 %v1778_v56, 0.0  ;;  %v1780_v7 = vadd.f32 %v1779_v61, %v10582_v25  ;;  %v2359_v34 = vpop.f32.mrf.mxu1  ;;  %v634_v61 = vld [vmem:[%s10464_s21 + $0x470] sm:$0xff] }
 0x251   : > { %v1781_v17 = vpop.f32.mrf.mxu0  ;;  %v9647_v41 = vpack.c.bf16 %v3015_v15, %v3014_v20  ;;  %v5402_v42 = vadd.f32 %v5401_v47, %v3015_v15  ;;  %8908 = vmatmul.mubr.msk.bf16.gmra.mxu1 %vm901_vm1, %v875_v21  ;;  %v3017_v56 = vmax.f32 %v2354_v45, 0.0  ;;  %v2358_v5 = vadd.f32 %v2357_v23, %v10579_v24 }
 0x252   : > { %4743 = vst [vmem:[%s10596_s18 + $0x2c8] sm:$0xff] %v9532_v9  ;;  %v5083_v26 = vadd.f32 %v5082_v40, %v2786_v6  ;;  %v2787_v28 = vmax.f32 %v1780_v7, 0.0  ;;  %v1782_v30 = vadd.f32 %v1781_v17, %v10579_v24  ;;  %v2361_v62 = vpop.f32.mrf.mxu1  ;;  %v5366_v60 = vadd.f32 %v5365_v36, %v3016_v38 }
 0x253   : > { %v1783_v31 = vpop.f32.mrf.mxu0  ;;  %4858 = vst [vmem:[%s10596_s18 + $0x660] sm:$0xff] %v9647_v41  ;;  %v9648_v8 = vpack.c.bf16 %v3017_v56, %v3016_v38  ;;  %v5403_v9 = vadd.f32 %v5402_v42, %v3017_v56  ;;  %v819_v21 = vpack.c.bf16 %v635_v2, %v634_v61  ;;  %v2362_v36 = vadd.f32 %v2361_v62, %v10579_v24 }
 0x254   : > { %v9533_v48 = vpack.c.bf16 %v2787_v28, %v2786_v6  ;;  %v5120_v51 = vadd.f32 %v5119_v10, %v2787_v28  ;;  %v2788_v52 = vmax.f32 %v1782_v30, 0.0  ;;  %v1784_v40 = vadd.f32 %v1783_v31, %v10582_v25  ;;  %v2363_v6 = vpop.f32.mrf.mxu1 }
 0x255   : > { %v1787_v53 = vpop.f32.mrf.mxu0  ;;  %8851 = vmatmul.mubr.msk.bf16.gmra.mxu0 %vm901_vm1, %v818_v19  ;;  %v2360_v10 = vadd.f32 %v2359_v34, %v10582_v25  ;;  %4859 = vst [vmem:[%s10596_s18 + $0x668] sm:$0xff] %v9648_v8  ;;  %v3020_v62 = vmax.f32 %v2362_v36, 0.0 }
 0x256   : > { %4744 = vst [vmem:[%s10596_s18 + $0x2d0] sm:$0xff] %v9533_v48  ;;  %v5084_v55 = vadd.f32 %v5083_v26, %v2788_v52  ;;  %v2789_v39 = vmax.f32 %v1784_v40, 0.0  ;;  %v1788_v57 = vadd.f32 %v1787_v53, %v10579_v24  ;;  %2035 = vmatprep.mubr.bf16.mxu0 %v13763_v3  ;;  %v3018_v26 = vmax.f32 %v2358_v5, 0.0  ;;  %v2367_v30 = vpop.f32.mrf.mxu1  ;;  %v636_v5 = vld [vmem:[%s10464_s21 + $0x480] sm:$0xff] }
 0x257   : > { %v1789_v47 = vpop.f32.mrf.mxu0  ;;  %v3019_v28 = vmax.f32 %v2360_v10, 0.0  ;;  %v2364_v48 = vadd.f32 %v2363_v6, %v10582_v25 }
 0x258   : > { %v9534_v7 = vpack.c.bf16 %v2789_v39, %v2788_v52  ;;  %v5121_v17 = vadd.f32 %v5120_v51, %v2789_v39  ;;  %v2790_v19 = vmax.f32 %v1788_v57, 0.0  ;;  %v1790_v20 = vadd.f32 %v1789_v47, %v10582_v25  ;;  %v2369_v51 = vpop.f32.mrf.mxu1  ;;  %v637_v47 = vld [vmem:[%s10464_s21 + $0x488] sm:$0xff] }
 0x259   : > { %v1791_v15 = vpop.f32.mrf.mxu0  ;;  %v5367_v42 = vadd.f32 %v5366_v60, %v3018_v26  ;;  %v9649_v45 = vpack.c.bf16 %v3019_v28, %v3018_v26  ;;  %v5404_v34 = vadd.f32 %v5403_v9, %v3019_v28  ;;  %v2368_v60 = vadd.f32 %v2367_v30, %v10579_v24 }
 0x25a   : > { %4745 = vst [vmem:[%s10596_s18 + $0x2d8] sm:$0xff] %v9534_v7  ;;  %v5085_v23 = vadd.f32 %v5084_v55, %v2790_v19  ;;  %v2791_v35 = vmax.f32 %v1790_v20, 0.0  ;;  %v1792_v31 = vadd.f32 %v1791_v15, %v10579_v24  ;;  %v3021_v55 = vmax.f32 %v2364_v48, 0.0  ;;  %v2371_v39 = vpop.f32.mrf.mxu1 }
 0x25b   : > { %v1793_v41 = vpop.f32.mrf.mxu0  ;;  %4860 = vst [vmem:[%s10596_s18 + $0x670] sm:$0xff] %v9649_v45  ;;  %v5368_v9 = vadd.f32 %v5367_v42, %v3020_v62  ;;  %v2370_v7 = vadd.f32 %v2369_v51, %v10582_v25  ;;  %v820_v28 = vpack.c.bf16 %v637_v47, %v636_v5  ;;  %v2372_v42 = vadd.f32 %v2371_v39, %v10579_v24  ;;  %v638_v47 = vld [vmem:[%s10464_s21 + $0x490] sm:$0xff] }
 0x25c   : > { %v9535_v52 = vpack.c.bf16 %v2791_v35, %v2790_v19  ;;  %v5122_v40 = vadd.f32 %v5121_v17, %v2791_v35  ;;  %v2792_v53 = vmax.f32 %v1792_v31, 0.0  ;;  %v1794_v38 = vadd.f32 %v1793_v41, %v10582_v25  ;;  %v2373_v17 = vpop.f32.mrf.mxu1 }
 0x25d   : > { %v1797_v56 = vpop.f32.mrf.mxu0  ;;  %8852 = vmatmul.mubr.msk.bf16.gmra.mxu0 %vm901_vm1, %v819_v21  ;;  %v9650_v10 = vpack.c.bf16 %v3021_v55, %v3020_v62  ;;  %v5405_v6 = vadd.f32 %v5404_v34, %v3021_v55  ;;  %v3023_v35 = vmax.f32 %v2370_v7, 0.0  ;;  %v3024_v39 = vmax.f32 %v2372_v42, 0.0 }
 0x25e   : > { %4746 = vst [vmem:[%s10596_s18 + $0x2e0] sm:$0xff] %v9535_v52  ;;  %v5086_v57 = vadd.f32 %v5085_v23, %v2792_v53  ;;  %v2793_v61 = vmax.f32 %v1794_v38, 0.0  ;;  %v1798_v2 = vadd.f32 %v1797_v56, %v10579_v24  ;;  %2045 = vmatprep.mubr.bf16.mxu0 %v13763_v3  ;;  %v3022_v23 = vmax.f32 %v2368_v60, 0.0  ;;  %v2377_v31 = vpop.f32.mrf.mxu1  ;;  %v639_v60 = vld [vmem:[%s10464_s21 + $0x498] sm:$0xff] }
 0x25f   : > { %v1799_v8 = vpop.f32.mrf.mxu0  ;;  %4861 = vst [vmem:[%s10596_s18 + $0x678] sm:$0xff] %v9650_v10  ;;  %v5406_v51 = vadd.f32 %v5405_v6, %v3023_v35  ;;  %v2374_v52 = vadd.f32 %v2373_v17, %v10582_v25 }
 0x260   : > { %v9536_v19 = vpack.c.bf16 %v2793_v61, %v2792_v53  ;;  %v5123_v20 = vadd.f32 %v5122_v40, %v2793_v61  ;;  %v2794_v15 = vmax.f32 %v1798_v2, 0.0  ;;  %v1800_v21 = vadd.f32 %v1799_v8, %v10582_v25  ;;  %v11313_v40 = vpop.f32.mrf.mxu1 }
 0x261   : > { %v1801_v26 = vpop.f32.mrf.mxu0  ;;  %v5369_v34 = vadd.f32 %v5368_v9, %v3022_v23  ;;  %v9651_v48 = vpack.c.bf16 %v3023_v35, %v3022_v23  ;;  %v11327_v8 = vadd.f32 %v2377_v31, %v10579_v24 }
 0x262   : > { %4747 = vst [vmem:[%s10596_s18 + $0x2e8] sm:$0xff] %v9536_v19  ;;  %v5087_v30 = vadd.f32 %v5086_v57, %v2794_v15  ;;  %v2795_v36 = vmax.f32 %v1800_v21, 0.0  ;;  %v1802_v41 = vadd.f32 %v1801_v26, %v10579_v24  ;;  %v3025_v57 = vmax.f32 %v2374_v52, 0.0  ;;  %v11318_v61 = vpop.f32.mrf.mxu1 }
 0x263   : > { %v1803_v45 = vpop.f32.mrf.mxu0  ;;  %4862 = vst [vmem:[%s10596_s18 + $0x680] sm:$0xff] %v9651_v48  ;;  %v5370_v6 = vadd.f32 %v5369_v34, %v3024_v39  ;;  %v3026_v23 = vmax.f32 %v11327_v8, 0.0 }
 0x264   : > { %v9537_v53 = vpack.c.bf16 %v2795_v36, %v2794_v15  ;;  %v5124_v38 = vadd.f32 %v5123_v20, %v2795_v36  ;;  %v2796_v56 = vmax.f32 %v1802_v41, 0.0  ;;  %v1804_v62 = vadd.f32 %v1803_v45, %v10582_v25  ;;  %v11332_v19 = vpop.f32.mrf.mxu1 }
 0x265   : > { %v1807_v55 = vpop.f32.mrf.mxu0  ;;  %8853 = vmatmul.mubr.msk.bf16.gmra.mxu0 %vm901_vm1, %v820_v28  ;;  %v9652_v7 = vpack.c.bf16 %v3025_v57, %v3024_v39  ;;  %v11330_v17 = vadd.f32 %v5406_v51, %v3025_v57  ;;  %v821_v28 = vpack.c.bf16 %v639_v60, %v638_v47  ;;  %v11345_v42 = vadd.f32 %v5370_v6, %v3026_v23 }
 0x266   : > { %4748 = vst [vmem:[%s10596_s18 + $0x2f0] sm:$0xff] %v9537_v53  ;;  %v11321_v2 = vadd.f32 %v5087_v30, %v2796_v56  ;;  %v2797_v5 = vmax.f32 %v1804_v62, 0.0  ;;  %2055 = vmatprep.mubr.bf16.mxu0 %v13763_v3  ;;  %v1808_v9 = vadd.f32 %v1807_v55, %v10579_v24  ;;  %v11339_v35 = vpop.f32.mrf.mxu1  ;;  %v640_v62 = vld [vmem:[%s10464_s21 + $0x4a0] sm:$0xff]  ;;  %v641_v55 = vld [vmem:[%s10464_s21 + $0x4a8] sm:$0xff] }
 0x267   : > { %v1809_v10 = vpop.f32.mrf.mxu0  ;;  %4863 = vst [vmem:[%s10596_s18 + $0x688] sm:$0xff] %v9652_v7  ;;  %v822_v7 = vpack.c.bf16 %v641_v55, %v640_v62  ;;  %v643_v55 = vld [vmem:[%s10464_s21 + $0x4b8] sm:$0xff] }
 0x268   : > { %v9538_v20 = vpack.c.bf16 %v2797_v5, %v2796_v56  ;;  %v11334_v15 = vadd.f32 %v5124_v38, %v2797_v5  ;;  %v1810_v21 = vadd.f32 %v1809_v10, %v10582_v25  ;;  %v2798_v30 = vmax.f32 %v1808_v9, 0.0  ;;  %v11347_v45 = vpop.f32.mrf.mxu1 }
 0x269   : > { %v1811_v26 = vpop.f32.mrf.mxu0 }
 0x26a   : > { %4749 = vst [vmem:[%s10596_s18 + $0x2f8] sm:$0xff] %v9538_v20  ;;  %v1812_v31 = vadd.f32 %v1811_v26, %v10579_v24  ;;  %v2799_v36 = vmax.f32 %v1810_v21, 0.0  ;;  %v11351_v53 = vpop.f32.mrf.mxu1 }
 0x26b   : > { %v1813_v41 = vpop.f32.mrf.mxu0 }
 0x26c   : > { %v2800_v34 = vmax.f32 %v1812_v31, 0.0  ;;  %v1814_v48 = vadd.f32 %v1813_v41, %v10582_v25  ;;  %v9539_v51 = vpack.c.bf16 %v2799_v36, %v2798_v30  ;;  %v11358_v5 = vpop.f32.mrf.mxu1 }
 0x26d   : > { %v1817_v52 = vpop.f32.mrf.mxu0  ;;  %8854 = vmatmul.mubr.msk.bf16.gmra.mxu0 %vm901_vm1, %v821_v28 }
 0x26e   : > { %v5132_v38 = vadd.f32 %v2800_v34, %v2798_v30  ;;  %v2801_v56 = vmax.f32 %v1814_v48, 0.0  ;;  %2065 = vmatprep.mubr.bf16.mxu0 %v13763_v3  ;;  %4750 = vst [vmem:[%s10596_s18 + $0x300] sm:$0xff] %v9539_v51  ;;  %v1818_v39 = vadd.f32 %v1817_v52, %v10579_v24  ;;  %v11361_v20 = vpop.f32.mrf.mxu1 }
 0x26f   : > { %v1819_v57 = vpop.f32.mrf.mxu0 }
 0x270   : > { %v9540_v47 = vpack.c.bf16 %v2801_v56, %v2800_v34  ;;  %v5169_v60 = vadd.f32 %v2801_v56, %v2799_v36  ;;  %v2802_v9 = vmax.f32 %v1818_v39, 0.0  ;;  %v1820_v10 = vadd.f32 %v1819_v57, %v10582_v25  ;;  %v11365_v30 = vpop.f32.mrf.mxu1 }
 0x271   : > { %v1821_v6 = vpop.f32.mrf.mxu0 }
 0x272   : > { %4751 = vst [vmem:[%s10596_s18 + $0x308] sm:$0xff] %v9540_v47  ;;  %v1822_v21 = vadd.f32 %v1821_v6, %v10579_v24  ;;  %v5133_v26 = vadd.f32 %v5132_v38, %v2802_v9  ;;  %v2803_v28 = vmax.f32 %v1820_v10, 0.0  ;;  %v11369_v52 = vpop.f32.mrf.mxu1  ;;  %v642_v38 = vld [vmem:[%s10464_s21 + $0x4b0] sm:$0xff]  ;;  %v11377_v47 = vld [vmem:[%s10464_s21 + $0x4c0] sm:$0xff] }
 0x273   : > { %v1823_v31 = vpop.f32.mrf.mxu0 }
 0x274   : > { %v2804_v36 = vmax.f32 %v1822_v21, 0.0  ;;  %v1824_v41 = vadd.f32 %v1823_v31, %v10582_v25  ;;  %v9541_v34 = vpack.c.bf16 %v2803_v28, %v2802_v9  ;;  %v5170_v48 = vadd.f32 %v5169_v60, %v2803_v28  ;;  %v11380_v60 = vld [vmem:[%s10464_s21 + $0x4c8] sm:$0xff]  ;;  %v11382_v9 = vpop.f32.mrf.mxu1  ;;  %v11386_v31 = vld [vmem:[%s10464_s21 + $0x4d0] sm:$0xff] }
 0x275   : > { %v1827_v51 = vpop.f32.mrf.mxu0  ;;  %8855 = vmatmul.mubr.msk.bf16.gmra.mxu0 %vm901_vm1, %v822_v7  ;;  %v823_v28 = vpack.c.bf16 %v643_v55, %v642_v38  ;;  %v824_v11 = vpack.c.bf16 %v11380_v60, %v11377_v47  ;;  %v2400_v60 = vadd.f32 %v11365_v30, %v10582_v25 }
 0x276   : > { %v5134_v56 = vadd.f32 %v5133_v26, %v2804_v36  ;;  %v2805_v62 = vmax.f32 %v1824_v41, 0.0  ;;  %2075 = vmatprep.mubr.bf16.mxu0 %v13763_v3  ;;  %4752 = vst [vmem:[%s10596_s18 + $0x310] sm:$0xff] %v9541_v34  ;;  %v1828_v39 = vadd.f32 %v1827_v51, %v10579_v24  ;;  %v11389_v41 = vld [vmem:[%s10464_s21 + $0x4d8] sm:$0xff]  ;;  %v11391_v34 = vpop.f32.mrf.mxu1 }
 0x277   : > { %v1829_v57 = vpop.f32.mrf.mxu0  ;;  %v825_v44 = vpack.c.bf16 %v11389_v41, %v11386_v31 }
 0x278   : > { %v9542_v10 = vpack.c.bf16 %v2805_v62, %v2804_v36  ;;  %v5171_v6 = vadd.f32 %v5170_v48, %v2805_v62  ;;  %v2806_v7 = vmax.f32 %v1828_v39, 0.0  ;;  %v1830_v21 = vadd.f32 %v1829_v57, %v10582_v25  ;;  %v9892_v48 = vld [vmem:[%s13821_s2 + $0x150] ss:$24 sps:$4 sm:$0xff]   ;;  %v9894_v62 = vld [vmem:[%s13821_s2 + $0x154] ss:$24 sps:$4 sm:$0xff]  }
 0x279   : > { %v1831_v26 = vpop.f32.mrf.mxu0  ;;  %v2380_v36 = vadd.f32 %v11313_v40, %v10582_v25  ;;  %v2382_v57 = vadd.f32 %v11318_v61, %v10579_v24  ;;  %6225 = vmatprep.subr.bf16.mxu1 %v9894_v62  ;;  %v2388_v62 = vadd.f32 %v11339_v35, %v10579_v24 }
 0x27a   : > { %4753 = vst [vmem:[%s10596_s18 + $0x318] sm:$0xff] %v9542_v10  ;;  %v1832_v51 = vadd.f32 %v1831_v26, %v10579_v24  ;;  %v5135_v38 = vadd.f32 %v5134_v56, %v2806_v7  ;;  %v2807_v55 = vmax.f32 %v1830_v21, 0.0  ;;  %v2384_v10 = vadd.f32 %v11332_v19, %v10582_v25  ;;  %v11409_v26 = vpop.f32.mrf.mxu1  ;;  %6226 = vmatpush1.bf16.msra.mxu1 %v9892_v48 }
 0x27b   : > { %v1833_v39 = vpop.f32.mrf.mxu0  ;;  %v3027_v0 = vmax.f32 %v2380_v36, 0.0  ;;  %v3028_v61 = vmax.f32 %v2382_v57, 0.0  ;;  %v2390_v57 = vadd.f32 %v11347_v45, %v10582_v25 }
 0x27c   : > { %v2808_v40 = vmax.f32 %v1832_v51, 0.0  ;;  %v1834_v1 = vadd.f32 %v1833_v39, %v10582_v25  ;;  %v9543_v56 = vpack.c.bf16 %v2807_v55, %v2806_v7  ;;  %v5172_v21 = vadd.f32 %v5171_v6, %v2807_v55  ;;  %v11415_v19 = vpop.f32.mrf.mxu1 }
 0x27d   : > { %v1837_v13 = vpop.f32.mrf.mxu0  ;;  %8856 = vmatmul.mubr.msk.bf16.gmra.mxu0 %vm901_vm1, %v823_v28  ;;  %v3029_v43 = vmax.f32 %v2384_v10, 0.0  ;;  %v9653_v36 = vpack.c.bf16 %v3027_v0, %v3026_v23  ;;  %v5408_v7 = vadd.f32 %v11330_v17, %v3027_v0  ;;  %v5372_v28 = vadd.f32 %v11345_v42, %v3028_v61 }
 0x27e   : > { %v5136_v59 = vadd.f32 %v5135_v38, %v2808_v40  ;;  %v2809_v51 = vmax.f32 %v1834_v1, 0.0  ;;  %v1838_v39 = vadd.f32 %v1837_v13, %v10579_v24  ;;  %2085 = vmatprep.mubr.bf16.mxu0 %v13763_v3  ;;  %4754 = vst [vmem:[%s10596_s18 + $0x320] sm:$0xff] %v9543_v56  ;;  %v9895_v13 = vld [vmem:[%s13821_s2 + $0x120] ss:$24 sps:$4 sm:$0xff]   ;;  %v9897_v1 = vld [vmem:[%s13821_s2 + $0x124] ss:$24 sps:$4 sm:$0xff]   ;;  %v11432_v8 = vpop.f32.mrf.mxu1  ;;  %v2392_v10 = vadd.f32 %v11351_v53, %v10579_v24 }
 0x27f   : > { %v1839_v6 = vpop.f32.mrf.mxu0  ;;  %v9654_v48 = vpack.c.bf16 %v3029_v43, %v3028_v61  ;;  %4864 = vst [vmem:[%s10596_s18 + $0x690] sm:$0xff] %v9653_v36  ;;  %v5409_v35 = vadd.f32 %v5408_v7, %v3029_v43  ;;  %v3030_v55 = vmax.f32 %v2388_v62, 0.0  ;;  %6227 = vmatprep.subr.bf16.mxu1 %v9897_v1  ;;  %v3031_v36 = vmax.f32 %v2390_v57, 0.0 }
 0x280   : > { %v9544_v23 = vpack.c.bf16 %v2809_v51, %v2808_v40  ;;  %v5173_v38 = vadd.f32 %v5172_v21, %v2809_v51  ;;  %v2810_v0 = vmax.f32 %v1838_v39, 0.0  ;;  %v1840_v17 = vadd.f32 %v1839_v6, %v10582_v25  ;;  %v11441_v56 = vpop.f32.mrf.mxu1  ;;  %6228 = vmatpush1.bf16.msra.mxu1 %v9895_v13 }
 0x281   : > { %v1841_v42 = vpop.f32.mrf.mxu0  ;;  %4865 = vst [vmem:[%s10596_s18 + $0x698] sm:$0xff] %v9654_v48  ;;  %v2394_v51 = vadd.f32 %v11358_v5, %v10582_v25  ;;  %v5373_v39 = vadd.f32 %v5372_v28, %v3030_v55  ;;  %v3032_v45 = vmax.f32 %v2392_v10, 0.0  ;;  %v2398_v53 = vadd.f32 %v11361_v20, %v10579_v24 }
 0x282   : > { %4755 = vst [vmem:[%s10596_s18 + $0x328] sm:$0xff] %v9544_v23  ;;  %v5137_v40 = vadd.f32 %v5136_v59, %v2810_v0  ;;  %v2811_v21 = vmax.f32 %v1840_v17, 0.0  ;;  %v1842_v61 = vadd.f32 %v1841_v42, %v10579_v24  ;;  %v11449_v6 = vpop.f32.mrf.mxu1  ;;  %v9655_v5 = vpack.c.bf16 %v3031_v36, %v3030_v55 }
 0x283   : > { %v1843_v43 = vpop.f32.mrf.mxu0  ;;  %v5410_v28 = vadd.f32 %v5409_v35, %v3031_v36  ;;  %v5374_v13 = vadd.f32 %v5373_v39, %v3032_v45  ;;  %v3033_v23 = vmax.f32 %v2394_v51, 0.0  ;;  %v3034_v42 = vmax.f32 %v2398_v53, 0.0 }
 0x284   : > { %v9545_v7 = vpack.c.bf16 %v2811_v21, %v2810_v0  ;;  %v5174_v48 = vadd.f32 %v5173_v38, %v2811_v21  ;;  %v2812_v59 = vmax.f32 %v1842_v61, 0.0  ;;  %v1844_v62 = vadd.f32 %v1843_v43, %v10582_v25  ;;  %v11456_v17 = vpop.f32.mrf.mxu1  ;;  %4866 = vst [vmem:[%s10596_s18 + $0x6a0] sm:$0xff] %v9655_v5 }
 0x285   : > { %v1847_v1 = vpop.f32.mrf.mxu0  ;;  %8857 = vmatmul.mubr.msk.bf16.gmra.mxu0 %vm901_vm1, %v824_v11  ;;  %v9656_v47 = vpack.c.bf16 %v3033_v23, %v3032_v45  ;;  %v5411_v11 = vadd.f32 %v5410_v28, %v3033_v23  ;;  %v2402_v35 = vadd.f32 %v11369_v52, %v10579_v24  ;;  %v5375_v43 = vadd.f32 %v5374_v13, %v3034_v42 }
 0x286   : > { %4756 = vst [vmem:[%s10596_s18 + $0x330] sm:$0xff] %v9545_v7  ;;  %v5138_v20 = vadd.f32 %v5137_v40, %v2812_v59  ;;  %v2813_v0 = vmax.f32 %v1844_v62, 0.0  ;;  %v1848_v38 = vadd.f32 %v1847_v1, %v10579_v24  ;;  %2095 = vmatprep.mubr.bf16.mxu0 %v13763_v3  ;;  %v11466_v55 = vpop.f32.mrf.mxu1  ;;  %v3035_v39 = vmax.f32 %v2400_v60, 0.0 }
 0x287   : > { %v1849_v57 = vpop.f32.mrf.mxu0  ;;  %4867 = vst [vmem:[%s10596_s18 + $0x6a8] sm:$0xff] %v9656_v47  ;;  %v3036_v36 = vmax.f32 %v2402_v35, 0.0  ;;  %v2404_v45 = vadd.f32 %v11382_v9, %v10582_v25  ;;  %v2410_v60 = vadd.f32 %v11409_v26, %v10582_v25  ;;  %v2414_v26 = vadd.f32 %v11432_v8, %v10582_v25 }
 0x288   : > { %v9546_v10 = vpack.c.bf16 %v2813_v0, %v2812_v59  ;;  %v5175_v40 = vadd.f32 %v5174_v48, %v2813_v0  ;;  %v2814_v21 = vmax.f32 %v1848_v38, 0.0  ;;  %v1850_v61 = vadd.f32 %v1849_v57, %v10582_v25  ;;  %v11472_v53 = vpop.f32.mrf.mxu1  ;;  %v648_v38 = vld [vmem:[%s10464_s21 + $0x4e0] sm:$0xff]  ;;  %v649_v57 = vld [vmem:[%s10464_s21 + $0x4e8] sm:$0xff] }
 0x289   : > { %v1851_v51 = vpop.f32.mrf.mxu0  ;;  %v2408_v48 = vadd.f32 %v11391_v34, %v10579_v24  ;;  %v9657_v62 = vpack.c.bf16 %v3035_v39, %v3034_v42  ;;  %v5412_v1 = vadd.f32 %v5411_v11, %v3035_v39  ;;  %v5376_v5 = vadd.f32 %v5375_v43, %v3036_v36 }
 0x28a   : > { %4757 = vst [vmem:[%s10596_s18 + $0x338] sm:$0xff] %v9546_v10  ;;  %v5139_v30 = vadd.f32 %v5138_v20, %v2814_v21  ;;  %v2815_v52 = vmax.f32 %v1850_v61, 0.0  ;;  %v1852_v7 = vadd.f32 %v1851_v51, %v10579_v24  ;;  %v3037_v28 = vmax.f32 %v2404_v45, 0.0  ;;  %v11478_v9 = vpop.f32.mrf.mxu1 }
 0x28b   : > { %v1853_v59 = vpop.f32.mrf.mxu0  ;;  %4868 = vst [vmem:[%s10596_s18 + $0x6b0] sm:$0xff] %v9657_v62  ;;  %v3038_v11 = vmax.f32 %v2408_v48, 0.0  ;;  %v826_v41 = vpack.c.bf16 %v649_v57, %v648_v38  ;;  %v3039_v51 = vmax.f32 %v2410_v60, 0.0  ;;  %v3041_v62 = vmax.f32 %v2414_v26, 0.0 }
 0x28c   : > { %v9547_v13 = vpack.c.bf16 %v2815_v52, %v2814_v21  ;;  %v5176_v23 = vadd.f32 %v5175_v40, %v2815_v52  ;;  %v2816_v0 = vmax.f32 %v1852_v7, 0.0  ;;  %v1854_v20 = vadd.f32 %v1853_v59, %v10582_v25  ;;  %v11490_v35 = vpop.f32.mrf.mxu1 }
 0x28d   : > { %v1857_v47 = vpop.f32.mrf.mxu0  ;;  %8858 = vmatmul.mubr.msk.bf16.gmra.mxu0 %vm901_vm1, %v825_v44  ;;  %v9658_v34 = vpack.c.bf16 %v3037_v28, %v3036_v36  ;;  %v5413_v42 = vadd.f32 %v5412_v1, %v3037_v28  ;;  %v2412_v44 = vadd.f32 %v11415_v19, %v10579_v24  ;;  %v5377_v61 = vadd.f32 %v5376_v5, %v3038_v11  ;;  %v11504_v19 = vld [vmem:[%s10464_s21 + $0x4f0] sm:$0xff] }
 0x28e   : > { %4758 = vst [vmem:[%s10596_s18 + $0x340] sm:$0xff] %v9547_v13  ;;  %v5140_v10 = vadd.f32 %v5139_v30, %v2816_v0  ;;  %v2817_v40 = vmax.f32 %v1854_v20, 0.0  ;;  %v1858_v21 = vadd.f32 %v1857_v47, %v10579_v24  ;;  %2105 = vmatprep.mubr.bf16.mxu0 %v13763_v3  ;;  %v11500_v43 = vpop.f32.mrf.mxu1  ;;  %v9659_v7 = vpack.c.bf16 %v3039_v51, %v3038_v11  ;;  %v11511_v13 = vld [vmem:[%s10464_s21 + $0x4f8] sm:$0xff]  ;;  %v9900_v20 = vld [vmem:[%s13821_s2 + $0xf4] ss:$24 sps:$4 sm:$0xff]  }
 0x28f   : > { %v1859_v31 = vpop.f32.mrf.mxu0  ;;  %4869 = vst [vmem:[%s10596_s18 + $0x6b8] sm:$0xff] %v9658_v34  ;;  %v5414_v48 = vadd.f32 %v5413_v42, %v3039_v51  ;;  %v3040_v59 = vmax.f32 %v2412_v44, 0.0  ;;  %v2420_v42 = vadd.f32 %v11449_v6, %v10582_v25  ;;  %6229 = vmatprep.subr.bf16.mxu1 %v9900_v20  ;;  %v827_v44 = vpack.c.bf16 %v11511_v13, %v11504_v19 }
 0x290   : > { %v9548_v39 = vpack.c.bf16 %v2817_v40, %v2816_v0  ;;  %v5177_v36 = vadd.f32 %v5176_v23, %v2817_v40  ;;  %v2818_v45 = vmax.f32 %v1858_v21, 0.0  ;;  %v1860_v30 = vadd.f32 %v1859_v31, %v10582_v25  ;;  %v11506_v1 = vpop.f32.mrf.mxu1  ;;  %v9898_v0 = vld [vmem:[%s13821_s2 + $0xf0] ss:$24 sps:$4 sm:$0xff]   ;;  %4870 = vst [vmem:[%s10596_s18 + $0x6c0] sm:$0xff] %v9659_v7 }
 0x291   : > { %v1861_v52 = vpop.f32.mrf.mxu0  ;;  %v2418_v23 = vadd.f32 %v11441_v56, %v10579_v24  ;;  %v5378_v57 = vadd.f32 %v5377_v61, %v3040_v59  ;;  %v9660_v47 = vpack.c.bf16 %v3041_v62, %v3040_v59  ;;  %v5415_v34 = vadd.f32 %v5414_v48, %v3041_v62  ;;  %6230 = vmatpush1.bf16.msra.mxu1 %v9898_v0 }
 0x292   : > { %4759 = vst [vmem:[%s10596_s18 + $0x348] sm:$0xff] %v9548_v39  ;;  %v5141_v8 = vadd.f32 %v5140_v10, %v2818_v45  ;;  %v2819_v5 = vmax.f32 %v1860_v30, 0.0  ;;  %v1862_v28 = vadd.f32 %v1861_v52, %v10579_v24  ;;  %v11524_v11 = vpop.f32.mrf.mxu1  ;;  %v3043_v61 = vmax.f32 %v2420_v42, 0.0  ;;  %v652_v42 = vld [vmem:[%s10464_s21 + $0x500] sm:$0xff] }
 0x293   : > { %v1863_v38 = vpop.f32.mrf.mxu0  ;;  %4871 = vst [vmem:[%s10596_s18 + $0x6c8] sm:$0xff] %v9660_v47  ;;  %v3042_v31 = vmax.f32 %v2418_v23, 0.0  ;;  %v2422_v6 = vadd.f32 %v11456_v17, %v10579_v24  ;;  %v2430_v23 = vadd.f32 %v11478_v9, %v10582_v25  ;;  %v2432_v47 = vadd.f32 %v11490_v35, %v10579_v24 }
 0x294   : > { %v9549_v56 = vpack.c.bf16 %v2819_v5, %v2818_v45  ;;  %v5178_v60 = vadd.f32 %v5177_v36, %v2819_v5  ;;  %v2820_v10 = vmax.f32 %v1862_v28, 0.0  ;;  %v1864_v40 = vadd.f32 %v1863_v38, %v10582_v25  ;;  %v11533_v51 = vpop.f32.mrf.mxu1 }
 0x295   : > { %v1867_v21 = vpop.f32.mrf.mxu0  ;;  %8859 = vmatmul.mubr.msk.bf16.gmra.mxu0 %vm901_vm1, %v826_v41  ;;  %v2424_v41 = vadd.f32 %v11466_v55, %v10582_v25  ;;  %v5379_v30 = vadd.f32 %v5378_v57, %v3042_v31  ;;  %v9661_v52 = vpack.c.bf16 %v3043_v61, %v3042_v31  ;;  %v5416_v19 = vadd.f32 %v5415_v34, %v3043_v61 }
 0x296   : > { %4760 = vst [vmem:[%s10596_s18 + $0x350] sm:$0xff] %v9549_v56  ;;  %v5142_v26 = vadd.f32 %v5141_v8, %v2820_v10  ;;  %v2821_v39 = vmax.f32 %v1864_v40, 0.0  ;;  %v1868_v36 = vadd.f32 %v1867_v21, %v10579_v24  ;;  %2115 = vmatprep.mubr.bf16.mxu0 %v13763_v3  ;;  %v3044_v17 = vmax.f32 %v2422_v6, 0.0  ;;  %v11540_v7 = vpop.f32.mrf.mxu1  ;;  %v653_v56 = vld [vmem:[%s10464_s21 + $0x508] sm:$0xff] }
 0x297   : > { %v1869_v45 = vpop.f32.mrf.mxu0  ;;  %4872 = vst [vmem:[%s10596_s18 + $0x6d0] sm:$0xff] %v9661_v52  ;;  %v3045_v13 = vmax.f32 %v2424_v41, 0.0  ;;  %v2428_v55 = vadd.f32 %v11472_v53, %v10579_v24  ;;  %v3047_v40 = vmax.f32 %v2430_v23, 0.0  ;;  %v3048_v41 = vmax.f32 %v2432_v47, 0.0 }
 0x298   : > { %v9550_v48 = vpack.c.bf16 %v2821_v39, %v2820_v10  ;;  %v5179_v59 = vadd.f32 %v5178_v60, %v2821_v39  ;;  %v2822_v62 = vmax.f32 %v1868_v36, 0.0  ;;  %v1870_v8 = vadd.f32 %v1869_v45, %v10582_v25  ;;  %v11548_v0 = vpop.f32.mrf.mxu1 }
 0x299   : > { %v1871_v5 = vpop.f32.mrf.mxu0  ;;  %v5380_v28 = vadd.f32 %v5379_v30, %v3044_v17  ;;  %v9662_v60 = vpack.c.bf16 %v3045_v13, %v3044_v17  ;;  %v5417_v10 = vadd.f32 %v5416_v19, %v3045_v13  ;;  %v3046_v53 = vmax.f32 %v2428_v55, 0.0 }
 0x29a   : > { %4761 = vst [vmem:[%s10596_s18 + $0x358] sm:$0xff] %v9550_v48  ;;  %v5143_v20 = vadd.f32 %v5142_v26, %v2822_v62  ;;  %v2823_v38 = vmax.f32 %v1870_v8, 0.0  ;;  %v1872_v57 = vadd.f32 %v1871_v5, %v10579_v24  ;;  %v11556_v9 = vpop.f32.mrf.mxu1  ;;  %v828_v17 = vpack.c.bf16 %v653_v56, %v652_v42 }
 0x29b   : > { %v1873_v34 = vpop.f32.mrf.mxu0  ;;  %4873 = vst [vmem:[%s10596_s18 + $0x6d8] sm:$0xff] %v9662_v60  ;;  %v5381_v35 = vadd.f32 %v5380_v28, %v3046_v53  ;;  %v9663_v39 = vpack.c.bf16 %v3047_v40, %v3046_v53  ;;  %v5418_v36 = vadd.f32 %v5417_v10, %v3047_v40  ;;  %v2440_v8 = vadd.f32 %v11524_v11, %v10582_v25  ;;  %v9901_v60 = vld [vmem:[%s13821_s2 + $0xc0] ss:$24 sps:$4 sm:$0xff]  }
 0x29c   : > { %v9551_v21 = vpack.c.bf16 %v2823_v38, %v2822_v62  ;;  %v5180_v31 = vadd.f32 %v5179_v59, %v2823_v38  ;;  %v2824_v61 = vmax.f32 %v1872_v57, 0.0  ;;  %v1874_v6 = vadd.f32 %v1873_v34, %v10582_v25  ;;  %v11561_v45 = vpop.f32.mrf.mxu1 }
 0x29d   : > { %v1877_v26 = vpop.f32.mrf.mxu0  ;;  %8860 = vmatmul.mubr.msk.bf16.gmra.mxu0 %vm901_vm1, %v827_v44  ;;  %4874 = vst [vmem:[%s10596_s18 + $0x6e0] sm:$0xff] %v9663_v39  ;;  %v5382_v59 = vadd.f32 %v5381_v35, %v3048_v41  ;;  %v2434_v44 = vadd.f32 %v11500_v43, %v10582_v25  ;;  %v2438_v62 = vadd.f32 %v11506_v1, %v10579_v24  ;;  %v3051_v47 = vmax.f32 %v2440_v8, 0.0 }
 0x29e   : > { %4762 = vst [vmem:[%s10596_s18 + $0x360] sm:$0xff] %v9551_v21  ;;  %v5144_v30 = vadd.f32 %v5143_v20, %v2824_v61  ;;  %v2825_v52 = vmax.f32 %v1874_v6, 0.0  ;;  %v1878_v19 = vadd.f32 %v1877_v26, %v10579_v24  ;;  %2125 = vmatprep.mubr.bf16.mxu0 %v13763_v3  ;;  %v11573_v5 = vpop.f32.mrf.mxu1  ;;  %v2442_v43 = vadd.f32 %v11533_v51, %v10579_v24  ;;  %v9903_v51 = vld [vmem:[%s13821_s2 + $0xc4] ss:$24 sps:$4 sm:$0xff]  }
 0x29f   : > { %v1879_v48 = vpop.f32.mrf.mxu0  ;;  %v3049_v38 = vmax.f32 %v2434_v44, 0.0  ;;  %v3050_v57 = vmax.f32 %v2438_v62, 0.0  ;;  %v2444_v56 = vadd.f32 %v11540_v7, %v10582_v25  ;;  %6231 = vmatprep.subr.bf16.mxu1 %v9903_v51  ;;  %v655_v62 = vld [vmem:[%s10464_s21 + $0x518] sm:$0xff]  ;;  %v2450_v8 = vadd.f32 %v11556_v9, %v10582_v25 }
 0x2a0   : > { %v9552_v28 = vpack.c.bf16 %v2825_v52, %v2824_v61  ;;  %v5181_v13 = vadd.f32 %v5180_v31, %v2825_v52  ;;  %v2826_v55 = vmax.f32 %v1878_v19, 0.0  ;;  %v1880_v23 = vadd.f32 %v1879_v48, %v10582_v25  ;;  %v11578_v34 = vpop.f32.mrf.mxu1  ;;  %6232 = vmatpush1.bf16.msra.mxu1 %v9901_v60 }
 0x2a1   : > { %v1881_v20 = vpop.f32.mrf.mxu0  ;;  %v9664_v53 = vpack.c.bf16 %v3049_v38, %v3048_v41  ;;  %v5419_v40 = vadd.f32 %v5418_v36, %v3049_v38  ;;  %v5383_v21 = vadd.f32 %v5382_v59, %v3050_v57  ;;  %v9665_v31 = vpack.c.bf16 %v3051_v47, %v3050_v57 }
 0x2a2   : > { %4763 = vst [vmem:[%s10596_s18 + $0x368] sm:$0xff] %v9552_v28  ;;  %v5145_v1 = vadd.f32 %v5144_v30, %v2826_v55  ;;  %v2827_v42 = vmax.f32 %v1880_v23, 0.0  ;;  %v1882_v11 = vadd.f32 %v1881_v20, %v10579_v24  ;;  %v11590_v61 = vpop.f32.mrf.mxu1  ;;  %v3052_v36 = vmax.f32 %v2442_v43, 0.0 }
 0x2a3   : > { %v1883_v10 = vpop.f32.mrf.mxu0  ;;  %4875 = vst [vmem:[%s10596_s18 + $0x6e8] sm:$0xff] %v9664_v53  ;;  %4876 = vst [vmem:[%s10596_s18 + $0x6f0] sm:$0xff] %v9665_v31  ;;  %v5420_v41 = vadd.f32 %v5419_v40, %v3051_v47  ;;  %v3053_v30 = vmax.f32 %v2444_v56, 0.0  ;;  %v2448_v52 = vadd.f32 %v11548_v0, %v10579_v24  ;;  %v2452_v9 = vadd.f32 %v11561_v45, %v10579_v24 }
 0x2a4   : > { %v9553_v6 = vpack.c.bf16 %v2827_v42, %v2826_v55  ;;  %v5182_v7 = vadd.f32 %v5181_v13, %v2827_v42  ;;  %v2828_v26 = vmax.f32 %v1882_v11, 0.0  ;;  %v1884_v35 = vadd.f32 %v1883_v10, %v10582_v25  ;;  %v11598_v19 = vpop.f32.mrf.mxu1 }
 0x2a5   : > { %v1887_v39 = vpop.f32.mrf.mxu0  ;;  %8861 = vmatmul.mubr.msk.bf16.gmra.mxu0 %vm901_vm1, %v828_v17  ;;  %v654_v17 = vld [vmem:[%s10464_s21 + $0x510] sm:$0xff]  ;;  %v11607_v13 = vadd.f32 %v5383_v21, %v3052_v36  ;;  %v9666_v0 = vpack.c.bf16 %v3053_v30, %v3052_v36  ;;  %v11609_v55 = vadd.f32 %v5420_v41, %v3053_v30  ;;  %v3054_v42 = vmax.f32 %v2448_v52, 0.0 }
 0x2a6   : > { %4764 = vst [vmem:[%s10596_s18 + $0x370] sm:$0xff] %v9553_v6  ;;  %v5146_v48 = vadd.f32 %v5145_v1, %v2828_v26  ;;  %v2829_v59 = vmax.f32 %v1884_v35, 0.0  ;;  %v1888_v44 = vadd.f32 %v1887_v39, %v10579_v24  ;;  %2135 = vmatprep.mubr.bf16.mxu0 %v13763_v3  ;;  %v11611_v23 = vpop.f32.mrf.mxu1  ;;  %v829_v1 = vpack.c.bf16 %v655_v62, %v654_v17 }
 0x2a7   : > { %v1889_v28 = vpop.f32.mrf.mxu0  ;;  %4877 = vst [vmem:[%s10596_s18 + $0x6f8] sm:$0xff] %v9666_v0  ;;  %v3055_v11 = vmax.f32 %v2450_v8, 0.0  ;;  %v2454_v53 = vadd.f32 %v11573_v5, %v10582_v25  ;;  %v3056_v31 = vmax.f32 %v2452_v9, 0.0  ;;  %v2458_v17 = vadd.f32 %v11578_v34, %v10579_v24 }
 0x2a8   : > { %v9554_v20 = vpack.c.bf16 %v2829_v59, %v2828_v26  ;;  %v5183_v38 = vadd.f32 %v5182_v7, %v2829_v59  ;;  %v2830_v57 = vmax.f32 %v1888_v44, 0.0  ;;  %v1890_v47 = vadd.f32 %v1889_v28, %v10582_v25  ;;  %v11617_v56 = vpop.f32.mrf.mxu1  ;;  %v656_v59 = vld [vmem:[%s10464_s21 + $0x520] sm:$0xff]  ;;  %v657_v44 = vld [vmem:[%s10464_s21 + $0x528] sm:$0xff] }
 0x2a9   : > { %v1891_v43 = vpop.f32.mrf.mxu0  ;;  %v9667_v21 = vpack.c.bf16 %v3055_v11, %v3054_v42  ;;  %v5428_v41 = vadd.f32 %v3056_v31, %v3054_v42  ;;  %v3057_v36 = vmax.f32 %v2454_v53, 0.0  ;;  %v11641_v42 = vld [vmem:[%s10464_s21 + $0x530] sm:$0xff]  ;;  %v3058_v9 = vmax.f32 %v2458_v17, 0.0  ;;  %v11651_v53 = vld [vmem:[%s10464_s21 + $0x538] sm:$0xff]  ;;  %v11680_v17 = vld [vmem:[%s10464_s21 + $0x560] sm:$0xff] }
 0x2aa   : > { %4765 = vst [vmem:[%s10596_s18 + $0x378] sm:$0xff] %v9554_v20  ;;  %v5147_v60 = vadd.f32 %v5146_v48, %v2830_v57  ;;  %v2831_v51 = vmax.f32 %v1890_v47, 0.0  ;;  %v1892_v10 = vadd.f32 %v1891_v43, %v10579_v24  ;;  %v11623_v6 = vpop.f32.mrf.mxu1  ;;  %v2460_v34 = vadd.f32 %v11590_v61, %v10582_v25  ;;  %v9906_v61 = vld [vmem:[%s13821_s2 + $0x94] ss:$24 sps:$4 sm:$0xff]  }
 0x2ab   : > { %v1893_v40 = vpop.f32.mrf.mxu0  ;;  %4878 = vst [vmem:[%s10596_s18 + $0x700] sm:$0xff] %v9667_v21  ;;  %v9668_v8 = vpack.c.bf16 %v3057_v36, %v3056_v31  ;;  %v5465_v28 = vadd.f32 %v3057_v36, %v3055_v11  ;;  %v9904_v21 = vld [vmem:[%s13821_s2 + $0x90] ss:$24 sps:$4 sm:$0xff]   ;;  %6233 = vmatprep.subr.bf16.mxu1 %v9906_v61  ;;  %v2470_v58 = vadd.f32 %v11623_v6, %v10582_v25 }
 0x2ac   : > { %v9555_v7 = vpack.c.bf16 %v2831_v51, %v2830_v57  ;;  %v5184_v45 = vadd.f32 %v5183_v38, %v2831_v51  ;;  %v2832_v26 = vmax.f32 %v1892_v10, 0.0  ;;  %v1894_v35 = vadd.f32 %v1893_v40, %v10582_v25  ;;  %v11628_v30 = vpop.f32.mrf.mxu1  ;;  %6234 = vmatpush1.bf16.msra.mxu1 %v9904_v21 }
 0x2ad   : > { %v1897_v39 = vpop.f32.mrf.mxu0  ;;  %8862 = vmatmul.mubr.msk.bf16.gmra.mxu0 %vm901_vm1, %v829_v1  ;;  %v830_v1 = vpack.c.bf16 %v657_v44, %v656_v59  ;;  %4879 = vst [vmem:[%s10596_s18 + $0x708] sm:$0xff] %v9668_v8  ;;  %v2462_v40 = vadd.f32 %v11598_v19, %v10579_v24  ;;  %v11674_v59 = vld [vmem:[%s10464_s21 + $0x558] sm:$0xff]  ;;  %v831_v44 = vpack.c.bf16 %v11651_v53, %v11641_v42 }
 0x2ae   : > { %4766 = vst [vmem:[%s10596_s18 + $0x380] sm:$0xff] %v9555_v7  ;;  %v5148_v5 = vadd.f32 %v5147_v60, %v2832_v26  ;;  %v2833_v52 = vmax.f32 %v1894_v35, 0.0  ;;  %v1898_v48 = vadd.f32 %v1897_v39, %v10579_v24  ;;  %2145 = vmatprep.mubr.bf16.mxu0 %v13763_v3  ;;  %v11637_v0 = vpop.f32.mrf.mxu1  ;;  %v11662_v7 = vld [vmem:[%s10464_s21 + $0x540] sm:$0xff]  ;;  %v11694_v42 = vld [vmem:[%s10464_s21 + $0x578] sm:$0xff] }
 0x2af   : > { %v1899_v62 = vpop.f32.mrf.mxu0  ;;  %v2474_v6 = vadd.f32 %v11637_v0, %v10582_v25 }
 0x2b0   : > { %v9556_v20 = vpack.c.bf16 %v2833_v52, %v2832_v26  ;;  %v5185_v38 = vadd.f32 %v5184_v45, %v2833_v52  ;;  %v2834_v57 = vmax.f32 %v1898_v48, 0.0  ;;  %v1900_v47 = vadd.f32 %v1899_v62, %v10582_v25  ;;  %v11646_v60 = vpop.f32.mrf.mxu1  ;;  %v11668_v52 = vld [vmem:[%s10464_s21 + $0x548] sm:$0xff]  ;;  %v11671_v48 = vld [vmem:[%s10464_s21 + $0x550] sm:$0xff] }
 0x2b1   : > { %v1901_v43 = vpop.f32.mrf.mxu0  ;;  %v5429_v45 = vadd.f32 %v5428_v41, %v3058_v9  ;;  %v3059_v26 = vmax.f32 %v2460_v34, 0.0  ;;  %v3060_v34 = vmax.f32 %v2462_v40, 0.0 }
 0x2b2   : > { %4767 = vst [vmem:[%s10596_s18 + $0x388] sm:$0xff] %v9556_v20  ;;  %v5149_v11 = vadd.f32 %v5148_v5, %v2834_v57  ;;  %v2835_v51 = vmax.f32 %v1900_v47, 0.0  ;;  %v1902_v10 = vadd.f32 %v1901_v43, %v10579_v24  ;;  %v11664_v35 = vpop.f32.mrf.mxu1  ;;  %v11688_v43 = vld [vmem:[%s10464_s21 + $0x568] sm:$0xff] }
 0x2b3   : > { %v1903_v31 = vpop.f32.mrf.mxu0  ;;  %v9669_v62 = vpack.c.bf16 %v3059_v26, %v3058_v9  ;;  %v5466_v8 = vadd.f32 %v5465_v28, %v3059_v26  ;;  %v832_v28 = vpack.c.bf16 %v11668_v52, %v11662_v7 }
 0x2b4   : > { %v9557_v39 = vpack.c.bf16 %v2835_v51, %v2834_v57  ;;  %v5186_v36 = vadd.f32 %v5185_v38, %v2835_v51  ;;  %v2836_v19 = vmax.f32 %v1902_v10, 0.0  ;;  %v1904_v5 = vadd.f32 %v1903_v31, %v10582_v25  ;;  %v11682_v20 = vpop.f32.mrf.mxu1 }
 0x2b5   : > { %v1907_v41 = vpop.f32.mrf.mxu0  ;;  %8863 = vmatmul.mubr.msk.bf16.gmra.mxu0 %vm901_vm1, %v830_v1  ;;  %v11691_v1 = vld [vmem:[%s10464_s21 + $0x570] sm:$0xff]  ;;  %4880 = vst [vmem:[%s10596_s18 + $0x710] sm:$0xff] %v9669_v62  ;;  %v2464_v51 = vadd.f32 %v11611_v23, %v10582_v25  ;;  %v2468_v10 = vadd.f32 %v11617_v56, %v10579_v24 }
 0x2b6   : > { %4768 = vst [vmem:[%s10596_s18 + $0x390] sm:$0xff] %v9557_v39  ;;  %v5150_v38 = vadd.f32 %v5149_v11, %v2836_v19  ;;  %v2837_v57 = vmax.f32 %v1904_v5, 0.0  ;;  %v1908_v47 = vadd.f32 %v1907_v41, %v10579_v24  ;;  %2155 = vmatprep.mubr.bf16.mxu0 %v13763_v3  ;;  %v11705_v53 = vpop.f32.mrf.mxu1  ;;  %v5430_v41 = vadd.f32 %v5429_v45, %v3060_v34 }
 0x2b7   : > { %v1909_v9 = vpop.f32.mrf.mxu0  ;;  %v3061_v62 = vmax.f32 %v2464_v51, 0.0  ;;  %v2472_v5 = vadd.f32 %v11628_v30, %v10579_v24 }
 0x2b8   : > { %v9558_v21 = vpack.c.bf16 %v2837_v57, %v2836_v19  ;;  %v5187_v61 = vadd.f32 %v5186_v36, %v2837_v57  ;;  %v2838_v40 = vmax.f32 %v1908_v47, 0.0  ;;  %v1910_v31 = vadd.f32 %v1909_v9, %v10582_v25  ;;  %v2487_v23 = vpop.f32.mrf.mxu1 }
 0x2b9   : > { %v1911_v26 = vpop.f32.mrf.mxu0  ;;  %v3062_v36 = vmax.f32 %v2468_v10, 0.0  ;;  %v9670_v47 = vpack.c.bf16 %v3061_v62, %v3060_v34  ;;  %v5467_v9 = vadd.f32 %v5466_v8, %v3061_v62  ;;  %v3063_v8 = vmax.f32 %v2470_v58, 0.0 }
 0x2ba   : > { %4769 = vst [vmem:[%s10596_s18 + $0x398] sm:$0xff] %v9558_v21  ;;  %v5151_v12 = vadd.f32 %v5150_v38, %v2838_v40  ;;  %v2839_v56 = vmax.f32 %v1910_v31, 0.0  ;;  %v1912_v19 = vadd.f32 %v1911_v26, %v10579_v24  ;;  %v11718_v45 = vpop.f32.mrf.mxu1  ;;  %v3064_v10 = vmax.f32 %v2472_v5, 0.0 }
 0x2bb   : > { %v1913_v57 = vpop.f32.mrf.mxu0  ;;  %4881 = vst [vmem:[%s10596_s18 + $0x718] sm:$0xff] %v9670_v47  ;;  %v5431_v34 = vadd.f32 %v5430_v41, %v3062_v36  ;;  %v9671_v41 = vpack.c.bf16 %v3063_v8, %v3062_v36  ;;  %v5468_v58 = vadd.f32 %v5467_v9, %v3063_v8 }
 0x2bc   : > { %v9559_v51 = vpack.c.bf16 %v2839_v56, %v2838_v40  ;;  %v5188_v21 = vadd.f32 %v5187_v61, %v2839_v56  ;;  %v2840_v38 = vmax.f32 %v1912_v19, 0.0  ;;  %v1914_v31 = vadd.f32 %v1913_v57, %v10582_v25  ;;  %v11725_v26 = vpop.f32.mrf.mxu1 }
 0x2bd   : > { %v1917_v39 = vpop.f32.mrf.mxu0  ;;  %8864 = vmatmul.mubr.msk.bf16.gmra.mxu0 %vm901_vm1, %v831_v44  ;;  %v2478_v44 = vadd.f32 %v11646_v60, %v10579_v24  ;;  %v5432_v5 = vadd.f32 %v5431_v34, %v3064_v10  ;;  %v3065_v56 = vmax.f32 %v2474_v6, 0.0  ;;  %4882 = vst [vmem:[%s10596_s18 + $0x720] sm:$0xff] %v9671_v41  ;;  %v2480_v60 = vadd.f32 %v11664_v35, %v10582_v25 }
 0x2be   : > { %4770 = vst [vmem:[%s10596_s18 + $0x3a0] sm:$0xff] %v9559_v51  ;;  %v5152_v30 = vadd.f32 %v5151_v12, %v2840_v38  ;;  %v2841_v40 = vmax.f32 %v1914_v31, 0.0  ;;  %v1918_v61 = vadd.f32 %v1917_v39, %v10579_v24  ;;  %2165 = vmatprep.mubr.bf16.mxu0 %v13763_v3  ;;  %v2493_v0 = vpop.f32.mrf.mxu1 }
 0x2bf   : > { %v1919_v62 = vpop.f32.mrf.mxu0  ;;  %v9672_v39 = vpack.c.bf16 %v3065_v56, %v3064_v10  ;;  %v5469_v31 = vadd.f32 %v5468_v58, %v3065_v56  ;;  %v3066_v11 = vmax.f32 %v2478_v44, 0.0  ;;  %v9909_v10 = vld [vmem:[%s13821_s2 + $0x64] ss:$24 sps:$4 sm:$0xff]  }
 0x2c0   : > { %v9560_v19 = vpack.c.bf16 %v2841_v40, %v2840_v38  ;;  %v5189_v57 = vadd.f32 %v5188_v21, %v2841_v40  ;;  %v2842_v47 = vmax.f32 %v1918_v61, 0.0  ;;  %v1920_v12 = vadd.f32 %v1919_v62, %v10582_v25  ;;  %v2497_v36 = vpop.f32.mrf.mxu1  ;;  %v9907_v38 = vld [vmem:[%s13821_s2 + $0x60] ss:$24 sps:$4 sm:$0xff]   ;;  %6235 = vmatprep.subr.bf16.mxu1 %v9909_v10 }
 0x2c1   : > { %v1921_v51 = vpop.f32.mrf.mxu0  ;;  %v2482_v21 = vadd.f32 %v11682_v20, %v10579_v24  ;;  %4883 = vst [vmem:[%s10596_s18 + $0x728] sm:$0xff] %v9672_v39  ;;  %v5433_v35 = vadd.f32 %v5432_v5, %v3066_v11  ;;  %v3067_v40 = vmax.f32 %v2480_v60, 0.0  ;;  %v2488_v61 = vadd.f32 %v2487_v23, %v10579_v24  ;;  %6236 = vmatpush1.bf16.msra.mxu1 %v9907_v38 }
 0x2c2   : > { %4771 = vst [vmem:[%s10596_s18 + $0x3a8] sm:$0xff] %v9560_v19  ;;  %v5153_v9 = vadd.f32 %v5152_v30, %v2842_v47  ;;  %v2843_v34 = vmax.f32 %v1920_v12, 0.0  ;;  %v1922_v8 = vadd.f32 %v1921_v51, %v10579_v24  ;;  %v2484_v30 = vadd.f32 %v11705_v53, %v10582_v25  ;;  %v11750_v44 = vpop.f32.mrf.mxu1 }
 0x2c3   : > { %v1923_v6 = vpop.f32.mrf.mxu0  ;;  %v9673_v5 = vpack.c.bf16 %v3067_v40, %v3066_v11  ;;  %v5470_v53 = vadd.f32 %v5469_v31, %v3067_v40  ;;  %v3068_v19 = vmax.f32 %v2482_v21, 0.0  ;;  %v3070_v39 = vmax.f32 %v2488_v61, 0.0 }
 0x2c4   : > { %v9561_v20 = vpack.c.bf16 %v2843_v34, %v2842_v47  ;;  %v5190_v62 = vadd.f32 %v5189_v57, %v2843_v34  ;;  %v2844_v41 = vmax.f32 %v1922_v8, 0.0  ;;  %v1924_v58 = vadd.f32 %v1923_v6, %v10582_v25  ;;  %v2501_v23 = vpop.f32.mrf.mxu1 }
 0x2c5   : > { %v1927_v56 = vpop.f32.mrf.mxu0  ;;  %8865 = vmatmul.mubr.msk.bf16.gmra.mxu0 %vm901_vm1, %v832_v28  ;;  %v3069_v12 = vmax.f32 %v2484_v30, 0.0  ;;  %4884 = vst [vmem:[%s10596_s18 + $0x730] sm:$0xff] %v9673_v5  ;;  %v5434_v7 = vadd.f32 %v5433_v35, %v3068_v19  ;;  %v2490_v11 = vadd.f32 %v11718_v45, %v10582_v25  ;;  %v2492_v40 = vadd.f32 %v11725_v26, %v10579_v24 }
 0x2c6   : > { %4772 = vst [vmem:[%s10596_s18 + $0x3b0] sm:$0xff] %v9561_v20  ;;  %v5154_v47 = vadd.f32 %v5153_v9, %v2844_v41  ;;  %v2845_v57 = vmax.f32 %v1924_v58, 0.0  ;;  %v1928_v51 = vadd.f32 %v1927_v56, %v10579_v24  ;;  %2175 = vmatprep.mubr.bf16.mxu0 %v13763_v3  ;;  %v2503_v31 = vpop.f32.mrf.mxu1  ;;  %v2494_v35 = vadd.f32 %v2493_v0, %v10582_v25 }
 0x2c7   : > { %v1929_v60 = vpop.f32.mrf.mxu0  ;;  %v9674_v52 = vpack.c.bf16 %v3069_v12, %v3068_v19  ;;  %v5471_v28 = vadd.f32 %v5470_v53, %v3069_v12  ;;  %v5435_v10 = vadd.f32 %v5434_v7, %v3070_v39  ;;  %v3071_v6 = vmax.f32 %v2490_v11, 0.0 }
 0x2c8   : > { %v9562_v34 = vpack.c.bf16 %v2845_v57, %v2844_v41  ;;  %v5191_v8 = vadd.f32 %v5190_v62, %v2845_v57  ;;  %v2846_v9 = vmax.f32 %v1928_v51, 0.0  ;;  %v1930_v21 = vadd.f32 %v1929_v60, %v10582_v25  ;;  %v2507_v30 = vpop.f32.mrf.mxu1 }
 0x2c9   : > { %v1931_v38 = vpop.f32.mrf.mxu0  ;;  %4885 = vst [vmem:[%s10596_s18 + $0x738] sm:$0xff] %v9674_v52  ;;  %v2498_v62 = vadd.f32 %v2497_v36, %v10579_v24  ;;  %v9675_v58 = vpack.c.bf16 %v3071_v6, %v3070_v39  ;;  %v5472_v56 = vadd.f32 %v5471_v28, %v3071_v6  ;;  %v3072_v5 = vmax.f32 %v2492_v40, 0.0 }
 0x2ca   : > { %4773 = vst [vmem:[%s10596_s18 + $0x3b8] sm:$0xff] %v9562_v34  ;;  %v5155_v61 = vadd.f32 %v5154_v47, %v2846_v9  ;;  %v2847_v45 = vmax.f32 %v1930_v21, 0.0  ;;  %v1932_v20 = vadd.f32 %v1931_v38, %v10579_v24  ;;  %v3073_v53 = vmax.f32 %v2494_v35, 0.0  ;;  %v2509_v19 = vpop.f32.mrf.mxu1 }
 0x2cb   : > { %v1933_v41 = vpop.f32.mrf.mxu0  ;;  %v13822_v51 = vpack.c.bf16 %v11674_v59, %v11671_v48  ;;  %4886 = vst [vmem:[%s10596_s18 + $0x740] sm:$0xff] %v9675_v58  ;;  %v5436_v36 = vadd.f32 %v5435_v10, %v3072_v5  ;;  %v3074_v7 = vmax.f32 %v2498_v62, 0.0  ;;  %v2502_v59 = vadd.f32 %v2501_v23, %v10579_v24 }
 0x2cc   : > { %v9563_v12 = vpack.c.bf16 %v2847_v45, %v2846_v9  ;;  %v5192_v26 = vadd.f32 %v5191_v8, %v2847_v45  ;;  %v2848_v57 = vmax.f32 %v1932_v20, 0.0  ;;  %v1934_v0 = vadd.f32 %v1933_v41, %v10582_v25  ;;  %v2511_v52 = vpop.f32.mrf.mxu1 }
 0x2cd   : > { %v1937_v47 = vpop.f32.mrf.mxu0  ;;  %8866 = vmatmul.mubr.msk.bf16.gmra.mxu0 %vm901_vm1, %v13822_v51  ;;  %v9676_v39 = vpack.c.bf16 %v3073_v53, %v3072_v5  ;;  %v5473_v60 = vadd.f32 %v5472_v56, %v3073_v53  ;;  %v2500_v8 = vadd.f32 %v11750_v44, %v10582_v25  ;;  %v5437_v48 = vadd.f32 %v5436_v36, %v3074_v7 }
 0x2ce   : > { %4774 = vst [vmem:[%s10596_s18 + $0x3c0] sm:$0xff] %v9563_v12  ;;  %v5156_v28 = vadd.f32 %v5155_v61, %v2848_v57  ;;  %v2849_v11 = vmax.f32 %v1934_v0, 0.0  ;;  %v1938_v34 = vadd.f32 %v1937_v47, %v10579_v24  ;;  %2185 = vmatprep.mubr.bf16.mxu0 %v13763_v3  ;;  %v2504_v21 = vadd.f32 %v2503_v31, %v10582_v25  ;;  %v2513_v10 = vpop.f32.mrf.mxu1 }
 0x2cf   : > { %v1939_v9 = vpop.f32.mrf.mxu0  ;;  %4887 = vst [vmem:[%s10596_s18 + $0x748] sm:$0xff] %v9676_v39  ;;  %v2508_v38 = vadd.f32 %v2507_v30, %v10579_v24  ;;  %v3075_v20 = vmax.f32 %v2500_v8, 0.0  ;;  %v3076_v62 = vmax.f32 %v2502_v59, 0.0  ;;  %v2510_v30 = vadd.f32 %v2509_v19, %v10582_v25 }
 0x2d0   : > { %v9564_v6 = vpack.c.bf16 %v2849_v11, %v2848_v57  ;;  %v5193_v40 = vadd.f32 %v5192_v26, %v2849_v11  ;;  %v2850_v35 = vmax.f32 %v1938_v34, 0.0  ;;  %v1940_v61 = vadd.f32 %v1939_v9, %v10582_v25  ;;  %v2517_v58 = vpop.f32.mrf.mxu1 }
 0x2d1   : > { %v1941_v45 = vpop.f32.mrf.mxu0  ;;  %v3077_v44 = vmax.f32 %v2504_v21, 0.0  ;;  %v3078_v41 = vmax.f32 %v2508_v38, 0.0  ;;  %v9677_v53 = vpack.c.bf16 %v3075_v20, %v3074_v7  ;;  %v5474_v12 = vadd.f32 %v5473_v60, %v3075_v20  ;;  %v9912_v21 = vld [vmem:[%s13821_s2 + $0x34] ss:$24 sps:$4 sm:$0xff]  }
 0x2d2   : > { %4775 = vst [vmem:[%s10596_s18 + $0x3c8] sm:$0xff] %v9564_v6  ;;  %v5157_v56 = vadd.f32 %v5156_v28, %v2850_v35  ;;  %v2851_v23 = vmax.f32 %v1940_v61, 0.0  ;;  %v1942_v31 = vadd.f32 %v1941_v45, %v10579_v24  ;;  %v5438_v26 = vadd.f32 %v5437_v48, %v3076_v62  ;;  %v2519_v0 = vpop.f32.mrf.mxu1  ;;  %6237 = vmatprep.subr.bf16.mxu1 %v9912_v21 }
 0x2d3   : > { %v1943_v5 = vpop.f32.mrf.mxu0  ;;  %v9678_v57 = vpack.c.bf16 %v3077_v44, %v3076_v62  ;;  %v13823_v11 = vpack.c.bf16 %v11688_v43, %v11680_v17  ;;  %4888 = vst [vmem:[%s10596_s18 + $0x750] sm:$0xff] %v9677_v53  ;;  %v5475_v19 = vadd.f32 %v5474_v12, %v3077_v44  ;;  %v3079_v60 = vmax.f32 %v2510_v30, 0.0  ;;  %v9910_v43 = vld [vmem:[%s13821_s2 + $0x30] ss:$24 sps:$4 sm:$0xff]  }
 0x2d4   : > { %v9565_v47 = vpack.c.bf16 %v2851_v23, %v2850_v35  ;;  %v5194_v51 = vadd.f32 %v5193_v40, %v2851_v23  ;;  %v2852_v36 = vmax.f32 %v1942_v31, 0.0  ;;  %v1944_v39 = vadd.f32 %v1943_v5, %v10582_v25  ;;  %v2521_v8 = vpop.f32.mrf.mxu1  ;;  %6238 = vmatpush1.bf16.msra.mxu1 %v9910_v43 }
 0x2d5   : > { %v1947_v28 = vpop.f32.mrf.mxu0  ;;  %8867 = vmatmul.mubr.msk.bf16.gmra.mxu0 %vm901_vm1, %v13823_v11  ;;  %4889 = vst [vmem:[%s10596_s18 + $0x758] sm:$0xff] %v9678_v57  ;;  %v5439_v7 = vadd.f32 %v5438_v26, %v3078_v41  ;;  %v2512_v34 = vadd.f32 %v2511_v52, %v10579_v24  ;;  %v2514_v17 = vadd.f32 %v2513_v10, %v10582_v25 }
 0x2d6   : > { %4776 = vst [vmem:[%s10596_s18 + $0x3d0] sm:$0xff] %v9565_v47  ;;  %v5158_v9 = vadd.f32 %v5157_v56, %v2852_v36  ;;  %v2853_v48 = vmax.f32 %v1944_v39, 0.0  ;;  %v1948_v59 = vadd.f32 %v1947_v28, %v10579_v24  ;;  %2195 = vmatprep.mubr.bf16.mxu0 %v13763_v3  ;;  %v9679_v38 = vpack.c.bf16 %v3079_v60, %v3078_v41  ;;  %v2523_v61 = vpop.f32.mrf.mxu1 }
 0x2d7   : > { %v1949_v52 = vpop.f32.mrf.mxu0  ;;  %v5476_v6 = vadd.f32 %v5475_v19, %v3079_v60  ;;  %v3080_v40 = vmax.f32 %v2512_v34, 0.0  ;;  %v2518_v35 = vadd.f32 %v2517_v58, %v10579_v24  ;;  %v3081_v23 = vmax.f32 %v2514_v17, 0.0  ;;  %v669_v60 = vld [vmem:[%s10464_s21 + $0x588] sm:$0xff] }
 0x2d8   : > { %v9566_v45 = vpack.c.bf16 %v2853_v48, %v2852_v36  ;;  %v5195_v20 = vadd.f32 %v5194_v51, %v2853_v48  ;;  %v2854_v62 = vmax.f32 %v1948_v59, 0.0  ;;  %v1950_v10 = vadd.f32 %v1949_v52, %v10582_v25  ;;  %4890 = vst [vmem:[%s10596_s18 + $0x760] sm:$0xff] %v9679_v38  ;;  %v2527_v30 = vpop.f32.mrf.mxu1 }
 0x2d9   : > { %v1951_v44 = vpop.f32.mrf.mxu0  ;;  %v5440_v56 = vadd.f32 %v5439_v7, %v3080_v40  ;;  %v3082_v31 = vmax.f32 %v2518_v35, 0.0  ;;  %v2520_v41 = vadd.f32 %v2519_v0, %v10582_v25  ;;  %v2522_v12 = vadd.f32 %v2521_v8, %v10579_v24  ;;  %v668_v7 = vld [vmem:[%s10464_s21 + $0x580] sm:$0xff] }
 0x2da   : > { %4777 = vst [vmem:[%s10596_s18 + $0x3d8] sm:$0xff] %v9566_v45  ;;  %v5159_v58 = vadd.f32 %v5158_v9, %v2854_v62  ;;  %v2855_v5 = vmax.f32 %v1950_v10, 0.0  ;;  %v1952_v53 = vadd.f32 %v1951_v44, %v10579_v24  ;;  %v9680_v57 = vpack.c.bf16 %v3081_v23, %v3080_v40  ;;  %v2529_v39 = vpop.f32.mrf.mxu1 }
 0x2db   : > { %v1953_v26 = vpop.f32.mrf.mxu0  ;;  %v5477_v47 = vadd.f32 %v5476_v6, %v3081_v23  ;;  %v5441_v51 = vadd.f32 %v5440_v56, %v3082_v31  ;;  %v3083_v36 = vmax.f32 %v2520_v41, 0.0  ;;  %v13824_v9 = vpack.c.bf16 %v11694_v42, %v11691_v1 }
 0x2dc   : > { %v9567_v28 = vpack.c.bf16 %v2855_v5, %v2854_v62  ;;  %v5196_v0 = vadd.f32 %v5195_v20, %v2855_v5  ;;  %v2856_v11 = vmax.f32 %v1952_v53, 0.0  ;;  %v1954_v19 = vadd.f32 %v1953_v26, %v10582_v25  ;;  %4891 = vst [vmem:[%s10596_s18 + $0x768] sm:$0xff] %v9680_v57  ;;  %v2531_v43 = vpop.f32.mrf.mxu1 }
 0x2dd   : > { %v1957_v34 = vpop.f32.mrf.mxu0  ;;  %8868 = vmatmul.mubr.msk.bf16.gmra.mxu0 %vm901_vm1, %v13824_v9  ;;  %v9681_v8 = vpack.c.bf16 %v3083_v36, %v3082_v31  ;;  %v5478_v48 = vadd.f32 %v5477_v47, %v3083_v36  ;;  %v3084_v59 = vmax.f32 %v2522_v12, 0.0  ;;  %v2524_v17 = vadd.f32 %v2523_v61, %v10582_v25 }
 0x2de   : > { %4778 = vst [vmem:[%s10596_s18 + $0x3e0] sm:$0xff] %v9567_v28  ;;  %v5160_v21 = vadd.f32 %v5159_v58, %v2856_v11  ;;  %v2857_v52 = vmax.f32 %v1954_v19, 0.0  ;;  %v1958_v38 = vadd.f32 %v1957_v34, %v10579_v24  ;;  %2205 = vmatprep.mubr.bf16.mxu0 %v13763_v3  ;;  %v2528_v6 = vadd.f32 %v2527_v30, %v10579_v24  ;;  %v2533_v20 = vpop.f32.mrf.mxu1  ;;  %v670_v34 = vld [vmem:[%s10464_s21 + $0x590] sm:$0xff] }
 0x2df   : > { %v1959_v1 = vpop.f32.mrf.mxu0  ;;  %v836_v42 = vpack.c.bf16 %v669_v60, %v668_v7  ;;  %4892 = vst [vmem:[%s10596_s18 + $0x770] sm:$0xff] %v9681_v8  ;;  %v5442_v40 = vadd.f32 %v5441_v51, %v3084_v59  ;;  %v3085_v35 = vmax.f32 %v2524_v17, 0.0  ;;  %v2530_v45 = vadd.f32 %v2529_v39, %v10582_v25 }
 0x2e0   : > { %v9568_v61 = vpack.c.bf16 %v2857_v52, %v2856_v11  ;;  %v5197_v62 = vadd.f32 %v5196_v0, %v2857_v52  ;;  %v2858_v10 = vmax.f32 %v1958_v38, 0.0  ;;  %v1960_v44 = vadd.f32 %v1959_v1, %v10582_v25  ;;  %v2537_v58 = vpop.f32.mrf.mxu1  ;;  %v9913_v52 = vld [vmem:[%s13821_s2] ss:$24 sps:$4 sm:$0xff]   ;;  %v9915_v38 = vld [vmem:[%s13821_s2 + $0x4] ss:$24 sps:$4 sm:$0xff]  }
 0x2e1   : > { %v1961_v56 = vpop.f32.mrf.mxu0  ;;  %v9682_v23 = vpack.c.bf16 %v3085_v35, %v3084_v59  ;;  %v5479_v31 = vadd.f32 %v5478_v48, %v3085_v35  ;;  %v3086_v41 = vmax.f32 %v2528_v6, 0.0  ;;  %v3087_v30 = vmax.f32 %v2530_v45, 0.0  ;;  %6239 = vmatprep.subr.bf16.mxu1 %v9915_v38 }
 0x2e2   : > { %4779 = vst [vmem:[%s10596_s18 + $0x3e8] sm:$0xff] %v9568_v61  ;;  %v5161_v5 = vadd.f32 %v5160_v21, %v2858_v10  ;;  %v2859_v53 = vmax.f32 %v1960_v44, 0.0  ;;  %v1962_v12 = vadd.f32 %v1961_v56, %v10579_v24  ;;  %v2532_v26 = vadd.f32 %v2531_v43, %v10579_v24  ;;  %v11836_v28 = vpop.f32.mrf.mxu1  ;;  %v671_v43 = vld [vmem:[%s10464_s21 + $0x598] sm:$0xff]  ;;  %6240 = vmatpush1.bf16.msra.mxu1 %v9913_v52 }
 0x2e3   : > { %v1963_v57 = vpop.f32.mrf.mxu0  ;;  %4893 = vst [vmem:[%s10596_s18 + $0x778] sm:$0xff] %v9682_v23  ;;  %v5443_v47 = vadd.f32 %v5442_v40, %v3086_v41  ;;  %v9683_v51 = vpack.c.bf16 %v3087_v30, %v3086_v41  ;;  %v5480_v36 = vadd.f32 %v5479_v31, %v3087_v30  ;;  %v2534_v39 = vadd.f32 %v2533_v20, %v10582_v25 }
 0x2e4   : > { %v9569_v0 = vpack.c.bf16 %v2859_v53, %v2858_v10  ;;  %v5198_v11 = vadd.f32 %v5197_v62, %v2859_v53  ;;  %v2860_v19 = vmax.f32 %v1962_v12, 0.0  ;;  %v1964_v7 = vadd.f32 %v1963_v57, %v10582_v25  ;;  %v11842_v48 = vpop.f32.mrf.mxu1 }
 0x2e5   : > { %v1967_v60 = vpop.f32.mrf.mxu0  ;;  %8869 = vmatmul.mubr.msk.bf16.gmra.mxu0 %vm901_vm1, %v836_v42  ;;  %4894 = vst [vmem:[%s10596_s18 + $0x780] sm:$0xff] %v9683_v51  ;;  %v3088_v9 = vmax.f32 %v2532_v26, 0.0  ;;  %v3089_v8 = vmax.f32 %v2534_v39, 0.0  ;;  %v11850_v21 = vadd.f32 %v2537_v58, %v10579_v24  ;;  %v837_v44 = vpack.c.bf16 %v671_v43, %v670_v34  ;;  %v672_v39 = vld [vmem:[%s10464_s21 + $0x5a0] sm:$0xff] }
 0x2e6   : > { %4780 = vst [vmem:[%s10596_s18 + $0x3f0] sm:$0xff] %v9569_v0  ;;  %v11845_v59 = vadd.f32 %v5161_v5, %v2860_v19  ;;  %v2861_v17 = vmax.f32 %v1964_v7, 0.0  ;;  %2215 = vmatprep.mubr.bf16.mxu0 %v13763_v3  ;;  %v1968_v6 = vadd.f32 %v1967_v60, %v10579_v24  ;;  %v11861_v45 = vpop.f32.mrf.mxu1  ;;  %v673_v0 = vld [vmem:[%s10464_s21 + $0x5a8] sm:$0xff] }
 0x2e7   : > { %v1969_v1 = vpop.f32.mrf.mxu0  ;;  %v5444_v42 = vadd.f32 %v5443_v47, %v3088_v9  ;;  %v9684_v40 = vpack.c.bf16 %v3089_v8, %v3088_v9  ;;  %v11859_v35 = vadd.f32 %v5480_v36, %v3089_v8  ;;  %v3090_v56 = vmax.f32 %v11850_v21, 0.0 }
 0x2e8   : > { %v9570_v20 = vpack.c.bf16 %v2861_v17, %v2860_v19  ;;  %v11863_v61 = vadd.f32 %v5198_v11, %v2861_v17  ;;  %v1970_v62 = vadd.f32 %v1969_v1, %v10582_v25  ;;  %v2862_v31 = vmax.f32 %v1968_v6, 0.0  ;;  %v11874_v5 = vpop.f32.mrf.mxu1 }
 0x2e9   : > { %v1971_v10 = vpop.f32.mrf.mxu0  ;;  %4895 = vst [vmem:[%s10596_s18 + $0x788] sm:$0xff] %v9684_v40  ;;  %v11872_v58 = vadd.f32 %v5444_v42, %v3090_v56  ;;  %v838_v43 = vpack.c.bf16 %v673_v0, %v672_v39  ;;  %v11910_v39 = vld [vmem:[%s10464_s21 + $0x5d0] sm:$0xff]  ;;  %v11913_v0 = vld [vmem:[%s10464_s21 + $0x5d8] sm:$0xff] }
 0x2ea   : > { %4781 = vst [vmem:[%s10596_s18 + $0x3f8] sm:$0xff] %v9570_v20  ;;  %v1972_v23 = vadd.f32 %v1971_v10, %v10579_v24  ;;  %v2863_v41 = vmax.f32 %v1970_v62, 0.0  ;;  %v11878_v47 = vpop.f32.mrf.mxu1 }
 0x2eb   : > { %v1973_v30 = vpop.f32.mrf.mxu0 }
 0x2ec   : > { %v2864_v53 = vmax.f32 %v1972_v23, 0.0  ;;  %v1974_v12 = vadd.f32 %v1973_v30, %v10582_v25  ;;  %v9571_v26 = vpack.c.bf16 %v2863_v41, %v2862_v31  ;;  %v11885_v7 = vpop.f32.mrf.mxu1 }
 0x2ed   : > { %v1977_v57 = vpop.f32.mrf.mxu0  ;;  %8870 = vmatmul.mubr.msk.bf16.gmra.mxu0 %vm901_vm1, %v837_v44 }
 0x2ee   : > { %v5206_v51 = vadd.f32 %v2864_v53, %v2862_v31  ;;  %v2865_v36 = vmax.f32 %v1974_v12, 0.0  ;;  %2225 = vmatprep.mubr.bf16.mxu0 %v13763_v3  ;;  %4782 = vst [vmem:[%s10596_s18 + $0x400] sm:$0xff] %v9571_v26  ;;  %v1978_v11 = vadd.f32 %v1977_v57, %v10579_v24  ;;  %v11888_v52 = vpop.f32.mrf.mxu1  ;;  %v675_v12 = vld [vmem:[%s10464_s21 + $0x5b8] sm:$0xff]  ;;  %v11902_v26 = vld [vmem:[%s10464_s21 + $0x5c0] sm:$0xff] }
 0x2ef   : > { %v1979_v19 = vpop.f32.mrf.mxu0 }
 0x2f0   : > { %v9572_v60 = vpack.c.bf16 %v2865_v36, %v2864_v53  ;;  %v5243_v34 = vadd.f32 %v2865_v36, %v2863_v41  ;;  %v2866_v9 = vmax.f32 %v1978_v11, 0.0  ;;  %v1980_v8 = vadd.f32 %v1979_v19, %v10582_v25  ;;  %v674_v53 = vld [vmem:[%s10464_s21 + $0x5b0] sm:$0xff]  ;;  %v11907_v36 = vld [vmem:[%s10464_s21 + $0x5c8] sm:$0xff]  ;;  %s10268_s21 = sshll.u32 %s10329_s1, 4  ;;  %s10269_s21 = int_to_ptr.vmem [resolvable:$false] %s10268_s21 }
 0x2f1   : > { %v1981_v17 = vpop.f32.mrf.mxu0  ;;  %v11892_v40 = vpop.f32.mrf.mxu1  ;;  %s10270_s22 = scalar_lea.vmem %s10269_s21, 65536  ;;  %p10271_p0 = scmp.lt.s32.totalorder %s13684_s25, %s10269_s21 }
 0x2f2   : > { %4783 = vst [vmem:[%s10596_s18 + $0x408] sm:$0xff] %v9572_v60  ;;  %v1982_v38 = vadd.f32 %v1981_v17, %v10579_v24  ;;  %v5207_v6 = vadd.f32 %v5206_v51, %v2866_v9  ;;  %v2867_v1 = vmax.f32 %v1980_v8, 0.0  ;;  %v839_v17 = vpack.c.bf16 %v675_v12, %v674_v53  ;;  %p10272_p1 = scmp.lt.s32.totalorder %s10270_s22, %s10264_s28 }
 0x2f3   : > { %v1983_v42 = vpop.f32.mrf.mxu0  ;;  %v11896_v31 = vpop.f32.mrf.mxu1  ;;  %v2544_v53 = vadd.f32 %v11861_v45, %v10582_v25 }
 0x2f4   : > { %v2868_v20 = vmax.f32 %v1982_v38, 0.0  ;;  %v1984_v62 = vadd.f32 %v1983_v42, %v10582_v25  ;;  %v9573_v10 = vpack.c.bf16 %v2867_v1, %v2866_v9  ;;  %v5244_v44 = vadd.f32 %v5243_v34, %v2867_v1  ;;  %p10273_p2 = por %p10272_p1, %p10271_p0 }
 0x2f5   : > { %v1987_v23 = vpop.f32.mrf.mxu0  ;;  %8871 = vmatmul.mubr.msk.bf16.gmra.mxu0 %vm901_vm1, %v838_v43  ;;  %v11915_v11 = vpop.f32.mrf.mxu1  ;;  %v2540_v42 = vadd.f32 %v11836_v28, %v10582_v25  ;;  %v3093_v1 = vmax.f32 %v2544_v53, 0.0 }
 0x2f6   : > { %v5208_v41 = vadd.f32 %v5207_v6, %v2868_v20  ;;  %v2869_v30 = vmax.f32 %v1984_v62, 0.0  ;;  %2235 = vmatprep.mubr.bf16.mxu0 %v13763_v3  ;;  %4784 = vst [vmem:[%s10596_s18 + $0x410] sm:$0xff] %v9573_v10  ;;  %v1988_v57 = vadd.f32 %v1987_v23, %v10579_v24  ;;  %v9918_v62 = vld [vmem:[%s13821_s2 + $0x2d4] ss:$24 sps:$4 sm:$0xff]   ;;  %p10274_p3 = pnand %p10273_p2, %p10267_p13 }
 0x2f7   : > { %v1989_v51 = vpop.f32.mrf.mxu0  ;;  %v11918_v43 = vpop.f32.mrf.mxu1  ;;  %6241 = vmatprep.subr.bf16.mxu1 %v9918_v62 }
 0x2f8   : > { %v9574_v19 = vpack.c.bf16 %v2869_v30, %v2868_v20  ;;  %v5245_v60 = vadd.f32 %v5244_v44, %v2869_v30  ;;  %v2870_v34 = vmax.f32 %v1988_v57, 0.0  ;;  %v1990_v9 = vadd.f32 %v1989_v51, %v10582_v25  ;;  %v9916_v20 = vld [vmem:[%s13821_s2 + $0x2d0] ss:$24 sps:$4 sm:$0xff]  }
 0x2f9   : > { %v1991_v8 = vpop.f32.mrf.mxu0  ;;  %v2542_v30 = vadd.f32 %v11842_v48, %v10579_v24  ;;  %v11938_v12 = vpop.f32.mrf.mxu1  ;;  %v3091_v51 = vmax.f32 %v2540_v42, 0.0  ;;  %6242 = vmatpush2.bf16.msra.mxu1 %v9916_v20 }
 0x2fa   : > { %4785 = vst [vmem:[%s10596_s18 + $0x418] sm:$0xff] %v9574_v19  ;;  %v1992_v38 = vadd.f32 %v1991_v8, %v10579_v24  ;;  %v5209_v10 = vadd.f32 %v5208_v41, %v2870_v34  ;;  %v2871_v44 = vmax.f32 %v1990_v9, 0.0  ;;  %v2548_v19 = vadd.f32 %v11874_v5, %v10579_v24 }
 0x2fb   : > { %v1993_v23 = vpop.f32.mrf.mxu0  ;;  %v3092_v48 = vmax.f32 %v2542_v30, 0.0  ;;  %v11944_v45 = vpop.f32.mrf.mxu1  ;;  %v9685_v5 = vpack.c.bf16 %v3091_v51, %v3090_v56 }
 0x2fc   : > { %v2872_v28 = vmax.f32 %v1992_v38, 0.0  ;;  %v1994_v57 = vadd.f32 %v1993_v23, %v10582_v25  ;;  %v9575_v41 = vpack.c.bf16 %v2871_v44, %v2870_v34  ;;  %v5246_v9 = vadd.f32 %v5245_v60, %v2871_v44 }
 0x2fd   : > { %v1997_v8 = vpop.f32.mrf.mxu0  ;;  %8872 = vmatmul.mubr.msk.bf16.gmra.mxu0 %vm901_vm1, %v839_v17  ;;  %v5482_v34 = vadd.f32 %v11859_v35, %v3091_v51  ;;  %v5446_v17 = vadd.f32 %v11872_v58, %v3092_v48  ;;  %v9686_v20 = vpack.c.bf16 %v3093_v1, %v3092_v48  ;;  %v3094_v62 = vmax.f32 %v2548_v19, 0.0  ;;  %4896 = vst [vmem:[%s10596_s18 + $0x790] sm:$0xff] %v9685_v5 }
 0x2fe   : > { %v5210_v6 = vadd.f32 %v5209_v10, %v2872_v28  ;;  %v2873_v38 = vmax.f32 %v1994_v57, 0.0  ;;  %v1998_v42 = vadd.f32 %v1997_v8, %v10579_v24  ;;  %2245 = vmatprep.mubr.bf16.mxu0 %v13763_v3  ;;  %4786 = vst [vmem:[%s10596_s18 + $0x420] sm:$0xff] %v9575_v41  ;;  %v11953_v10 = vpop.f32.mrf.mxu1  ;;  %v2550_v35 = vadd.f32 %v11878_v47, %v10582_v25 }
 0x2ff   : > { %v1999_v60 = vpop.f32.mrf.mxu0  ;;  %4897 = vst [vmem:[%s10596_s18 + $0x798] sm:$0xff] %v9686_v20  ;;  %v5483_v21 = vadd.f32 %v5482_v34, %v3093_v1  ;;  %v5447_v56 = vadd.f32 %v5446_v17, %v3094_v62  ;;  %v2552_v58 = vadd.f32 %v11885_v7, %v10579_v24  ;;  %v2558_v47 = vadd.f32 %v11892_v40, %v10579_v24 }
 0x300   : > { %v9576_v44 = vpack.c.bf16 %v2873_v38, %v2872_v28  ;;  %v5247_v23 = vadd.f32 %v5246_v9, %v2873_v38  ;;  %v2874_v30 = vmax.f32 %v1998_v42, 0.0  ;;  %v2000_v53 = vadd.f32 %v1999_v60, %v10582_v25  ;;  %v11962_v51 = vpop.f32.mrf.mxu1 }
 0x301   : > { %v2001_v57 = vpop.f32.mrf.mxu0  ;;  %v2554_v9 = vadd.f32 %v11888_v52, %v10582_v25  ;;  %v3095_v48 = vmax.f32 %v2550_v35, 0.0  ;;  %v3096_v1 = vmax.f32 %v2552_v58, 0.0  ;;  %v2560_v7 = vadd.f32 %v11896_v31, %v10582_v25 }
 0x302   : > { %4787 = vst [vmem:[%s10596_s18 + $0x428] sm:$0xff] %v9576_v44  ;;  %v5211_v19 = vadd.f32 %v5210_v6, %v2874_v30  ;;  %v2875_v28 = vmax.f32 %v2000_v53, 0.0  ;;  %v2002_v41 = vadd.f32 %v2001_v57, %v10579_v24  ;;  %v11972_v38 = vpop.f32.mrf.mxu1  ;;  %v13825_v52 = vpack.c.bf16 %v11907_v36, %v11902_v26  ;;  %v9919_v26 = vld [vmem:[%s13821_s2 + $0x2a0] ss:$24 sps:$4 sm:$0xff]   ;;  %v9921_v36 = vld [vmem:[%s13821_s2 + $0x2a4] ss:$24 sps:$4 sm:$0xff]  }
 0x303   : > { %v2003_v8 = vpop.f32.mrf.mxu0  ;;  %v9687_v17 = vpack.c.bf16 %v3095_v48, %v3094_v62  ;;  %v5484_v20 = vadd.f32 %v5483_v21, %v3095_v48  ;;  %v5448_v40 = vadd.f32 %v5447_v56, %v3096_v1  ;;  %v3097_v44 = vmax.f32 %v2554_v9, 0.0  ;;  %6243 = vmatprep.subr.bf16.mxu1 %v9921_v36 }
 0x304   : > { %v9577_v42 = vpack.c.bf16 %v2875_v28, %v2874_v30  ;;  %v5248_v6 = vadd.f32 %v5247_v23, %v2875_v28  ;;  %v2876_v5 = vmax.f32 %v2002_v41, 0.0  ;;  %v2004_v60 = vadd.f32 %v2003_v8, %v10582_v25  ;;  %v11979_v53 = vpop.f32.mrf.mxu1  ;;  %6244 = vmatpush2.bf16.msra.mxu1 %v9919_v26 }
 0x305   : > { %v2007_v34 = vpop.f32.mrf.mxu0  ;;  %8873 = vmatmul.mubr.msk.bf16.gmra.mxu0 %vm901_vm1, %v13825_v52  ;;  %v3098_v57 = vmax.f32 %v2558_v47, 0.0  ;;  %4898 = vst [vmem:[%s10596_s18 + $0x7a0] sm:$0xff] %v9687_v17  ;;  %v9688_v21 = vpack.c.bf16 %v3097_v44, %v3096_v1  ;;  %v5485_v56 = vadd.f32 %v5484_v20, %v3097_v44  ;;  %v3099_v35 = vmax.f32 %v2560_v7, 0.0 }
 0x306   : > { %4788 = vst [vmem:[%s10596_s18 + $0x430] sm:$0xff] %v9577_v42  ;;  %v5212_v31 = vadd.f32 %v5211_v19, %v2876_v5  ;;  %v2877_v30 = vmax.f32 %v2004_v60, 0.0  ;;  %v2008_v23 = vadd.f32 %v2007_v34, %v10579_v24  ;;  %2255 = vmatprep.mubr.bf16.mxu0 %v13763_v3  ;;  %v2562_v58 = vadd.f32 %v11915_v11, %v10579_v24  ;;  %v11993_v19 = vpop.f32.mrf.mxu1 }
 0x307   : > { %v2009_v62 = vpop.f32.mrf.mxu0  ;;  %4899 = vst [vmem:[%s10596_s18 + $0x7a8] sm:$0xff] %v9688_v21  ;;  %v5449_v47 = vadd.f32 %v5448_v40, %v3098_v57  ;;  %v9689_v42 = vpack.c.bf16 %v3099_v35, %v3098_v57  ;;  %v5486_v1 = vadd.f32 %v5485_v56, %v3099_v35  ;;  %v2568_v20 = vadd.f32 %v11938_v12, %v10579_v24 }
 0x308   : > { %v9578_v28 = vpack.c.bf16 %v2877_v30, %v2876_v5  ;;  %v5249_v41 = vadd.f32 %v5248_v6, %v2877_v30  ;;  %v2878_v9 = vmax.f32 %v2008_v23, 0.0  ;;  %v2010_v8 = vadd.f32 %v2009_v62, %v10582_v25  ;;  %v11997_v7 = vpop.f32.mrf.mxu1 }
 0x309   : > { %v2011_v48 = vpop.f32.mrf.mxu0  ;;  %v3100_v60 = vmax.f32 %v2562_v58, 0.0  ;;  %v2564_v6 = vadd.f32 %v11918_v43, %v10582_v25  ;;  %4900 = vst [vmem:[%s10596_s18 + $0x7b0] sm:$0xff] %v9689_v42  ;;  %v2570_v40 = vadd.f32 %v11944_v45, %v10582_v25  ;;  %v2572_v44 = vadd.f32 %v11953_v10, %v10579_v24 }
 0x30a   : > { %4789 = vst [vmem:[%s10596_s18 + $0x438] sm:$0xff] %v9578_v28  ;;  %v5213_v11 = vadd.f32 %v5212_v31, %v2878_v9  ;;  %v2879_v34 = vmax.f32 %v2010_v8, 0.0  ;;  %v2012_v5 = vadd.f32 %v2011_v48, %v10579_v24  ;;  %v2587_v31 = vpop.f32.mrf.mxu1  ;;  %v13826_v36 = vpack.c.bf16 %v11913_v0, %v11910_v39 }
 0x30b   : > { %v2013_v52 = vpop.f32.mrf.mxu0  ;;  %v5450_v17 = vadd.f32 %v5449_v47, %v3100_v60  ;;  %v3101_v62 = vmax.f32 %v2564_v6, 0.0  ;;  %v3102_v12 = vmax.f32 %v2568_v20, 0.0  ;;  %v3103_v21 = vmax.f32 %v2570_v40, 0.0 }
 0x30c   : > { %v9579_v30 = vpack.c.bf16 %v2879_v34, %v2878_v9  ;;  %v5250_v23 = vadd.f32 %v5249_v41, %v2879_v34  ;;  %v2880_v57 = vmax.f32 %v2012_v5, 0.0  ;;  %v2014_v26 = vadd.f32 %v2013_v52, %v10582_v25  ;;  %v12015_v45 = vpop.f32.mrf.mxu1 }
 0x30d   : > { %v2017_v43 = vpop.f32.mrf.mxu0  ;;  %8874 = vmatmul.mubr.msk.bf16.gmra.mxu0 %vm901_vm1, %v13826_v36  ;;  %v3104_v56 = vmax.f32 %v2572_v44, 0.0  ;;  %v2574_v28 = vadd.f32 %v11962_v51, %v10582_v25  ;;  %v9690_v39 = vpack.c.bf16 %v3101_v62, %v3100_v60  ;;  %v5487_v0 = vadd.f32 %v5486_v1, %v3101_v62 }
 0x30e   : > { %4790 = vst [vmem:[%s10596_s18 + $0x440] sm:$0xff] %v9579_v30  ;;  %v5214_v10 = vadd.f32 %v5213_v11, %v2880_v57  ;;  %v2881_v35 = vmax.f32 %v2014_v26, 0.0  ;;  %v2018_v58 = vadd.f32 %v2017_v43, %v10579_v24  ;;  %v5451_v9 = vadd.f32 %v5450_v17, %v3102_v12  ;;  %v2591_v48 = vpop.f32.mrf.mxu1 }
 0x30f   : > { %v2019_v41 = vpop.f32.mrf.mxu0  ;;  %v9691_v8 = vpack.c.bf16 %v3103_v21, %v3102_v12  ;;  %4901 = vst [vmem:[%s10596_s18 + $0x7b8] sm:$0xff] %v9690_v39  ;;  %v5488_v6 = vadd.f32 %v5487_v0, %v3103_v21  ;;  %v3105_v20 = vmax.f32 %v2574_v28, 0.0  ;;  %v2578_v51 = vadd.f32 %v11972_v38, %v10579_v24 }
 0x310   : > { %v9580_v47 = vpack.c.bf16 %v2881_v35, %v2880_v57  ;;  %v5251_v42 = vadd.f32 %v5250_v23, %v2881_v35  ;;  %v2882_v34 = vmax.f32 %v2018_v58, 0.0  ;;  %v2020_v5 = vadd.f32 %v2019_v41, %v10582_v25  ;;  %v2593_v60 = vpop.f32.mrf.mxu1 }
 0x311   : > { %v2021_v11 = vpop.f32.mrf.mxu0  ;;  %4902 = vst [vmem:[%s10596_s18 + $0x7c0] sm:$0xff] %v9691_v8  ;;  %v5452_v52 = vadd.f32 %v5451_v9, %v3104_v56  ;;  %v2580_v44 = vadd.f32 %v11979_v53, %v10582_v25  ;;  %v9692_v23 = vpack.c.bf16 %v3105_v20, %v3104_v56  ;;  %v5489_v57 = vadd.f32 %v5488_v6, %v3105_v20 }
 0x312   : > { %4791 = vst [vmem:[%s10596_s18 + $0x448] sm:$0xff] %v9580_v47  ;;  %v5215_v1 = vadd.f32 %v5214_v10, %v2882_v34  ;;  %v2883_v17 = vmax.f32 %v2020_v5, 0.0  ;;  %v2022_v40 = vadd.f32 %v2021_v11, %v10579_v24  ;;  %v3106_v26 = vmax.f32 %v2578_v51, 0.0  ;;  %v2597_v36 = vpop.f32.mrf.mxu1 }
 0x313   : > { %v2023_v30 = vpop.f32.mrf.mxu0  ;;  %v2582_v43 = vadd.f32 %v11993_v19, %v10579_v24  ;;  %4903 = vst [vmem:[%s10596_s18 + $0x7c8] sm:$0xff] %v9692_v23  ;;  %v3107_v58 = vmax.f32 %v2580_v44, 0.0  ;;  %v2584_v53 = vadd.f32 %v11997_v7, %v10582_v25  ;;  %v2588_v39 = vadd.f32 %v2587_v31, %v10579_v24 }
 0x314   : > { %v9581_v38 = vpack.c.bf16 %v2883_v17, %v2882_v34  ;;  %v5252_v62 = vadd.f32 %v5251_v42, %v2883_v17  ;;  %v2884_v12 = vmax.f32 %v2022_v40, 0.0  ;;  %v2024_v21 = vadd.f32 %v2023_v30, %v10582_v25  ;;  %v2599_v0 = vpop.f32.mrf.mxu1 }
 0x315   : > { %v2027_v10 = vpop.f32.mrf.mxu0  ;;  %v5453_v35 = vadd.f32 %v5452_v52, %v3106_v26  ;;  %v3108_v28 = vmax.f32 %v2582_v43, 0.0  ;;  %v9693_v8 = vpack.c.bf16 %v3107_v58, %v3106_v26  ;;  %v5490_v47 = vadd.f32 %v5489_v57, %v3107_v58  ;;  %v9922_v57 = vld [vmem:[%s13821_s2 + $0x270] ss:$24 sps:$4 sm:$0xff]   ;;  %v9924_v26 = vld [vmem:[%s13821_s2 + $0x274] ss:$24 sps:$4 sm:$0xff]  }
 0x316   : > { %4792 = vst [vmem:[%s10596_s18 + $0x450] sm:$0xff] %v9581_v38  ;;  %v5216_v56 = vadd.f32 %v5215_v1, %v2884_v12  ;;  %v2885_v41 = vmax.f32 %v2024_v21, 0.0  ;;  %v2028_v19 = vadd.f32 %v2027_v10, %v10579_v24  ;;  %v3109_v34 = vmax.f32 %v2584_v53, 0.0  ;;  %v2601_v23 = vpop.f32.mrf.mxu1  ;;  %6245 = vmatprep.subr.bf16.mxu1 %v9924_v26 }
 0x317   : > { %v2029_v9 = vpop.f32.mrf.mxu0  ;;  %v5454_v42 = vadd.f32 %v5453_v35, %v3108_v28  ;;  %4904 = vst [vmem:[%s10596_s18 + $0x7d0] sm:$0xff] %v9693_v8  ;;  %v3110_v1 = vmax.f32 %v2588_v39, 0.0  ;;  %v2590_v31 = vadd.f32 %v12015_v45, %v10582_v25  ;;  %v2592_v30 = vadd.f32 %v2591_v48, %v10579_v24  ;;  %6246 = vmatpush2.bf16.msra.mxu1 %v9922_v57 }
 0x318   : > { %v9582_v5 = vpack.c.bf16 %v2885_v41, %v2884_v12  ;;  %v5253_v11 = vadd.f32 %v5252_v62, %v2885_v41  ;;  %v2886_v6 = vmax.f32 %v2028_v19, 0.0  ;;  %v2030_v7 = vadd.f32 %v2029_v9, %v10582_v25  ;;  %v2603_v9 = vpop.f32.mrf.mxu1 }
 0x319   : > { %v2031_v52 = vpop.f32.mrf.mxu0  ;;  %v9694_v20 = vpack.c.bf16 %v3109_v34, %v3108_v28  ;;  %v5491_v51 = vadd.f32 %v5490_v47, %v3109_v34  ;;  %v5455_v45 = vadd.f32 %v5454_v42, %v3110_v1  ;;  %v3111_v38 = vmax.f32 %v2590_v31, 0.0 }
 0x31a   : > { %4793 = vst [vmem:[%s10596_s18 + $0x458] sm:$0xff] %v9582_v5  ;;  %v5217_v17 = vadd.f32 %v5216_v56, %v2886_v6  ;;  %v2887_v40 = vmax.f32 %v2030_v7, 0.0  ;;  %v2032_v44 = vadd.f32 %v2031_v52, %v10579_v24  ;;  %v2594_v62 = vadd.f32 %v2593_v60, %v10582_v25 }
 0x31b   : > { %v2033_v43 = vpop.f32.mrf.mxu0  ;;  %4905 = vst [vmem:[%s10596_s18 + $0x7d8] sm:$0xff] %v9694_v20  ;;  %v2598_v12 = vadd.f32 %v2597_v36, %v10579_v24  ;;  %v9695_v28 = vpack.c.bf16 %v3111_v38, %v3110_v1  ;;  %v5492_v53 = vadd.f32 %v5491_v51, %v3111_v38  ;;  %v3112_v56 = vmax.f32 %v2592_v30, 0.0 }
 0x31c   : > { %v9583_v21 = vpack.c.bf16 %v2887_v40, %v2886_v6  ;;  %v5254_v48 = vadd.f32 %v5253_v11, %v2887_v40  ;;  %v2888_v10 = vmax.f32 %v2032_v44, 0.0  ;;  %v2034_v35 = vadd.f32 %v2033_v43, %v10582_v25 }
 0x31d   : > { %v2037_v58 = vpop.f32.mrf.mxu0  ;;  %v3113_v41 = vmax.f32 %v2594_v62, 0.0  ;;  %v3114_v36 = vmax.f32 %v2598_v12, 0.0  ;;  %4906 = vst [vmem:[%s10596_s18 + $0x7e0] sm:$0xff] %v9695_v28  ;;  %v5456_v47 = vadd.f32 %v5455_v45, %v3112_v56  ;;  %v2600_v5 = vadd.f32 %v2599_v0, %v10582_v25 }
 0x31e   : > { %4794 = vst [vmem:[%s10596_s18 + $0x460] sm:$0xff] %v9583_v21  ;;  %v5218_v19 = vadd.f32 %v5217_v17, %v2888_v10  ;;  %v2889_v39 = vmax.f32 %v2034_v35, 0.0  ;;  %v2038_v60 = vadd.f32 %v2037_v58, %v10579_v24  ;;  %v2602_v31 = vadd.f32 %v2601_v23, %v10579_v24 }
 0x31f   : > { %v2039_v8 = vpop.f32.mrf.mxu0  ;;  %v9696_v42 = vpack.c.bf16 %v3113_v41, %v3112_v56  ;;  %v5493_v34 = vadd.f32 %v5492_v53, %v3113_v41  ;;  %v5457_v51 = vadd.f32 %v5456_v47, %v3114_v36  ;;  %v3115_v1 = vmax.f32 %v2600_v5, 0.0 }
 0x320   : > { %v9584_v11 = vpack.c.bf16 %v2889_v39, %v2888_v10  ;;  %v5255_v6 = vadd.f32 %v5254_v48, %v2889_v39  ;;  %v2890_v7 = vmax.f32 %v2038_v60, 0.0  ;;  %v2040_v52 = vadd.f32 %v2039_v8, %v10582_v25 }
 0x321   : > { %v2041_v20 = vpop.f32.mrf.mxu0  ;;  %4907 = vst [vmem:[%s10596_s18 + $0x7e8] sm:$0xff] %v9696_v42  ;;  %v2604_v17 = vadd.f32 %v2603_v9, %v10582_v25  ;;  %v9697_v57 = vpack.c.bf16 %v3115_v1, %v3114_v36  ;;  %v5494_v26 = vadd.f32 %v5493_v34, %v3115_v1  ;;  %v3116_v43 = vmax.f32 %v2602_v31, 0.0  ;;  %v9925_v42 = vld [vmem:[%s13821_s2 + $0x240] ss:$24 sps:$4 sm:$0xff]   ;;  %v9927_v34 = vld [vmem:[%s13821_s2 + $0x244] ss:$24 sps:$4 sm:$0xff]  }
 0x322   : > { %4795 = vst [vmem:[%s10596_s18 + $0x468] sm:$0xff] %v9584_v11  ;;  %v5219_v40 = vadd.f32 %v5218_v19, %v2890_v7  ;;  %v2891_v44 = vmax.f32 %v2040_v52, 0.0  ;;  %v2042_v0 = vadd.f32 %v2041_v20, %v10579_v24  ;;  %6247 = vmatprep.subr.bf16.mxu1 %v9927_v34  ;;  %v9930_v34 = vld [vmem:[%s13821_s2 + $0x214] ss:$24 sps:$4 sm:$0xff]  }
 0x323   : > { %v2043_v30 = vpop.f32.mrf.mxu0  ;;  %v3117_v45 = vmax.f32 %v2604_v17, 0.0  ;;  %4908 = vst [vmem:[%s10596_s18 + $0x7f0] sm:$0xff] %v9697_v57  ;;  %v12068_v48 = vadd.f32 %v5457_v51, %v3116_v43  ;;  %6248 = vmatpush2.bf16.msra.mxu1 %v9925_v42  ;;  %v9928_v42 = vld [vmem:[%s13821_s2 + $0x210] ss:$24 sps:$4 sm:$0xff]  }
 0x324   : > { %v9585_v38 = vpack.c.bf16 %v2891_v44, %v2890_v7  ;;  %v5256_v62 = vadd.f32 %v5255_v6, %v2891_v44  ;;  %v2892_v12 = vmax.f32 %v2042_v0, 0.0  ;;  %v2044_v23 = vadd.f32 %v2043_v30, %v10582_v25  ;;  %6249 = vmatprep.subr.bf16.mxu1 %v9930_v34  ;;  %v9933_v34 = vld [vmem:[%s13821_s2 + $0x1e4] ss:$24 sps:$4 sm:$0xff]  }
 0x325   : > { %v2047_v21 = vpop.f32.mrf.mxu0  ;;  %v9698_v10 = vpack.c.bf16 %v3117_v45, %v3116_v43  ;;  %v12070_v35 = vadd.f32 %v5494_v26, %v3117_v45 }
 0x326   : > { %4796 = vst [vmem:[%s10596_s18 + $0x470] sm:$0xff] %v9585_v38  ;;  %v5220_v58 = vadd.f32 %v5219_v40, %v2892_v12  ;;  %v2893_v28 = vmax.f32 %v2044_v23, 0.0  ;;  %v2048_v53 = vadd.f32 %v2047_v21, %v10579_v24 }
 0x327   : > { %v2049_v56 = vpop.f32.mrf.mxu0  ;;  %4909 = vst [vmem:[%s10596_s18 + $0x7f8] sm:$0xff] %v9698_v10  ;;  %6250 = vmatpush2.bf16.msra.mxu1 %v9928_v42  ;;  %v9931_v42 = vld [vmem:[%s13821_s2 + $0x1e0] ss:$24 sps:$4 sm:$0xff]  }
 0x328   : > { %v9586_v41 = vpack.c.bf16 %v2893_v28, %v2892_v12  ;;  %v5257_v19 = vadd.f32 %v5256_v62, %v2893_v28  ;;  %v2894_v39 = vmax.f32 %v2048_v53, 0.0  ;;  %v2050_v60 = vadd.f32 %v2049_v56, %v10582_v25  ;;  %6251 = vmatprep.subr.bf16.mxu1 %v9933_v34 }
 0x329   : > { %v2051_v36 = vpop.f32.mrf.mxu0 }
 0x32a   : > { %4797 = vst [vmem:[%s10596_s18 + $0x478] sm:$0xff] %v9586_v41  ;;  %v5221_v9 = vadd.f32 %v5220_v58, %v2894_v39  ;;  %v2895_v8 = vmax.f32 %v2050_v60, 0.0  ;;  %v2052_v47 = vadd.f32 %v2051_v36, %v10579_v24 }
 0x32b   : > { %v2053_v5 = vpop.f32.mrf.mxu0  ;;  %6252 = vmatpush2.bf16.msra.mxu1 %v9931_v42 }
 0x32c   : > { %v9587_v11 = vpack.c.bf16 %v2895_v8, %v2894_v39  ;;  %v5258_v6 = vadd.f32 %v5257_v19, %v2895_v8  ;;  %v2896_v7 = vmax.f32 %v2052_v47, 0.0  ;;  %v2054_v52 = vadd.f32 %v2053_v5, %v10582_v25 }
 0x32d   : > { %v2057_v20 = vpop.f32.mrf.mxu0 }
 0x32e   : > { %4798 = vst [vmem:[%s10596_s18 + $0x480] sm:$0xff] %v9587_v11  ;;  %v5222_v51 = vadd.f32 %v5221_v9, %v2896_v7  ;;  %v2897_v1 = vmax.f32 %v2054_v52, 0.0  ;;  %v2058_v31 = vadd.f32 %v2057_v20, %v10579_v24 }
 0x32f   : > { %v2059_v17 = vpop.f32.mrf.mxu0 }
 0x330   : > { %v9588_v40 = vpack.c.bf16 %v2897_v1, %v2896_v7  ;;  %v5259_v44 = vadd.f32 %v5258_v6, %v2897_v1  ;;  %v2898_v0 = vmax.f32 %v2058_v31, 0.0  ;;  %v2060_v30 = vadd.f32 %v2059_v17, %v10582_v25 }
 0x331   : > { %v2061_v57 = vpop.f32.mrf.mxu0 }
 0x332   : > { %4799 = vst [vmem:[%s10596_s18 + $0x488] sm:$0xff] %v9588_v40  ;;  %v5223_v26 = vadd.f32 %v5222_v51, %v2898_v0  ;;  %v2899_v43 = vmax.f32 %v2060_v30, 0.0  ;;  %v2062_v45 = vadd.f32 %v2061_v57, %v10579_v24 }
 0x333   : > { %v2063_v38 = vpop.f32.mrf.mxu0 }
 0x334   : > { %v9589_v62 = vpack.c.bf16 %v2899_v43, %v2898_v0  ;;  %v5260_v12 = vadd.f32 %v5259_v44, %v2899_v43  ;;  %v2900_v23 = vmax.f32 %v2062_v45, 0.0  ;;  %v2064_v21 = vadd.f32 %v2063_v38, %v10582_v25 }
 0x335   : > { %v2067_v10 = vpop.f32.mrf.mxu0 }
 0x336   : > { %4800 = vst [vmem:[%s10596_s18 + $0x490] sm:$0xff] %v9589_v62  ;;  %v5224_v58 = vadd.f32 %v5223_v26, %v2900_v23  ;;  %v2901_v28 = vmax.f32 %v2064_v21, 0.0  ;;  %v2068_v53 = vadd.f32 %v2067_v10, %v10579_v24 }
 0x337   : > { %v2069_v56 = vpop.f32.mrf.mxu0 }
 0x338   : > { %v9590_v41 = vpack.c.bf16 %v2901_v28, %v2900_v23  ;;  %v5261_v19 = vadd.f32 %v5260_v12, %v2901_v28  ;;  %v2902_v39 = vmax.f32 %v2068_v53, 0.0  ;;  %v2070_v60 = vadd.f32 %v2069_v56, %v10582_v25 }
 0x339   : > { %v2071_v36 = vpop.f32.mrf.mxu0 }
 0x33a   : > { %4801 = vst [vmem:[%s10596_s18 + $0x498] sm:$0xff] %v9590_v41  ;;  %v5225_v9 = vadd.f32 %v5224_v58, %v2902_v39  ;;  %v2903_v8 = vmax.f32 %v2070_v60, 0.0  ;;  %v2072_v47 = vadd.f32 %v2071_v36, %v10579_v24 }
 0x33b   : > { %v2073_v5 = vpop.f32.mrf.mxu0 }
 0x33c   : > { %v9591_v11 = vpack.c.bf16 %v2903_v8, %v2902_v39  ;;  %v5262_v6 = vadd.f32 %v5261_v19, %v2903_v8  ;;  %v2904_v7 = vmax.f32 %v2072_v47, 0.0  ;;  %v2074_v52 = vadd.f32 %v2073_v5, %v10582_v25 }
 0x33d   : > { %v2077_v20 = vpop.f32.mrf.mxu0 }
 0x33e   : > { %4802 = vst [vmem:[%s10596_s18 + $0x4a0] sm:$0xff] %v9591_v11  ;;  %v5226_v51 = vadd.f32 %v5225_v9, %v2904_v7  ;;  %v2905_v1 = vmax.f32 %v2074_v52, 0.0  ;;  %v2078_v31 = vadd.f32 %v2077_v20, %v10579_v24 }
 0x33f   : > { %v2079_v17 = vpop.f32.mrf.mxu0 }
 0x340   : > { %v9592_v40 = vpack.c.bf16 %v2905_v1, %v2904_v7  ;;  %v5263_v44 = vadd.f32 %v5262_v6, %v2905_v1  ;;  %v2906_v0 = vmax.f32 %v2078_v31, 0.0  ;;  %v2080_v30 = vadd.f32 %v2079_v17, %v10582_v25 }
 0x341   : > { %v2081_v57 = vpop.f32.mrf.mxu0 }
 0x342   : > { %4803 = vst [vmem:[%s10596_s18 + $0x4a8] sm:$0xff] %v9592_v40  ;;  %v5227_v26 = vadd.f32 %v5226_v51, %v2906_v0  ;;  %v2907_v43 = vmax.f32 %v2080_v30, 0.0  ;;  %v2082_v45 = vadd.f32 %v2081_v57, %v10579_v24 }
 0x343   : > { %v2083_v38 = vpop.f32.mrf.mxu0 }
 0x344   : > { %v9593_v62 = vpack.c.bf16 %v2907_v43, %v2906_v0  ;;  %v5264_v12 = vadd.f32 %v5263_v44, %v2907_v43  ;;  %v2908_v23 = vmax.f32 %v2082_v45, 0.0  ;;  %v2084_v21 = vadd.f32 %v2083_v38, %v10582_v25 }
 0x345   : > { %v2087_v10 = vpop.f32.mrf.mxu0 }
 0x346   : > { %4804 = vst [vmem:[%s10596_s18 + $0x4b0] sm:$0xff] %v9593_v62  ;;  %v5228_v58 = vadd.f32 %v5227_v26, %v2908_v23  ;;  %v2909_v28 = vmax.f32 %v2084_v21, 0.0  ;;  %v2088_v53 = vadd.f32 %v2087_v10, %v10579_v24 }
 0x347   : > { %v2089_v56 = vpop.f32.mrf.mxu0 }
 0x348   : > { %v9594_v41 = vpack.c.bf16 %v2909_v28, %v2908_v23  ;;  %v5265_v19 = vadd.f32 %v5264_v12, %v2909_v28  ;;  %v2910_v39 = vmax.f32 %v2088_v53, 0.0  ;;  %v2090_v60 = vadd.f32 %v2089_v56, %v10582_v25 }
 0x349   : > { %v2091_v36 = vpop.f32.mrf.mxu0 }
 0x34a   : > { %4805 = vst [vmem:[%s10596_s18 + $0x4b8] sm:$0xff] %v9594_v41  ;;  %v5229_v9 = vadd.f32 %v5228_v58, %v2910_v39  ;;  %v2911_v8 = vmax.f32 %v2090_v60, 0.0  ;;  %v2092_v47 = vadd.f32 %v2091_v36, %v10579_v24 }
 0x34b   : > { %v2093_v5 = vpop.f32.mrf.mxu0 }
 0x34c   : > { %v9595_v11 = vpack.c.bf16 %v2911_v8, %v2910_v39  ;;  %v5266_v6 = vadd.f32 %v5265_v19, %v2911_v8  ;;  %v2912_v7 = vmax.f32 %v2092_v47, 0.0  ;;  %v2094_v52 = vadd.f32 %v2093_v5, %v10582_v25 }
 0x34d   : > { %v2097_v20 = vpop.f32.mrf.mxu0 }
 0x34e   : > { %4806 = vst [vmem:[%s10596_s18 + $0x4c0] sm:$0xff] %v9595_v11  ;;  %v5230_v51 = vadd.f32 %v5229_v9, %v2912_v7  ;;  %v2913_v1 = vmax.f32 %v2094_v52, 0.0  ;;  %v2098_v31 = vadd.f32 %v2097_v20, %v10579_v24 }
 0x34f   : > { %v2099_v17 = vpop.f32.mrf.mxu0 }
 0x350   : > { %v9596_v40 = vpack.c.bf16 %v2913_v1, %v2912_v7  ;;  %v5267_v44 = vadd.f32 %v5266_v6, %v2913_v1  ;;  %v2914_v0 = vmax.f32 %v2098_v31, 0.0  ;;  %v2100_v30 = vadd.f32 %v2099_v17, %v10582_v25 }
 0x351   : > { %v2101_v57 = vpop.f32.mrf.mxu0 }
 0x352   : > { %4807 = vst [vmem:[%s10596_s18 + $0x4c8] sm:$0xff] %v9596_v40  ;;  %v5231_v26 = vadd.f32 %v5230_v51, %v2914_v0  ;;  %v2915_v43 = vmax.f32 %v2100_v30, 0.0  ;;  %v2102_v45 = vadd.f32 %v2101_v57, %v10579_v24 }
 0x353   : > { %v2103_v38 = vpop.f32.mrf.mxu0 }
 0x354   : > { %v9597_v62 = vpack.c.bf16 %v2915_v43, %v2914_v0  ;;  %v5268_v12 = vadd.f32 %v5267_v44, %v2915_v43  ;;  %v2916_v23 = vmax.f32 %v2102_v45, 0.0  ;;  %v2104_v21 = vadd.f32 %v2103_v38, %v10582_v25 }
 0x355   : > { %v2107_v10 = vpop.f32.mrf.mxu0 }
 0x356   : > { %4808 = vst [vmem:[%s10596_s18 + $0x4d0] sm:$0xff] %v9597_v62  ;;  %v5232_v58 = vadd.f32 %v5231_v26, %v2916_v23  ;;  %v2917_v28 = vmax.f32 %v2104_v21, 0.0  ;;  %v2108_v53 = vadd.f32 %v2107_v10, %v10579_v24 }
 0x357   : > { %v2109_v56 = vpop.f32.mrf.mxu0 }
 0x358   : > { %v9598_v41 = vpack.c.bf16 %v2917_v28, %v2916_v23  ;;  %v5269_v19 = vadd.f32 %v5268_v12, %v2917_v28  ;;  %v2918_v39 = vmax.f32 %v2108_v53, 0.0  ;;  %v2110_v60 = vadd.f32 %v2109_v56, %v10582_v25 }
 0x359   : > { %v2111_v36 = vpop.f32.mrf.mxu0 }
 0x35a   : > { %4809 = vst [vmem:[%s10596_s18 + $0x4d8] sm:$0xff] %v9598_v41  ;;  %v5233_v9 = vadd.f32 %v5232_v58, %v2918_v39  ;;  %v2919_v8 = vmax.f32 %v2110_v60, 0.0  ;;  %v2112_v47 = vadd.f32 %v2111_v36, %v10579_v24 }
 0x35b   : > { %v2113_v42 = vpop.f32.mrf.mxu0 }
 0x35c   : > { %v9599_v34 = vpack.c.bf16 %v2919_v8, %v2918_v39  ;;  %v5270_v5 = vadd.f32 %v5269_v19, %v2919_v8  ;;  %v2920_v11 = vmax.f32 %v2112_v47, 0.0  ;;  %v2114_v6 = vadd.f32 %v2113_v42, %v10582_v25 }
 0x35d   : > { %v2117_v7 = vpop.f32.mrf.mxu0 }
 0x35e   : > { %4810 = vst [vmem:[%s10596_s18 + $0x4e0] sm:$0xff] %v9599_v34  ;;  %v5234_v52 = vadd.f32 %v5233_v9, %v2920_v11  ;;  %v2921_v20 = vmax.f32 %v2114_v6, 0.0  ;;  %v2118_v51 = vadd.f32 %v2117_v7, %v10579_v24 }
 0x35f   : > { %v2119_v1 = vpop.f32.mrf.mxu0 }
 0x360   : > { %v9600_v31 = vpack.c.bf16 %v2921_v20, %v2920_v11  ;;  %v5271_v17 = vadd.f32 %v5270_v5, %v2921_v20  ;;  %v2922_v40 = vmax.f32 %v2118_v51, 0.0  ;;  %v2120_v44 = vadd.f32 %v2119_v1, %v10582_v25  ;;  %v9936_v20 = vld [vmem:[%s13821_s2 + $0x1b4] ss:$24 sps:$4 sm:$0xff]  }
 0x361   : > { %v2121_v0 = vpop.f32.mrf.mxu0  ;;  %6253 = vmatprep.subr.bf16.mxu1 %v9936_v20 }
 0x362   : > { %4811 = vst [vmem:[%s10596_s18 + $0x4e8] sm:$0xff] %v9600_v31  ;;  %v5235_v30 = vadd.f32 %v5234_v52, %v2922_v40  ;;  %v2923_v57 = vmax.f32 %v2120_v44, 0.0  ;;  %v2122_v26 = vadd.f32 %v2121_v0, %v10579_v24  ;;  %v9934_v52 = vld [vmem:[%s13821_s2 + $0x1b0] ss:$24 sps:$4 sm:$0xff]   ;;  %v9939_v31 = vld [vmem:[%s13821_s2 + $0x184] ss:$24 sps:$4 sm:$0xff]  }
 0x363   : > { %v2123_v43 = vpop.f32.mrf.mxu0  ;;  %6254 = vmatpush2.bf16.msra.mxu1 %v9934_v52 }
 0x364   : > { %v9601_v45 = vpack.c.bf16 %v2923_v57, %v2922_v40  ;;  %v5272_v38 = vadd.f32 %v5271_v17, %v2923_v57  ;;  %v2924_v62 = vmax.f32 %v2122_v26, 0.0  ;;  %v2124_v12 = vadd.f32 %v2123_v43, %v10582_v25  ;;  %6255 = vmatprep.subr.bf16.mxu1 %v9939_v31 }
 0x365   : > { %v2127_v23 = vpop.f32.mrf.mxu0 }
 0x366   : > { %4812 = vst [vmem:[%s10596_s18 + $0x4f0] sm:$0xff] %v9601_v45  ;;  %v12140_v21 = vadd.f32 %v5235_v30, %v2924_v62  ;;  %v2925_v10 = vmax.f32 %v2124_v12, 0.0  ;;  %v12143_v58 = vadd.f32 %v2127_v23, %v10579_v24  ;;  %v9937_v30 = vld [vmem:[%s13821_s2 + $0x180] ss:$24 sps:$4 sm:$0xff]  }
 0x367   : > { %v2129_v28 = vpop.f32.mrf.mxu0  ;;  %6256 = vmatpush2.bf16.msra.mxu1 %v9937_v30 }
 0x368   : > { %v9602_v53 = vpack.c.bf16 %v2925_v10, %v2924_v62  ;;  %v12145_v56 = vadd.f32 %v5272_v38, %v2925_v10  ;;  %v12148_v41 = vadd.f32 %v2129_v28, %v10582_v25  ;;  %v13787_v60 = vmax.f32 %v12143_v58, 0.0 }
 0x369   : > { %v2131_v19 = vpop.f32.mrf.mxu0 }
 0x36a   : > { %4813 = vst [vmem:[%s10596_s18 + $0x4f8] sm:$0xff] %v9602_v53  ;;  %v12152_v39 = vadd.f32 %v2131_v19, %v10579_v24  ;;  %v13783_v36 = vmax.f32 %v12148_v41, 0.0  ;;  %v9942_v53 = vld [vmem:[%s13821_s2 + $0x15c] ss:$24 sps:$4 sm:$0xff]  }
 0x36b   : > { %v2133_v9 = vpop.f32.mrf.mxu0  ;;  %6266 = vmatprep.subr.bf16.mxu1 %v9942_v53 }
 0x36c   : > { %v12157_v8 = vadd.f32 %v2133_v9, %v10582_v25  ;;  %v9603_v47 = vpack.c.bf16 %v13783_v36, %v13787_v60  ;;  %v13784_v34 = vmax.f32 %v12152_v39, 0.0 }
 0x36d   : > { %v2137_v42 = vpop.f32.mrf.mxu0 }
 0x36e   : > { %v13780_v5 = vmax.f32 %v12157_v8, 0.0  ;;  %4814 = vst [vmem:[%s10596_s18 + $0x500] sm:$0xff] %v9603_v47  ;;  %v12167_v11 = vadd.f32 %v2137_v42, %v10579_v24 }
 0x36f   : > { %v2139_v6 = vpop.f32.mrf.mxu0 }
 0x370   : > { %v9604_v7 = vpack.c.bf16 %v13780_v5, %v13784_v34  ;;  %v12180_v51 = vadd.f32 %v2139_v6, %v10582_v25  ;;  %v13779_v40 = vmax.f32 %v12167_v11, 0.0  ;;  %v13831_v50 = vmax.f32 %v12167_v11, 0.0 }
 0x371   : > { %v2141_v1 = vpop.f32.mrf.mxu0 }
 0x372   : > { %4815 = vst [vmem:[%s10596_s18 + $0x508] sm:$0xff] %v9604_v7  ;;  %v12187_v17 = vadd.f32 %v2141_v1, %v10579_v24  ;;  %v13776_v44 = vmax.f32 %v12180_v51, 0.0 }
 0x373   : > { %v2143_v0 = vpop.f32.mrf.mxu0 }
 0x374   : > { %v12195_v57 = vadd.f32 %v2143_v0, %v10582_v25  ;;  %v9605_v26 = vpack.c.bf16 %v13776_v44, %v13779_v40  ;;  %v13775_v45 = vmax.f32 %v12187_v17, 0.0 }
 0x375   : > { %v2147_v43 = vpop.f32.mrf.mxu0 }
 0x376   : > { %v13772_v38 = vmax.f32 %v12195_v57, 0.0  ;;  %4816 = vst [vmem:[%s10596_s18 + $0x510] sm:$0xff] %v9605_v26  ;;  %v12205_v62 = vadd.f32 %v2147_v43, %v10579_v24 }
 0x377   : > { %v2149_v12 = vpop.f32.mrf.mxu0 }
 0x378   : > { %v9606_v23 = vpack.c.bf16 %v13772_v38, %v13775_v45  ;;  %v12212_v10 = vadd.f32 %v2149_v12, %v10582_v25  ;;  %v13771_v9 = vmax.f32 %v12205_v62, 0.0 }
 0x379   : > { %v2151_v28 = vpop.f32.mrf.mxu0 }
 0x37a   : > { %4817 = vst [vmem:[%s10596_s18 + $0x518] sm:$0xff] %v9606_v23  ;;  %v12219_v19 = vadd.f32 %v2151_v28, %v10579_v24  ;;  %v13768_v47 = vmax.f32 %v12212_v10, 0.0 }
 0x37b   : > { %v2153_v42 = vpop.f32.mrf.mxu0 }
 0x37c   : > { %v12224_v6 = vadd.f32 %v2153_v42, %v10582_v25  ;;  %v9607_v7 = vpack.c.bf16 %v13768_v47, %v13771_v9  ;;  %v13767_v20 = vmax.f32 %v12219_v19, 0.0 }
 0x37d   : > { %v2157_v52 = vpop.f32.mrf.mxu0 }
 0x37e   : > { %v13764_v1 = vmax.f32 %v12224_v6, 0.0  ;;  %v12233_v31 = vadd.f32 %v2157_v52, %v10579_v24  ;;  %4818 = vst [vmem:[%s10596_s18 + $0x520] sm:$0xff] %v9607_v7 }
 0x37f   : > { %v2159_v0 = vpop.f32.mrf.mxu0 }
 0x380   : > { %v9608_v30 = vpack.c.bf16 %v13764_v1, %v13767_v20  ;;  %v12241_v26 = vadd.f32 %v2159_v0, %v10582_v25  ;;  %v13766_v12 = vmax.f32 %v12233_v31, 0.0 }
 0x381   : > { %v2161_v43 = vpop.f32.mrf.mxu0 }
 0x382   : > { %4819 = vst [vmem:[%s10596_s18 + $0x528] sm:$0xff] %v9608_v30  ;;  %v13765_v23 = vmax.f32 %v12241_v26, 0.0  ;;  %v12247_v28 = vadd.f32 %v2161_v43, %v10579_v24 }
 0x383   : > { %v2163_v53 = vpop.f32.mrf.mxu0 }
 0x384   : > { %v9609_v42 = vpack.c.bf16 %v13765_v23, %v13766_v12  ;;  %v12254_v7 = vadd.f32 %v2163_v53, %v10582_v25  ;;  %v13770_v0 = vmax.f32 %v12247_v28, 0.0 }
 0x385   : > { %v2167_v52 = vpop.f32.mrf.mxu0 }
 0x386   : > { %4820 = vst [vmem:[%s10596_s18 + $0x530] sm:$0xff] %v9609_v42  ;;  %v13769_v30 = vmax.f32 %v12254_v7, 0.0  ;;  %v12260_v3 = vadd.f32 %v2167_v52, %v10579_v24 }
 0x387   : > { %v2169_v43 = vpop.f32.mrf.mxu0 }
 0x388   : > { %v9610_v1 = vpack.c.bf16 %v13769_v30, %v13770_v0  ;;  %v12267_v23 = vadd.f32 %v2169_v43, %v10582_v25  ;;  %v13774_v42 = vmax.f32 %v12260_v3, 0.0 }
 0x389   : > { %v2171_v53 = vpop.f32.mrf.mxu0 }
 0x38a   : > { %4821 = vst [vmem:[%s10596_s18 + $0x538] sm:$0xff] %v9610_v1  ;;  %v13773_v12 = vmax.f32 %v12267_v23, 0.0  ;;  %v12273_v20 = vadd.f32 %v2171_v53, %v10579_v24 }
 0x38b   : > { %v2173_v52 = vpop.f32.mrf.mxu0 }
 0x38c   : > { %v9611_v47 = vpack.c.bf16 %v13773_v12, %v13774_v42  ;;  %v12280_v30 = vadd.f32 %v2173_v52, %v10582_v25  ;;  %v13778_v1 = vmax.f32 %v12273_v20, 0.0 }
 0x38d   : > { %v2177_v43 = vpop.f32.mrf.mxu0 }
 0x38e   : > { %4822 = vst [vmem:[%s10596_s18 + $0x540] sm:$0xff] %v9611_v47  ;;  %v13777_v0 = vmax.f32 %v12280_v30, 0.0  ;;  %v12286_v9 = vadd.f32 %v2177_v43, %v10579_v24 }
 0x38f   : > { %v2179_v53 = vpop.f32.mrf.mxu0 }
 0x390   : > { %v9612_v38 = vpack.c.bf16 %v13777_v0, %v13778_v1  ;;  %v12293_v12 = vadd.f32 %v2179_v53, %v10582_v25  ;;  %v13782_v47 = vmax.f32 %v12286_v9, 0.0 }
 0x391   : > { %v2181_v52 = vpop.f32.mrf.mxu0 }
 0x392   : > { %4823 = vst [vmem:[%s10596_s18 + $0x548] sm:$0xff] %v9612_v38  ;;  %v13781_v42 = vmax.f32 %v12293_v12, 0.0  ;;  %v12299_v45 = vadd.f32 %v2181_v52, %v10579_v24 }
 0x393   : > { %v2183_v43 = vpop.f32.mrf.mxu0 }
 0x394   : > { %v9613_v44 = vpack.c.bf16 %v13781_v42, %v13782_v47  ;;  %v12306_v0 = vadd.f32 %v2183_v43, %v10582_v25  ;;  %v13786_v38 = vmax.f32 %v12299_v45, 0.0 }
 0x395   : > { %v2187_v53 = vpop.f32.mrf.mxu0 }
 0x396   : > { %4824 = vst [vmem:[%s10596_s18 + $0x550] sm:$0xff] %v9613_v44  ;;  %v13785_v1 = vmax.f32 %v12306_v0, 0.0  ;;  %v12312_v40 = vadd.f32 %v2187_v53, %v10579_v24 }
 0x397   : > { %v2189_v52 = vpop.f32.mrf.mxu0 }
 0x398   : > { %v9614_v5 = vpack.c.bf16 %v13785_v1, %v13786_v38  ;;  %v12319_v42 = vadd.f32 %v2189_v52, %v10582_v25  ;;  %v13791_v44 = vmax.f32 %v12312_v40, 0.0 }
 0x399   : > { %v2191_v43 = vpop.f32.mrf.mxu0 }
 0x39a   : > { %4825 = vst [vmem:[%s10596_s18 + $0x558] sm:$0xff] %v9614_v5  ;;  %v13790_v47 = vmax.f32 %v12319_v42, 0.0  ;;  %v12325_v36 = vadd.f32 %v2191_v43, %v10579_v24 }
 0x39b   : > { %v2193_v53 = vpop.f32.mrf.mxu0 }
 0x39c   : > { %v9615_v34 = vpack.c.bf16 %v13790_v47, %v13791_v44  ;;  %v12332_v1 = vadd.f32 %v2193_v53, %v10582_v25  ;;  %v13798_v5 = vmax.f32 %v12325_v36, 0.0  ;;  %v13828_v44 = vmax.f32 %v12152_v39, 0.0 }
 0x39d   : > { %v2197_v52 = vpop.f32.mrf.mxu0 }
 0x39e   : > { %4826 = vst [vmem:[%s10596_s18 + $0x560] sm:$0xff] %v9615_v34  ;;  %v13797_v38 = vmax.f32 %v12332_v1, 0.0  ;;  %v12338_v60 = vadd.f32 %v2197_v52, %v10579_v24  ;;  %v13827_v34 = vmax.f32 %v12143_v58, 0.0 }
 0x39f   : > { %v2199_v43 = vpop.f32.mrf.mxu0 }
 0x3a0   : > { %v9616_v14 = vpack.c.bf16 %v13797_v38, %v13798_v5  ;;  %v12345_v47 = vadd.f32 %v2199_v43, %v10582_v25  ;;  %v5280_v18 = vadd.f32 %v13828_v44, %v13827_v34  ;;  %v2954_v52 = vmax.f32 %v12338_v60, 0.0 }
 0x3a1   : > { %v2201_v53 = vpop.f32.mrf.mxu0  ;;  %v13829_v38 = vmax.f32 %v12148_v41, 0.0  ;;  %v13830_v5 = vmax.f32 %v12157_v8, 0.0  ;;  %v13832_v44 = vmax.f32 %v12180_v51, 0.0  ;;  %v13833_v41 = vmax.f32 %v12187_v17, 0.0 }
 0x3a2   : > { %4827 = vst [vmem:[%s10596_s18 + $0x568] sm:$0xff] %v9616_v14  ;;  %v2955_v16 = vmax.f32 %v12345_v47, 0.0  ;;  %v12355_v54 = vadd.f32 %v2201_v53, %v10579_v24  ;;  %v5281_v58 = vadd.f32 %v5280_v18, %v13831_v50  ;;  %v13835_v51 = vmax.f32 %v12205_v62, 0.0 }
 0x3a3   : > { %v5317_v43 = vadd.f32 %v13830_v5, %v13829_v38  ;;  %v2203_v32 = vpop.f32.mrf.mxu0  ;;  %v13834_v38 = vmax.f32 %v12195_v57, 0.0 }
 0x3a4   : > { %v9617_v14 = vpack.c.bf16 %v2955_v16, %v2954_v52  ;;  %v12368_v39 = vadd.f32 %v2203_v32, %v10582_v25  ;;  %v5282_v8 = vadd.f32 %v5281_v58, %v13833_v41  ;;  %v13802_v11 = vmax.f32 %v12355_v54, 0.0 }
 0x3a5   : > { %v5318_v53 = vadd.f32 %v5317_v43, %v13832_v44  ;;  %v2207_v34 = vpop.f32.mrf.mxu0  ;;  %v4978_v44 = vrot.slane %v10773_v37, 4  ;;  %v13837_v41 = vmax.f32 %v12219_v19, 0.0 }
 0x3a6   : > { %4828 = vst [vmem:[%s10596_s18 + $0x570] sm:$0xff] %v9617_v14  ;;  %v13801_v18 = vmax.f32 %v12368_v39, 0.0  ;;  %v12378_v50 = vadd.f32 %v2207_v34, %v10579_v24  ;;  %v5283_v43 = vadd.f32 %v5282_v8, %v13835_v51  ;;  %v4941_v14 = vrot.slane %v10767_v29, 4 }
 0x3a7   : > { %v5319_v32 = vadd.f32 %v5318_v53, %v13834_v38  ;;  %v2209_v5 = vpop.f32.mrf.mxu0  ;;  %v13836_v34 = vmax.f32 %v12212_v10, 0.0  ;;  %v13838_v51 = vmax.f32 %v12224_v6, 0.0  ;;  %v13839_v10 = vmax.f32 %v12233_v31, 0.0 }
 0x3a8   : > { %v9618_v17 = vpack.c.bf16 %v13801_v18, %v13802_v11  ;;  %v12389_v58 = vadd.f32 %v2209_v5, %v10582_v25  ;;  %v5284_v62 = vadd.f32 %v5283_v43, %v13837_v41  ;;  %v2958_v8 = vmax.f32 %v12378_v50, 0.0 }
 0x3a9   : > { %v5320_v57 = vadd.f32 %v5319_v32, %v13836_v34  ;;  %v2211_v53 = vpop.f32.mrf.mxu0  ;;  %v4979_v34 = vadd.f32 %v4978_v44, %v10773_v37  ;;  %v13841_v41 = vmax.f32 %v12247_v28, 0.0 }
 0x3aa   : > { %4829 = vst [vmem:[%s10596_s18 + $0x578] sm:$0xff] %v9618_v17  ;;  %v2959_v38 = vmax.f32 %v12389_v58, 0.0  ;;  %v12401_v5 = vadd.f32 %v2211_v53, %v10579_v24  ;;  %v5285_v32 = vadd.f32 %v5284_v62, %v13839_v10  ;;  %v4942_v17 = vadd.f32 %v4941_v14, %v10767_v29 }
 0x3ab   : > { %v5321_v18 = vadd.f32 %v5320_v57, %v13838_v51  ;;  %v2213_v11 = vpop.f32.mrf.mxu0  ;;  %v13840_v53 = vmax.f32 %v12241_v26, 0.0  ;;  %v13842_v29 = vmax.f32 %v12254_v7, 0.0  ;;  %v13843_v26 = vmax.f32 %v12260_v3, 0.0 }
 0x3ac   : > { %v9619_v19 = vpack.c.bf16 %v2959_v38, %v2958_v8  ;;  %v12412_v43 = vadd.f32 %v2213_v11, %v10582_v25  ;;  %v5286_v31 = vadd.f32 %v5285_v32, %v13841_v41  ;;  %v13804_v62 = vmax.f32 %v12401_v5, 0.0 }
 0x3ad   : > { %v5322_v6 = vadd.f32 %v5321_v18, %v13840_v53  ;;  %v2217_v57 = vpop.f32.mrf.mxu0  ;;  %v4943_v10 = vrot.slane %v4942_v17, 2  ;;  %v4980_v32 = vrot.slane %v4979_v34, 2  ;;  %v13845_v7 = vmax.f32 %v12273_v20, 0.0 }
 0x3ae   : > { %4830 = vst [vmem:[%s10596_s18 + $0x580] sm:$0xff] %v9619_v19  ;;  %v13803_v51 = vmax.f32 %v12412_v43, 0.0  ;;  %v12424_v11 = vadd.f32 %v2217_v57, %v10579_v24  ;;  %v5287_v18 = vadd.f32 %v5286_v31, %v13843_v26  ;;  %v13844_v19 = vmax.f32 %v12267_v23, 0.0 }
 0x3af   : > { %v5323_v14 = vadd.f32 %v5322_v6, %v13842_v29  ;;  %v2219_v37 = vpop.f32.mrf.mxu0  ;;  %v5015_v29 = vrot.slane %v10995_v22, 4 }
 0x3b0   : > { %v9620_v28 = vpack.c.bf16 %v13803_v51, %v13804_v62  ;;  %v12435_v44 = vadd.f32 %v2219_v37, %v10582_v25  ;;  %v5288_v6 = vadd.f32 %v5287_v18, %v13845_v7  ;;  %v2962_v3 = vmax.f32 %v12424_v11, 0.0 }
 0x3b1   : > { %v5324_v53 = vadd.f32 %v5323_v14, %v13844_v19  ;;  %v2221_v57 = vpop.f32.mrf.mxu0  ;;  %v13846_v37 = vmax.f32 %v12280_v30, 0.0  ;;  %v13847_v14 = vmax.f32 %v12286_v9, 0.0  ;;  %v13848_v7 = vmax.f32 %v12293_v12, 0.0 }
 0x3b2   : > { %4831 = vst [vmem:[%s10596_s18 + $0x588] sm:$0xff] %v9620_v28  ;;  %v2963_v41 = vmax.f32 %v12435_v44, 0.0  ;;  %v12445_v31 = vadd.f32 %v2221_v57, %v10579_v24  ;;  %v4944_v28 = vadd.f32 %v4943_v10, %v4942_v17  ;;  %v4981_v57 = vadd.f32 %v4980_v32, %v4979_v34 }
 0x3b3   : > { %v5325_v26 = vadd.f32 %v5324_v53, %v13846_v37  ;;  %v2223_v23 = vpop.f32.mrf.mxu0  ;;  %v5289_v19 = vadd.f32 %v5288_v6, %v13847_v14  ;;  %v13849_v30 = vmax.f32 %v12299_v45, 0.0  ;;  %v13850_v17 = vmax.f32 %v12306_v0, 0.0 }
 0x3b4   : > { %v9621_v20 = vpack.c.bf16 %v2963_v41, %v2962_v3  ;;  %v12457_v18 = vadd.f32 %v2223_v23, %v10582_v25  ;;  %v2964_v9 = vmax.f32 %v12445_v31, 0.0  ;;  %v5016_v23 = vadd.f32 %v5015_v29, %v10995_v22 }
 0x3b5   : > { %v5326_v51 = vadd.f32 %v5325_v26, %v13848_v7  ;;  %v2227_v62 = vpop.f32.mrf.mxu0  ;;  %v5290_v53 = vadd.f32 %v5289_v19, %v13849_v30  ;;  %v13851_v10 = vmax.f32 %v12312_v40, 0.0  ;;  %v4945_v31 = vrot.slane %v4944_v28, 1 }
 0x3b6   : > { %4832 = vst [vmem:[%s10596_s18 + $0x590] sm:$0xff] %v9621_v20  ;;  %v2965_v6 = vmax.f32 %v12457_v18, 0.0  ;;  %v12467_v37 = vadd.f32 %v2227_v62, %v10579_v24  ;;  %v4982_v14 = vrot.slane %v4981_v57, 1  ;;  %v13852_v62 = vmax.f32 %v12319_v42, 0.0 }
 0x3b7   : > { %v5327_v34 = vadd.f32 %v5326_v51, %v13850_v17  ;;  %v2229_v12 = vpop.f32.mrf.mxu0  ;;  %v5291_v32 = vadd.f32 %v5290_v53, %v13851_v10  ;;  %v13853_v22 = vmax.f32 %v12325_v36, 0.0  ;;  %v5017_v7 = vrot.slane %v5016_v23, 2 }
 0x3b8   : > { %v9622_v45 = vpack.c.bf16 %v2965_v6, %v2964_v9  ;;  %v12477_v26 = vadd.f32 %v2229_v12, %v10582_v25  ;;  %v2966_v40 = vmax.f32 %v12467_v37, 0.0  ;;  %v5052_v30 = vrot.slane %v11001_v33, 4 }
 0x3b9   : > { %v5328_v19 = vadd.f32 %v5327_v34, %v13852_v62  ;;  %v2231_v20 = vpop.f32.mrf.mxu0  ;;  %v5292_v0 = vadd.f32 %v5291_v32, %v13853_v22  ;;  %v13854_v53 = vmax.f32 %v12332_v1, 0.0  ;;  %v4946_v12 = vadd.f32 %v4945_v31, %v4944_v28 }
 0x3ba   : > { %4833 = vst [vmem:[%s10596_s18 + $0x598] sm:$0xff] %v9622_v45  ;;  %v2967_v51 = vmax.f32 %v12477_v26, 0.0  ;;  %v12487_v29 = vadd.f32 %v2231_v20, %v10579_v24  ;;  %v4983_v10 = vadd.f32 %v4982_v14, %v4981_v57  ;;  %v13855_v62 = vmax.f32 %v12355_v54, 0.0 }
 0x3bb   : > { %v5329_v42 = vadd.f32 %v5328_v19, %v13854_v53  ;;  %v2233_v17 = vpop.f32.mrf.mxu0  ;;  %v5293_v36 = vadd.f32 %v5292_v0, %v2954_v52  ;;  %v5018_v20 = vadd.f32 %v5017_v7, %v5016_v23  ;;  %v5053_v22 = vadd.f32 %v5052_v30, %v11001_v33 }
 0x3bc   : > { %v9623_v34 = vpack.c.bf16 %v2967_v51, %v2966_v40  ;;  %v12497_v37 = vadd.f32 %v2233_v17, %v10582_v25  ;;  %v2968_v60 = vmax.f32 %v12487_v29, 0.0  ;;  %v13856_v28 = vmax.f32 %v12368_v39, 0.0 }
 0x3bd   : > { %v5330_v32 = vadd.f32 %v5329_v42, %v2955_v16  ;;  %v2237_v45 = vpop.f32.mrf.mxu0  ;;  %v5294_v1 = vadd.f32 %v5293_v36, %v13855_v62  ;;  %v12513_v14 = vmul.f32 0.00390625, %v4946_v12  ;;  %v12515_v0 = vmul.f32 0.00390625, %v4983_v10 }
 0x3be   : > { %4834 = vst [vmem:[%s10596_s18 + $0x5a0] sm:$0xff] %v9623_v34  ;;  %v2969_v52 = vmax.f32 %v12497_v37, 0.0  ;;  %v2238_v19 = vadd.f32 %v2237_v45, %v10579_v24  ;;  %v13857_v33 = vmax.f32 %v12401_v5, 0.0  ;;  %v5054_v53 = vrot.slane %v5053_v22, 2 }
 0x3bf   : > { %v5331_v57 = vadd.f32 %v5330_v32, %v13856_v28  ;;  %v2239_v47 = vpop.f32.mrf.mxu0  ;;  %v5295_v16 = vadd.f32 %v5294_v1, %v2958_v8  ;;  %v5019_v8 = vrot.slane %v5018_v20, 1  ;;  %v5089_v42 = vrot.slane %v11321_v2, 4 }
 0x3c0   : > { %v9624_v54 = vpack.c.bf16 %v2969_v52, %v2968_v60  ;;  %v2240_v31 = vadd.f32 %v2239_v47, %v10582_v25  ;;  %v2970_v39 = vmax.f32 %v2238_v19, 0.0  ;;  %v13858_v17 = vmax.f32 %v12412_v43, 0.0 }
 0x3c1   : > { %v5332_v29 = vadd.f32 %v5331_v57, %v2959_v38  ;;  %v2241_v23 = vpop.f32.mrf.mxu0  ;;  %v5296_v7 = vadd.f32 %v5295_v16, %v13857_v33  ;;  %v5519_v37 = vpack.c.bf16 %v12513_v14, %v12513_v14  ;;  %v5520_v12 = vpack.c.bf16 %v12515_v0, %v12515_v0 }
 0x3c2   : > { %4835 = vst [vmem:[%s10596_s18 + $0x5a8] sm:$0xff] %v9624_v54  ;;  %v2971_v30 = vmax.f32 %v2240_v31, 0.0  ;;  %v2242_v50 = vadd.f32 %v2241_v23, %v10579_v24  ;;  %v12537_v1 = vadd.f32 %v5054_v53, %v5053_v22  ;;  %v5090_v19 = vadd.f32 %v5089_v42, %v11321_v2 }
 0x3c3   : > { %v5333_v36 = vadd.f32 %v5332_v29, %v13858_v17  ;;  %v2243_v34 = vpop.f32.mrf.mxu0  ;;  %v5297_v58 = vadd.f32 %v5296_v7, %v2962_v3  ;;  %v5020_v3 = vadd.f32 %v5019_v8, %v5018_v20  ;;  %v5126_v44 = vrot.slane %v11334_v15, 4 }
 0x3c4   : > { %v9625_v38 = vpack.c.bf16 %v2971_v30, %v2970_v39  ;;  %v2244_v5 = vadd.f32 %v2243_v34, %v10582_v25  ;;  %v2972_v43 = vmax.f32 %v2242_v50, 0.0  ;;  %v12544_v16 = vunpack.c.l.b16 %v5519_v37 }
 0x3c5   : > { %v5334_v10 = vadd.f32 %v5333_v36, %v2963_v41  ;;  %v2247_v32 = vpop.f32.mrf.mxu0  ;;  %v5298_v45 = vadd.f32 %v5297_v58, %v2964_v9  ;;  %v12546_v54 = vunpack.c.l.b16 %v5520_v12  ;;  %v5163_v20 = vrot.slane %v11845_v59, 4 }
 0x3c6   : > { %4836 = vst [vmem:[%s10596_s18 + $0x5b0] sm:$0xff] %v9625_v38  ;;  %v2973_v62 = vmax.f32 %v2244_v5, 0.0  ;;  %v2248_v11 = vadd.f32 %v2247_v32, %v10579_v24  ;;  %v5056_v23 = vrot.slane %v12537_v1, 1  ;;  %v5091_v33 = vrot.slane %v5090_v19, 2 }
 0x3c7   : > { %v5335_v28 = vadd.f32 %v5334_v10, %v2965_v6  ;;  %v2249_v57 = vpop.f32.mrf.mxu0  ;;  %v5299_v41 = vadd.f32 %v5298_v45, %v2966_v40  ;;  %v12553_v40 = vmul.f32 0.00390625, %v5020_v3  ;;  %v5127_v8 = vadd.f32 %v5126_v44, %v11334_v15 }
 0x3c8   : > { %v9626_v47 = vpack.c.bf16 %v2973_v62, %v2972_v43  ;;  %v2250_v9 = vadd.f32 %v2249_v57, %v10582_v25  ;;  %v2974_v18 = vmax.f32 %v2248_v11, 0.0  ;;  %v5200_v42 = vrot.slane %v11863_v61, 4 }
 0x3c9   : > { %v5336_v22 = vadd.f32 %v5335_v28, %v2967_v51  ;;  %v2251_v2 = vpop.f32.mrf.mxu0  ;;  %v5300_v31 = vadd.f32 %v5299_v41, %v2968_v60  ;;  %v5164_v60 = vadd.f32 %v5163_v20, %v11845_v59  ;;  %v5237_v17 = vrot.slane %v12140_v21, 4 }
 0x3ca   : > { %4837 = vst [vmem:[%s10596_s18 + $0x5b8] sm:$0xff] %v9626_v47  ;;  %v2975_v6 = vmax.f32 %v2250_v9, 0.0  ;;  %v2252_v29 = vadd.f32 %v2251_v2, %v10579_v24  ;;  %v5092_v37 = vadd.f32 %v5091_v33, %v5090_v19  ;;  %v5385_v15 = vrot.slane %v11607_v13, 4 }
 0x3cb   : > { %v5337_v7 = vadd.f32 %v5336_v22, %v2969_v52  ;;  %v2253_v50 = vpop.f32.mrf.mxu0  ;;  %v5301_v53 = vadd.f32 %v5300_v31, %v2970_v39  ;;  %v5274_v39 = vrot.slane %v12145_v56, 4  ;;  %v5165_v11 = vrot.slane %v5164_v60, 2 }
 0x3cc   : > { %v9627_v26 = vpack.c.bf16 %v2975_v6, %v2974_v18  ;;  %v2254_v51 = vadd.f32 %v2253_v50, %v10582_v25  ;;  %v2976_v38 = vmax.f32 %v2252_v29, 0.0  ;;  %v5238_v3 = vadd.f32 %v5237_v17, %v12140_v21 }
 0x3cd   : > { %v5338_v36 = vadd.f32 %v5337_v7, %v2971_v30  ;;  %v2257_v34 = vpop.f32.mrf.mxu0  ;;  %v5302_v58 = vadd.f32 %v5301_v53, %v2972_v43  ;;  %v5422_v43 = vrot.slane %v11609_v55, 4  ;;  %v5201_v19 = vadd.f32 %v5200_v42, %v11863_v61 }
 0x3ce   : > { %4838 = vst [vmem:[%s10596_s18 + $0x5c0] sm:$0xff] %v9627_v26  ;;  %v2977_v5 = vmax.f32 %v2254_v51, 0.0  ;;  %v2258_v52 = vadd.f32 %v2257_v34, %v10579_v24  ;;  %v5275_v47 = vadd.f32 %v5274_v39, %v12145_v56  ;;  %v5459_v9 = vrot.slane %v12068_v48, 4 }
 0x3cf   : > { %v5339_v12 = vadd.f32 %v5338_v36, %v2973_v62  ;;  %v2259_v59 = vpop.f32.mrf.mxu0  ;;  %v5303_v10 = vadd.f32 %v5302_v58, %v2974_v18  ;;  %v5496_v20 = vrot.slane %v12070_v35, 4  ;;  %v5128_v61 = vrot.slane %v5127_v8, 2 }
 0x3d0   : > { %v9628_v32 = vpack.c.bf16 %v2977_v5, %v2976_v38  ;;  %v2978_v45 = vmax.f32 %v2258_v52, 0.0  ;;  %v2260_v30 = vadd.f32 %v2259_v59, %v10582_v25  ;;  %v5386_v29 = vadd.f32 %v5385_v15, %v11607_v13 }
 0x3d1   : > { %v5340_v28 = vadd.f32 %v5339_v12, %v2975_v6  ;;  %v2261_v57 = vpop.f32.mrf.mxu0  ;;  %v5304_v44 = vadd.f32 %v5303_v10, %v2976_v38  ;;  %v5423_v33 = vadd.f32 %v5422_v43, %v11609_v55  ;;  %v5239_v7 = vrot.slane %v5238_v3, 2 }
 0x3d2   : > { %4839 = vst [vmem:[%s10596_s18 + $0x5c8] sm:$0xff] %v9628_v32  ;;  %v2979_v41 = vmax.f32 %v2260_v30, 0.0  ;;  %v2262_v62 = vadd.f32 %v2261_v57, %v10579_v24  ;;  %v5202_v24 = vrot.slane %v5201_v19, 2  ;;  %v5093_v26 = vrot.slane %v5092_v37, 1 }
 0x3d3   : > { %v5341_v22 = vadd.f32 %v5340_v28, %v2977_v5  ;;  %v2263_v2 = vpop.f32.mrf.mxu0  ;;  %v5305_v31 = vadd.f32 %v5304_v44, %v2978_v45  ;;  %v5166_v51 = vadd.f32 %v5165_v11, %v5164_v60  ;;  %v5276_v42 = vrot.slane %v5275_v47, 2 }
 0x3d4   : > { %v9629_v21 = vpack.c.bf16 %v2979_v41, %v2978_v45  ;;  %v2980_v18 = vmax.f32 %v2262_v62, 0.0  ;;  %v2264_v6 = vadd.f32 %v2263_v2, %v10582_v25  ;;  %v5460_v17 = vadd.f32 %v5459_v9, %v12068_v48  ;;  %v13866_v62 = vld [vmem:[#allocation10_spill] sm:$0xff] }
 0x3d5   : > { %v5342_v56 = vadd.f32 %v5341_v22, %v2979_v41  ;;  %v5497_v36 = vadd.f32 %v5496_v20, %v12070_v35  ;;  %v13859_v25 = vmax.f32 %v11074_v46, 0.0  ;;  %v5129_v55 = vadd.f32 %v5128_v61, %v5127_v8 }
 0x3d6   : > { %4840 = vst [vmem:[%s10596_s18 + $0x5d0] sm:$0xff] %v9629_v21  ;;  %v5306_v50 = vadd.f32 %v5305_v31, %v2980_v18  ;;  %v2981_v53 = vmax.f32 %v2264_v6, 0.0  ;;  %v5387_v38 = vrot.slane %v5386_v29, 2  ;;  %v5424_v5 = vrot.slane %v5423_v33, 2  ;;  %v13868_v21 = vld [vmem:[#allocation12_spill] sm:$0xff] }
 0x3d7   : > { %v5240_v52 = vadd.f32 %v5239_v7, %v5238_v3  ;;  %v5057_v15 = vadd.f32 %v5056_v23, %v12537_v1  ;;  %v5203_v39 = vadd.f32 %v5202_v24, %v5201_v19  ;;  %v13860_v60 = vmax.f32 %v11086_v63, 0.0  ;;  %v13864_v19 = vld [vmem:[#allocation11_spill] sm:$0xff] }
 0x3d8   : > { %v5307_v34 = vadd.f32 %v5306_v50, %v13859_v25  ;;  %v9630_v13 = vpack.c.bf16 %v2981_v53, %v2980_v18  ;;  %v5343_v58 = vadd.f32 %v5342_v56, %v2981_v53  ;;  %v13861_v48 = vmax.f32 %v11077_v49, 0.0 }
 0x3d9   : > { %v5521_v46 = vpack.c.bf16 %v12553_v40, %v12553_v40  ;;  %v5167_v59 = vrot.slane %v5166_v51, 1  ;;  %v5277_v8 = vadd.f32 %v5276_v42, %v5275_v47  ;;  %v5461_v10 = vrot.slane %v5460_v17, 2 }
 0x3da   : > { %v5308_v12 = vadd.f32 %v5307_v34, %v13860_v60  ;;  %4841 = vst [vmem:[%s10596_s18 + $0x5d8] sm:$0xff] %v9630_v13  ;;  %v5344_v35 = vadd.f32 %v5343_v58, %v13861_v48  ;;  %v5094_v32 = vadd.f32 %v5093_v26, %v5092_v37  ;;  %v5498_v45 = vrot.slane %v5497_v36, 2 }
 0x3db   : > { %v13862_v30 = vmax.f32 %v11109_v27, 0.0  ;;  %v13863_v23 = vmax.f32 %v11094_v4, 0.0  ;;  %v5130_v11 = vrot.slane %v5129_v55, 1  ;;  %v5388_v43 = vadd.f32 %v5387_v38, %v5386_v29 }
 0x3dc   : > { %v5425_v3 = vadd.f32 %v5424_v5, %v5423_v33  ;;  %v5241_v49 = vrot.slane %v5240_v52, 1  ;;  %v12596_v28 = vmul.f32 0.00390625, %v5057_v15  ;;  %v5204_v57 = vrot.slane %v5203_v39, 1 }
 0x3dd   : > { %v5309_v1 = vadd.f32 %v5308_v12, %v13862_v30  ;;  %v5345_v63 = vadd.f32 %v5344_v35, %v13863_v23  ;;  %v13865_v44 = vmax.f32 %v13864_v19, 0.0  ;;  %v13867_v47 = vmax.f32 %v13866_v62, 0.0 }
 0x3de   : > { %v5706_v9 = vunpack.c.l.b16 %v5521_v46  ;;  %v5168_v20 = vadd.f32 %v5167_v59, %v5166_v51  ;;  %v5278_v27 = vrot.slane %v5277_v8, 1  ;;  %v5462_v22 = vadd.f32 %v5461_v10, %v5460_v17 }
 0x3df   : > { %v5310_v41 = vadd.f32 %v5309_v1, %v13865_v44  ;;  %v5346_v37 = vadd.f32 %v5345_v63, %v13867_v47  ;;  %v12602_v2 = vmul.f32 0.00390625, %v5094_v32  ;;  %v5499_v4 = vadd.f32 %v5498_v45, %v5497_v36 }
 0x3e0   : > { %v13869_v18 = vmax.f32 %v13868_v21, 0.0  ;;  %v5131_v61 = vadd.f32 %v5130_v11, %v5129_v55  ;;  %v5389_v29 = vrot.slane %v5388_v43, 1  ;;  %v5426_v33 = vrot.slane %v5425_v3, 1 }
 0x3e1   : > { %v5311_v31 = vrot.slane %v5310_v41, 4  ;;  %v5242_v7 = vadd.f32 %v5241_v49, %v5240_v52  ;;  %v5522_v24 = vpack.c.bf16 %v12596_v28, %v12596_v28  ;;  %v5205_v56 = vadd.f32 %v5204_v57, %v5203_v39 }
 0x3e2   : > { %v5347_v6 = vadd.f32 %v5346_v37, %v13869_v18  ;;  %v12608_v26 = vmul.f32 0.00390625, %v5168_v20  ;;  %v5279_v51 = vadd.f32 %v5278_v27, %v5277_v8  ;;  %v5463_v42 = vrot.slane %v5462_v22, 1 }
 0x3e3   : > { %v5312_v50 = vadd.f32 %v5311_v31, %v5310_v41  ;;  %v5523_v17 = vpack.c.bf16 %v12602_v2, %v12602_v2  ;;  %v5500_v36 = vrot.slane %v5499_v4, 1  ;;  %v12612_v13 = vmul.f32 0.00390625, %v5131_v61 }
 0x3e4   : > { %v5348_v53 = vrot.slane %v5347_v6, 4  ;;  %v5390_v58 = vadd.f32 %v5389_v29, %v5388_v43  ;;  %v5427_v55 = vadd.f32 %v5426_v33, %v5425_v3  ;;  %v12614_v38 = vmul.f32 0.00390625, %v5242_v7 }
 0x3e5   : > { %v5313_v25 = vrot.slane %v5312_v50, 2  ;;  %v5707_v5 = vunpack.c.l.b16 %v5522_v24  ;;  %v12616_v52 = vmul.f32 0.00390625, %v5205_v56  ;;  %v5721_v60 = vsel %vm5720_vm2, %v5706_v9, %v12544_v16 }
 0x3e6   : > { %v5349_v34 = vadd.f32 %v5348_v53, %v5347_v6  ;;  %v5525_v12 = vpack.c.bf16 %v12608_v26, %v12608_v26  ;;  %v12622_v48 = vmul.f32 0.00390625, %v5279_v51  ;;  %v5464_v35 = vadd.f32 %v5463_v42, %v5462_v22 }
 0x3e7   : > { %v5314_v15 = vadd.f32 %v5313_v25, %v5312_v50  ;;  %v5708_v46 = vunpack.c.l.b16 %v5523_v17  ;;  %v5501_v59 = vadd.f32 %v5500_v36, %v5499_v4  ;;  %v5524_v32 = vpack.c.bf16 %v12612_v13, %v12612_v13 }
 0x3e8   : > { %v5350_v39 = vrot.slane %v5349_v34, 2  ;;  %v12626_v45 = vmul.f32 0.00390625, %v5390_v58  ;;  %v12628_v30 = vmul.f32 0.00390625, %v5427_v55  ;;  %v5527_v16 = vpack.c.bf16 %v12614_v38, %v12614_v38 }
 0x3e9   : > { %v5315_v8 = vrot.slane %v5314_v15, 1  ;;  %v5734_v1 = vsel %vm5720_vm2, %v5707_v5, %v12546_v54  ;;  %v5526_v23 = vpack.c.bf16 %v12616_v52, %v12616_v52  ;;  %v5710_v43 = vunpack.c.l.b16 %v5525_v12  ;;  %v9940_v5 = vld [vmem:[%s13821_s2 + $0x158] ss:$24 sps:$4 sm:$0xff]   ;;  %v9948_v12 = vld [vmem:[%s13821_s2 + $0xfc] ss:$24 sps:$4 sm:$0xff]  }
 0x3ea   : > { %v5351_v10 = vadd.f32 %v5350_v39, %v5349_v34  ;;  %v5528_v3 = vpack.c.bf16 %v12622_v48, %v12622_v48  ;;  %v12638_v49 = vmul.f32 0.00390625, %v5464_v35  ;;  %v5723_v57 = vsel %vm5722_vm3, %v5708_v46, %v5721_v60  ;;  %v9945_v39 = vld [vmem:[%s13821_s2 + $0x12c] ss:$24 sps:$4 sm:$0xff]   ;;  %v9943_v60 = vld [vmem:[%s13821_s2 + $0x128] ss:$24 sps:$4 sm:$0xff]  }
 0x3eb   : > { %v5316_v63 = vadd.f32 %v5315_v8, %v5314_v15  ;;  %v12641_v19 = vmul.f32 0.00390625, %v5501_v59  ;;  %v5709_v54 = vunpack.c.l.b16 %v5524_v32  ;;  %v5531_v62 = vpack.c.bf16 %v12626_v45, %v12626_v45  ;;  %v9946_v35 = vld [vmem:[%s13821_s2 + $0xf8] ss:$24 sps:$4 sm:$0xff]   ;;  %v9951_v46 = vld [vmem:[%s13821_s2 + $0xcc] ss:$24 sps:$4 sm:$0xff]  }
 0x3ec   : > { %v5352_v11 = vrot.slane %v5351_v10, 1  ;;  %v5532_v47 = vpack.c.bf16 %v12628_v30, %v12628_v30  ;;  %v5712_v37 = vunpack.c.l.b16 %v5527_v16  ;;  %v5711_v9 = vunpack.c.l.b16 %v5526_v23  ;;  %v9949_v59 = vld [vmem:[%s13821_s2 + $0xc8] ss:$24 sps:$4 sm:$0xff]   ;;  %v9954_v8 = vld [vmem:[%s13821_s2 + $0x9c] ss:$24 sps:$4 sm:$0xff]  }
 0x3ed   : > { %v12643_v44 = vmul.f32 0.00390625, %v5316_v63  ;;  %v5725_v22 = vsel %vm5724_vm4, %v5710_v43, %v5723_v57  ;;  %v5713_v4 = vunpack.c.l.b16 %v5528_v3  ;;  %v5533_v31 = vpack.c.bf16 %v12638_v49, %v12638_v49  ;;  %v9957_v32 = vld [vmem:[%s13821_s2 + $0x6c] ss:$24 sps:$4 sm:$0xff]   ;;  %v9955_v16 = vld [vmem:[%s13821_s2 + $0x68] ss:$24 sps:$4 sm:$0xff]  }
 0x3ee   : > { %v5353_v41 = vadd.f32 %v5352_v11, %v5351_v10  ;;  %v5534_v21 = vpack.c.bf16 %v12641_v19, %v12641_v19  ;;  %v5735_v61 = vsel %vm5722_vm3, %v5709_v54, %v5734_v1  ;;  %v5716_v29 = vunpack.c.l.b16 %v5531_v62  ;;  %v9952_v10 = vld [vmem:[%s13821_s2 + $0x98] ss:$24 sps:$4 sm:$0xff]   ;;  %v9960_v1 = vld [vmem:[%s13821_s2 + $0x3c] ss:$24 sps:$4 sm:$0xff]   ;;  %v9963_v63 = vld [vmem:[%s13821_s2 + $0xc] ss:$24 sps:$4 sm:$0xff]  }
 0x3ef   : > { %v5529_v20 = vpack.c.bf16 %v12643_v44, %v12643_v44  ;;  %v5727_v33 = vsel %vm5726_vm5, %v5712_v37, %v5725_v22  ;;  %v5736_v56 = vsel %vm5724_vm4, %v5711_v9, %v5735_v61  ;;  %v5717_v50 = vunpack.c.l.b16 %v5532_v47  ;;  %v9958_v23 = vld [vmem:[%s13821_s2 + $0x38] ss:$24 sps:$4 sm:$0xff]   ;;  %v9961_v11 = vld [vmem:[%s13821_s2 + $0x8] ss:$24 sps:$4 sm:$0xff]   ;;  %v9966_v43 = vld [vmem:[%s13821_s2 + $0x2dc] ss:$24 sps:$4 sm:$0xff]  }
 0x3f0   : > { %v12651_v27 = vmul.f32 0.00390625, %v5353_v41  ;;  %v5718_v53 = vunpack.c.l.b16 %v5533_v31  ;;  %v5737_v42 = vsel %vm5726_vm5, %v5713_v4, %v5736_v56  ;;  %v5719_v17 = vunpack.c.l.b16 %v5534_v21  ;;  %v9964_v3 = vld [vmem:[%s13821_s2 + $0x2d8] ss:$24 sps:$4 sm:$0xff]   ;;  %v9969_v57 = vld [vmem:[%s13821_s2 + $0x2ac] ss:$24 sps:$4 sm:$0xff]  }
 0x3f1   : > { %v5714_v18 = vunpack.c.l.b16 %v5529_v20  ;;  %v9967_v41 = vld [vmem:[%s13821_s2 + $0x2a8] ss:$24 sps:$4 sm:$0xff]   ;;  %v9972_v54 = vld [vmem:[%s13821_s2 + $0x27c] ss:$24 sps:$4 sm:$0xff]   ;;  %v9970_v62 = vld [vmem:[%s13821_s2 + $0x278] ss:$24 sps:$4 sm:$0xff]  }
 0x3f2   : > { %v5530_v6 = vpack.c.bf16 %v12651_v27, %v12651_v27  ;;  %v9975_v47 = vld [vmem:[%s13821_s2 + $0x24c] ss:$24 sps:$4 sm:$0xff]   ;;  %v9973_v37 = vld [vmem:[%s13821_s2 + $0x248] ss:$24 sps:$4 sm:$0xff]   ;;  %v9978_v9 = vld [vmem:[%s13821_s2 + $0x21c] ss:$24 sps:$4 sm:$0xff]  }
 0x3f3   : > { %v5729_v24 = vsel %vm5728_vm6, %v5714_v18, %v5727_v33  ;;  %v9976_v20 = vld [vmem:[%s13821_s2 + $0x218] ss:$24 sps:$4 sm:$0xff]   ;;  %v9981_v22 = vld [vmem:[%s13821_s2 + $0x1ec] ss:$24 sps:$4 sm:$0xff]   ;;  %v9979_v4 = vld [vmem:[%s13821_s2 + $0x1e8] ss:$24 sps:$4 sm:$0xff]  }
 0x3f4   : > { %v5715_v7 = vunpack.c.l.b16 %v5530_v6  ;;  %v5731_v51 = vsel %vm5730_vm7, %v5716_v29, %v5729_v24  ;;  %v9984_v31 = vld [vmem:[%s13821_s2 + $0x1bc] ss:$24 sps:$4 sm:$0xff]   ;;  %v9982_v21 = vld [vmem:[%s13821_s2 + $0x1b8] ss:$24 sps:$4 sm:$0xff]   ;;  %v9987_v18 = vld [vmem:[%s13821_s2 + $0x18c] ss:$24 sps:$4 sm:$0xff]  }
 0x3f5   : > { %v5733_v25 = vsel %vm5732_vm8, %v5718_v53, %v5731_v51  ;;  %v9985_v6 = vld [vmem:[%s13821_s2 + $0x188] ss:$24 sps:$4 sm:$0xff]   ;;  %v9990_v61 = vld [vmem:[%s13821_s2 + $0x164] ss:$24 sps:$4 sm:$0xff]   ;;  %v9993_v33 = vld [vmem:[%s13821_s2 + $0x134] ss:$24 sps:$4 sm:$0xff]  }
 0x3f6   : > { %v5738_v36 = vsel %vm5728_vm6, %v5715_v7, %v5737_v42  ;;  %v12675_v15 = vpack.c.b16 %v5733_v25, %v5733_v25  ;;  %v9988_v29 = vld [vmem:[%s13821_s2 + $0x160] ss:$24 sps:$4 sm:$0xff]   ;;  %v9991_v7 = vld [vmem:[%s13821_s2 + $0x130] ss:$24 sps:$4 sm:$0xff]   ;;  %v9996_v24 = vld [vmem:[%s13821_s2 + $0x104] ss:$24 sps:$4 sm:$0xff]  }
 0x3f7   : > { %v5739_v34 = vsel %vm5730_vm7, %v5717_v50, %v5738_v36  ;;  %v9994_v56 = vld [vmem:[%s13821_s2 + $0x100] ss:$24 sps:$4 sm:$0xff]   ;;  %v9999_v50 = vld [vmem:[%s13821_s2 + $0xd4] ss:$24 sps:$4 sm:$0xff]   ;;  %v9997_v53 = vld [vmem:[%s13821_s2 + $0xd0] ss:$24 sps:$4 sm:$0xff]  }
 0x3f8   : > { %v5740_v58 = vsel %vm5732_vm8, %v5719_v17, %v5739_v34  ;;  %v10002_v51 = vld [vmem:[%s13821_s2 + $0xa4] ss:$24 sps:$4 sm:$0xff]   ;;  %v10000_v42 = vld [vmem:[%s13821_s2 + $0xa0] ss:$24 sps:$4 sm:$0xff]   ;;  %v10005_v17 = vld [vmem:[%s13821_s2 + $0x74] ss:$24 sps:$4 sm:$0xff]  }
 0x3f9   : > { %v12670_v55 = vpack.c.b16 %v5740_v58, %v5740_v58  ;;  %v10003_v36 = vld [vmem:[%s13821_s2 + $0x70] ss:$24 sps:$4 sm:$0xff]   ;;  %v10008_v25 = vld [vmem:[%s13821_s2 + $0x44] ss:$24 sps:$4 sm:$0xff]   ;;  %v10006_v34 = vld [vmem:[%s13821_s2 + $0x40] ss:$24 sps:$4 sm:$0xff]  }
 0x3fa   : > { %v10011_v58 = vld [vmem:[%s13821_s2 + $0x14] ss:$24 sps:$4 sm:$0xff]  }
 0x3fb   : > { %6257 = vmatprep.mubr.bf16.mxu1 %v12670_v55 }
 0x3fc   : > { %6258 = vmatmul.mubr.bf16.vlgmr.msra.gmra.mxu1 %v12675_v15 }
 0x3fd   : > { %6267 = vmatpush1.bf16.msra.mxu1 %v9940_v5  ;;  %6298 = vmatprep.mubr.bf16.mxu1 %v12670_v55  ;;  %v10009_v5 = vld [vmem:[%s13821_s2 + $0x10] ss:$24 sps:$4 sm:$0xff]  }
 0x3fe   : > { %6268 = vmatprep.subr.bf16.mxu1 %v9945_v39  ;;  %v10014_v39 = vld [vmem:[%s13821_s2 + $0x2e4] ss:$24 sps:$4 sm:$0xff]  }
 0x401   : > { %6269 = vmatpush1.bf16.msra.mxu1 %v9943_v60  ;;  %v10012_v60 = vld [vmem:[%s13821_s2 + $0x2e0] ss:$24 sps:$4 sm:$0xff]  }
 0x402   : > { %6270 = vmatprep.subr.bf16.mxu1 %v9948_v12  ;;  %v10017_v12 = vld [vmem:[%s13821_s2 + $0x2b4] ss:$24 sps:$4 sm:$0xff]  }
 0x405   : > { %6271 = vmatpush1.bf16.msra.mxu1 %v9946_v35  ;;  %v10015_v35 = vld [vmem:[%s13821_s2 + $0x2b0] ss:$24 sps:$4 sm:$0xff]  }
 0x406   : > { %6272 = vmatprep.subr.bf16.mxu1 %v9951_v46  ;;  %v10020_v46 = vld [vmem:[%s13821_s2 + $0x284] ss:$24 sps:$4 sm:$0xff]  }
 0x409   : > { %6273 = vmatpush1.bf16.msra.mxu1 %v9949_v59  ;;  %v10018_v59 = vld [vmem:[%s13821_s2 + $0x280] ss:$24 sps:$4 sm:$0xff]  }
 0x40a   : > { %6274 = vmatprep.subr.bf16.mxu1 %v9954_v8  ;;  %v10023_v8 = vld [vmem:[%s13821_s2 + $0x254] ss:$24 sps:$4 sm:$0xff]  }
 0x40d   : > { %6275 = vmatpush1.bf16.msra.mxu1 %v9952_v10  ;;  %v10021_v10 = vld [vmem:[%s13821_s2 + $0x250] ss:$24 sps:$4 sm:$0xff]  }
 0x40e   : > { %6276 = vmatprep.subr.bf16.mxu1 %v9957_v32  ;;  %v10026_v32 = vld [vmem:[%s13821_s2 + $0x224] ss:$24 sps:$4 sm:$0xff]  }
 0x411   : > { %6277 = vmatpush1.bf16.msra.mxu1 %v9955_v16  ;;  %v10024_v16 = vld [vmem:[%s13821_s2 + $0x220] ss:$24 sps:$4 sm:$0xff]  }
 0x412   : > { %6278 = vmatprep.subr.bf16.mxu1 %v9960_v1  ;;  %v10029_v1 = vld [vmem:[%s13821_s2 + $0x1f4] ss:$24 sps:$4 sm:$0xff]  }
 0x415   : > { %6279 = vmatpush1.bf16.msra.mxu1 %v9958_v23  ;;  %v10027_v23 = vld [vmem:[%s13821_s2 + $0x1f0] ss:$24 sps:$4 sm:$0xff]  }
 0x416   : > { %6280 = vmatprep.subr.bf16.mxu1 %v9963_v63  ;;  %v10032_v63 = vld [vmem:[%s13821_s2 + $0x1c4] ss:$24 sps:$4 sm:$0xff]  }
 0x419   : > { %6281 = vmatpush1.bf16.msra.mxu1 %v9961_v11  ;;  %v10030_v11 = vld [vmem:[%s13821_s2 + $0x1c0] ss:$24 sps:$4 sm:$0xff]  }
 0x41a   : > { %6282 = vmatprep.subr.bf16.mxu1 %v9966_v43  ;;  %v10035_v43 = vld [vmem:[%s13821_s2 + $0x194] ss:$24 sps:$4 sm:$0xff]  }
 0x41d   : > { %6283 = vmatpush2.bf16.msra.mxu1 %v9964_v3  ;;  %v10033_v3 = vld [vmem:[%s13821_s2 + $0x190] ss:$24 sps:$4 sm:$0xff]  }
 0x41e   : > { %6284 = vmatprep.subr.bf16.mxu1 %v9969_v57  ;;  %v12872_v57 = vld [vmem:[%s13746_s8] sm:$0x77] }
 0x421   : > { %6285 = vmatpush2.bf16.msra.mxu1 %v9967_v41  ;;  %v13870_v41 = vld [vmem:[#allocation8_spill] sm:$0xff] }
 0x422   : > { %6286 = vmatprep.subr.bf16.mxu1 %v9972_v54  ;;  %v5637_v54 = vrot.slane %v12872_v57, %v13870_v41 }
 0x425   : > { %6287 = vmatpush2.bf16.msra.mxu1 %v9970_v62  ;;  %v13871_v62 = vld [vmem:[#allocation9_spill] sm:$0xff] }
 0x426   : > { %6288 = vmatprep.subr.bf16.mxu1 %v9975_v47  ;;  %v5641_v47 = vrot.slane %v12872_v57, %v13871_v62 }
 0x429   : > { %6289 = vmatpush2.bf16.msra.mxu1 %v9973_v37  ;;  %v5667_v37 = vrot.slane %v5637_v54, %v13870_v41  ;;  %v10037_v54 = vld [vmem:[%s13741_s3 + $0x38] sm:$0xff]  }
 0x42a   : > { %6290 = vmatprep.subr.bf16.mxu1 %v9978_v9  ;;  %v5671_v9 = vrot.slane %v5641_v47, %v13870_v41  ;;  %v10038_v47 = vld [vmem:[%s13741_s3 + $0x70] sm:$0xff]  }
 0x42d   : > { %6291 = vmatpush2.bf16.msra.mxu1 %v9976_v20 }
 0x42e   : > { %6292 = vmatprep.subr.bf16.mxu1 %v9981_v22 }
 0x431   : > { %6293 = vmatpush2.bf16.msra.mxu1 %v9979_v4 }
 0x432   : > { %6294 = vmatprep.subr.bf16.mxu1 %v9984_v31 }
 0x435   : > { %6295 = vmatpush2.bf16.msra.mxu1 %v9982_v21 }
 0x436   : > { %6296 = vmatprep.subr.bf16.mxu1 %v9987_v18 }
 0x439   : > { %6297 = vmatpush2.bf16.msra.mxu1 %v9985_v6 }
 0x43a   : > { %6307 = vmatprep.subr.bf16.mxu1 %v9990_v61  ;;  %v12883_v61 = vld [vmem:[%s13746_s8 + $0x8] sm:$0x77] }
 0x43c   : > { %6299 = vmatmul.mubr.bf16.vlgmr.msra.gmra.mxu1 %v12675_v15 }
 0x43d   : > { %6308 = vmatpush1.bf16.msra.mxu1 %v9988_v29  ;;  %6339 = vmatprep.mubr.bf16.mxu1 %v12670_v55  ;;  %v5645_v29 = vrot.slane %v12883_v61, %v13870_v41 }
 0x43e   : > { %6309 = vmatprep.subr.bf16.mxu1 %v9993_v33  ;;  %v5649_v33 = vrot.slane %v12883_v61, %v13871_v62 }
 0x441   : > { %6310 = vmatpush1.bf16.msra.mxu1 %v9991_v7  ;;  %v5675_v7 = vrot.slane %v5645_v29, %v13870_v41  ;;  %v10048_v29 = vld [vmem:[%s13741_s3 + $0x48] sm:$0xff]  }
 0x442   : > { %6311 = vmatprep.subr.bf16.mxu1 %v9996_v24  ;;  %v5679_v24 = vrot.slane %v5649_v33, %v13870_v41  ;;  %v10049_v33 = vld [vmem:[%s13741_s3 + $0x8] sm:$0xff]  }
 0x445   : > { %6312 = vmatpush1.bf16.msra.mxu1 %v9994_v56 }
 0x446   : > { %6313 = vmatprep.subr.bf16.mxu1 %v9999_v50 }
 0x449   : > { %6314 = vmatpush1.bf16.msra.mxu1 %v9997_v53 }
 0x44a   : > { %6315 = vmatprep.subr.bf16.mxu1 %v10002_v51 }
 0x44d   : > { %6316 = vmatpush1.bf16.msra.mxu1 %v10000_v42 }
 0x44e   : > { %6317 = vmatprep.subr.bf16.mxu1 %v10005_v17 }
 0x451   : > { %6318 = vmatpush1.bf16.msra.mxu1 %v10003_v36 }
 0x452   : > { %6319 = vmatprep.subr.bf16.mxu1 %v10008_v25  ;;  %v12900_v25 = vld [vmem:[%s13746_s8 + $0x10] sm:$0x77] }
 0x455   : > { %6320 = vmatpush1.bf16.msra.mxu1 %v10006_v34  ;;  %v5653_v34 = vrot.slane %v12900_v25, %v13870_v41 }
 0x456   : > { %6321 = vmatprep.subr.bf16.mxu1 %v10011_v58  ;;  %v5657_v58 = vrot.slane %v12900_v25, %v13871_v62 }
 0x459   : > { %6322 = vmatpush1.bf16.msra.mxu1 %v10009_v5  ;;  %v5683_v5 = vrot.slane %v5653_v34, %v13870_v41 }
 0x45a   : > { %6323 = vmatprep.subr.bf16.mxu1 %v10014_v39  ;;  %v5687_v39 = vrot.slane %v5657_v58, %v13870_v41 }
 0x45d   : > { %6324 = vmatpush2.bf16.msra.mxu1 %v10012_v60 }
 0x45e   : > { %6325 = vmatprep.subr.bf16.mxu1 %v10017_v12 }
 0x461   : > { %6326 = vmatpush2.bf16.msra.mxu1 %v10015_v35 }
 0x462   : > { %6327 = vmatprep.subr.bf16.mxu1 %v10020_v46 }
 0x465   : > { %6328 = vmatpush2.bf16.msra.mxu1 %v10018_v59 }
 0x466   : > { %6329 = vmatprep.subr.bf16.mxu1 %v10023_v8 }
 0x469   : > { %6330 = vmatpush2.bf16.msra.mxu1 %v10021_v10 }
 0x46a   : > { %6331 = vmatprep.subr.bf16.mxu1 %v10026_v32 }
 0x46d   : > { %6332 = vmatpush2.bf16.msra.mxu1 %v10024_v16 }
 0x46e   : > { %6333 = vmatprep.subr.bf16.mxu1 %v10029_v1 }
 0x471   : > { %6334 = vmatpush2.bf16.msra.mxu1 %v10027_v23 }
 0x472   : > { %6335 = vmatprep.subr.bf16.mxu1 %v10032_v63 }
 0x475   : > { %6336 = vmatpush2.bf16.msra.mxu1 %v10030_v11 }
 0x476   : > { %6337 = vmatprep.subr.bf16.mxu1 %v10035_v43 }
 0x479   : > { %6338 = vmatpush2.bf16.msra.mxu1 %v10033_v3  ;;  %v10036_v3 = vld [vmem:[%s13741_s3 + $0x78] sm:$0xff]  }
 0x47a   : > { %9701 = vmatprep.subr.bf16.mxu1 %v10036_v3 }
 0x47c   : > { %6340 = vmatmul.mubr.bf16.vlgmr.msra.gmra.mxu1 %v12675_v15 }
 0x47d   : > { %9702 = vmatpush3.bf16.msra.mxu1 %v10037_v54 }
 0x47e   : > { %9703 = vmatprep.subr.bf16.mxu1 %v10038_v47 }
 0x4bc   : > { %v6259_v20 = vpop.f32.mrf.mxu1 }
 0x4bd   : > { %v6260_v4 = vadd.f32 %v6259_v20, %v5667_v37  ;;  %v10039_v37 = vld [vmem:[%s13741_s3 + $0x30] sm:$0xff]   ;;  %v10041_v20 = vld [vmem:[%s13741_s3 + $0x28] sm:$0xff]  }
 0x4be   : > { %v6261_v22 = vpop.f32.mrf.mxu1  ;;  %9704 = vmatpush3.bf16.msra.mxu1 %v10039_v37 }
 0x4bf   : > { %v6262_v31 = vadd.f32 %v6261_v22, %v5671_v9  ;;  %v10040_v9 = vld [vmem:[%s13741_s3 + $0x68] sm:$0xff]   ;;  %v10042_v22 = vld [vmem:[%s13741_s3 + $0x60] sm:$0xff]  }
 0x4c0   : > { %v6263_v21 = vpop.f32.mrf.mxu1  ;;  %9705 = vmatprep.subr.bf16.mxu1 %v10040_v9 }
 0x4c1   : > { %v6348_v18 = vadd.f32 %v6262_v31, %v6260_v4  ;;  %v10045_v21 = vld [vmem:[%s13741_s3 + $0x18] sm:$0xff]  }
 0x4c2   : > { %v6264_v6 = vpop.f32.mrf.mxu1  ;;  %9706 = vmatpush3.bf16.msra.mxu1 %v10041_v20 }
 0x4c3   : > { %6349 = vadd.xlane.f32.xlu0 %v6348_v18  ;;  %9707 = vmatprep.subr.bf16.mxu1 %v10042_v22  ;;  %v10046_v18 = vld [vmem:[%s13741_s3 + $0x50] sm:$0xff]  }
 0x4c4   : > { %v10047_v6 = vld [vmem:[%s13741_s3 + $0x10] sm:$0xff]  }
 0x4fc   : > { %v6300_v56 = vpop.f32.mrf.mxu1 }
 0x4fd   : > { %v12891_v53 = vadd.f32 %v6300_v56, %v5675_v7  ;;  %v10050_v7 = vld [vmem:[%s13741_s3 + $0x40] sm:$0xff]   ;;  %v10052_v56 = vld [vmem:[%s13741_s3 + $0xf8] sm:$0xff]  }
 0x4fe   : > { %v6302_v50 = vpop.f32.mrf.mxu1 }
 0x4ff   : > { %v12893_v51 = vadd.f32 %v6302_v50, %v5679_v24  ;;  %v10051_v24 = vld [vmem:[%s13741_s3] sm:$0xff]  }
 0x500   : > { %v6304_v42 = vpop.f32.mrf.mxu1 }
 0x501   : > { %v6406_v17 = vadd.f32 %v12893_v51, %v12891_v53 }
 0x502   : > { %v6305_v36 = vpop.f32.mrf.mxu1 }
 0x503   : > { %6407 = vadd.xlane.f32.xlu0 %v6406_v17 }
 0x53c   : > { %v6341_v60 = vpop.f32.mrf.mxu1 }
 0x53d   : > { %v6342_v35 = vadd.f32 %v6341_v60, %v5683_v5 }
 0x53e   : > { %v6343_v12 = vpop.f32.mrf.mxu1 }
 0x53f   : > { %v6344_v46 = vadd.f32 %v6343_v12, %v5687_v39 }
 0x540   : > { %v6345_v59 = vpop.f32.mrf.mxu1 }
 0x541   : > { %v6464_v8 = vadd.f32 %v6344_v46, %v6342_v35 }
 0x542   : > { %v6346_v10 = vpop.f32.mrf.mxu1 }
 0x543   : > { %6465 = vadd.xlane.f32.xlu1 %v6464_v8 }
 0x54c   : > { %v6350_v32 = vpop.xlane.xlu0 %6349 }
 0x54d   : > { %v6351_v16 = vmul.f32 0.00390625, %v6350_v32 }
 0x54f   : > { %v12908_v1 = vsub.f32 %v6260_v4, %v6351_v16  ;;  %v12910_v23 = vsub.f32 %v6262_v31, %v6351_v16  ;;  %v10043_v4 = vld [vmem:[%s13741_s3 + $0x20] sm:$0xff]   ;;  %v10044_v31 = vld [vmem:[%s13741_s3 + $0x58] sm:$0xff]  }
 0x550   : > { %9708 = vmatpush3.bf16.msra.mxu1 %v10043_v4 }
 0x551   : > { %v6354_v63 = vmul.f32 %v12908_v1, %v12908_v1  ;;  %v6355_v11 = vmul.f32 %v12910_v23, %v12910_v23  ;;  %9709 = vmatprep.subr.bf16.mxu1 %v10044_v31 }
 0x553   : > { %v6356_v43 = vadd.f32 %v6355_v11, %v6354_v63  ;;  %v13872_v63 = vld [vmem:[#allocation7_spill] sm:$0xff] }
 0x554   : > { %9710 = vmatpush3.bf16.msra.mxu1 %v10045_v21  ;;  %v12986_v11 = vsub.s32 1, %v13872_v63 }
 0x555   : > { %6357 = vadd.xlane.f32.xlu1 %v6356_v43  ;;  %9711 = vmatprep.subr.bf16.mxu1 %v10046_v18  ;;  %v12995_v43 = vsub.s32 6, %v13872_v63 }
 0x556   : > { %v6367_v54 = vrot.slane %v12872_v57, %v12986_v11 }
 0x557   : > { %v6391_v47 = vrot.slane %v12872_v57, %v12995_v43 }
 0x558   : > { %9712 = vmatpush3.bf16.msra.mxu1 %v10047_v6  ;;  %v6377_v20 = vrot.slane %v6367_v54, %v12986_v11  ;;  %v10068_v54 = vld [vmem:[%s13741_s3 + $0x178] sm:$0xff]  }
 0x559   : > { %9713 = vmatprep.subr.bf16.mxu1 %v10048_v29 }
 0x55c   : > { %9714 = vmatpush3.bf16.msra.mxu1 %v10049_v33 }
 0x55d   : > { %9715 = vmatprep.subr.bf16.mxu1 %v10050_v7 }
 0x560   : > { %9716 = vmatpush3.bf16.msra.mxu1 %v10051_v24 }
 0x561   : > { %9723 = vmatprep.subr.bf16.mxu1 %v10052_v56 }
 0x58c   : > { %v6408_v50 = vpop.xlane.xlu0 %6407 }
 0x58d   : > { %v6409_v42 = vmul.f32 0.00390625, %v6408_v50 }
 0x58f   : > { %v12968_v17 = vsub.f32 %v12891_v53, %v6409_v42  ;;  %v12971_v36 = vsub.f32 %v12893_v51, %v6409_v42  ;;  %v10053_v42 = vld [vmem:[%s13741_s3 + $0xb8] sm:$0xff]  }
 0x591   : > { %v6412_v34 = vmul.f32 %v12968_v17, %v12968_v17  ;;  %v6413_v58 = vmul.f32 %v12971_v36, %v12971_v36 }
 0x593   : > { %v6414_v5 = vadd.f32 %v6413_v58, %v6412_v34  ;;  %v10056_v34 = vld [vmem:[%s13741_s3 + $0xe8] sm:$0xff]  }
 0x594   : > { %v10057_v58 = vld [vmem:[%s13741_s3 + $0xa8] sm:$0xff]  }
 0x595   : > { %6415 = vadd.xlane.f32.xlu0 %v6414_v5  ;;  %v10058_v5 = vld [vmem:[%s13741_s3 + $0xe0] sm:$0xff]  }
 0x5cc   : > { %v6466_v39 = vpop.xlane.xlu1 %6465 }
 0x5cd   : > { %v6467_v60 = vmul.f32 0.00390625, %v6466_v39  ;;  %v10059_v39 = vld [vmem:[%s13741_s3 + $0xa0] sm:$0xff]  }
 0x5cf   : > { %v12977_v12 = vsub.f32 %v6342_v35, %v6467_v60  ;;  %v12979_v59 = vsub.f32 %v6344_v46, %v6467_v60  ;;  %v12989_v35 = vsub.s32 5, %v13872_v63  ;;  %v12992_v46 = vsub.s32 2, %v13872_v63  ;;  %v10060_v60 = vld [vmem:[%s13741_s3 + $0xd8] sm:$0xff]  }
 0x5d1   : > { %v6470_v53 = vmul.f32 %v12977_v12, %v12977_v12  ;;  %v6471_v51 = vmul.f32 %v12979_v59, %v12979_v59  ;;  %v6371_v3 = vrot.slane %v12872_v57, %v12989_v35  ;;  %v6387_v37 = vrot.slane %v12872_v57, %v12992_v46 }
 0x5d2   : > { %v6401_v21 = vrot.slane %v6391_v47, %v12992_v46 }
 0x5d3   : > { %v6472_v8 = vadd.f32 %v6471_v51, %v6470_v53  ;;  %v6381_v9 = vrot.slane %v6371_v3, %v12986_v11  ;;  %v6397_v18 = vrot.slane %v6387_v37, %v12992_v46  ;;  %v10061_v53 = vld [vmem:[%s13741_s3 + $0x98] sm:$0xff]   ;;  %v10062_v51 = vld [vmem:[%s13741_s3 + $0xd0] sm:$0xff]   ;;  %v10067_v3 = vld [vmem:[%s13741_s3 + $0x80] sm:$0xff]  }
 0x5d5   : > { %6473 = vadd.xlane.f32.xlu1 %v6472_v8  ;;  %v10063_v8 = vld [vmem:[%s13741_s3 + $0x90] sm:$0xff]  }
 0x5de   : > { %v6358_v10 = vpop.xlane.xlu1 %6357 }
 0x5df   : > { %v6359_v32 = vmul.f32 0.00390625, %v6358_v10  ;;  %v10064_v10 = vld [vmem:[%s13741_s3 + $0xc8] sm:$0xff]  }
 0x5e1   : > { %v6360_v16 = vadd.f32 1e-05, %v6359_v32  ;;  %v10065_v32 = vld [vmem:[%s13741_s3 + $0x88] sm:$0xff]  }
 0x5e3   : > { %10242 = vrsqrt.f32 %v6360_v16  ;;  %v10066_v16 = vld [vmem:[%s13741_s3 + $0xc0] sm:$0xff]  }
 0x5f0   : > { %v10243_v22 = vpop.eup %10242 }
 0x5f1   : > { %v6362_v4 = vmul.f32 %v10243_v22, %v12908_v1  ;;  %v6363_v31 = vmul.f32 %v10243_v22, %v12910_v23  ;;  %v10054_v1 = vld [vmem:[%s13741_s3 + $0xf0] sm:$0xff]   ;;  %v6425_v22 = vrot.slane %v12883_v61, %v12986_v11 }
 0x5f2   : > { %v10055_v23 = vld [vmem:[%s13741_s3 + $0xb0] sm:$0xff]  }
 0x5f3   : > { %v6383_v6 = vmul.f32 %v6381_v9, %v6363_v31  ;;  %v6382_v29 = vmul.f32 %v6377_v20, %v6362_v4  ;;  %v6429_v20 = vrot.slane %v12883_v61, %v12989_v35  ;;  %v6449_v4 = vrot.slane %v12883_v61, %v12995_v43 }
 0x5f4   : > { %v6445_v31 = vrot.slane %v12883_v61, %v12992_v46 }
 0x5f5   : > { %v6403_v33 = vadd.f32 %v6401_v21, %v6383_v6  ;;  %v6402_v7 = vadd.f32 %v6397_v18, %v6382_v29  ;;  %v6439_v21 = vrot.slane %v6429_v20, %v12986_v11  ;;  %v6435_v18 = vrot.slane %v6425_v22, %v12986_v11 }
 0x5f6   : > { %v6487_v22 = vrot.slane %v12900_v25, %v12989_v35 }
 0x5f7   : > { %v6405_v24 = vmax.f32 %v6403_v33, 0.0  ;;  %v6404_v56 = vmax.f32 %v6402_v7, 0.0  ;;  %v6459_v7 = vrot.slane %v6449_v4, %v12992_v46  ;;  %v6483_v4 = vrot.slane %v12900_v25, %v12986_v11 }
 0x5f9   : > { %v6523_v57 = vpack.c.bf16 %v6405_v24, %v6405_v24  ;;  %v6522_v50 = vpack.c.bf16 %v6404_v56, %v6404_v56  ;;  %v6455_v24 = vrot.slane %v6445_v31, %v12992_v46  ;;  %v6507_v31 = vrot.slane %v12900_v25, %v12995_v43 }
 0x5fb   : > { %6948 = vmatprep.mubr.bf16.mxu1 %v6523_v57 }
 0x5fc   : > { %6949 = vmatmul.mubr.bf16.vlgmr.msra.gmra.mxu1 %v6522_v50 }
 0x5fd   : > { %9724 = vmatpush3.bf16.msra.mxu1 %v10053_v42 }
 0x5fe   : > { %9725 = vmatprep.subr.bf16.mxu1 %v10054_v1 }
 0x601   : > { %9726 = vmatpush3.bf16.msra.mxu1 %v10055_v23 }
 0x602   : > { %9727 = vmatprep.subr.bf16.mxu1 %v10056_v34 }
 0x605   : > { %9728 = vmatpush3.bf16.msra.mxu1 %v10057_v58  ;;  %v10069_v58 = vld [vmem:[%s13741_s3 + $0x138] sm:$0xff]  }
 0x606   : > { %9729 = vmatprep.subr.bf16.mxu1 %v10058_v5  ;;  %v10072_v5 = vld [vmem:[%s13741_s3 + $0x168] sm:$0xff]  }
 0x609   : > { %9730 = vmatpush3.bf16.msra.mxu1 %v10059_v39  ;;  %v10073_v39 = vld [vmem:[%s13741_s3 + $0x128] sm:$0xff]  }
 0x60a   : > { %9731 = vmatprep.subr.bf16.mxu1 %v10060_v60  ;;  %v10074_v60 = vld [vmem:[%s13741_s3 + $0x160] sm:$0xff]  }
 0x60d   : > { %9732 = vmatpush3.bf16.msra.mxu1 %v10061_v53  ;;  %v10075_v53 = vld [vmem:[%s13741_s3 + $0x120] sm:$0xff]  }
 0x60e   : > { %9733 = vmatprep.subr.bf16.mxu1 %v10062_v51  ;;  %v10076_v51 = vld [vmem:[%s13741_s3 + $0x158] sm:$0xff]  }
 0x611   : > { %9734 = vmatpush3.bf16.msra.mxu1 %v10063_v8  ;;  %v10077_v8 = vld [vmem:[%s13741_s3 + $0x118] sm:$0xff]  }
 0x612   : > { %9735 = vmatprep.subr.bf16.mxu1 %v10064_v10  ;;  %v10078_v10 = vld [vmem:[%s13741_s3 + $0x150] sm:$0xff]  }
 0x615   : > { %9736 = vmatpush3.bf16.msra.mxu1 %v10065_v32  ;;  %v10079_v32 = vld [vmem:[%s13741_s3 + $0x110] sm:$0xff]  }
 0x616   : > { %9737 = vmatprep.subr.bf16.mxu1 %v10066_v16  ;;  %v10080_v16 = vld [vmem:[%s13741_s3 + $0x148] sm:$0xff]  }
 0x619   : > { %9738 = vmatpush3.bf16.msra.mxu1 %v10067_v3  ;;  %v10081_v3 = vld [vmem:[%s13741_s3 + $0x108] sm:$0xff]  }
 0x61a   : > { %9745 = vmatprep.subr.bf16.mxu1 %v10068_v54  ;;  %v10082_v54 = vld [vmem:[%s13741_s3 + $0x140] sm:$0xff]  }
 0x61e   : > { %v6416_v47 = vpop.xlane.xlu0 %6415 }
 0x61f   : > { %v6417_v37 = vmul.f32 0.00390625, %v6416_v47  ;;  %v10083_v47 = vld [vmem:[%s13741_s3 + $0x100] sm:$0xff]  }
 0x621   : > { %v6418_v9 = vadd.f32 1e-05, %v6417_v37 }
 0x623   : > { %10244 = vrsqrt.f32 %v6418_v9 }
 0x630   : > { %v10245_v6 = vpop.eup %10244 }
 0x631   : > { %v6420_v29 = vmul.f32 %v10245_v6, %v12968_v17  ;;  %v6421_v33 = vmul.f32 %v10245_v6, %v12971_v36  ;;  %v10070_v17 = vld [vmem:[%s13741_s3 + $0x170] sm:$0xff]   ;;  %v6493_v6 = vrot.slane %v6483_v4, %v12986_v11 }
 0x632   : > { %v10071_v36 = vld [vmem:[%s13741_s3 + $0x130] sm:$0xff]  }
 0x633   : > { %v6441_v56 = vmul.f32 %v6439_v21, %v6421_v33  ;;  %v6440_v57 = vmul.f32 %v6435_v18, %v6420_v29  ;;  %v6503_v21 = vrot.slane %v12900_v25, %v12992_v46  ;;  %v6497_v18 = vrot.slane %v6487_v22, %v12986_v11 }
 0x635   : > { %v6461_v50 = vadd.f32 %v6459_v7, %v6441_v56  ;;  %v6460_v42 = vadd.f32 %v6455_v24, %v6440_v57  ;;  %v6517_v24 = vrot.slane %v6507_v31, %v12992_v46  ;;  %v6513_v56 = vrot.slane %v6503_v21, %v12992_v46 }
 0x636   : > { %v13873_v21 = vlaneseq }
 0x637   : > { %v6463_v1 = vmax.f32 %v6461_v50, 0.0  ;;  %v6462_v23 = vmax.f32 %v6460_v42, 0.0 }
 0x639   : > { %v6525_v61 = vpack.c.bf16 %v6463_v1, %v6463_v1  ;;  %v6524_v34 = vpack.c.bf16 %v6462_v23, %v6462_v23 }
 0x63b   : > { %6988 = vmatprep.mubr.bf16.mxu1 %v6525_v61 }
 0x63c   : > { %6989 = vmatmul.mubr.bf16.vlgmr.msra.gmra.mxu1 %v6524_v34 }
 0x63d   : > { %9746 = vmatpush3.bf16.msra.mxu1 %v10069_v58 }
 0x63e   : > { %9747 = vmatprep.subr.bf16.mxu1 %v10070_v17 }
 0x641   : > { %9748 = vmatpush3.bf16.msra.mxu1 %v10071_v36 }
 0x642   : > { %9749 = vmatprep.subr.bf16.mxu1 %v10072_v5 }
 0x645   : > { %9750 = vmatpush3.bf16.msra.mxu1 %v10073_v39 }
 0x646   : > { %9751 = vmatprep.subr.bf16.mxu1 %v10074_v60 }
 0x649   : > { %9752 = vmatpush3.bf16.msra.mxu1 %v10075_v53 }
 0x64a   : > { %9753 = vmatprep.subr.bf16.mxu1 %v10076_v51 }
 0x64d   : > { %9754 = vmatpush3.bf16.msra.mxu1 %v10077_v8 }
 0x64e   : > { %9755 = vmatprep.subr.bf16.mxu1 %v10078_v10 }
 0x651   : > { %9756 = vmatpush3.bf16.msra.mxu1 %v10079_v32 }
 0x652   : > { %9757 = vmatprep.subr.bf16.mxu1 %v10080_v16 }
 0x655   : > { %9758 = vmatpush3.bf16.msra.mxu1 %v10081_v3 }
 0x656   : > { %9759 = vmatprep.subr.bf16.mxu1 %v10082_v54 }
 0x659   : > { %9760 = vmatpush3.bf16.msra.mxu1 %v10083_v47 }
 0x65e   : > { %v6474_v37 = vpop.xlane.xlu1 %6473 }
 0x65f   : > { %v6475_v9 = vmul.f32 0.00390625, %v6474_v37 }
 0x661   : > { %v6476_v20 = vadd.f32 1e-05, %v6475_v9 }
 0x663   : > { %10246 = vrsqrt.f32 %v6476_v20 }
 0x670   : > { %v10247_v29 = vpop.eup %10246 }
 0x671   : > { %v6478_v33 = vmul.f32 %v10247_v29, %v12977_v12  ;;  %v6479_v7 = vmul.f32 %v10247_v29, %v12979_v59  ;;  %v490_v59 = vld [vmem:[%s13749_s11] sm:$0x3] }
 0x672   : > { %v6627_v39 = vrot.slane %v490_v59, %v13870_v41 }
 0x673   : > { %v6499_v57 = vmul.f32 %v6497_v18, %v6479_v7  ;;  %v6498_v50 = vmul.f32 %v6493_v6, %v6478_v33  ;;  %v7037_v18 = vand.u32 127, %v13873_v21 }
 0x675   : > { %v6519_v42 = vadd.f32 %v6517_v24, %v6499_v57  ;;  %v6518_v1 = vadd.f32 %v6513_v56, %v6498_v50  ;;  %vm7046_vm9 = vcmp.lt.s32.totalorder %v7037_v18, 6 }
 0x677   : > { %v6521_v23 = vmax.f32 %v6519_v42, 0.0  ;;  %v6520_v61 = vmax.f32 %v6518_v1, 0.0 }
 0x679   : > { %v6527_v25 = vpack.c.bf16 %v6521_v23, %v6521_v23  ;;  %v6526_v34 = vpack.c.bf16 %v6520_v61, %v6520_v61 }
 0x67b   : > { %7028 = vmatprep.mubr.bf16.mxu1 %v6527_v25 }
 0x67c   : > { %7029 = vmatmul.mubr.bf16.vlgmr.msra.gmra.mxu1 %v6526_v34 }
 0x6bc   : > { %v9717_v58 = vpop.f32.mrf.mxu1 }
 0x6be   : > { %v9718_v17 = vpop.f32.mrf.mxu1 }
 0x6bf   : > { %v9719_v36 = vadd.f32 %v9718_v17, %v9717_v58 }
 0x6c0   : > { %v9720_v12 = vpop.f32.mrf.mxu1 }
 0x6c1   : > { %v6951_v51 = vadd.f32 %v9719_v36, %v6627_v39 }
 0x6c2   : > { %v9721_v5 = vpop.f32.mrf.mxu1 }
 0x6fc   : > { %v9739_v60 = vpop.f32.mrf.mxu1 }
 0x6fe   : > { %v9740_v53 = vpop.f32.mrf.mxu1 }
 0x6ff   : > { %v9741_v8 = vadd.f32 %v9740_v53, %v9739_v60 }
 0x700   : > { %v9742_v10 = vpop.f32.mrf.mxu1 }
 0x701   : > { %v6991_v32 = vadd.f32 %v9741_v8, %v6951_v51  ;;  %v13145_v10 = vld [vmem:[%s13750_s12] sm:$0xff] }
 0x702   : > { %v9743_v16 = vpop.f32.mrf.mxu1 }
 0x703   : > { %v7091_v16 = vrot.slane %v13145_v10, %v12986_v11 }
 0x73c   : > { %v9761_v3 = vpop.f32.mrf.mxu1 }
 0x73e   : > { %v9762_v54 = vpop.f32.mrf.mxu1 }
 0x73f   : > { %v9763_v47 = vadd.f32 %v9762_v54, %v9761_v3  ;;  %v7086_v3 = vrot.slane %v13145_v10, %v13870_v41 }
 0x740   : > { %v9764_v37 = vpop.f32.mrf.mxu1 }
 0x741   : > { %v13136_v9 = vadd.f32 %v9763_v47, %v6991_v32 }
 0x742   : > { %v9765_v20 = vpop.f32.mrf.mxu1 }
 0x743   : > { %v9309_v22 = vmul.f32 -1.442695, %v13136_v9  ;;  %v9310_v59 = vclamps-f32 %v13136_v9, 0.5 }
 0x745   : > { %10248 = vpow2.f32 %v9309_v22 }
 0x752   : > { %v10249_v4 = vpop.eup %10248 }
 0x753   : > { %v7041_v31 = vadd.f32 1.0, %v10249_v4  ;;  %v7097_v4 = vrot.slane %v13145_v10, %v12992_v46 }
 0x755   : > { %10250 = vrcp.f32 %v7041_v31 }
 0x762   : > { %v10251_v6 = vpop.eup %10250 }
 0x763   : > { %v7044_v29 = vmax.f32 %v10251_v6, 1e-06 }
 0x765   : > { %v7045_v33 = vmin.f32 %v7044_v29, 0.999999 }
 0x767   : > { %v7047_v7 = vsel %vm7046_vm9, %v7045_v33, -1.0 }
 0x768   : > { %7048 = vmax.xlane.f32.xlu0 %v7047_v7 }
 0x7f1   : > { %v7049_v24 = vpop.xlane.xlu0 %7048 }
 0x7f2   : > { %vm7050_vm10 = vcmp.eq.f32.partialorder %v7047_v7, %v7049_v24 }
 0x7f3   : > { %v7051_v56 = vsel %vm7050_vm10, %v7037_v18, 6 }
 0x7f4   : > { %v7053_v57 = vshra.s32 %v7051_v56, 16  ;;  %v7052_v42 = vand.u32 65535, %v7051_v56  ;;  %v10084_v56 = vld [vmem:[%s13742_s4 + $0x88] sm:$0xff]  }
 0x7f6   : > { %v7055_v50 = vcvt.s32.f32 %v7053_v57  ;;  %v7054_v23 = vcvt.s32.f32 %v7052_v42  ;;  %v10327_v57 = vmov 0.0   ;;  %v10086_v42 = vld [vmem:[%s13742_s4 + $0x78] sm:$0xff]  }
 0x7f7   : > { %9836 = vmatprep.subr.bf16.mxu1 %v10327_v57  ;;  %9840 = vmatprep.mubr.msk.bf16.mxu1 %vm10328_vm15, %v10327_v57 }
 0x7f8   : > { %7056 = vmin.xlane.f32.xlu1 %v7055_v50  ;;  %9837 = vmatpush3.bf16.msra.mxu1 %v10084_v56 }
 0x7f9   : > { %9838 = vmatprep.subr.bf16.mxu1 %v10327_v57  ;;  %v7356_v57 = vrot.slane %v13145_v10, %v12989_v35 }
 0x881   : > { %v7057_v1 = vpop.xlane.xlu1 %7056 }
 0x882   : > { %vm7058_vm11 = vcmp.eq.f32.partialorder %v7055_v50, %v7057_v1  ;;  %v7063_v25 = vcvt.f32.s32 %v7057_v1  ;;  %v10085_v50 = vld [vmem:[%s13742_s4 + $0x80] sm:$0xff]  }
 0x883   : > { %v7059_v61 = vsel %vm7058_vm11, %v7054_v23, inf  ;;  %9839 = vmatpush3.bf16.msra.mxu1 %v10085_v50 }
 0x884   : > { %7060 = vmin.xlane.f32.xlu0 %v7059_v61  ;;  %v7064_v58 = vshll.u32 %v7063_v25, 16  ;;  %9770 = vmatprep.subr.bf16.mxu1 %v10086_v42  ;;  %v13165_v25 = vsub.s32 3, %v13872_v63 }
 0x90d   : > { %v7061_v34 = vpop.xlane.xlu0 %7060 }
 0x90e   : > { %v7062_v17 = vcvt.f32.s32 %v7061_v34  ;;  %v7117_v34 = vrot.slane %v13145_v10, %v13165_v25 }
 0x910   : > { %v7065_v36 = vadd.s32 %v7064_v58, %v7062_v17 }
 0x912   : > { %v7073_v12 = vadd.s32 12, %v7065_v36  ;;  %v7066_v5 = vadd.s32 6, %v7065_v36  ;;  %v7078_v53 = vcvt.s32.f32 %v7065_v36  ;;  %v7122_v36 = vrot.slane %v13145_v10, %v13871_v62 }
 0x914   : > { %vm7074_vm12 = vcmp.eq.s32.totalorder %v7037_v18, %v7073_v12  ;;  %vm7067_vm13 = vcmp.eq.s32.totalorder %v7037_v18, %v7066_v5 }
 0x915   : > { %v7075_v39 = vsel %vm7074_vm12, %v13136_v9, 0.0  ;;  %v7070_v60 = vsel %vm7067_vm13, %v9310_v59, 0.0 }
 0x916   : > { %7076 = vadd.xlane.f32.xlu0 %v7075_v39  ;;  %7071 = vadd.xlane.f32.xlu1 %v7070_v60  ;;  %v10087_v39 = vld [vmem:[%s13742_s4 + $0x38] sm:$0xff]  }
 0x99f   : > { %v7072_v51 = vpop.xlane.xlu1 %7071  ;;  %v7077_v47 = vpop.xlane.xlu0 %7076 }
 0x9a0   : > { %v7079_v8 = vadd.f32 %v7078_v53, %v7072_v51  ;;  %v7092_v20 = vmul.f32 %v7091_v16, %v7077_v47  ;;  %v10088_v53 = vld [vmem:[%s13742_s4 + $0x70] sm:$0xff]   ;;  %v10092_v16 = vld [vmem:[%s13742_s4 + $0x60] sm:$0xff]  }
 0x9a1   : > { %v10089_v51 = vld [vmem:[%s13742_s4 + $0x30] sm:$0xff]  }
 0x9a2   : > { %v7080_v32 = vadd.f32 0.5, %v7079_v8  ;;  %v10090_v8 = vld [vmem:[%s13742_s4 + $0x68] sm:$0xff]   ;;  %v10096_v47 = vld [vmem:[%s13742_s4 + $0x50] sm:$0xff]  }
 0x9a4   : > { %v7081_v54 = vmul.f32 0.5235988, %v7080_v32  ;;  %v10091_v32 = vld [vmem:[%s13742_s4 + $0x28] sm:$0xff]  }
 0x9a6   : > { %v9311_v37 = vadd.f32 -1.5707964, %v7081_v54  ;;  %v10095_v54 = vld [vmem:[%s13742_s4 + $0x18] sm:$0xff]  }
 0x9a8   : > { %v7087_v22 = vmul.f32 %v9311_v37, %v7086_v3  ;;  %v10094_v3 = vld [vmem:[%s13742_s4 + $0x58] sm:$0xff]   ;;  %v10097_v37 = vld [vmem:[%s13742_s4 + $0x10] sm:$0xff]  }
 0x9aa   : > { %v7093_v31 = vadd.f32 %v7092_v20, %v7087_v22  ;;  %v10098_v20 = vld [vmem:[%s13742_s4 + $0x48] sm:$0xff]  }
 0x9ab   : > { %v10099_v22 = vld [vmem:[%s13742_s4 + $0x8] sm:$0xff]  }
 0x9ac   : > { %v7098_v21 = vadd.f32 %v7097_v4, %v7093_v31  ;;  %v10100_v4 = vld [vmem:[%s13742_s4 + $0x40] sm:$0xff]  }
 0x9ad   : > { %v10101_v31 = vld [vmem:[%s13742_s4] sm:$0xff]  }
 0x9ae   : > { %v7100_v18 = vsel %vm7099_vm14, %v7098_v21, 0.0 }
 0x9af   : > { %7101 = vadd.xlane.f32.xlu1 %v7100_v18 }
 0xa38   : > { %v7102_v6 = vpop.xlane.xlu1 %7101 }
 0xa39   : > { %v7104_v29 = vmul.f32 0.03125, %v7102_v6 }
 0xa3b   : > { %v7105_v33 = vsub.f32 %v7098_v21, %v7104_v29  ;;  %v13874_v21 = vmov 0  }
 0xa3d   : > { %v7106_v7 = vmul.f32 %v7105_v33, %v7105_v33 }
 0xa3f   : > { %v7107_v24 = vsel %vm7099_vm14, %v7106_v7, 0.0 }
 0xa40   : > { %7108 = vadd.xlane.f32.xlu0 %v7107_v24 }
 0xac9   : > { %v7109_v1 = vpop.xlane.xlu0 %7108 }
 0xaca   : > { %v7110_v23 = vmul.f32 0.03125, %v7109_v1 }
 0xacc   : > { %v7111_v61 = vadd.f32 1e-05, %v7110_v23 }
 0xace   : > { %10252 = vrsqrt.f32 %v7111_v61 }
 0xadb   : > { %v10253_v58 = vpop.eup %10252 }
 0xadc   : > { %v7113_v17 = vmul.f32 %v10253_v58, %v7105_v33 }
 0xade   : > { %v7118_v12 = vmul.f32 %v7117_v34, %v7113_v17 }
 0xae0   : > { %v7123_v5 = vadd.f32 %v7122_v36, %v7118_v12  ;;  %v10102_v12 = vld [vmem:[%s13743_s5 + $0x30] ss:$8 sps:$4 sm:$0xff]  }
 0xae2   : > { %v7124_v59 = vmax.f32 %v7123_v5, 0.0  ;;  %v10104_v5 = vld [vmem:[%s13743_s5 + $0x34] ss:$8 sps:$4 sm:$0xff]  }
 0xae4   : > { %v7161_v60 = vpack.c.bf16 %v7124_v59, %v7124_v59  ;;  %v10107_v59 = vld [vmem:[%s13743_s5 + $0x24] ss:$8 sps:$4 sm:$0xff]  }
 0xae6   : > { %9841 = vmatmul.mubr.msk.bf16.vlgmr.msra.gmra.mxu1 %vm7099_vm14, %v7161_v60  ;;  %v10110_v60 = vld [vmem:[%s13743_s5 + $0x14] ss:$8 sps:$4 sm:$0xff]  }
 0xae7   : > { %9771 = vmatpush3.bf16.msra.mxu1 %v10087_v39  ;;  %7345 = vmatprep.mubr.bf16.mxu1 %v12670_v55  ;;  %v10093_v55 = vld [vmem:[%s13742_s4 + $0x20] sm:$0xff]  }
 0xae8   : > { %9772 = vmatprep.subr.bf16.mxu1 %v10088_v53  ;;  %v10105_v39 = vld [vmem:[%s13743_s5 + $0x20] ss:$8 sps:$4 sm:$0xff]   ;;  %v10108_v53 = vld [vmem:[%s13743_s5 + $0x10] ss:$8 sps:$4 sm:$0xff]  }
 0xaeb   : > { %9773 = vmatpush3.bf16.msra.mxu1 %v10089_v51  ;;  %v10113_v51 = vld [vmem:[%s13743_s5 + $0x4] ss:$8 sps:$4 sm:$0xff]  }
 0xaec   : > { %9774 = vmatprep.subr.bf16.mxu1 %v10090_v8  ;;  %v10111_v8 = vld [vmem:[%s13743_s5] ss:$8 sps:$4 sm:$0xff]  }
 0xaef   : > { %9775 = vmatpush3.bf16.msra.mxu1 %v10091_v32 }
 0xaf0   : > { %9776 = vmatprep.subr.bf16.mxu1 %v10092_v16 }
 0xaf3   : > { %9777 = vmatpush3.bf16.msra.mxu1 %v10093_v55 }
 0xaf4   : > { %9778 = vmatprep.subr.bf16.mxu1 %v10094_v3  ;;  %v7380_v3 = vsub.s32 7, %v13872_v63 }
 0xaf7   : > { %9779 = vmatpush3.bf16.msra.mxu1 %v10095_v54  ;;  %v7376_v54 = vrot.slane %v13145_v10, %v12995_v43 }
 0xaf8   : > { %9780 = vmatprep.subr.bf16.mxu1 %v10096_v47 }
 0xafb   : > { %9781 = vmatpush3.bf16.msra.mxu1 %v10097_v37 }
 0xafc   : > { %9782 = vmatprep.subr.bf16.mxu1 %v10098_v20  ;;  %v7381_v20 = vrot.slane %v13145_v10, %v7380_v3 }
 0xaff   : > { %9783 = vmatpush3.bf16.msra.mxu1 %v10099_v22 }
 0xb00   : > { %9784 = vmatprep.subr.bf16.mxu1 %v10100_v4 }
 0xb03   : > { %9785 = vmatpush3.bf16.msra.mxu1 %v10101_v31 }
 0xb04   : > { %7462 = vmatprep.subr.bf16.mxu1 %v10104_v5  ;;  %v10128_v5 = vld [vmem:[%s13744_s6 + $0x64] ss:$16 sps:$4 sm:$0xff]  }
 0xb06   : > { %7346 = vmatmul.mubr.bf16.vlgmr.msra.gmra.mxu1 %v12675_v15 }
 0xb07   : > { %7486 = vmatprep.mubr.bf16.mxu1 %v13874_v21  ;;  %7463 = vmatpush1.bf16.msra.mxu1 %v10102_v12  ;;  %v10123_v12 = vld [vmem:[%s13744_s6 + $0x80] ss:$16 sps:$4 sm:$0xff]  }
 0xb08   : > { %7464 = vmatprep.subr.bf16.mxu1 %v10107_v59  ;;  %v10126_v59 = vld [vmem:[%s13744_s6 + $0x60] ss:$16 sps:$4 sm:$0xff]  }
 0xb0b   : > { %7465 = vmatpush1.bf16.msra.mxu1 %v10105_v39 }
 0xb0c   : > { %7466 = vmatprep.subr.bf16.mxu1 %v10110_v60 }
 0xb0f   : > { %7467 = vmatpush1.bf16.msra.mxu1 %v10108_v53 }
 0xb10   : > { %7468 = vmatprep.subr.bf16.mxu1 %v10113_v51 }
 0xb13   : > { %7469 = vmatpush1.bf16.msra.mxu1 %v10111_v8 }
 0xba6   : > { %v7211_v18 = vpop.f32.mrf.mxu1 }
 0xba8   : > { %v9842_v6 = vpop.f32.mrf.mxu1 }
 0xbaa   : > { %v7214_v29 = vpop.f32.mrf.mxu1 }
 0xbac   : > { %v9843_v33 = vpop.f32.mrf.mxu1 }
 0xbc6   : > { %v9786_v7 = vpop.f32.mrf.mxu1 }
 0xbc8   : > { %v9787_v24 = vpop.f32.mrf.mxu1 }
 0xbc9   : > { %v9788_v56 = vadd.f32 %v9787_v24, %v9786_v7 }
 0xbca   : > { %v9789_v50 = vpop.f32.mrf.mxu1 }
 0xbcb   : > { %v7348_v42 = vadd.f32 %v9788_v56, %v7211_v18  ;;  %v13258_v18 = vld [vmem:[%s13748_s10] sm:$0xff] }
 0xbcc   : > { %v9790_v1 = vpop.f32.mrf.mxu1  ;;  %v7396_v6 = vrot.slane %v13258_v18, %v12986_v11  ;;  %v7400_v29 = vrot.slane %v13258_v18, %v12989_v35 }
 0xbcd   : > { %v7357_v23 = vadd.f32 %v7356_v57, %v7348_v42 }
 0xbce   : > { %v7406_v33 = vrot.slane %v7396_v6, %v12986_v11  ;;  %v7410_v10 = vrot.slane %v7400_v29, %v12986_v11  ;;  %v10141_v6 = vld [vmem:[%s13744_s6 + $0x1c0] ss:$16 sps:$4 sm:$0xff]   ;;  %v10146_v29 = vld [vmem:[%s13744_s6 + $0x1a4] ss:$16 sps:$4 sm:$0xff]  }
 0xbcf   : > { %v7359_v61 = vsel %vm7358_vm0, %v7357_v23, 0.0 }
 0xbd0   : > { %7360 = vadd.xlane.f32.xlu1 %v7359_v61  ;;  %v10116_v61 = vld [vmem:[%s13744_s6 + $0xe4] ss:$16 sps:$4 sm:$0xff]  }
 0xbd1   : > { %8117 = vmatprep.subr.bf16.mxu1 %v10116_v61  ;;  %v10159_v61 = vld [vmem:[%s13744_s6 + $0x100] ss:$16 sps:$4 sm:$0xff]  }
 0xc59   : > { %v7361_v15 = vpop.xlane.xlu1 %7360 }
 0xc5a   : > { %v7363_v34 = vmul.f32 0.015625, %v7361_v15  ;;  %v10119_v15 = vld [vmem:[%s13744_s6 + $0xc4] ss:$16 sps:$4 sm:$0xff]  }
 0xc5c   : > { %v7364_v58 = vsub.f32 %v7357_v23, %v7363_v34  ;;  %v10114_v23 = vld [vmem:[%s13744_s6 + $0xe0] ss:$16 sps:$4 sm:$0xff]  }
 0xc5d   : > { %v10117_v34 = vld [vmem:[%s13744_s6 + $0xc0] ss:$16 sps:$4 sm:$0xff]  }
 0xc5e   : > { %v7365_v17 = vmul.f32 %v7364_v58, %v7364_v58 }
 0xc60   : > { %v7366_v36 = vsel %vm7358_vm0, %v7365_v17, 0.0  ;;  %v10120_v17 = vld [vmem:[%s13744_s6 + $0xa0] ss:$16 sps:$4 sm:$0xff]  }
 0xc61   : > { %7367 = vadd.xlane.f32.xlu0 %v7366_v36  ;;  %v10125_v36 = vld [vmem:[%s13744_s6 + $0x84] ss:$16 sps:$4 sm:$0xff]  }
 0xcea   : > { %v7368_v32 = vpop.xlane.xlu0 %7367 }
 0xceb   : > { %v7369_v16 = vmul.f32 0.015625, %v7368_v32 }
 0xced   : > { %v7370_v55 = vadd.f32 1e-05, %v7369_v16 }
 0xcef   : > { %10254 = vrsqrt.f32 %v7370_v55  ;;  %v10129_v55 = vld [vmem:[%s13744_s6 + $0x40] ss:$16 sps:$4 sm:$0xff]  }
 0xcfc   : > { %v10255_v47 = vpop.eup %10254 }
 0xcfd   : > { %v7372_v37 = vmul.f32 %v10255_v47, %v7364_v58  ;;  %v10122_v58 = vld [vmem:[%s13744_s6 + $0xa4] ss:$16 sps:$4 sm:$0xff]  }
 0xcfe   : > { %v10134_v47 = vld [vmem:[%s13744_s6 + $0x24] ss:$16 sps:$4 sm:$0xff]  }
 0xcff   : > { %v7377_v22 = vmul.f32 %v7376_v54, %v7372_v37  ;;  %v10131_v54 = vld [vmem:[%s13744_s6 + $0x44] ss:$16 sps:$4 sm:$0xff]   ;;  %v10132_v37 = vld [vmem:[%s13744_s6 + $0x20] ss:$16 sps:$4 sm:$0xff]  }
 0xd01   : > { %v7382_v4 = vadd.f32 %v7381_v20, %v7377_v22  ;;  %v10137_v20 = vld [vmem:[%s13744_s6 + $0x4] ss:$16 sps:$4 sm:$0xff]   ;;  %v10135_v22 = vld [vmem:[%s13744_s6] ss:$16 sps:$4 sm:$0xff]  }
 0xd03   : > { %v7383_v31 = vmax.f32 %v7382_v4, 0.0  ;;  %v10140_v4 = vld [vmem:[%s13744_s6 + $0x1e4] ss:$16 sps:$4 sm:$0xff]  }
 0xd05   : > { %v7384_v21 = vpack.c.bf16 %v7383_v31, %v7383_v31  ;;  %v10138_v31 = vld [vmem:[%s13744_s6 + $0x1e0] ss:$16 sps:$4 sm:$0xff]  }
 0xd07   : > { %9339 = vmatmul.mubr.msk.bf16.vlgmr.msra.gmra.mxu1 %vm7358_vm0, %v7384_v21  ;;  %v10143_v21 = vld [vmem:[%s13744_s6 + $0x1c4] ss:$16 sps:$4 sm:$0xff]  }
 0xd08   : > { %8118 = vmatpush1.bf16.msra.mxu1 %v10114_v23  ;;  %v10161_v23 = vld [vmem:[%s13744_s6 + $0x104] ss:$16 sps:$4 sm:$0xff]  }
 0xd09   : > { %8119 = vmatprep.subr.bf16.mxu1 %v10119_v15  ;;  %v10164_v15 = vld [vmem:[%s13744_s6 + $0xec] ss:$16 sps:$4 sm:$0xff]  }
 0xd0c   : > { %8120 = vmatpush1.bf16.msra.mxu1 %v10117_v34 }
 0xd0d   : > { %8121 = vmatprep.subr.bf16.mxu1 %v10122_v58 }
 0xd10   : > { %8122 = vmatpush1.bf16.msra.mxu1 %v10120_v17 }
 0xd11   : > { %8123 = vmatprep.subr.bf16.mxu1 %v10125_v36  ;;  %v7514_v36 = vrot.slane %v13258_v18, %v12992_v46 }
 0xd14   : > { %8124 = vmatpush1.bf16.msra.mxu1 %v10123_v12  ;;  %v7518_v12 = vrot.slane %v13258_v18, %v12995_v43 }
 0xd15   : > { %8125 = vmatprep.subr.bf16.mxu1 %v10128_v5  ;;  %v7538_v5 = vrot.slane %v13258_v18, %v7380_v3 }
 0xd18   : > { %8126 = vmatpush1.bf16.msra.mxu1 %v10126_v59  ;;  %v7534_v59 = vrot.slane %v13258_v18, %v13165_v25 }
 0xd19   : > { %8127 = vmatprep.subr.bf16.mxu1 %v10131_v54 }
 0xd1a   : > { %v7544_v54 = vrot.slane %v7534_v59, %v13165_v25 }
 0xd1c   : > { %8128 = vmatpush1.bf16.msra.mxu1 %v10129_v55 }
 0xd1d   : > { %8129 = vmatprep.subr.bf16.mxu1 %v10134_v47 }
 0xd20   : > { %8130 = vmatpush1.bf16.msra.mxu1 %v10132_v37 }
 0xd21   : > { %8131 = vmatprep.subr.bf16.mxu1 %v10137_v20 }
 0xd24   : > { %8132 = vmatpush1.bf16.msra.mxu1 %v10135_v22 }
 0xd25   : > { %8133 = vmatprep.subr.bf16.mxu1 %v10140_v4 }
 0xd28   : > { %8134 = vmatpush2.bf16.msra.mxu1 %v10138_v31 }
 0xd29   : > { %8135 = vmatprep.subr.bf16.mxu1 %v10143_v21 }
 0xd2c   : > { %8136 = vmatpush2.bf16.msra.mxu1 %v10141_v6 }
 0xd2d   : > { %8137 = vmatprep.subr.bf16.mxu1 %v10146_v29 }
 0xdc7   : > { %v7488_v7 = vpop.f32.mrf.mxu1 }
 0xdc8   : > { %v7489_v56 = vadd.f32 %v7488_v7, %v7406_v33  ;;  %v10144_v33 = vld [vmem:[%s13744_s6 + $0x1a0] ss:$16 sps:$4 sm:$0xff]  }
 0xdc9   : > { %v7490_v24 = vpop.f32.mrf.mxu1  ;;  %8138 = vmatpush2.bf16.msra.mxu1 %v10144_v33  ;;  %v10147_v7 = vld [vmem:[%s13744_s6 + $0x180] ss:$16 sps:$4 sm:$0xff]  }
 0xdca   : > { %v7491_v57 = vadd.f32 %v7490_v24, %v7410_v10  ;;  %v10149_v10 = vld [vmem:[%s13744_s6 + $0x184] ss:$16 sps:$4 sm:$0xff]  }
 0xdcb   : > { %v7492_v50 = vpop.f32.mrf.mxu1  ;;  %8139 = vmatprep.subr.bf16.mxu1 %v10149_v10  ;;  %v10152_v24 = vld [vmem:[%s13744_s6 + $0x164] ss:$16 sps:$4 sm:$0xff]  }
 0xdcc   : > { %v7495_v42 = vadd.f32 %v7491_v57, %v7489_v56  ;;  %v10153_v50 = vld [vmem:[%s13744_s6 + $0x140] ss:$16 sps:$4 sm:$0xff]  }
 0xdcd   : > { %v7493_v1 = vpop.f32.mrf.mxu1  ;;  %8140 = vmatpush2.bf16.msra.mxu1 %v10147_v7 }
 0xdce   : > { %7496 = vadd.xlane.f32.xlu1 %v7495_v42  ;;  %8141 = vmatprep.subr.bf16.mxu1 %v10152_v24  ;;  %v10158_v42 = vld [vmem:[%s13744_s6 + $0x124] ss:$16 sps:$4 sm:$0xff]   ;;  %v10156_v1 = vld [vmem:[%s13744_s6 + $0x120] ss:$16 sps:$4 sm:$0xff]  }
 0xe57   : > { %v7497_v39 = vpop.xlane.xlu1 %7496 }
 0xe58   : > { %v7498_v60 = vmul.f32 0.00390625, %v7497_v39  ;;  %v7524_v39 = vrot.slane %v7514_v36, %v12992_v46 }
 0xe5a   : > { %v13296_v53 = vsub.f32 %v7489_v56, %v7498_v60  ;;  %v13298_v51 = vsub.f32 %v7491_v57, %v7498_v60  ;;  %v10150_v56 = vld [vmem:[%s13744_s6 + $0x160] ss:$16 sps:$4 sm:$0xff]   ;;  %v10155_v57 = vld [vmem:[%s13744_s6 + $0x144] ss:$16 sps:$4 sm:$0xff]   ;;  %v7528_v60 = vrot.slane %v7518_v12, %v12992_v46 }
 0xe5b   : > { %8142 = vmatpush2.bf16.msra.mxu1 %v10150_v56 }
 0xe5c   : > { %v7501_v8 = vmul.f32 %v13296_v53, %v13296_v53  ;;  %v7502_v32 = vmul.f32 %v13298_v51, %v13298_v51  ;;  %8143 = vmatprep.subr.bf16.mxu1 %v10155_v57 }
 0xe5e   : > { %v7503_v16 = vadd.f32 %v7502_v32, %v7501_v8  ;;  %v7548_v32 = vrot.slane %v7538_v5, %v13165_v25 }
 0xe5f   : > { %8144 = vmatpush2.bf16.msra.mxu1 %v10153_v50 }
 0xe60   : > { %7504 = vadd.xlane.f32.xlu0 %v7503_v16  ;;  %8145 = vmatprep.subr.bf16.mxu1 %v10158_v42 }
 0xe63   : > { %8146 = vmatpush2.bf16.msra.mxu1 %v10156_v1 }
 0xe64   : > { %8147 = vmatprep.subr.bf16.mxu1 %v10161_v23 }
 0xe67   : > { %8148 = vmatpush2.bf16.msra.mxu1 %v10159_v61 }
 0xe68   : > { %8158 = vmatprep.subr.bf16.mxu1 %v10164_v15 }
 0xee9   : > { %v7505_v34 = vpop.xlane.xlu0 %7504 }
 0xeea   : > { %v7506_v58 = vmul.f32 0.00390625, %v7505_v34 }
 0xeec   : > { %v7507_v17 = vadd.f32 1e-05, %v7506_v58 }
 0xeee   : > { %10256 = vrsqrt.f32 %v7507_v17 }
 0xefb   : > { %v10257_v8 = vpop.eup %10256 }
 0xefc   : > { %v7509_v16 = vmul.f32 %v10257_v8, %v13296_v53  ;;  %v7510_v55 = vmul.f32 %v10257_v8, %v13298_v51 }
 0xefe   : > { %v7529_v47 = vmul.f32 %v7524_v39, %v7509_v16  ;;  %v7530_v63 = vmul.f32 %v7528_v60, %v7510_v55 }
 0xf00   : > { %v7550_v37 = vadd.f32 %v7548_v32, %v7530_v63  ;;  %v13388_v3 = vadd.f32 %v7544_v54, %v7529_v47 }
 0xf02   : > { %v7554_v20 = vrot.slane %v7550_v37, 1  ;;  %v7556_v18 = vrot.slane %v7550_v37, 2  ;;  %v7558_v22 = vrot.slane %v7550_v37, 3  ;;  %v7560_v4 = vrot.slane %v7550_v37, 4 }
 0xf03   : > { %v7562_v31 = vrot.slane %v7550_v37, 5  ;;  %v7564_v21 = vrot.slane %v7550_v37, 6  ;;  %v7566_v6 = vrot.slane %v7550_v37, 7  ;;  %v7584_v29 = vadd.f32 %v7550_v37, %v12515_v0 }
 0xf04   : > { %v7586_v53 = vadd.f32 %v7554_v20, %v12596_v28  ;;  %v7588_v51 = vadd.f32 %v7556_v18, %v12612_v13  ;;  %v7590_v25 = vadd.f32 %v7558_v22, %v12616_v52  ;;  %v7592_v33 = vadd.f32 %v7560_v4, %v12622_v48 }
 0xf05   : > { %v7594_v10 = vadd.f32 %v7562_v31, %v12651_v27  ;;  %v7596_v7 = vadd.f32 %v7564_v21, %v12628_v30  ;;  %v7598_v24 = vadd.f32 %v7566_v6, %v12641_v19  ;;  %v7600_v56 = vmax.f32 %v7584_v29, 0.0 }
 0xf06   : > { %v7602_v57 = vmax.f32 %v7586_v53, 0.0  ;;  %v7604_v50 = vmax.f32 %v7588_v51, 0.0  ;;  %v7606_v42 = vmax.f32 %v7590_v25, 0.0  ;;  %v7608_v1 = vmax.f32 %v7592_v33, 0.0 }
 0xf07   : > { %v7610_v0 = vmax.f32 %v7594_v10, 0.0  ;;  %v7612_v23 = vmax.f32 %v7596_v7, 0.0  ;;  %v7614_v28 = vmax.f32 %v7598_v24, 0.0  ;;  %v7616_v61 = vpack.c.bf16 %v7600_v56, %v7600_v56 }
 0xf08   : > { %v7618_v13 = vpack.c.bf16 %v7602_v57, %v7602_v57  ;;  %v7620_v15 = vpack.c.bf16 %v7604_v50, %v7604_v50  ;;  %v7622_v52 = vpack.c.bf16 %v7606_v42, %v7606_v42  ;;  %v7624_v34 = vpack.c.bf16 %v7608_v1, %v7608_v1 }
 0xf09   : > { %v7626_v48 = vpack.c.bf16 %v7610_v0, %v7610_v0  ;;  %v7628_v58 = vpack.c.bf16 %v7612_v23, %v7612_v23  ;;  %v7630_v27 = vpack.c.bf16 %v7614_v28, %v7614_v28  ;;  %v7750_v17 = vunpack.c.l.b16 %v7616_v61 }
 0xf0a   : > { %v7752_v30 = vunpack.c.l.b16 %v7618_v13  ;;  %v7754_v36 = vunpack.c.l.b16 %v7620_v15  ;;  %v7756_v19 = vunpack.c.l.b16 %v7622_v52  ;;  %v7758_v12 = vunpack.c.l.b16 %v7624_v34 }
 0xf0b   : > { %v7760_v5 = vunpack.c.l.b16 %v7626_v48  ;;  %v7762_v59 = vunpack.c.l.b16 %v7628_v58  ;;  %v7764_v39 = vunpack.c.l.b16 %v7630_v27  ;;  %v7553_v60 = vrot.slane %v13388_v3, 1 }
 0xf0c   : > { %v7779_v8 = vrot.slane %v7752_v30, 7  ;;  %v7781_v32 = vrot.slane %v7754_v36, 6  ;;  %v7783_v16 = vrot.slane %v7756_v19, 5  ;;  %v7785_v55 = vrot.slane %v7758_v12, 4 }
 0xf0d   : > { %v7787_v54 = vrot.slane %v7760_v5, 3  ;;  %v7789_v47 = vrot.slane %v7762_v59, 2  ;;  %v7791_v63 = vrot.slane %v7764_v39, 1  ;;  %v7555_v37 = vrot.slane %v13388_v3, 2 }
 0xf0e   : > { %v7780_v20 = vsel %vm5720_vm2, %v7779_v8, %v7750_v17  ;;  %v7557_v18 = vrot.slane %v13388_v3, 3  ;;  %v7559_v22 = vrot.slane %v13388_v3, 4  ;;  %v7561_v4 = vrot.slane %v13388_v3, 5 }
 0xf0f   : > { %v7782_v31 = vsel %vm5722_vm3, %v7781_v32, %v7780_v20  ;;  %v7563_v21 = vrot.slane %v13388_v3, 6  ;;  %v7565_v6 = vrot.slane %v13388_v3, 7  ;;  %v7583_v29 = vadd.f32 %v13388_v3, %v12513_v14 }
 0xf10   : > { %v7784_v53 = vsel %vm5724_vm4, %v7783_v16, %v7782_v31  ;;  %v7585_v51 = vadd.f32 %v7553_v60, %v12553_v40  ;;  %v7587_v25 = vadd.f32 %v7555_v37, %v12602_v2  ;;  %v7589_v33 = vadd.f32 %v7557_v18, %v12608_v26  ;;  %v10162_v18 = vld [vmem:[%s13744_s6 + $0xe8] ss:$16 sps:$4 sm:$0xff]   ;;  %v10167_v31 = vld [vmem:[%s13744_s6 + $0xcc] ss:$16 sps:$4 sm:$0xff]  }
 0xf11   : > { %v7786_v10 = vsel %vm5726_vm5, %v7785_v55, %v7784_v53  ;;  %v7591_v7 = vadd.f32 %v7559_v22, %v12614_v38  ;;  %v7593_v24 = vadd.f32 %v7561_v4, %v12643_v44  ;;  %v7595_v56 = vadd.f32 %v7563_v21, %v12626_v45  ;;  %v10165_v21 = vld [vmem:[%s13744_s6 + $0xc8] ss:$16 sps:$4 sm:$0xff]   ;;  %v10173_v53 = vld [vmem:[%s13744_s6 + $0x8c] ss:$16 sps:$4 sm:$0xff]  }
 0xf12   : > { %v7788_v57 = vsel %vm5728_vm6, %v7787_v54, %v7786_v10  ;;  %v7597_v14 = vadd.f32 %v7565_v6, %v12638_v49  ;;  %v7599_v3 = vmax.f32 %v7583_v29, 0.0  ;;  %v7601_v50 = vmax.f32 %v7585_v51, 0.0  ;;  %v10170_v6 = vld [vmem:[%s13744_s6 + $0xac] ss:$16 sps:$4 sm:$0xff]   ;;  %v10168_v29 = vld [vmem:[%s13744_s6 + $0xa8] ss:$16 sps:$4 sm:$0xff]  }
 0xf13   : > { %v7790_v40 = vsel %vm5730_vm7, %v7789_v47, %v7788_v57  ;;  %v7603_v42 = vmax.f32 %v7587_v25, 0.0  ;;  %v7605_v2 = vmax.f32 %v7589_v33, 0.0  ;;  %v7607_v1 = vmax.f32 %v7591_v7, 0.0  ;;  %v10171_v51 = vld [vmem:[%s13744_s6 + $0x88] ss:$16 sps:$4 sm:$0xff]  }
 0xf14   : > { %v7792_v26 = vsel %vm5732_vm8, %v7791_v63, %v7790_v40  ;;  %v7609_v0 = vmax.f32 %v7593_v24, 0.0  ;;  %v7611_v23 = vmax.f32 %v7595_v56, 0.0  ;;  %v7613_v38 = vmax.f32 %v7597_v14, 0.0  ;;  %v10176_v25 = vld [vmem:[%s13744_s6 + $0x6c] ss:$16 sps:$4 sm:$0xff]  }
 0xf15   : > { %v7794_v28 = vpack.c.b16 %v7792_v26, %v7792_v26  ;;  %v7615_v44 = vpack.c.bf16 %v7599_v3, %v7599_v3  ;;  %v7617_v61 = vpack.c.bf16 %v7601_v50, %v7601_v50  ;;  %v7619_v45 = vpack.c.bf16 %v7603_v42, %v7603_v42  ;;  %v10174_v33 = vld [vmem:[%s13744_s6 + $0x68] ss:$16 sps:$4 sm:$0xff]   ;;  %v10179_v10 = vld [vmem:[%s13744_s6 + $0x4c] ss:$16 sps:$4 sm:$0xff]  }
 0xf16   : > { %v7621_v13 = vpack.c.bf16 %v7605_v2, %v7605_v2  ;;  %v7623_v15 = vpack.c.bf16 %v7607_v1, %v7607_v1  ;;  %v7625_v52 = vpack.c.bf16 %v7609_v0, %v7609_v0  ;;  %v7627_v49 = vpack.c.bf16 %v7611_v23, %v7611_v23  ;;  %v10177_v7 = vld [vmem:[%s13744_s6 + $0x48] ss:$16 sps:$4 sm:$0xff]   ;;  %v10182_v24 = vld [vmem:[%s13744_s6 + $0x2c] ss:$16 sps:$4 sm:$0xff]  }
 0xf17   : > { %8149 = vmatprep.mubr.bf16.mxu1 %v7794_v28  ;;  %v7629_v34 = vpack.c.bf16 %v7613_v38, %v7613_v38  ;;  %v7751_v48 = vunpack.c.l.b16 %v7617_v61  ;;  %v7753_v58 = vunpack.c.l.b16 %v7619_v45  ;;  %v7749_v30 = vunpack.c.l.b16 %v7615_v44  ;;  %v10180_v56 = vld [vmem:[%s13744_s6 + $0x28] ss:$16 sps:$4 sm:$0xff]   ;;  %v10185_v57 = vld [vmem:[%s13744_s6 + $0xc] ss:$16 sps:$4 sm:$0xff]  }
 0xf18   : > { %v7755_v27 = vunpack.c.l.b16 %v7621_v13  ;;  %v7757_v17 = vunpack.c.l.b16 %v7623_v15  ;;  %v7759_v36 = vunpack.c.l.b16 %v7625_v52  ;;  %v7761_v5 = vunpack.c.l.b16 %v7627_v49  ;;  %v10183_v14 = vld [vmem:[%s13744_s6 + $0x8] ss:$16 sps:$4 sm:$0xff]   ;;  %v10188_v3 = vld [vmem:[%s13744_s6 + $0x1ec] ss:$16 sps:$4 sm:$0xff]   ;;  %v13528_v52 = vld [vmem:[%s13747_s9] sm:$0x77] }
 0xf19   : > { %v7765_v19 = vrot.slane %v7751_v48, 7  ;;  %v7767_v12 = vrot.slane %v7753_v58, 6  ;;  %v7763_v59 = vunpack.c.l.b16 %v7629_v34  ;;  %v10186_v50 = vld [vmem:[%s13744_s6 + $0x1e8] ss:$16 sps:$4 sm:$0xff]   ;;  %v10191_v40 = vld [vmem:[%s13744_s6 + $0x1cc] ss:$16 sps:$4 sm:$0xff]   ;;  %v7700_v49 = vrot.slane %v13528_v52, %v13870_v41 }
 0xf1a   : > { %v7769_v60 = vrot.slane %v7755_v27, 5  ;;  %v7771_v32 = vrot.slane %v7757_v17, 4  ;;  %v7773_v55 = vrot.slane %v7759_v36, 3  ;;  %v7775_v47 = vrot.slane %v7761_v5, 2  ;;  %v10189_v42 = vld [vmem:[%s13744_s6 + $0x1c8] ss:$16 sps:$4 sm:$0xff]  }
 0xf1b   : > { %v7766_v39 = vsel %vm5720_vm2, %v7765_v19, %v7749_v30  ;;  %v7777_v37 = vrot.slane %v7763_v59, 1  ;;  %v10194_v2 = vld [vmem:[%s13744_s6 + $0x1ac] ss:$16 sps:$4 sm:$0xff]   ;;  %v10192_v1 = vld [vmem:[%s13744_s6 + $0x1a8] ss:$16 sps:$4 sm:$0xff]   ;;  %v7704_v34 = vrot.slane %v13528_v52, %v13871_v62  ;;  %v7720_v48 = vrot.slane %v7700_v49, %v13870_v41 }
 0xf1c   : > { %v7768_v8 = vsel %vm5722_vm3, %v7767_v12, %v7766_v39  ;;  %v10197_v26 = vld [vmem:[%s13744_s6 + $0x18c] ss:$16 sps:$4 sm:$0xff]   ;;  %v10195_v0 = vld [vmem:[%s13744_s6 + $0x188] ss:$16 sps:$4 sm:$0xff]   ;;  %v8218_v49 = vrot.slane %v13528_v52, %v12986_v11 }
 0xf1d   : > { %v7770_v16 = vsel %vm5724_vm4, %v7769_v60, %v7768_v8  ;;  %v10200_v23 = vld [vmem:[%s13744_s6 + $0x16c] ss:$16 sps:$4 sm:$0xff]   ;;  %v10198_v38 = vld [vmem:[%s13744_s6 + $0x168] ss:$16 sps:$4 sm:$0xff]   ;;  %v7724_v58 = vrot.slane %v7704_v34, %v13870_v41  ;;  %v8242_v34 = vrot.slane %v13528_v52, %v12995_v43 }
 0xf1e   : > { %v7772_v54 = vsel %vm5726_vm5, %v7771_v32, %v7770_v16  ;;  %v10201_v44 = vld [vmem:[%s13744_s6 + $0x148] ss:$16 sps:$4 sm:$0xff]   ;;  %v10206_v61 = vld [vmem:[%s13744_s6 + $0x12c] ss:$16 sps:$4 sm:$0xff]  }
 0xf1f   : > { %v7774_v63 = vsel %vm5728_vm6, %v7773_v55, %v7772_v54  ;;  %v10204_v45 = vld [vmem:[%s13744_s6 + $0x128] ss:$16 sps:$4 sm:$0xff]   ;;  %v10209_v13 = vld [vmem:[%s13744_s6 + $0x10c] ss:$16 sps:$4 sm:$0xff]  }
 0xf20   : > { %v7776_v20 = vsel %vm5730_vm7, %v7775_v47, %v7774_v63  ;;  %v10207_v15 = vld [vmem:[%s13744_s6 + $0x108] ss:$16 sps:$4 sm:$0xff]  }
 0xf21   : > { %v7778_v22 = vsel %vm5732_vm8, %v7777_v37, %v7776_v20  ;;  %v13539_v59 = vld [vmem:[%s13747_s9 + $0x8] sm:$0x77] }
 0xf22   : > { %v13431_v4 = vpack.c.b16 %v7778_v22, %v7778_v22  ;;  %v7708_v39 = vrot.slane %v13539_v59, %v13870_v41  ;;  %v7712_v60 = vrot.slane %v13539_v59, %v13871_v62  ;;  %v10211_v62 = vld [vmem:[%s13745_s7 + $0x38] sm:$0xff]  }
 0xf24   : > { %8150 = vmatmul.mubr.bf16.vlgmr.msra.gmra.mxu1 %v13431_v4  ;;  %v7728_v8 = vrot.slane %v7708_v39, %v13870_v41  ;;  %v7732_v32 = vrot.slane %v7712_v60, %v13870_v41 }
 0xf25   : > { %8159 = vmatpush1.bf16.msra.mxu1 %v10162_v18  ;;  %8190 = vmatprep.mubr.bf16.mxu1 %v7794_v28  ;;  %v10203_v28 = vld [vmem:[%s13744_s6 + $0x14c] ss:$16 sps:$4 sm:$0xff]  }
 0xf26   : > { %8160 = vmatprep.subr.bf16.mxu1 %v10167_v31  ;;  %v10210_v18 = vld [vmem:[%s13745_s7 + $0x78] sm:$0xff]  }
 0xf29   : > { %8161 = vmatpush1.bf16.msra.mxu1 %v10165_v21 }
 0xf2a   : > { %8162 = vmatprep.subr.bf16.mxu1 %v10170_v6 }
 0xf2d   : > { %8163 = vmatpush1.bf16.msra.mxu1 %v10168_v29 }
 0xf2e   : > { %8164 = vmatprep.subr.bf16.mxu1 %v10173_v53  ;;  %v10212_v53 = vld [vmem:[%s13745_s7 + $0x70] sm:$0xff]  }
 0xf31   : > { %8165 = vmatpush1.bf16.msra.mxu1 %v10171_v51  ;;  %v10213_v51 = vld [vmem:[%s13745_s7 + $0x30] sm:$0xff]  }
 0xf32   : > { %8166 = vmatprep.subr.bf16.mxu1 %v10176_v25  ;;  %v10214_v25 = vld [vmem:[%s13745_s7 + $0x68] sm:$0xff]  }
 0xf35   : > { %8167 = vmatpush1.bf16.msra.mxu1 %v10174_v33  ;;  %v10215_v33 = vld [vmem:[%s13745_s7 + $0x28] sm:$0xff]  }
 0xf36   : > { %8168 = vmatprep.subr.bf16.mxu1 %v10179_v10  ;;  %v10216_v10 = vld [vmem:[%s13745_s7 + $0x60] sm:$0xff]  }
 0xf39   : > { %8169 = vmatpush1.bf16.msra.mxu1 %v10177_v7  ;;  %v10217_v7 = vld [vmem:[%s13745_s7 + $0x20] sm:$0xff]  }
 0xf3a   : > { %8170 = vmatprep.subr.bf16.mxu1 %v10182_v24  ;;  %v10218_v24 = vld [vmem:[%s13745_s7 + $0x58] sm:$0xff]  }
 0xf3d   : > { %8171 = vmatpush1.bf16.msra.mxu1 %v10180_v56  ;;  %v10219_v56 = vld [vmem:[%s13745_s7 + $0x18] sm:$0xff]  }
 0xf3e   : > { %8172 = vmatprep.subr.bf16.mxu1 %v10185_v57  ;;  %v10220_v57 = vld [vmem:[%s13745_s7 + $0x50] sm:$0xff]  }
 0xf41   : > { %8173 = vmatpush1.bf16.msra.mxu1 %v10183_v14  ;;  %v10221_v14 = vld [vmem:[%s13745_s7 + $0x10] sm:$0xff]  }
 0xf42   : > { %8174 = vmatprep.subr.bf16.mxu1 %v10188_v3  ;;  %v10222_v3 = vld [vmem:[%s13745_s7 + $0x48] sm:$0xff]  }
 0xf45   : > { %8175 = vmatpush2.bf16.msra.mxu1 %v10186_v50  ;;  %v10223_v50 = vld [vmem:[%s13745_s7 + $0x8] sm:$0xff]  }
 0xf46   : > { %8176 = vmatprep.subr.bf16.mxu1 %v10191_v40  ;;  %v10224_v40 = vld [vmem:[%s13745_s7 + $0x40] sm:$0xff]  }
 0xf49   : > { %8177 = vmatpush2.bf16.msra.mxu1 %v10189_v42  ;;  %v10225_v42 = vld [vmem:[%s13745_s7] sm:$0xff]  }
 0xf4a   : > { %8178 = vmatprep.subr.bf16.mxu1 %v10194_v2  ;;  %v10226_v2 = vld [vmem:[%s13745_s7 + $0xf8] sm:$0xff]  }
 0xf4d   : > { %8179 = vmatpush2.bf16.msra.mxu1 %v10192_v1 }
 0xf4e   : > { %8180 = vmatprep.subr.bf16.mxu1 %v10197_v26 }
 0xf51   : > { %8181 = vmatpush2.bf16.msra.mxu1 %v10195_v0 }
 0xf52   : > { %8182 = vmatprep.subr.bf16.mxu1 %v10200_v23 }
 0xf55   : > { %8183 = vmatpush2.bf16.msra.mxu1 %v10198_v38 }
 0xf56   : > { %8184 = vmatprep.subr.bf16.mxu1 %v10203_v28 }
 0xf59   : > { %8185 = vmatpush2.bf16.msra.mxu1 %v10201_v44 }
 0xf5a   : > { %8186 = vmatprep.subr.bf16.mxu1 %v10206_v61 }
 0xf5d   : > { %8187 = vmatpush2.bf16.msra.mxu1 %v10204_v45 }
 0xf5e   : > { %8188 = vmatprep.subr.bf16.mxu1 %v10209_v13 }
 0xf61   : > { %8189 = vmatpush2.bf16.msra.mxu1 %v10207_v15  ;;  %v8222_v15 = vrot.slane %v13528_v52, %v12989_v35 }
 0xf62   : > { %9792 = vmatprep.subr.bf16.mxu1 %v10210_v18  ;;  %v10232_v18 = vld [vmem:[%s13745_s7 + $0xe0] sm:$0xff]  }
 0xf64   : > { %8191 = vmatmul.mubr.bf16.vlgmr.msra.gmra.mxu1 %v13431_v4 }
 0xf65   : > { %9793 = vmatpush3.bf16.msra.mxu1 %v10211_v62  ;;  %v10233_v62 = vld [vmem:[%s13745_s7 + $0xa0] sm:$0xff]  }
 0xf66   : > { %9794 = vmatprep.subr.bf16.mxu1 %v10212_v53  ;;  %v10241_v53 = vld [vmem:[%s13745_s7 + $0x80] sm:$0xff]  }
 0xf69   : > { %9795 = vmatpush3.bf16.msra.mxu1 %v10213_v51 }
 0xf6a   : > { %9796 = vmatprep.subr.bf16.mxu1 %v10214_v25 }
 0xf6d   : > { %9797 = vmatpush3.bf16.msra.mxu1 %v10215_v33 }
 0xf6e   : > { %9798 = vmatprep.subr.bf16.mxu1 %v10216_v10  ;;  %v8280_v10 = vrot.slane %v13539_v59, %v12989_v35 }
 0xf71   : > { %9799 = vmatpush3.bf16.msra.mxu1 %v10217_v7  ;;  %v8276_v7 = vrot.slane %v13539_v59, %v12986_v11 }
 0xf72   : > { %9800 = vmatprep.subr.bf16.mxu1 %v10218_v24  ;;  %v8300_v24 = vrot.slane %v13539_v59, %v12995_v43 }
 0xf75   : > { %9801 = vmatpush3.bf16.msra.mxu1 %v10219_v56  ;;  %v8296_v56 = vrot.slane %v13539_v59, %v12992_v46 }
 0xf76   : > { %9802 = vmatprep.subr.bf16.mxu1 %v10220_v57  ;;  %v8290_v57 = vrot.slane %v8280_v10, %v12986_v11 }
 0xf79   : > { %9803 = vmatpush3.bf16.msra.mxu1 %v10221_v14  ;;  %v8286_v14 = vrot.slane %v8276_v7, %v12986_v11 }
 0xf7a   : > { %9804 = vmatprep.subr.bf16.mxu1 %v10222_v3 }
 0xf7d   : > { %9805 = vmatpush3.bf16.msra.mxu1 %v10223_v50 }
 0xf7e   : > { %9806 = vmatprep.subr.bf16.mxu1 %v10224_v40  ;;  %v8310_v40 = vrot.slane %v8300_v24, %v12992_v46 }
 0xf81   : > { %9807 = vmatpush3.bf16.msra.mxu1 %v10225_v42  ;;  %v8306_v42 = vrot.slane %v8296_v56, %v12992_v46 }
 0xf82   : > { %9814 = vmatprep.subr.bf16.mxu1 %v10226_v2 }
 0xfe4   : > { %v8151_v27 = vpop.f32.mrf.mxu1 }
 0xfe5   : > { %v8152_v30 = vadd.f32 %v8151_v27, %v7720_v48  ;;  %v8238_v48 = vrot.slane %v13528_v52, %v12992_v46  ;;  %v8228_v27 = vrot.slane %v8218_v49, %v12986_v11  ;;  %v10227_v52 = vld [vmem:[%s13745_s7 + $0xb8] sm:$0xff]  }
 0xfe6   : > { %v8153_v17 = vpop.f32.mrf.mxu1 }
 0xfe7   : > { %v8154_v36 = vadd.f32 %v8153_v17, %v7724_v58  ;;  %v8232_v58 = vrot.slane %v8222_v15, %v12986_v11 }
 0xfe8   : > { %v8155_v19 = vpop.f32.mrf.mxu1 }
 0xfe9   : > { %v8199_v12 = vadd.f32 %v8154_v36, %v8152_v30  ;;  %v8252_v19 = vrot.slane %v8242_v34, %v12992_v46 }
 0xfea   : > { %v8156_v5 = vpop.f32.mrf.mxu1 }
 0xfeb   : > { %8200 = vadd.xlane.f32.xlu1 %v8199_v12  ;;  %v8248_v12 = vrot.slane %v8238_v48, %v12992_v46 }
0x1024   : > { %v8192_v16 = vpop.f32.mrf.mxu1 }
0x1025   : > { %v8193_v54 = vadd.f32 %v8192_v16, %v7728_v8 }
0x1026   : > { %v8194_v55 = vpop.f32.mrf.mxu1 }
0x1027   : > { %v8195_v47 = vadd.f32 %v8194_v55, %v7732_v32 }
0x1028   : > { %v8196_v63 = vpop.f32.mrf.mxu1 }
0x1029   : > { %v8257_v37 = vadd.f32 %v8195_v47, %v8193_v54  ;;  %v10229_v63 = vld [vmem:[%s13745_s7 + $0xb0] sm:$0xff]  }
0x102a   : > { %v8197_v20 = vpop.f32.mrf.mxu1 }
0x102b   : > { %8258 = vadd.xlane.f32.xlu0 %v8257_v37  ;;  %v10230_v37 = vld [vmem:[%s13745_s7 + $0xe8] sm:$0xff]  }
0x102c   : > { %v10231_v20 = vld [vmem:[%s13745_s7 + $0xa8] sm:$0xff]  }
0x1074   : > { %v8201_v22 = vpop.xlane.xlu1 %8200 }
0x1075   : > { %v8202_v41 = vmul.f32 0.00390625, %v8201_v22  ;;  %v10234_v22 = vld [vmem:[%s13745_s7 + $0xd8] sm:$0xff]  }
0x1077   : > { %v8203_v4 = vsub.f32 %v8152_v30, %v8202_v41  ;;  %v8204_v31 = vsub.f32 %v8154_v36, %v8202_v41  ;;  %v10235_v41 = vld [vmem:[%s13745_s7 + $0x98] sm:$0xff]  }
0x1079   : > { %v8205_v21 = vmul.f32 %v8203_v4, %v8203_v4  ;;  %v8206_v6 = vmul.f32 %v8204_v31, %v8204_v31 }
0x107b   : > { %v8207_v29 = vadd.f32 %v8206_v6, %v8205_v21  ;;  %v10238_v21 = vld [vmem:[%s13745_s7 + $0xc8] sm:$0xff]  }
0x107c   : > { %v10239_v6 = vld [vmem:[%s13745_s7 + $0x88] sm:$0xff]  }
0x107d   : > { %8208 = vadd.xlane.f32.xlu1 %v8207_v29  ;;  %v10240_v29 = vld [vmem:[%s13745_s7 + $0xc0] sm:$0xff]  }
0x10b4   : > { %v8259_v1 = vpop.xlane.xlu0 %8258 }
0x10b5   : > { %v8260_v26 = vmul.f32 0.00390625, %v8259_v1 }
0x10b7   : > { %v13598_v0 = vsub.f32 %v8193_v54, %v8260_v26  ;;  %v13600_v23 = vsub.f32 %v8195_v47, %v8260_v26  ;;  %v10228_v47 = vld [vmem:[%s13745_s7 + $0xf0] sm:$0xff]  }
0x10b9   : > { %v8263_v38 = vmul.f32 %v13598_v0, %v13598_v0  ;;  %v8264_v28 = vmul.f32 %v13600_v23, %v13600_v23 }
0x10bb   : > { %v8265_v44 = vadd.f32 %v8264_v28, %v8263_v38 }
0x10bd   : > { %8266 = vadd.xlane.f32.xlu0 %v8265_v44 }
0x1106   : > { %v8209_v61 = vpop.xlane.xlu1 %8208 }
0x1107   : > { %v8210_v45 = vmul.f32 0.00390625, %v8209_v61 }
0x1109   : > { %v8211_v13 = vadd.f32 1e-05, %v8210_v45 }
0x110b   : > { %10258 = vrsqrt.f32 %v8211_v13 }
0x1118   : > { %v10259_v17 = vpop.eup %10258 }
0x1119   : > { %v8213_v30 = vmul.f32 %v10259_v17, %v8203_v4  ;;  %v8214_v36 = vmul.f32 %v10259_v17, %v8204_v31  ;;  %v10236_v4 = vld [vmem:[%s13745_s7 + $0xd0] sm:$0xff]  }
0x111a   : > { %v10237_v31 = vld [vmem:[%s13745_s7 + $0x90] sm:$0xff]  }
0x111b   : > { %v8234_v5 = vmul.f32 %v8232_v58, %v8214_v36  ;;  %v8233_v39 = vmul.f32 %v8228_v27, %v8213_v30 }
0x111d   : > { %v8254_v60 = vadd.f32 %v8252_v19, %v8234_v5  ;;  %v8253_v8 = vadd.f32 %v8248_v12, %v8233_v39 }
0x111f   : > { %v8256_v32 = vmax.f32 %v8254_v60, 0.0  ;;  %v8255_v16 = vmax.f32 %v8253_v8, 0.0 }
0x1121   : > { %v8316_v55 = vpack.c.bf16 %v8256_v32, %v8256_v32  ;;  %v8315_v54 = vpack.c.bf16 %v8255_v16, %v8255_v16 }
0x1123   : > { %8611 = vmatprep.mubr.bf16.mxu1 %v8316_v55 }
0x1124   : > { %8612 = vmatmul.mubr.bf16.vlgmr.msra.gmra.mxu1 %v8315_v54 }
0x1125   : > { %9815 = vmatpush3.bf16.msra.mxu1 %v10227_v52 }
0x1126   : > { %9816 = vmatprep.subr.bf16.mxu1 %v10228_v47 }
0x1129   : > { %9817 = vmatpush3.bf16.msra.mxu1 %v10229_v63 }
0x112a   : > { %9818 = vmatprep.subr.bf16.mxu1 %v10230_v37 }
0x112d   : > { %9819 = vmatpush3.bf16.msra.mxu1 %v10231_v20 }
0x112e   : > { %9820 = vmatprep.subr.bf16.mxu1 %v10232_v18 }
0x1131   : > { %9821 = vmatpush3.bf16.msra.mxu1 %v10233_v62 }
0x1132   : > { %9822 = vmatprep.subr.bf16.mxu1 %v10234_v22 }
0x1135   : > { %9823 = vmatpush3.bf16.msra.mxu1 %v10235_v41 }
0x1136   : > { %9824 = vmatprep.subr.bf16.mxu1 %v10236_v4 }
0x1139   : > { %9825 = vmatpush3.bf16.msra.mxu1 %v10237_v31 }
0x113a   : > { %9826 = vmatprep.subr.bf16.mxu1 %v10238_v21 }
0x113d   : > { %9827 = vmatpush3.bf16.msra.mxu1 %v10239_v6 }
0x113e   : > { %9828 = vmatprep.subr.bf16.mxu1 %v10240_v29 }
0x1141   : > { %9829 = vmatpush3.bf16.msra.mxu1 %v10241_v53 }
0x1146   : > { %v8267_v51 = vpop.xlane.xlu0 %8266 }
0x1147   : > { %v8268_v25 = vmul.f32 0.00390625, %v8267_v51 }
0x1149   : > { %v8269_v33 = vadd.f32 1e-05, %v8268_v25 }
0x114b   : > { %10260 = vrsqrt.f32 %v8269_v33 }
0x1158   : > { %v10261_v3 = vpop.eup %10260 }
0x1159   : > { %v8271_v50 = vmul.f32 %v10261_v3, %v13598_v0  ;;  %v8272_v35 = vmul.f32 %v10261_v3, %v13600_v23 }
0x115b   : > { %v8292_v43 = vmul.f32 %v8290_v57, %v8272_v35  ;;  %v8291_v2 = vmul.f32 %v8286_v14, %v8271_v50 }
0x115d   : > { %v8312_v59 = vadd.f32 %v8310_v40, %v8292_v43  ;;  %v8311_v1 = vadd.f32 %v8306_v42, %v8291_v2 }
0x115f   : > { %v8314_v26 = vmax.f32 %v8312_v59, 0.0  ;;  %v8313_v38 = vmax.f32 %v8311_v1, 0.0 }
0x1161   : > { %v8318_v28 = vpack.c.bf16 %v8314_v26, %v8314_v26  ;;  %v8317_v44 = vpack.c.bf16 %v8313_v38, %v8313_v38 }
0x1163   : > { %8651 = vmatprep.mubr.bf16.mxu1 %v8318_v28 }
0x1164   : > { %8652 = vmatmul.mubr.bf16.vlgmr.msra.gmra.mxu1 %v8317_v44 }
0x1165   : > { %10277 = shalt.err (!%p10274_p3)
}
0x1166   : > { %s10278_s18 = scalar_lea.hbm %s13681_s20, 32768  ;;  %s10282_s26 = scalar_lea.hbm %s13751_s13, 65536 }
0x1167   : > { %p10279_p4 = scmp.ne.s32.totalorder %s13681_s20, %s10278_s18  ;;  %p10283_p9 = scmp.lt.s32.totalorder %s13681_s20, %s13751_s13 }
0x1168   : > { %p10284_p10 = scmp.lt.s32.totalorder %s10282_s26, %s10278_s18 }
0x1169   : > { %p10280_p7 = pnand %p10279_p4, %p10445_p5 }
0x116a   : > { %p10285_p11 = por %p10284_p10, %p10283_p9 }
0x116b   : > { %p10281_p8 = pneg %p10280_p7 }
0x116d   : > { %p10286_p12 = pnand %p10285_p11, %p10281_p8 }
0x116f   : > { %10289 = shalt.err (!%p10286_p12)
}
0x1170   : > { %s10330_s28 = smov 128   ;;  %s10331_s21 = smov 8   ;;  %v10263_v45 = vld [vmem:[%s13749_s11] sm:$0x3] }
0x1171   : > { %9846 = dma.vmem_to_hbm [thread:$0]  (%p10445_p5), %s13684_s25, 32768, %s13681_s20, %s13688_s0, %s10330_s28, %s10330_s28, %s10331_s21   ;;  %v8386_v13 = vrot.slane %v10263_v45, %v12986_v11 }
0x1172   : > { %p479_p13 = scmp.lt.s32.totalorder %s10428_s17, 1 }
0x1174   : > { %s13885_s17 = smov (!%p479_p13, %s10428_s17), 1 }
0x1175   : > { %s8777_s18 = sshll.u32 %s13885_s17, 3 }
0x1176   : > { %s482_s25 = scalar_lea.vmem %s13752_s14, %s8777_s18 }
0x11e4   : > { %v9808_v46 = vpop.f32.mrf.mxu1 }
0x11e6   : > { %v9809_v0 = vpop.f32.mrf.mxu1 }
0x11e7   : > { %v9810_v15 = vadd.f32 %v9809_v0, %v9808_v46 }
0x11e8   : > { %v9811_v23 = vpop.f32.mrf.mxu1 }
0x11e9   : > { %v8614_v48 = vadd.f32 %v9810_v15, %v8386_v13 }
0x11ea   : > { %v9812_v61 = vpop.f32.mrf.mxu1 }
0x1224   : > { %v9830_v49 = vpop.f32.mrf.mxu1 }
0x1226   : > { %v9831_v34 = vpop.f32.mrf.mxu1 }
0x1227   : > { %v9832_v58 = vadd.f32 %v9831_v34, %v9830_v49 }
0x1228   : > { %v9833_v27 = vpop.f32.mrf.mxu1 }
0x1229   : > { %v8654_v17 = vadd.f32 %v9832_v58, %v8614_v48 }
0x122a   : > { %v9834_v30 = vpop.f32.mrf.mxu1 }
0x122b   : > { %v8659_v36 = vadd.f32 %v8654_v17, %v13136_v9 }
0x122d   : > { %8660 = vst [vmem:[%s482_s25] sm:$0xff] %v8659_v36 }
0x122e PF: > { %p9852_p5 = scmp.ge.s32.totalorder %s10324_s16, 2  ;;  %s8698_s0 = sand.u32 1, %s10312_s29  }
0x122f   : > { %s8699_s17 = scalar_lea.sflag [#allocation3], %s8698_s0 }
0x1230   : > { %p9849_p0 = pnand %p9852_p5, %p10449_p6 }
0x1232   : > { %p9850_p1 = pneg %p9849_p0 }
0x1234   : > { %10307 = dma.done.wait (%p9850_p1), %s8699_s17, 32768  }
0x1235   : > { %10309 = vsyncadd (%p9850_p1), %s8699_s17, 4294934528  ;;  %s13876_s15 = sld [smem:[#allocation5_spill]]  ;;  %p25_p2 = scmp.ge.s32.totalorder %s10432_s19, 4  }
0x1236   : > { %s13877_s27 = sld [smem:[#allocation6_spill]]  ;;  %s13878_s29 = smov %s10316_s30 }
0x1237   : > { %s13881_s16 = smov %s10432_s19 }
0x1238   :  { %27 = sbr.rel (!%p25_p2) target bundleno = 7 (0x7), region = 119 }
0x123b   : > { %s13879_s30 = smov %s13876_s15 }
0x123c   : > { %s13880_s15 = smov %s13877_s27 }
0x123d   :  { %8711 = vsyncpa [#allocation3], 1 }
0x123e   :  { %8713 = vsyncpa [#allocation3 + $0x1], 1 }

</bundles_post_ra>
